<compile_context>
chip_gen: v7x
topology: tpu7x:2x2x1
jax: 0.10.0
libtpu: 0.0.40
codegen_flags: <defaults>
</compile_context>

<pallas_src>
import functools

import jax
import jax.numpy as jnp
from jax.experimental import pallas as pl
from jax.experimental.pallas import tpu as pltpu


# ----------------------------------------------------------------------------
# Model-size constants (mirroring the PyTorch spec)
# ----------------------------------------------------------------------------
KSIZE = 5
OC1 = 20            # conv1 out channels (real)
OC2 = 50            # conv2 out channels (real)
C_PAD = 128         # lane-dense channel padding for conv outputs
FC1_OUT = 500
FC1_OUT_PAD = 512   # pad N so lin1 output / lin2 K are 128-aligned
NCLASS = 10

FC1_IN = OC2 * 18 * 18       # actual flattened feature count = 16200
FC1_TK = 4096                # K-tile for the big FC1 weight stream
FC1_TN = 256                 # split N=512 into 2 parallel tiles (v7x megacore)
FC1_IN_PAD = ((FC1_IN + FC1_TK - 1) // FC1_TK) * FC1_TK   # 16384


# ----------------------------------------------------------------------------
# Pallas kernels
# ----------------------------------------------------------------------------
def _matmul_bias_kernel(x_ref, w_ref, b_ref, o_ref, *, relu):
    """y[g] = x[g] @ w + b, K-reduction over grid axis 2, accumulating
    directly into the resident output block (no scratch accumulator)."""
    k = pl.program_id(2)

    @pl.when(k == 0)
    def _():
        o_ref[...] = jnp.zeros_like(o_ref)

    o_ref[...] += jnp.dot(
        x_ref[...], w_ref[...], preferred_element_type=jnp.float32
    )

    @pl.when(k == pl.num_programs(2) - 1)
    def _():
        out = o_ref[...] + b_ref[...]
        if relu:
            out = jnp.maximum(out, 0.0)
        o_ref[...] = out


def matmul_bias(x, w, b, *, relu=False, tn=None, tk=None):
    """x: (G, M, K) f32, w: (K, N) f32, b: (N,) f32 -> (G, M, N) f32.

    Grid = (G, N//tn, K//tk); G and N are 'parallel', K is the 'arbitrary'
    reduction axis (last).  Output accumulates in-place in its VMEM block.
    """
    G, M, K = x.shape
    K2, N = w.shape
    assert K == K2, (K, K2)
    if tk is None or tk > K:
        tk = K
    if tn is None or tn > N:
        tn = N
    assert K % tk == 0, (K, tk)
    assert N % tn == 0, (N, tn)

    grid = (G, N // tn, K // tk)
    b2 = b.reshape(1, N)
    kernel = functools.partial(_matmul_bias_kernel, relu=relu)
    return pl.pallas_call(
        kernel,
        out_shape=jax.ShapeDtypeStruct((G, M, N), jnp.float32),
        grid_spec=pltpu.PrefetchScalarGridSpec(
            num_scalar_prefetch=0,
            grid=grid,
            in_specs=[
                pl.BlockSpec((None, M, tk), lambda g, n, k: (g, 0, k)),
                pl.BlockSpec((tk, tn), lambda g, n, k: (k, n)),
                pl.BlockSpec((1, tn), lambda g, n, k: (0, n)),
            ],
            out_specs=pl.BlockSpec((None, M, tn), lambda g, n, k: (g, 0, n)),
        ),
        compiler_params=pltpu.CompilerParams(
            dimension_semantics=("parallel", "parallel", "arbitrary"),
        ),
    )(x, w, b2)


def _maxpool_kernel(x_ref, o_ref):
    """MaxPool2d(kernel_size=2, stride=1) on one (H, W, C) batch block."""
    x = x_ref[...]
    o_ref[...] = jnp.maximum(
        jnp.maximum(x[:-1, :-1, :], x[:-1, 1:, :]),
        jnp.maximum(x[1:, :-1, :], x[1:, 1:, :]),
    )


def maxpool2x2_stride1(x):
    """x: (B, H, W, C) -> (B, H-1, W-1, C), batch-parallel grid."""
    B, H, W, C = x.shape
    return pl.pallas_call(
        _maxpool_kernel,
        out_shape=jax.ShapeDtypeStruct((B, H - 1, W - 1, C), x.dtype),
        grid_spec=pltpu.PrefetchScalarGridSpec(
            num_scalar_prefetch=0,
            grid=(B,),
            in_specs=[pl.BlockSpec((None, H, W, C), lambda b: (b, 0, 0, 0))],
            out_specs=pl.BlockSpec(
                (None, H - 1, W - 1, C), lambda b: (b, 0, 0, 0)
            ),
        ),
        compiler_params=pltpu.CompilerParams(
            dimension_semantics=("parallel",),
        ),
    )(x)


# ----------------------------------------------------------------------------
# Glue (plain JAX): im2col, one-time weight layout prep
# ----------------------------------------------------------------------------
def _im2col(x_nhwc, kh, kw):
    """(B,H,W,C) -> patches (B, OH*OW, KH*KW*C); element order (kh,kw,c)."""
    B, H, W, C = x_nhwc.shape
    OH, OW = H - kh + 1, W - kw + 1
    cols = []
    for i in range(kh):
        for j in range(kw):
            cols.append(x_nhwc[:, i : i + OH, j : j + OW, :])
    p = jnp.stack(cols, axis=-2)                      # (B, OH, OW, KH*KW, C)
    return p.reshape(B, OH * OW, kh * kw * C), (B, OH, OW)


def lenet_forward(x_nchw, params):
    # NCHW (PyTorch) -> NHWC (kernel layout)
    x = jnp.transpose(x_nchw, (0, 2, 3, 1))                     # (B,28,28,1)

    # conv1 + relu1 (OC padded 20 -> 128 for lane-dense stores)
    patches, (B, OH, OW) = _im2col(x, KSIZE, KSIZE)             # (B,576,25)
    x = matmul_bias(patches, params["conv1_w"], params["conv1_b"], relu=True)
    x = x.reshape(B, OH, OW, C_PAD)                             # (B,24,24,128)
    x = maxpool2x2_stride1(x)                                   # (B,23,23,128)

    # conv2 + relu2 (K = 25*128 = 3200 lane-aligned, OC padded 50 -> 128)
    patches, (B, OH, OW) = _im2col(x, KSIZE, KSIZE)             # (B,361,3200)
    x = matmul_bias(patches, params["conv2_w"], params["conv2_b"],
                    relu=True, tk=640)
    x = x.reshape(B, OH, OW, C_PAD)                             # (B,19,19,128)
    x = maxpool2x2_stride1(x)                                   # (B,18,18,128)

    # Flatten in NHWC (H,W,C) order — lin1_w rows were permuted once at init
    # to match, so no per-forward activation transpose is needed.  Drop the
    # channel padding and zero-pad K so FC1 uses 128-aligned K tiles.
    x = x[:, :, :, :OC2].reshape(B, FC1_IN)                     # (B, 16200)
    x = jnp.pad(x, ((0, 0), (0, FC1_IN_PAD - FC1_IN)))          # (B, 16384)
    x = x.reshape(1, B, FC1_IN_PAD)

    # lin1 + relu3 (N=512 split into two 256-lane parallel tiles)
    x = matmul_bias(x, params["lin1_w"], params["lin1_b"],
                    relu=True, tn=FC1_TN, tk=FC1_TK)            # (1,B,512)
    # dropout1: identity in eval mode.
    x = matmul_bias(x, params["lin2_w"], params["lin2_b"], relu=False)
    return x.reshape(B, NCLASS)                                 # (B,10)


def init_params(key):
    """Create PyTorch-shaped parameters, then do all layout prep ONCE here."""
    ks = jax.random.split(key, 8)

    def u(k, shape, fan_in):
        bound = 1.0 / (fan_in ** 0.5)
        return jax.random.uniform(k, shape, jnp.float32, -bound, bound)

    # Native PyTorch-layout parameters.
    conv1_w = u(ks[0], (OC1, 1, KSIZE, KSIZE), 1 * KSIZE * KSIZE)
    conv1_b = u(ks[1], (OC1,), 1 * KSIZE * KSIZE)
    conv2_w = u(ks[2], (OC2, OC1, KSIZE, KSIZE), OC1 * KSIZE * KSIZE)
    conv2_b = u(ks[3], (OC2,), OC1 * KSIZE * KSIZE)
    lin1_w = u(ks[4], (FC1_IN, FC1_OUT), FC1_IN)   # rows in (C,H,W) flatten order
    lin1_b = u(ks[5], (FC1_OUT,), FC1_IN)
    lin2_w = u(ks[6], (FC1_OUT, NCLASS), FC1_OUT)
    lin2_b = u(ks[7], (NCLASS,), FC1_OUT)

    def conv_w_to_kn(w_oihw, ic_pad, oc_pad):
        oc, ic, kh, kw = w_oihw.shape
        w = jnp.transpose(w_oihw, (2, 3, 1, 0))                 # (KH,KW,IC,OC)
        w = jnp.pad(w, ((0, 0), (0, 0), (0, ic_pad - ic), (0, oc_pad - oc)))
        return w.reshape(kh * kw * ic_pad, oc_pad)              # matches im2col

    params = {
        # conv weights as (KH*KW*IC, OC_pad) matmul operands, channels -> 128.
        "conv1_w": conv_w_to_kn(conv1_w, 1, C_PAD),             # (25, 128)
        "conv1_b": jnp.pad(conv1_b, (0, C_PAD - OC1)),
        "conv2_w": conv_w_to_kn(conv2_w, C_PAD, C_PAD),         # (3200, 128)
        "conv2_b": jnp.pad(conv2_b, (0, C_PAD - OC2)),
        "lin1_b": jnp.pad(lin1_b, (0, FC1_OUT_PAD - FC1_OUT)),
        # lin2: pad K 500->512 with zero rows (matches lin1's padded outputs).
        "lin2_w": jnp.pad(lin2_w, ((0, FC1_OUT_PAD - FC1_OUT), (0, 0))),
        "lin2_b": lin2_b,
    }
    # lin1: permute rows from PyTorch (C,H,W) flatten order to NHWC (H,W,C)
    # order, then zero-pad K 16200->16384 and N 500->512.  One-time cost.
    w = lin1_w.reshape(OC2, 18, 18, FC1_OUT)
    w = jnp.transpose(w, (1, 2, 0, 3)).reshape(FC1_IN, FC1_OUT)
    params["lin1_w"] = jnp.pad(
        w, ((0, FC1_IN_PAD - FC1_IN), (0, FC1_OUT_PAD - FC1_OUT))
    )
    return params


if __name__ == "__main__":
    key = jax.random.PRNGKey(0)
    pkey, xkey = jax.random.split(key)
    params = init_params(pkey)

    # MNIST-like input, small batch: NCHW = (2, 1, 28, 28)
    x = jax.random.normal(xkey, (2, 1, 28, 28), jnp.float32)

    fwd = jax.jit(lambda inp: lenet_forward(inp, params))
    out = fwd(x)
    jax.block_until_ready(out)
    assert out.shape == (2, NCLASS), out.shape
    assert jnp.all(jnp.isfinite(out))
    print("KERNEL_OK")
</pallas_src>

<mosaic_0001>
module attributes {stable_mosaic.version = 11 : i64} {
  func.func @_matmul_bias_kernel(%arg0: i32, %arg1: i32, %arg2: i32, %arg3: memref<1x576x25xf32, #tpu.memory_space<vmem>>, %arg4: memref<25x128xf32, #tpu.memory_space<vmem>>, %arg5: memref<1x128xf32, #tpu.memory_space<vmem>>, %arg6: memref<1x576x128xf32, #tpu.memory_space<vmem>>) attributes {dimension_semantics = [#tpu.dimension_semantics<parallel>, #tpu.dimension_semantics<parallel>, #tpu.dimension_semantics<arbitrary>], iteration_bounds = array<i64: 2, 1, 1>, scalar_prefetch = 0 : i64, scratch_operands = 0 : i64, tpu.core_type = #tpu.core_type<tc>, window_params = [{transform_indices = @transform_0, window_bounds = array<i64: 1, 576, 25>}, {transform_indices = @transform_1, window_bounds = array<i64: 25, 128>}, {transform_indices = @transform_2, window_bounds = array<i64: 1, 128>}, {transform_indices = @transform_3, window_bounds = array<i64: 1, 576, 128>}]} {
    %c0_i32 = arith.constant 0 : i32
    %0 = arith.cmpi eq, %arg2, %c0_i32 : i32
    %1 = arith.extui %0 : i1 to i32
    %c0_i32_0 = arith.constant 0 : i32
    %2 = arith.cmpi ne, %1, %c0_i32_0 : i32
    scf.if %2 {
      %cst_13 = arith.constant 0.000000e+00 : f32
      %16 = vector.broadcast %cst_13 : f32 to vector<576x128xf32>
      %c0_14 = arith.constant 0 : index
      %c0_15 = arith.constant 0 : index
      %c0_16 = arith.constant 0 : index
      %17 = vector.load %arg6[%c0_14, %c0_15, %c0_16] : memref<1x576x128xf32, #tpu.memory_space<vmem>>, vector<1x576x128xf32>
      %18 = vector.shape_cast %17 : vector<1x576x128xf32> to vector<576x128xf32>
      %19 = vector.shape_cast %16 : vector<576x128xf32> to vector<1x576x128xf32>
      tpu.vector_store %arg6[%c0_14, %c0_15, %c0_16], %19 {strides = array<i32>} : memref<1x576x128xf32, #tpu.memory_space<vmem>>, vector<1x576x128xf32>,
    } else {
    }
    %c0 = arith.constant 0 : index
    %c0_1 = arith.constant 0 : index
    %c0_2 = arith.constant 0 : index
    %3 = vector.load %arg6[%c0, %c0_1, %c0_2] : memref<1x576x128xf32, #tpu.memory_space<vmem>>, vector<1x576x128xf32>
    %4 = vector.shape_cast %3 : vector<1x576x128xf32> to vector<576x128xf32>
    %c0_3 = arith.constant 0 : index
    %c0_4 = arith.constant 0 : index
    %c0_5 = arith.constant 0 : index
    %5 = vector.load %arg3[%c0_3, %c0_4, %c0_5] : memref<1x576x25xf32, #tpu.memory_space<vmem>>, vector<1x576x25xf32>
    %6 = vector.shape_cast %5 : vector<1x576x25xf32> to vector<576x25xf32>
    %c0_6 = arith.constant 0 : index
    %c0_7 = arith.constant 0 : index
    %7 = vector.load %arg4[%c0_6, %c0_7] : memref<25x128xf32, #tpu.memory_space<vmem>>, vector<25x128xf32>
    %cst = arith.constant dense<0.000000e+00> : vector<576x128xf32>
    %8 = tpu.matmul %6, %7, %cst {dimension_numbers = #tpu.dot_dimension_numbers<[1], [0], [0], [1], [0, 0, 1, 1], [], []>} : vector<576x25xf32>, vector<25x128xf32>, vector<576x128xf32> -> vector<576x128xf32>
    %9 = arith.addf %4, %8 : vector<576x128xf32>
    %c0_8 = arith.constant 0 : index
    %c0_9 = arith.constant 0 : index
    %c0_10 = arith.constant 0 : index
    %10 = vector.load %arg6[%c0_8, %c0_9, %c0_10] : memref<1x576x128xf32, #tpu.memory_space<vmem>>, vector<1x576x128xf32>
    %11 = vector.shape_cast %10 : vector<1x576x128xf32> to vector<576x128xf32>
    %12 = vector.shape_cast %9 : vector<576x128xf32> to vector<1x576x128xf32>
    tpu.vector_store %arg6[%c0_8, %c0_9, %c0_10], %12 {strides = array<i32>} : memref<1x576x128xf32, #tpu.memory_space<vmem>>, vector<1x576x128xf32>,
    %c0_i32_11 = arith.constant 0 : i32
    %13 = arith.cmpi eq, %arg2, %c0_i32_11 : i32
    %14 = arith.extui %13 : i1 to i32
    %c0_i32_12 = arith.constant 0 : i32
    %15 = arith.cmpi ne, %14, %c0_i32_12 : i32
    scf.if %15 {
      %c0_13 = arith.constant 0 : index
      %c0_14 = arith.constant 0 : index
      %c0_15 = arith.constant 0 : index
      %16 = vector.load %arg6[%c0_13, %c0_14, %c0_15] : memref<1x576x128xf32, #tpu.memory_space<vmem>>, vector<1x576x128xf32>
      %17 = vector.shape_cast %16 : vector<1x576x128xf32> to vector<576x128xf32>
      %c0_16 = arith.constant 0 : index
      %c0_17 = arith.constant 0 : index
      %18 = vector.load %arg5[%c0_16, %c0_17] : memref<1x128xf32, #tpu.memory_space<vmem>>, vector<1x128xf32>
      %19 = vector.broadcast %18 : vector<1x128xf32> to vector<576x128xf32>
      %20 = arith.addf %17, %19 : vector<576x128xf32>
      %cst_18 = arith.constant 0.000000e+00 : f32
      %21 = vector.broadcast %cst_18 : f32 to vector<576x128xf32>
      %22 = arith.maximumf %20, %21 : vector<576x128xf32>
      %c0_19 = arith.constant 0 : index
      %c0_20 = arith.constant 0 : index
      %c0_21 = arith.constant 0 : index
      %23 = vector.load %arg6[%c0_19, %c0_20, %c0_21] : memref<1x576x128xf32, #tpu.memory_space<vmem>>, vector<1x576x128xf32>
      %24 = vector.shape_cast %23 : vector<1x576x128xf32> to vector<576x128xf32>
      %25 = vector.shape_cast %22 : vector<576x128xf32> to vector<1x576x128xf32>
      tpu.vector_store %arg6[%c0_19, %c0_20, %c0_21], %25 {strides = array<i32>} : memref<1x576x128xf32, #tpu.memory_space<vmem>>, vector<1x576x128xf32>,
    } else {
    }
    return
  }
  func.func @transform_0(%arg0: i32, %arg1: i32, %arg2: i32) -> (i32, i32, i32) {
    %c0_i32 = arith.constant 0 : i32
    %c0_i32_0 = arith.constant 0 : i32
    return %arg0, %c0_i32, %arg2 : i32, i32, i32
  }
  func.func @transform_1(%arg0: i32, %arg1: i32, %arg2: i32) -> (i32, i32) {
    %c0_i32 = arith.constant 0 : i32
    return %arg2, %arg1 : i32, i32
  }
  func.func @transform_2(%arg0: i32, %arg1: i32, %arg2: i32) -> (i32, i32) {
    %c0_i32 = arith.constant 0 : i32
    %c0_i32_0 = arith.constant 0 : i32
    return %c0_i32, %arg1 : i32, i32
  }
  func.func @transform_3(%arg0: i32, %arg1: i32, %arg2: i32) -> (i32, i32, i32) {
    %c0_i32 = arith.constant 0 : i32
    %c0_i32_0 = arith.constant 0 : i32
    return %arg0, %c0_i32, %arg1 : i32, i32, i32
  }
}

module attributes {stable_mosaic.version = 11 : i64} {
  func.func @_maxpool_kernel(%arg0: i32, %arg1: memref<1x24x24x128xf32, #tpu.memory_space<vmem>>, %arg2: memref<1x23x23x128xf32, #tpu.memory_space<vmem>>) attributes {dimension_semantics = [#tpu.dimension_semantics<parallel>], iteration_bounds = array<i64: 2>, scalar_prefetch = 0 : i64, scratch_operands = 0 : i64, tpu.core_type = #tpu.core_type<tc>, window_params = [{transform_indices = @transform_0, window_bounds = array<i64: 1, 24, 24, 128>}, {transform_indices = @transform_1, window_bounds = array<i64: 1, 23, 23, 128>}]} {
    %c0 = arith.constant 0 : index
    %c0_0 = arith.constant 0 : index
    %c0_1 = arith.constant 0 : index
    %c0_2 = arith.constant 0 : index
    %0 = vector.load %arg1[%c0, %c0_0, %c0_1, %c0_2] : memref<1x24x24x128xf32, #tpu.memory_space<vmem>>, vector<1x24x24x128xf32>
    %1 = vector.shape_cast %0 : vector<1x24x24x128xf32> to vector<24x24x128xf32>
    %2 = vector.extract_strided_slice %1 {offsets = [0, 0, 0], sizes = [23, 23, 128], strides = [1, 1, 1]} : vector<24x24x128xf32> to vector<23x23x128xf32>
    %3 = vector.extract_strided_slice %1 {offsets = [0, 1, 0], sizes = [23, 23, 128], strides = [1, 1, 1]} : vector<24x24x128xf32> to vector<23x23x128xf32>
    %4 = arith.maximumf %2, %3 : vector<23x23x128xf32>
    %5 = vector.extract_strided_slice %1 {offsets = [1, 0, 0], sizes = [23, 23, 128], strides = [1, 1, 1]} : vector<24x24x128xf32> to vector<23x23x128xf32>
    %6 = vector.extract_strided_slice %1 {offsets = [1, 1, 0], sizes = [23, 23, 128], strides = [1, 1, 1]} : vector<24x24x128xf32> to vector<23x23x128xf32>
    %7 = arith.maximumf %5, %6 : vector<23x23x128xf32>
    %8 = arith.maximumf %4, %7 : vector<23x23x128xf32>
    %c0_3 = arith.constant 0 : index
    %c0_4 = arith.constant 0 : index
    %c0_5 = arith.constant 0 : index
    %c0_6 = arith.constant 0 : index
    %9 = vector.load %arg2[%c0_3, %c0_4, %c0_5, %c0_6] : memref<1x23x23x128xf32, #tpu.memory_space<vmem>>, vector<1x23x23x128xf32>
    %10 = vector.shape_cast %9 : vector<1x23x23x128xf32> to vector<23x23x128xf32>
    %11 = vector.shape_cast %8 : vector<23x23x128xf32> to vector<1x23x23x128xf32>
    tpu.vector_store %arg2[%c0_3, %c0_4, %c0_5, %c0_6], %11 {strides = array<i32>} : memref<1x23x23x128xf32, #tpu.memory_space<vmem>>, vector<1x23x23x128xf32>,
    return
  }
  func.func @transform_0(%arg0: i32) -> (i32, i32, i32, i32) {
    %c0_i32 = arith.constant 0 : i32
    %c0_i32_0 = arith.constant 0 : i32
    %c0_i32_1 = arith.constant 0 : i32
    %c0_i32_2 = arith.constant 0 : i32
    return %arg0, %c0_i32, %c0_i32_0, %c0_i32_1 : i32, i32, i32, i32
  }
  func.func @transform_1(%arg0: i32) -> (i32, i32, i32, i32) {
    %c0_i32 = arith.constant 0 : i32
    %c0_i32_0 = arith.constant 0 : i32
    %c0_i32_1 = arith.constant 0 : i32
    %c0_i32_2 = arith.constant 0 : i32
    return %arg0, %c0_i32, %c0_i32_0, %c0_i32_1 : i32, i32, i32, i32
  }
}

module attributes {stable_mosaic.version = 11 : i64} {
  func.func @_matmul_bias_kernel(%arg0: i32, %arg1: i32, %arg2: i32, %arg3: memref<1x361x640xf32, #tpu.memory_space<vmem>>, %arg4: memref<640x128xf32, #tpu.memory_space<vmem>>, %arg5: memref<1x128xf32, #tpu.memory_space<vmem>>, %arg6: memref<1x361x128xf32, #tpu.memory_space<vmem>>) attributes {dimension_semantics = [#tpu.dimension_semantics<parallel>, #tpu.dimension_semantics<parallel>, #tpu.dimension_semantics<arbitrary>], iteration_bounds = array<i64: 2, 1, 5>, scalar_prefetch = 0 : i64, scratch_operands = 0 : i64, tpu.core_type = #tpu.core_type<tc>, window_params = [{transform_indices = @transform_0, window_bounds = array<i64: 1, 361, 640>}, {transform_indices = @transform_1, window_bounds = array<i64: 640, 128>}, {transform_indices = @transform_2, window_bounds = array<i64: 1, 128>}, {transform_indices = @transform_3, window_bounds = array<i64: 1, 361, 128>}]} {
    %c0_i32 = arith.constant 0 : i32
    %0 = arith.cmpi eq, %arg2, %c0_i32 : i32
    %1 = arith.extui %0 : i1 to i32
    %c0_i32_0 = arith.constant 0 : i32
    %2 = arith.cmpi ne, %1, %c0_i32_0 : i32
    scf.if %2 {
      %cst_12 = arith.constant 0.000000e+00 : f32
      %16 = vector.broadcast %cst_12 : f32 to vector<361x128xf32>
      %c0_13 = arith.constant 0 : index
      %c0_14 = arith.constant 0 : index
      %c0_15 = arith.constant 0 : index
      %17 = vector.load %arg6[%c0_13, %c0_14, %c0_15] : memref<1x361x128xf32, #tpu.memory_space<vmem>>, vector<1x361x128xf32>
      %18 = vector.shape_cast %17 : vector<1x361x128xf32> to vector<361x128xf32>
      %19 = vector.shape_cast %16 : vector<361x128xf32> to vector<1x361x128xf32>
      tpu.vector_store %arg6[%c0_13, %c0_14, %c0_15], %19 {strides = array<i32>} : memref<1x361x128xf32, #tpu.memory_space<vmem>>, vector<1x361x128xf32>,
    } else {
    }
    %c0 = arith.constant 0 : index
    %c0_1 = arith.constant 0 : index
    %c0_2 = arith.constant 0 : index
    %3 = vector.load %arg6[%c0, %c0_1, %c0_2] : memref<1x361x128xf32, #tpu.memory_space<vmem>>, vector<1x361x128xf32>
    %4 = vector.shape_cast %3 : vector<1x361x128xf32> to vector<361x128xf32>
    %c0_3 = arith.constant 0 : index
    %c0_4 = arith.constant 0 : index
    %c0_5 = arith.constant 0 : index
    %5 = vector.load %arg3[%c0_3, %c0_4, %c0_5] : memref<1x361x640xf32, #tpu.memory_space<vmem>>, vector<1x361x640xf32>
    %6 = vector.shape_cast %5 : vector<1x361x640xf32> to vector<361x640xf32>
    %c0_6 = arith.constant 0 : index
    %c0_7 = arith.constant 0 : index
    %7 = vector.load %arg4[%c0_6, %c0_7] : memref<640x128xf32, #tpu.memory_space<vmem>>, vector<640x128xf32>
    %cst = arith.constant dense<0.000000e+00> : vector<361x128xf32>
    %8 = tpu.matmul %6, %7, %cst {dimension_numbers = #tpu.dot_dimension_numbers<[1], [0], [0], [1], [0, 0, 1, 1], [], []>} : vector<361x640xf32>, vector<640x128xf32>, vector<361x128xf32> -> vector<361x128xf32>
    %9 = arith.addf %4, %8 : vector<361x128xf32>
    %c0_8 = arith.constant 0 : index
    %c0_9 = arith.constant 0 : index
    %c0_10 = arith.constant 0 : index
    %10 = vector.load %arg6[%c0_8, %c0_9, %c0_10] : memref<1x361x128xf32, #tpu.memory_space<vmem>>, vector<1x361x128xf32>
    %11 = vector.shape_cast %10 : vector<1x361x128xf32> to vector<361x128xf32>
    %12 = vector.shape_cast %9 : vector<361x128xf32> to vector<1x361x128xf32>
    tpu.vector_store %arg6[%c0_8, %c0_9, %c0_10], %12 {strides = array<i32>} : memref<1x361x128xf32, #tpu.memory_space<vmem>>, vector<1x361x128xf32>,
    %c4_i32 = arith.constant 4 : i32
    %13 = arith.cmpi eq, %arg2, %c4_i32 : i32
    %14 = arith.extui %13 : i1 to i32
    %c0_i32_11 = arith.constant 0 : i32
    %15 = arith.cmpi ne, %14, %c0_i32_11 : i32
    scf.if %15 {
      %c0_12 = arith.constant 0 : index
      %c0_13 = arith.constant 0 : index
      %c0_14 = arith.constant 0 : index
      %16 = vector.load %arg6[%c0_12, %c0_13, %c0_14] : memref<1x361x128xf32, #tpu.memory_space<vmem>>, vector<1x361x128xf32>
      %17 = vector.shape_cast %16 : vector<1x361x128xf32> to vector<361x128xf32>
      %c0_15 = arith.constant 0 : index
      %c0_16 = arith.constant 0 : index
      %18 = vector.load %arg5[%c0_15, %c0_16] : memref<1x128xf32, #tpu.memory_space<vmem>>, vector<1x128xf32>
      %19 = vector.broadcast %18 : vector<1x128xf32> to vector<361x128xf32>
      %20 = arith.addf %17, %19 : vector<361x128xf32>
      %cst_17 = arith.constant 0.000000e+00 : f32
      %21 = vector.broadcast %cst_17 : f32 to vector<361x128xf32>
      %22 = arith.maximumf %20, %21 : vector<361x128xf32>
      %c0_18 = arith.constant 0 : index
      %c0_19 = arith.constant 0 : index
      %c0_20 = arith.constant 0 : index
      %23 = vector.load %arg6[%c0_18, %c0_19, %c0_20] : memref<1x361x128xf32, #tpu.memory_space<vmem>>, vector<1x361x128xf32>
      %24 = vector.shape_cast %23 : vector<1x361x128xf32> to vector<361x128xf32>
      %25 = vector.shape_cast %22 : vector<361x128xf32> to vector<1x361x128xf32>
      tpu.vector_store %arg6[%c0_18, %c0_19, %c0_20], %25 {strides = array<i32>} : memref<1x361x128xf32, #tpu.memory_space<vmem>>, vector<1x361x128xf32>,
    } else {
    }
    return
  }
  func.func @transform_0(%arg0: i32, %arg1: i32, %arg2: i32) -> (i32, i32, i32) {
    %c0_i32 = arith.constant 0 : i32
    %c0_i32_0 = arith.constant 0 : i32
    return %arg0, %c0_i32, %arg2 : i32, i32, i32
  }
  func.func @transform_1(%arg0: i32, %arg1: i32, %arg2: i32) -> (i32, i32) {
    %c0_i32 = arith.constant 0 : i32
    return %arg2, %arg1 : i32, i32
  }
  func.func @transform_2(%arg0: i32, %arg1: i32, %arg2: i32) -> (i32, i32) {
    %c0_i32 = arith.constant 0 : i32
    %c0_i32_0 = arith.constant 0 : i32
    return %c0_i32, %arg1 : i32, i32
  }
  func.func @transform_3(%arg0: i32, %arg1: i32, %arg2: i32) -> (i32, i32, i32) {
    %c0_i32 = arith.constant 0 : i32
    %c0_i32_0 = arith.constant 0 : i32
    return %arg0, %c0_i32, %arg1 : i32, i32, i32
  }
}

module attributes {stable_mosaic.version = 11 : i64} {
  func.func @_maxpool_kernel(%arg0: i32, %arg1: memref<1x19x19x128xf32, #tpu.memory_space<vmem>>, %arg2: memref<1x18x18x128xf32, #tpu.memory_space<vmem>>) attributes {dimension_semantics = [#tpu.dimension_semantics<parallel>], iteration_bounds = array<i64: 2>, scalar_prefetch = 0 : i64, scratch_operands = 0 : i64, tpu.core_type = #tpu.core_type<tc>, window_params = [{transform_indices = @transform_0, window_bounds = array<i64: 1, 19, 19, 128>}, {transform_indices = @transform_1, window_bounds = array<i64: 1, 18, 18, 128>}]} {
    %c0 = arith.constant 0 : index
    %c0_0 = arith.constant 0 : index
    %c0_1 = arith.constant 0 : index
    %c0_2 = arith.constant 0 : index
    %0 = vector.load %arg1[%c0, %c0_0, %c0_1, %c0_2] : memref<1x19x19x128xf32, #tpu.memory_space<vmem>>, vector<1x19x19x128xf32>
    %1 = vector.shape_cast %0 : vector<1x19x19x128xf32> to vector<19x19x128xf32>
    %2 = vector.extract_strided_slice %1 {offsets = [0, 0, 0], sizes = [18, 18, 128], strides = [1, 1, 1]} : vector<19x19x128xf32> to vector<18x18x128xf32>
    %3 = vector.extract_strided_slice %1 {offsets = [0, 1, 0], sizes = [18, 18, 128], strides = [1, 1, 1]} : vector<19x19x128xf32> to vector<18x18x128xf32>
    %4 = arith.maximumf %2, %3 : vector<18x18x128xf32>
    %5 = vector.extract_strided_slice %1 {offsets = [1, 0, 0], sizes = [18, 18, 128], strides = [1, 1, 1]} : vector<19x19x128xf32> to vector<18x18x128xf32>
    %6 = vector.extract_strided_slice %1 {offsets = [1, 1, 0], sizes = [18, 18, 128], strides = [1, 1, 1]} : vector<19x19x128xf32> to vector<18x18x128xf32>
    %7 = arith.maximumf %5, %6 : vector<18x18x128xf32>
    %8 = arith.maximumf %4, %7 : vector<18x18x128xf32>
    %c0_3 = arith.constant 0 : index
    %c0_4 = arith.constant 0 : index
    %c0_5 = arith.constant 0 : index
    %c0_6 = arith.constant 0 : index
    %9 = vector.load %arg2[%c0_3, %c0_4, %c0_5, %c0_6] : memref<1x18x18x128xf32, #tpu.memory_space<vmem>>, vector<1x18x18x128xf32>
    %10 = vector.shape_cast %9 : vector<1x18x18x128xf32> to vector<18x18x128xf32>
    %11 = vector.shape_cast %8 : vector<18x18x128xf32> to vector<1x18x18x128xf32>
    tpu.vector_store %arg2[%c0_3, %c0_4, %c0_5, %c0_6], %11 {strides = array<i32>} : memref<1x18x18x128xf32, #tpu.memory_space<vmem>>, vector<1x18x18x128xf32>,
    return
  }
  func.func @transform_0(%arg0: i32) -> (i32, i32, i32, i32) {
    %c0_i32 = arith.constant 0 : i32
    %c0_i32_0 = arith.constant 0 : i32
    %c0_i32_1 = arith.constant 0 : i32
    %c0_i32_2 = arith.constant 0 : i32
    return %arg0, %c0_i32, %c0_i32_0, %c0_i32_1 : i32, i32, i32, i32
  }
  func.func @transform_1(%arg0: i32) -> (i32, i32, i32, i32) {
    %c0_i32 = arith.constant 0 : i32
    %c0_i32_0 = arith.constant 0 : i32
    %c0_i32_1 = arith.constant 0 : i32
    %c0_i32_2 = arith.constant 0 : i32
    return %arg0, %c0_i32, %c0_i32_0, %c0_i32_1 : i32, i32, i32, i32
  }
}

module attributes {stable_mosaic.version = 11 : i64} {
  func.func @_matmul_bias_kernel(%arg0: i32, %arg1: i32, %arg2: i32, %arg3: memref<1x2x4096xf32, #tpu.memory_space<vmem>>, %arg4: memref<4096x256xf32, #tpu.memory_space<vmem>>, %arg5: memref<1x256xf32, #tpu.memory_space<vmem>>, %arg6: memref<1x2x256xf32, #tpu.memory_space<vmem>>) attributes {dimension_semantics = [#tpu.dimension_semantics<parallel>, #tpu.dimension_semantics<parallel>, #tpu.dimension_semantics<arbitrary>], iteration_bounds = array<i64: 1, 2, 4>, scalar_prefetch = 0 : i64, scratch_operands = 0 : i64, tpu.core_type = #tpu.core_type<tc>, window_params = [{transform_indices = @transform_0, window_bounds = array<i64: 1, 2, 4096>}, {transform_indices = @transform_1, window_bounds = array<i64: 4096, 256>}, {transform_indices = @transform_2, window_bounds = array<i64: 1, 256>}, {transform_indices = @transform_3, window_bounds = array<i64: 1, 2, 256>}]} {
    %c0_i32 = arith.constant 0 : i32
    %0 = arith.cmpi eq, %arg2, %c0_i32 : i32
    %1 = arith.extui %0 : i1 to i32
    %c0_i32_0 = arith.constant 0 : i32
    %2 = arith.cmpi ne, %1, %c0_i32_0 : i32
    scf.if %2 {
      %cst_12 = arith.constant 0.000000e+00 : f32
      %16 = vector.broadcast %cst_12 : f32 to vector<2x256xf32>
      %c0_13 = arith.constant 0 : index
      %c0_14 = arith.constant 0 : index
      %c0_15 = arith.constant 0 : index
      %17 = vector.load %arg6[%c0_13, %c0_14, %c0_15] : memref<1x2x256xf32, #tpu.memory_space<vmem>>, vector<1x2x256xf32>
      %18 = vector.shape_cast %17 : vector<1x2x256xf32> to vector<2x256xf32>
      %19 = vector.shape_cast %16 : vector<2x256xf32> to vector<1x2x256xf32>
      tpu.vector_store %arg6[%c0_13, %c0_14, %c0_15], %19 {strides = array<i32>} : memref<1x2x256xf32, #tpu.memory_space<vmem>>, vector<1x2x256xf32>,
    } else {
    }
    %c0 = arith.constant 0 : index
    %c0_1 = arith.constant 0 : index
    %c0_2 = arith.constant 0 : index
    %3 = vector.load %arg6[%c0, %c0_1, %c0_2] : memref<1x2x256xf32, #tpu.memory_space<vmem>>, vector<1x2x256xf32>
    %4 = vector.shape_cast %3 : vector<1x2x256xf32> to vector<2x256xf32>
    %c0_3 = arith.constant 0 : index
    %c0_4 = arith.constant 0 : index
    %c0_5 = arith.constant 0 : index
    %5 = vector.load %arg3[%c0_3, %c0_4, %c0_5] : memref<1x2x4096xf32, #tpu.memory_space<vmem>>, vector<1x2x4096xf32>
    %6 = vector.shape_cast %5 : vector<1x2x4096xf32> to vector<2x4096xf32>
    %c0_6 = arith.constant 0 : index
    %c0_7 = arith.constant 0 : index
    %7 = vector.load %arg4[%c0_6, %c0_7] : memref<4096x256xf32, #tpu.memory_space<vmem>>, vector<4096x256xf32>
    %cst = arith.constant dense<0.000000e+00> : vector<2x256xf32>
    %8 = tpu.matmul %6, %7, %cst {dimension_numbers = #tpu.dot_dimension_numbers<[1], [0], [0], [1], [0, 0, 1, 1], [], []>} : vector<2x4096xf32>, vector<4096x256xf32>, vector<2x256xf32> -> vector<2x256xf32>
    %9 = arith.addf %4, %8 : vector<2x256xf32>
    %c0_8 = arith.constant 0 : index
    %c0_9 = arith.constant 0 : index
    %c0_10 = arith.constant 0 : index
    %10 = vector.load %arg6[%c0_8, %c0_9, %c0_10] : memref<1x2x256xf32, #tpu.memory_space<vmem>>, vector<1x2x256xf32>
    %11 = vector.shape_cast %10 : vector<1x2x256xf32> to vector<2x256xf32>
    %12 = vector.shape_cast %9 : vector<2x256xf32> to vector<1x2x256xf32>
    tpu.vector_store %arg6[%c0_8, %c0_9, %c0_10], %12 {strides = array<i32>} : memref<1x2x256xf32, #tpu.memory_space<vmem>>, vector<1x2x256xf32>,
    %c3_i32 = arith.constant 3 : i32
    %13 = arith.cmpi eq, %arg2, %c3_i32 : i32
    %14 = arith.extui %13 : i1 to i32
    %c0_i32_11 = arith.constant 0 : i32
    %15 = arith.cmpi ne, %14, %c0_i32_11 : i32
    scf.if %15 {
      %c0_12 = arith.constant 0 : index
      %c0_13 = arith.constant 0 : index
      %c0_14 = arith.constant 0 : index
      %16 = vector.load %arg6[%c0_12, %c0_13, %c0_14] : memref<1x2x256xf32, #tpu.memory_space<vmem>>, vector<1x2x256xf32>
      %17 = vector.shape_cast %16 : vector<1x2x256xf32> to vector<2x256xf32>
      %c0_15 = arith.constant 0 : index
      %c0_16 = arith.constant 0 : index
      %18 = vector.load %arg5[%c0_15, %c0_16] : memref<1x256xf32, #tpu.memory_space<vmem>>, vector<1x256xf32>
      %19 = vector.broadcast %18 : vector<1x256xf32> to vector<2x256xf32>
      %20 = arith.addf %17, %19 : vector<2x256xf32>
      %cst_17 = arith.constant 0.000000e+00 : f32
      %21 = vector.broadcast %cst_17 : f32 to vector<2x256xf32>
      %22 = arith.maximumf %20, %21 : vector<2x256xf32>
      %c0_18 = arith.constant 0 : index
      %c0_19 = arith.constant 0 : index
      %c0_20 = arith.constant 0 : index
      %23 = vector.load %arg6[%c0_18, %c0_19, %c0_20] : memref<1x2x256xf32, #tpu.memory_space<vmem>>, vector<1x2x256xf32>
      %24 = vector.shape_cast %23 : vector<1x2x256xf32> to vector<2x256xf32>
      %25 = vector.shape_cast %22 : vector<2x256xf32> to vector<1x2x256xf32>
      tpu.vector_store %arg6[%c0_18, %c0_19, %c0_20], %25 {strides = array<i32>} : memref<1x2x256xf32, #tpu.memory_space<vmem>>, vector<1x2x256xf32>,
    } else {
    }
    return
  }
  func.func @transform_0(%arg0: i32, %arg1: i32, %arg2: i32) -> (i32, i32, i32) {
    %c0_i32 = arith.constant 0 : i32
    %c0_i32_0 = arith.constant 0 : i32
    return %arg0, %c0_i32, %arg2 : i32, i32, i32
  }
  func.func @transform_1(%arg0: i32, %arg1: i32, %arg2: i32) -> (i32, i32) {
    %c0_i32 = arith.constant 0 : i32
    return %arg2, %arg1 : i32, i32
  }
  func.func @transform_2(%arg0: i32, %arg1: i32, %arg2: i32) -> (i32, i32) {
    %c0_i32 = arith.constant 0 : i32
    %c0_i32_0 = arith.constant 0 : i32
    return %c0_i32, %arg1 : i32, i32
  }
  func.func @transform_3(%arg0: i32, %arg1: i32, %arg2: i32) -> (i32, i32, i32) {
    %c0_i32 = arith.constant 0 : i32
    %c0_i32_0 = arith.constant 0 : i32
    return %arg0, %c0_i32, %arg1 : i32, i32, i32
  }
}

module attributes {stable_mosaic.version = 11 : i64} {
  func.func @_matmul_bias_kernel(%arg0: i32, %arg1: i32, %arg2: i32, %arg3: memref<1x2x512xf32, #tpu.memory_space<vmem>>, %arg4: memref<512x10xf32, #tpu.memory_space<vmem>>, %arg5: memref<1x10xf32, #tpu.memory_space<vmem>>, %arg6: memref<1x2x10xf32, #tpu.memory_space<vmem>>) attributes {dimension_semantics = [#tpu.dimension_semantics<parallel>, #tpu.dimension_semantics<parallel>, #tpu.dimension_semantics<arbitrary>], iteration_bounds = array<i64: 1, 1, 1>, scalar_prefetch = 0 : i64, scratch_operands = 0 : i64, tpu.core_type = #tpu.core_type<tc>, window_params = [{transform_indices = @transform_0, window_bounds = array<i64: 1, 2, 512>}, {transform_indices = @transform_1, window_bounds = array<i64: 512, 10>}, {transform_indices = @transform_2, window_bounds = array<i64: 1, 10>}, {transform_indices = @transform_3, window_bounds = array<i64: 1, 2, 10>}]} {
    %c0_i32 = arith.constant 0 : i32
    %0 = arith.cmpi eq, %arg2, %c0_i32 : i32
    %1 = arith.extui %0 : i1 to i32
    %c0_i32_0 = arith.constant 0 : i32
    %2 = arith.cmpi ne, %1, %c0_i32_0 : i32
    scf.if %2 {
      %cst_13 = arith.constant 0.000000e+00 : f32
      %16 = vector.broadcast %cst_13 : f32 to vector<2x10xf32>
      %c0_14 = arith.constant 0 : index
      %c0_15 = arith.constant 0 : index
      %c0_16 = arith.constant 0 : index
      %17 = vector.load %arg6[%c0_14, %c0_15, %c0_16] : memref<1x2x10xf32, #tpu.memory_space<vmem>>, vector<1x2x10xf32>
      %18 = vector.shape_cast %17 : vector<1x2x10xf32> to vector<2x10xf32>
      %19 = vector.shape_cast %16 : vector<2x10xf32> to vector<1x2x10xf32>
      tpu.vector_store %arg6[%c0_14, %c0_15, %c0_16], %19 {strides = array<i32>} : memref<1x2x10xf32, #tpu.memory_space<vmem>>, vector<1x2x10xf32>,
    } else {
    }
    %c0 = arith.constant 0 : index
    %c0_1 = arith.constant 0 : index
    %c0_2 = arith.constant 0 : index
    %3 = vector.load %arg6[%c0, %c0_1, %c0_2] : memref<1x2x10xf32, #tpu.memory_space<vmem>>, vector<1x2x10xf32>
    %4 = vector.shape_cast %3 : vector<1x2x10xf32> to vector<2x10xf32>
    %c0_3 = arith.constant 0 : index
    %c0_4 = arith.constant 0 : index
    %c0_5 = arith.constant 0 : index
    %5 = vector.load %arg3[%c0_3, %c0_4, %c0_5] : memref<1x2x512xf32, #tpu.memory_space<vmem>>, vector<1x2x512xf32>
    %6 = vector.shape_cast %5 : vector<1x2x512xf32> to vector<2x512xf32>
    %c0_6 = arith.constant 0 : index
    %c0_7 = arith.constant 0 : index
    %7 = vector.load %arg4[%c0_6, %c0_7] : memref<512x10xf32, #tpu.memory_space<vmem>>, vector<512x10xf32>
    %cst = arith.constant dense<0.000000e+00> : vector<2x10xf32>
    %8 = tpu.matmul %6, %7, %cst {dimension_numbers = #tpu.dot_dimension_numbers<[1], [0], [0], [1], [0, 0, 1, 1], [], []>} : vector<2x512xf32>, vector<512x10xf32>, vector<2x10xf32> -> vector<2x10xf32>
    %9 = arith.addf %4, %8 : vector<2x10xf32>
    %c0_8 = arith.constant 0 : index
    %c0_9 = arith.constant 0 : index
    %c0_10 = arith.constant 0 : index
    %10 = vector.load %arg6[%c0_8, %c0_9, %c0_10] : memref<1x2x10xf32, #tpu.memory_space<vmem>>, vector<1x2x10xf32>
    %11 = vector.shape_cast %10 : vector<1x2x10xf32> to vector<2x10xf32>
    %12 = vector.shape_cast %9 : vector<2x10xf32> to vector<1x2x10xf32>
    tpu.vector_store %arg6[%c0_8, %c0_9, %c0_10], %12 {strides = array<i32>} : memref<1x2x10xf32, #tpu.memory_space<vmem>>, vector<1x2x10xf32>,
    %c0_i32_11 = arith.constant 0 : i32
    %13 = arith.cmpi eq, %arg2, %c0_i32_11 : i32
    %14 = arith.extui %13 : i1 to i32
    %c0_i32_12 = arith.constant 0 : i32
    %15 = arith.cmpi ne, %14, %c0_i32_12 : i32
    scf.if %15 {
      %c0_13 = arith.constant 0 : index
      %c0_14 = arith.constant 0 : index
      %c0_15 = arith.constant 0 : index
      %16 = vector.load %arg6[%c0_13, %c0_14, %c0_15] : memref<1x2x10xf32, #tpu.memory_space<vmem>>, vector<1x2x10xf32>
      %17 = vector.shape_cast %16 : vector<1x2x10xf32> to vector<2x10xf32>
      %c0_16 = arith.constant 0 : index
      %c0_17 = arith.constant 0 : index
      %18 = vector.load %arg5[%c0_16, %c0_17] : memref<1x10xf32, #tpu.memory_space<vmem>>, vector<1x10xf32>
      %19 = vector.broadcast %18 : vector<1x10xf32> to vector<2x10xf32>
      %20 = arith.addf %17, %19 : vector<2x10xf32>
      %c0_18 = arith.constant 0 : index
      %c0_19 = arith.constant 0 : index
      %c0_20 = arith.constant 0 : index
      %21 = vector.load %arg6[%c0_18, %c0_19, %c0_20] : memref<1x2x10xf32, #tpu.memory_space<vmem>>, vector<1x2x10xf32>
      %22 = vector.shape_cast %21 : vector<1x2x10xf32> to vector<2x10xf32>
      %23 = vector.shape_cast %20 : vector<2x10xf32> to vector<1x2x10xf32>
      tpu.vector_store %arg6[%c0_18, %c0_19, %c0_20], %23 {strides = array<i32>} : memref<1x2x10xf32, #tpu.memory_space<vmem>>, vector<1x2x10xf32>,
    } else {
    }
    return
  }
  func.func @transform_0(%arg0: i32, %arg1: i32, %arg2: i32) -> (i32, i32, i32) {
    %c0_i32 = arith.constant 0 : i32
    %c0_i32_0 = arith.constant 0 : i32
    return %arg0, %c0_i32, %arg2 : i32, i32, i32
  }
  func.func @transform_1(%arg0: i32, %arg1: i32, %arg2: i32) -> (i32, i32) {
    %c0_i32 = arith.constant 0 : i32
    return %arg2, %arg1 : i32, i32
  }
  func.func @transform_2(%arg0: i32, %arg1: i32, %arg2: i32) -> (i32, i32) {
    %c0_i32 = arith.constant 0 : i32
    %c0_i32_0 = arith.constant 0 : i32
    return %c0_i32, %arg1 : i32, i32
  }
  func.func @transform_3(%arg0: i32, %arg1: i32, %arg2: i32) -> (i32, i32, i32) {
    %c0_i32 = arith.constant 0 : i32
    %c0_i32_0 = arith.constant 0 : i32
    return %arg0, %c0_i32, %arg1 : i32, i32, i32
  }
}

</mosaic_0001>

<bundles_post_ra>
// kernel: _lambda_.7
= control target key start
LH: loop header
LB: loop body
LE: loop exit
PB: predicated region body
PF: predicated region fallthrough
CT: control target
= control target key end

     0   :  { %s756_s6 = smov 0   ;;  %s972_s0 = inlined_call_operand.vmem [shape: f32[2,24,24,128], index: 0, kind: input, shape index: {}]   ;;  %s973_s1 = inlined_call_operand.vmem [shape: f32[2,23,23,128], index: 1, kind: output, shape index: {}]  }
   0x1 LB: > { %s719_s7 = sadd.s32 4294967295, %s744_s6   ;;  %p723_p0 = scmp.ge.s32.totalorder %s744_s6, 1  ;;  %s744_s6 = sphi %s756_s6, %s11_s6  }
   0x2   : > { %p87_p1 = scmp.lt.s32.totalorder %s744_s6, 3 }
   0x4   : > { %p88_p2 = pnand %p723_p0, %p87_p1 }
   0x5   : > { %p107_p3 = scmp.lt.s32.totalorder (!%p88_p2), %s719_s7, 1  ;;  %vm258_vm0 = vcmask (!%p88_p2), 1046528  }
   0x6   : > { %91 = sbr.rel (%p88_p2) target bundleno = 89 (0x59), region = 24 }
   0xd   : > { %s975_s7 = smov (!%p107_p3, %s719_s7), 1 }
   0xe   : > { %s728_s8 = smul.u32 576, %s975_s7 }
   0xf   : > { %s729_s12 = smul.u32 552, %s975_s7 }
  0x10   : > { %s770_s11 = scalar_lea.vmem %s972_s0, %s728_s8 }
  0x11   : > { %v117_v0 = vld [vmem:[%s770_s11] sm:$0xff]  ;;  %v118_v1 = vld [vmem:[%s770_s11 + $0x8] sm:$0xff]  ;;  %v120_v2 = vld [vmem:[%s770_s11 + $0x18] sm:$0xff]  ;;  %s793_s15 = scalar_lea.vmem %s973_s1, %s729_s12 }
  0x12   : > { %v121_v3 = vld [vmem:[%s770_s11 + $0x20] sm:$0xff]  ;;  %v259_v4 = vrot.slane %v117_v0, 1  ;;  %v260_v5 = vrot.slane %v118_v1, 1  ;;  %v264_v6 = vrot.slane %v120_v2, 1  ;;  %v119_v7 = vld [vmem:[%s770_s11 + $0x10] sm:$0xff]  ;;  %v122_v8 = vld [vmem:[%s770_s11 + $0x28] sm:$0xff] }
  0x13   : > { %v265_v9 = vrot.slane %v121_v3, 1  ;;  %v262_v10 = vrot.slane %v119_v7, 1  ;;  %v267_v11 = vrot.slane %v122_v8, 1  ;;  %v123_v12 = vld [vmem:[%s770_s11 + $0x30] sm:$0xff]  ;;  %v124_v13 = vld [vmem:[%s770_s11 + $0x38] sm:$0xff]  ;;  %v125_v14 = vld [vmem:[%s770_s11 + $0x40] sm:$0xff] }
  0x14   : > { %v261_v15 = vsel %vm258_vm0, %v259_v4, %v260_v5  ;;  %v269_v16 = vrot.slane %v123_v12, 1  ;;  %v270_v17 = vrot.slane %v124_v13, 1  ;;  %v272_v18 = vrot.slane %v125_v14, 1  ;;  %v126_v27 = vld [vmem:[%s770_s11 + $0x48] sm:$0xff]  ;;  %v127_v28 = vld [vmem:[%s770_s11 + $0x50] sm:$0xff]  ;;  %v128_v33 = vld [vmem:[%s770_s11 + $0x58] sm:$0xff] }
  0x15   : > { %v266_v19 = vsel %vm258_vm0, %v264_v6, %v265_v9  ;;  %v443_v20 = vmax.f32 %v117_v0, %v261_v15  ;;  %v263_v21 = vsel %vm258_vm0, %v260_v5, %v262_v10  ;;  %v268_v22 = vsel %vm258_vm0, %v265_v9, %v267_v11  ;;  %v129_v34 = vld [vmem:[%s770_s11 + $0x60] sm:$0xff]  ;;  %v130_v39 = vld [vmem:[%s770_s11 + $0x68] sm:$0xff]  ;;  %v131_v40 = vld [vmem:[%s770_s11 + $0x70] sm:$0xff] }
  0x16   : > { %v446_v23 = vmax.f32 %v120_v2, %v266_v19  ;;  %v444_v24 = vmax.f32 %v118_v1, %v263_v21  ;;  %v447_v25 = vmax.f32 %v121_v3, %v268_v22  ;;  %v445_v26 = vmax.f32 %v119_v7, %v262_v10  ;;  %v132_v41 = vld [vmem:[%s770_s11 + $0x78] sm:$0xff]  ;;  %v133_v46 = vld [vmem:[%s770_s11 + $0x80] sm:$0xff]  ;;  %v134_v59 = vld [vmem:[%s770_s11 + $0x88] sm:$0xff] }
  0x17   : > { %v448_v29 = vmax.f32 %v122_v8, %v267_v11  ;;  %v271_v30 = vsel %vm258_vm0, %v269_v16, %v270_v17  ;;  %v273_v31 = vsel %vm258_vm0, %v270_v17, %v272_v18  ;;  %v451_v32 = vmax.f32 %v125_v14, %v272_v18  ;;  %v135_v0 = vld [vmem:[%s770_s11 + $0x90] sm:$0xff]  ;;  %v136_v5 = vld [vmem:[%s770_s11 + $0x98] sm:$0xff]  ;;  %v137_v6 = vld [vmem:[%s770_s11 + $0xa0] sm:$0xff] }
  0x18   : > { %v526_v35 = vmax.f32 %v443_v20, %v446_v23  ;;  %v527_v36 = vmax.f32 %v444_v24, %v447_v25  ;;  %v449_v37 = vmax.f32 %v123_v12, %v271_v30  ;;  %v450_v38 = vmax.f32 %v124_v13, %v273_v31  ;;  %v138_v11 = vld [vmem:[%s770_s11 + $0xa8] sm:$0xff]  ;;  %v139_v12 = vld [vmem:[%s770_s11 + $0xb0] sm:$0xff] }
  0x19   : > { %v528_v42 = vmax.f32 %v445_v26, %v448_v29  ;;  %v531_v43 = vmax.f32 %v448_v29, %v451_v32  ;;  %v274_v44 = vrot.slane %v126_v27, 1  ;;  %v275_v45 = vrot.slane %v127_v28, 1  ;;  %v141_v26 = vld [vmem:[%s770_s11 + $0xc0] sm:$0xff]  ;;  %v142_v31 = vld [vmem:[%s770_s11 + $0xc8] sm:$0xff] }
  0x1a   : > { %595 = vst [vmem:[%s793_s15] sm:$0xff] %v526_v35  ;;  %596 = vst [vmem:[%s793_s15 + $0x8] sm:$0xff] %v527_v36  ;;  %v529_v47 = vmax.f32 %v446_v23, %v449_v37  ;;  %v530_v48 = vmax.f32 %v447_v25, %v450_v38  ;;  %v277_v49 = vrot.slane %v128_v33, 1  ;;  %v279_v50 = vrot.slane %v129_v34, 1  ;;  %v140_v25 = vld [vmem:[%s770_s11 + $0xb8] sm:$0xff] }
  0x1b   : > { %597 = vst [vmem:[%s793_s15 + $0x10] sm:$0x7f] %v528_v42  ;;  %600 = vst [vmem:[%s793_s15 + $0x28] sm:$0x7f] %v531_v43  ;;  %v276_v51 = vsel %vm258_vm0, %v274_v44, %v275_v45  ;;  %v280_v52 = vrot.slane %v130_v39, 1  ;;  %v282_v53 = vrot.slane %v131_v40, 1 }
  0x1c   : > { %v284_v54 = vrot.slane %v132_v41, 1  ;;  %598 = vst [vmem:[%s793_s15 + $0x18] sm:$0xff] %v529_v47  ;;  %599 = vst [vmem:[%s793_s15 + $0x20] sm:$0xff] %v530_v48  ;;  %v452_v55 = vmax.f32 %v126_v27, %v276_v51  ;;  %v278_v56 = vsel %vm258_vm0, %v275_v45, %v277_v49  ;;  %v454_v57 = vmax.f32 %v128_v33, %v277_v49  ;;  %v146_v51 = vld [vmem:[%s770_s11 + $0xe8] sm:$0xff] }
  0x1d   : > { %v285_v58 = vrot.slane %v133_v46, 1  ;;  %v453_v60 = vmax.f32 %v127_v28, %v278_v56  ;;  %v281_v61 = vsel %vm258_vm0, %v279_v50, %v280_v52  ;;  %v283_v62 = vsel %vm258_vm0, %v280_v52, %v282_v53  ;;  %v147_v52 = vld [vmem:[%s770_s11 + $0xf0] sm:$0xff] }
  0x1e   : > { %v457_v63 = vmax.f32 %v131_v40, %v282_v53  ;;  %v532_v1 = vmax.f32 %v449_v37, %v452_v55  ;;  %v534_v2 = vmax.f32 %v451_v32, %v454_v57  ;;  %v455_v3 = vmax.f32 %v129_v34, %v281_v61  ;;  %v143_v32 = vld [vmem:[%s770_s11 + $0xd0] sm:$0xff]  ;;  %v144_v37 = vld [vmem:[%s770_s11 + $0xd8] sm:$0xff] }
  0x1f   : > { %v456_v4 = vmax.f32 %v130_v39, %v283_v62  ;;  %v533_v7 = vmax.f32 %v450_v38, %v453_v60  ;;  %v286_v9 = vsel %vm258_vm0, %v284_v54, %v285_v58  ;;  %v287_v10 = vrot.slane %v134_v59, 1  ;;  %v149_v62 = vld [vmem:[%s770_s11 + $0x100] sm:$0xff] }
  0x20   : > { %v537_v8 = vmax.f32 %v454_v57, %v457_v63  ;;  %601 = vst [vmem:[%s793_s15 + $0x30] sm:$0xff] %v532_v1  ;;  %603 = vst [vmem:[%s793_s15 + $0x40] sm:$0x7f] %v534_v2  ;;  %v535_v13 = vmax.f32 %v452_v55, %v455_v3  ;;  %v458_v15 = vmax.f32 %v132_v41, %v286_v9  ;;  %v289_v16 = vrot.slane %v135_v0, 1  ;;  %v148_v57 = vld [vmem:[%s770_s11 + $0xf8] sm:$0xff] }
  0x21   : > { %v536_v14 = vmax.f32 %v453_v60, %v456_v4  ;;  %602 = vst [vmem:[%s793_s15 + $0x38] sm:$0xff] %v533_v7  ;;  %v288_v17 = vsel %vm258_vm0, %v285_v58, %v287_v10  ;;  %v460_v18 = vmax.f32 %v134_v59, %v287_v10  ;;  %v290_v19 = vrot.slane %v136_v5, 1 }
  0x22   : > { %606 = vst [vmem:[%s793_s15 + $0x58] sm:$0x7f] %v537_v8  ;;  %v292_v20 = vrot.slane %v137_v6, 1  ;;  %604 = vst [vmem:[%s793_s15 + $0x48] sm:$0xff] %v535_v13  ;;  %v538_v21 = vmax.f32 %v455_v3, %v458_v15  ;;  %v459_v22 = vmax.f32 %v133_v46, %v288_v17  ;;  %v294_v23 = vrot.slane %v138_v11, 1  ;;  %v145_v46 = vld [vmem:[%s770_s11 + $0xe0] sm:$0xff] }
  0x23   : > { %605 = vst [vmem:[%s793_s15 + $0x50] sm:$0xff] %v536_v14  ;;  %v295_v24 = vrot.slane %v139_v12, 1  ;;  %v540_v27 = vmax.f32 %v457_v63, %v460_v18  ;;  %v291_v28 = vsel %vm258_vm0, %v289_v16, %v290_v19  ;;  %v297_v40 = vrot.slane %v140_v25, 1  ;;  %v150_v3 = vld [vmem:[%s770_s11 + $0x108] sm:$0xff]  ;;  %v152_v17 = vld [vmem:[%s770_s11 + $0x118] sm:$0xff] }
  0x24   : > { %v293_v29 = vsel %vm258_vm0, %v290_v19, %v292_v20  ;;  %v463_v30 = vmax.f32 %v137_v6, %v292_v20  ;;  %607 = vst [vmem:[%s793_s15 + $0x60] sm:$0xff] %v538_v21  ;;  %v539_v33 = vmax.f32 %v456_v4, %v459_v22  ;;  %v461_v34 = vmax.f32 %v135_v0, %v291_v28  ;;  %v151_v4 = vld [vmem:[%s770_s11 + $0x110] sm:$0xff] }
  0x25   : > { %v462_v35 = vmax.f32 %v136_v5, %v293_v29  ;;  %v296_v36 = vsel %vm258_vm0, %v294_v23, %v295_v24  ;;  %609 = vst [vmem:[%s793_s15 + $0x70] sm:$0x7f] %v540_v27  ;;  %v299_v41 = vrot.slane %v141_v26, 1  ;;  %v300_v44 = vrot.slane %v142_v31, 1  ;;  %v154_v23 = vld [vmem:[%s770_s11 + $0x128] sm:$0xff]  ;;  %v156_v29 = vld [vmem:[%s770_s11 + $0x138] sm:$0xff] }
  0x26   : > { %v543_v38 = vmax.f32 %v460_v18, %v463_v30  ;;  %v464_v39 = vmax.f32 %v138_v11, %v296_v36  ;;  %608 = vst [vmem:[%s793_s15 + $0x68] sm:$0xff] %v539_v33  ;;  %v541_v42 = vmax.f32 %v458_v15, %v461_v34  ;;  %v302_v45 = vrot.slane %v143_v32, 1  ;;  %v153_v18 = vld [vmem:[%s770_s11 + $0x120] sm:$0xff] }
  0x27   : > { %v542_v43 = vmax.f32 %v459_v22, %v462_v35  ;;  %v298_v48 = vsel %vm258_vm0, %v295_v24, %v297_v40  ;;  %v466_v49 = vmax.f32 %v140_v25, %v297_v40  ;;  %v304_v50 = vrot.slane %v144_v37, 1  ;;  %v155_v24 = vld [vmem:[%s770_s11 + $0x130] sm:$0xff] }
  0x28   : > { %612 = vst [vmem:[%s793_s15 + $0x88] sm:$0x7f] %v543_v38  ;;  %v544_v47 = vmax.f32 %v461_v34, %v464_v39  ;;  %610 = vst [vmem:[%s793_s15 + $0x78] sm:$0xff] %v541_v42  ;;  %v465_v53 = vmax.f32 %v139_v12, %v298_v48  ;;  %v301_v54 = vsel %vm258_vm0, %v299_v41, %v300_v44  ;;  %v305_v61 = vrot.slane %v145_v46, 1  ;;  %v157_v38 = vld [vmem:[%s770_s11 + $0x140] sm:$0xff] }
  0x29   : > { %611 = vst [vmem:[%s793_s15 + $0x80] sm:$0xff] %v542_v43  ;;  %v303_v55 = vsel %vm258_vm0, %v300_v44, %v302_v45  ;;  %v469_v56 = vmax.f32 %v143_v32, %v302_v45  ;;  %v546_v58 = vmax.f32 %v463_v30, %v466_v49  ;;  %v467_v59 = vmax.f32 %v141_v26, %v301_v54  ;;  %v158_v43 = vld [vmem:[%s770_s11 + $0x148] sm:$0xff]  ;;  %v159_v44 = vld [vmem:[%s770_s11 + $0x150] sm:$0xff]  ;;  %v161_v54 = vld [vmem:[%s770_s11 + $0x160] sm:$0xff] }
  0x2a   : > { %613 = vst [vmem:[%s793_s15 + $0x90] sm:$0xff] %v544_v47  ;;  %v468_v60 = vmax.f32 %v142_v31, %v303_v55  ;;  %v545_v63 = vmax.f32 %v462_v35, %v465_v53  ;;  %v307_v1 = vrot.slane %v146_v51, 1  ;;  %v309_v2 = vrot.slane %v147_v52, 1 }
  0x2b   : > { %v549_v0 = vmax.f32 %v466_v49, %v469_v56  ;;  %615 = vst [vmem:[%s793_s15 + $0xa0] sm:$0x7f] %v546_v58  ;;  %v547_v5 = vmax.f32 %v464_v39, %v467_v59  ;;  %v306_v7 = vsel %vm258_vm0, %v304_v50, %v305_v61  ;;  %v310_v8 = vrot.slane %v148_v57, 1  ;;  %v160_v49 = vld [vmem:[%s770_s11 + $0x158] sm:$0xff] }
  0x2c   : > { %v548_v6 = vmax.f32 %v465_v53, %v468_v60  ;;  %614 = vst [vmem:[%s793_s15 + $0x98] sm:$0xff] %v545_v63  ;;  %v470_v9 = vmax.f32 %v144_v37, %v306_v7  ;;  %v308_v10 = vsel %vm258_vm0, %v305_v61, %v307_v1  ;;  %v472_v11 = vmax.f32 %v146_v51, %v307_v1 }
  0x2d   : > { %618 = vst [vmem:[%s793_s15 + $0xb8] sm:$0x7f] %v549_v0  ;;  %v312_v12 = vrot.slane %v149_v62, 1  ;;  %616 = vst [vmem:[%s793_s15 + $0xa8] sm:$0xff] %v547_v5  ;;  %v471_v13 = vmax.f32 %v145_v46, %v308_v10  ;;  %v311_v14 = vsel %vm258_vm0, %v309_v2, %v310_v8  ;;  %v314_v15 = vrot.slane %v150_v3, 1  ;;  %v165_v10 = vld [vmem:[%s770_s11 + $0x180] sm:$0xff] }
  0x2e   : > { %617 = vst [vmem:[%s793_s15 + $0xb0] sm:$0xff] %v548_v6  ;;  %v315_v16 = vrot.slane %v151_v4, 1  ;;  %v550_v19 = vmax.f32 %v467_v59, %v470_v9  ;;  %v552_v20 = vmax.f32 %v469_v56, %v472_v11  ;;  %v473_v21 = vmax.f32 %v147_v52, %v311_v14  ;;  %v162_v59 = vld [vmem:[%s770_s11 + $0x168] sm:$0xff] }
  0x2f   : > { %v313_v22 = vsel %vm258_vm0, %v310_v8, %v312_v12  ;;  %v551_v25 = vmax.f32 %v468_v60, %v471_v13  ;;  %v475_v27 = vmax.f32 %v149_v62, %v312_v12  ;;  %v317_v32 = vrot.slane %v152_v17, 1  ;;  %v163_v60 = vld [vmem:[%s770_s11 + $0x170] sm:$0xff] }
  0x30   : > { %v474_v26 = vmax.f32 %v148_v57, %v313_v22  ;;  %v316_v28 = vsel %vm258_vm0, %v314_v15, %v315_v16  ;;  %619 = vst [vmem:[%s793_s15 + $0xc0] sm:$0xff] %v550_v19  ;;  %621 = vst [vmem:[%s793_s15 + $0xd0] sm:$0x7f] %v552_v20  ;;  %v553_v30 = vmax.f32 %v470_v9, %v473_v21  ;;  %v319_v33 = vrot.slane %v153_v18, 1  ;;  %v164_v9 = vld [vmem:[%s770_s11 + $0x178] sm:$0xff]  ;;  %v166_v15 = vld [vmem:[%s770_s11 + $0x188] sm:$0xff] }
  0x31   : > { %v476_v31 = vmax.f32 %v150_v3, %v316_v28  ;;  %620 = vst [vmem:[%s793_s15 + $0xc8] sm:$0xff] %v551_v25  ;;  %v555_v35 = vmax.f32 %v472_v11, %v475_v27  ;;  %v320_v36 = vrot.slane %v154_v23, 1  ;;  %v322_v37 = vrot.slane %v155_v24, 1 }
  0x32   : > { %v554_v34 = vmax.f32 %v471_v13, %v474_v26  ;;  %622 = vst [vmem:[%s793_s15 + $0xd8] sm:$0xff] %v553_v30  ;;  %v318_v40 = vsel %vm258_vm0, %v315_v16, %v317_v32  ;;  %v478_v41 = vmax.f32 %v152_v17, %v317_v32  ;;  %v324_v42 = vrot.slane %v156_v29, 1  ;;  %v167_v16 = vld [vmem:[%s770_s11 + $0x190] sm:$0xff]  ;;  %v169_v30 = vld [vmem:[%s770_s11 + $0x1a0] sm:$0xff] }
  0x33   : > { %v556_v39 = vmax.f32 %v473_v21, %v476_v31  ;;  %624 = vst [vmem:[%s793_s15 + $0xe8] sm:$0x7f] %v555_v35  ;;  %v477_v45 = vmax.f32 %v151_v4, %v318_v40  ;;  %v321_v46 = vsel %vm258_vm0, %v319_v33, %v320_v36  ;;  %v323_v47 = vsel %vm258_vm0, %v320_v36, %v322_v37  ;;  %v168_v21 = vld [vmem:[%s770_s11 + $0x198] sm:$0xff]  ;;  %v170_v35 = vld [vmem:[%s770_s11 + $0x1a8] sm:$0xff]  ;;  %v171_v36 = vld [vmem:[%s770_s11 + $0x1b0] sm:$0xff] }
  0x34   : > { %623 = vst [vmem:[%s793_s15 + $0xe0] sm:$0xff] %v554_v34  ;;  %v481_v48 = vmax.f32 %v155_v24, %v322_v37  ;;  %v558_v50 = vmax.f32 %v475_v27, %v478_v41  ;;  %v479_v51 = vmax.f32 %v153_v18, %v321_v46  ;;  %v480_v52 = vmax.f32 %v154_v23, %v323_v47  ;;  %v173_v46 = vld [vmem:[%s770_s11 + $0x1c0] sm:$0xff] }
  0x35   : > { %625 = vst [vmem:[%s793_s15 + $0xf0] sm:$0xff] %v556_v39  ;;  %v325_v53 = vrot.slane %v157_v38, 1  ;;  %v557_v55 = vmax.f32 %v474_v26, %v477_v45  ;;  %v327_v57 = vrot.slane %v158_v43, 1  ;;  %v329_v58 = vrot.slane %v159_v44, 1 }
  0x36   : > { %v561_v56 = vmax.f32 %v478_v41, %v481_v48  ;;  %627 = vst [vmem:[%s793_s15 + $0x100] sm:$0x7f] %v558_v50  ;;  %v559_v61 = vmax.f32 %v476_v31, %v479_v51  ;;  %v560_v62 = vmax.f32 %v477_v45, %v480_v52  ;;  %v330_v0 = vrot.slane %v160_v49, 1  ;;  %v172_v41 = vld [vmem:[%s770_s11 + $0x1b8] sm:$0xff] }
  0x37   : > { %v326_v63 = vsel %vm258_vm0, %v324_v42, %v325_v53  ;;  %626 = vst [vmem:[%s793_s15 + $0xf8] sm:$0xff] %v557_v55  ;;  %v328_v2 = vsel %vm258_vm0, %v325_v53, %v327_v57  ;;  %v484_v3 = vmax.f32 %v158_v43, %v327_v57  ;;  %v332_v4 = vrot.slane %v161_v54, 1 }
  0x38   : > { %630 = vst [vmem:[%s793_s15 + $0x118] sm:$0x7f] %v561_v56  ;;  %v482_v1 = vmax.f32 %v156_v29, %v326_v63  ;;  %628 = vst [vmem:[%s793_s15 + $0x108] sm:$0xff] %v559_v61  ;;  %v483_v5 = vmax.f32 %v157_v38, %v328_v2  ;;  %v331_v6 = vsel %vm258_vm0, %v329_v58, %v330_v0  ;;  %v334_v7 = vrot.slane %v162_v59, 1  ;;  %v177_v2 = vld [vmem:[%s770_s11 + $0x1e0] sm:$0xff] }
  0x39   : > { %629 = vst [vmem:[%s793_s15 + $0x110] sm:$0xff] %v560_v62  ;;  %v335_v8 = vrot.slane %v163_v60, 1  ;;  %v564_v12 = vmax.f32 %v481_v48, %v484_v3  ;;  %v485_v13 = vmax.f32 %v159_v44, %v331_v6  ;;  %v333_v14 = vsel %vm258_vm0, %v330_v0, %v332_v4 }
  0x3a   : > { %v562_v11 = vmax.f32 %v479_v51, %v482_v1  ;;  %v563_v17 = vmax.f32 %v480_v52, %v483_v5  ;;  %v486_v18 = vmax.f32 %v160_v49, %v333_v14  ;;  %v487_v19 = vmax.f32 %v161_v54, %v332_v4  ;;  %v174_v51 = vld [vmem:[%s770_s11 + $0x1c8] sm:$0xff]  ;;  %v175_v52 = vld [vmem:[%s770_s11 + $0x1d0] sm:$0xff] }
  0x3b   : > { %v336_v20 = vsel %vm258_vm0, %v334_v7, %v335_v8  ;;  %633 = vst [vmem:[%s793_s15 + $0x130] sm:$0x7f] %v564_v12  ;;  %v565_v22 = vmax.f32 %v482_v1, %v485_v13  ;;  %v337_v24 = vrot.slane %v164_v9, 1  ;;  %v339_v25 = vrot.slane %v165_v10, 1  ;;  %v176_v1 = vld [vmem:[%s770_s11 + $0x1d8] sm:$0xff]  ;;  %v178_v7 = vld [vmem:[%s770_s11 + $0x1e8] sm:$0xff] }
  0x3c   : > { %631 = vst [vmem:[%s793_s15 + $0x120] sm:$0xff] %v562_v11  ;;  %v488_v23 = vmax.f32 %v162_v59, %v336_v20  ;;  %632 = vst [vmem:[%s793_s15 + $0x128] sm:$0xff] %v563_v17  ;;  %v566_v26 = vmax.f32 %v483_v5, %v486_v18  ;;  %v567_v27 = vmax.f32 %v484_v3, %v487_v19  ;;  %v340_v28 = vrot.slane %v166_v15, 1 }
  0x3d   : > { %v342_v29 = vrot.slane %v167_v16, 1  ;;  %634 = vst [vmem:[%s793_s15 + $0x138] sm:$0xff] %v565_v22  ;;  %v338_v32 = vsel %vm258_vm0, %v335_v8, %v337_v24  ;;  %v490_v33 = vmax.f32 %v164_v9, %v337_v24  ;;  %v344_v34 = vrot.slane %v168_v21, 1  ;;  %v179_v8 = vld [vmem:[%s770_s11 + $0x1f0] sm:$0xff]  ;;  %v181_v22 = vld [vmem:[%s770_s11 + $0x200] sm:$0xff] }
  0x3e   : > { %v568_v31 = vmax.f32 %v485_v13, %v488_v23  ;;  %635 = vst [vmem:[%s793_s15 + $0x140] sm:$0xff] %v566_v26  ;;  %636 = vst [vmem:[%s793_s15 + $0x148] sm:$0x7f] %v567_v27  ;;  %v489_v37 = vmax.f32 %v163_v60, %v338_v32  ;;  %v341_v38 = vsel %vm258_vm0, %v339_v25, %v340_v28  ;;  %v345_v45 = vrot.slane %v169_v30, 1  ;;  %v180_v13 = vld [vmem:[%s770_s11 + $0x1f8] sm:$0xff]  ;;  %v182_v27 = vld [vmem:[%s770_s11 + $0x208] sm:$0xff] }
  0x3f   : > { %v343_v39 = vsel %vm258_vm0, %v340_v28, %v342_v29  ;;  %v493_v40 = vmax.f32 %v167_v16, %v342_v29  ;;  %v570_v42 = vmax.f32 %v487_v19, %v490_v33  ;;  %v491_v43 = vmax.f32 %v165_v10, %v341_v38  ;;  %v183_v28 = vld [vmem:[%s770_s11 + $0x210] sm:$0xff]  ;;  %v185_v38 = vld [vmem:[%s770_s11 + $0x220] sm:$0xff] }
  0x40   : > { %637 = vst [vmem:[%s793_s15 + $0x150] sm:$0xff] %v568_v31  ;;  %v492_v44 = vmax.f32 %v166_v15, %v343_v39  ;;  %v569_v47 = vmax.f32 %v486_v18, %v489_v37  ;;  %v347_v49 = vrot.slane %v170_v35, 1  ;;  %v349_v50 = vrot.slane %v171_v36, 1 }
  0x41   : > { %v573_v48 = vmax.f32 %v490_v33, %v493_v40  ;;  %639 = vst [vmem:[%s793_s15 + $0x160] sm:$0x7f] %v570_v42  ;;  %v571_v53 = vmax.f32 %v488_v23, %v491_v43  ;;  %v346_v55 = vsel %vm258_vm0, %v344_v34, %v345_v45  ;;  %v350_v56 = vrot.slane %v172_v41, 1  ;;  %v184_v33 = vld [vmem:[%s770_s11 + $0x218] sm:$0xff] }
  0x42   : > { %v572_v54 = vmax.f32 %v489_v37, %v492_v44  ;;  %638 = vst [vmem:[%s793_s15 + $0x158] sm:$0xff] %v569_v47  ;;  %v494_v57 = vmax.f32 %v168_v21, %v346_v55  ;;  %v348_v58 = vsel %vm258_vm0, %v345_v45, %v347_v49  ;;  %v496_v59 = vmax.f32 %v170_v35, %v347_v49 }
  0x43   : > { %642 = vst [vmem:[%s793_s15 + $0x178] sm:$0x7f] %v573_v48  ;;  %v352_v60 = vrot.slane %v173_v46, 1  ;;  %640 = vst [vmem:[%s793_s15 + $0x168] sm:$0xff] %v571_v53  ;;  %v495_v61 = vmax.f32 %v169_v30, %v348_v58  ;;  %v351_v62 = vsel %vm258_vm0, %v349_v50, %v350_v56  ;;  %v354_v63 = vrot.slane %v174_v51, 1 }
  0x44   : > { %641 = vst [vmem:[%s793_s15 + $0x170] sm:$0xff] %v572_v54  ;;  %v355_v0 = vrot.slane %v175_v52, 1  ;;  %v574_v3 = vmax.f32 %v491_v43, %v494_v57  ;;  %v576_v4 = vmax.f32 %v493_v40, %v496_v59  ;;  %v497_v5 = vmax.f32 %v171_v36, %v351_v62  ;;  %v186_v43 = vld [vmem:[%s770_s11 + $0x228] sm:$0xff] }
  0x45   : > { %v353_v6 = vsel %vm258_vm0, %v350_v56, %v352_v60  ;;  %v575_v9 = vmax.f32 %v492_v44, %v495_v61  ;;  %v499_v11 = vmax.f32 %v173_v46, %v352_v60  ;;  %v357_v16 = vrot.slane %v176_v1, 1  ;;  %v187_v44 = vld [vmem:[%s770_s11 + $0x230] sm:$0xff] }
  0x46   : > { %v498_v10 = vmax.f32 %v172_v41, %v353_v6  ;;  %v356_v12 = vsel %vm258_vm0, %v354_v63, %v355_v0  ;;  %643 = vst [vmem:[%s793_s15 + $0x180] sm:$0xff] %v574_v3  ;;  %645 = vst [vmem:[%s793_s15 + $0x190] sm:$0x7f] %v576_v4  ;;  %v577_v14 = vmax.f32 %v494_v57, %v497_v5  ;;  %v359_v17 = vrot.slane %v177_v2, 1  ;;  %v188_v57 = vld [vmem:[%s770_s11 + $0x238] sm:$0xff] }
  0x47   : > { %v500_v15 = vmax.f32 %v174_v51, %v356_v12  ;;  %644 = vst [vmem:[%s793_s15 + $0x188] sm:$0xff] %v575_v9  ;;  %v579_v19 = vmax.f32 %v496_v59, %v499_v11  ;;  %v360_v20 = vrot.slane %v178_v7, 1  ;;  %v362_v21 = vrot.slane %v179_v8, 1 }
  0x48   : > { %v578_v18 = vmax.f32 %v495_v61, %v498_v10  ;;  %646 = vst [vmem:[%s793_s15 + $0x198] sm:$0xff] %v577_v14  ;;  %v358_v24 = vsel %vm258_vm0, %v355_v0, %v357_v16  ;;  %v502_v25 = vmax.f32 %v176_v1, %v357_v16  ;;  %v364_v26 = vrot.slane %v180_v13, 1 }
  0x49   : > { %v580_v23 = vmax.f32 %v497_v5, %v500_v15  ;;  %648 = vst [vmem:[%s793_s15 + $0x1a8] sm:$0x7f] %v579_v19  ;;  %v501_v29 = vmax.f32 %v175_v52, %v358_v24  ;;  %v361_v30 = vsel %vm258_vm0, %v359_v17, %v360_v20  ;;  %v363_v31 = vsel %vm258_vm0, %v360_v20, %v362_v21 }
  0x4a   : > { %647 = vst [vmem:[%s793_s15 + $0x1a0] sm:$0xff] %v578_v18  ;;  %v505_v32 = vmax.f32 %v179_v8, %v362_v21  ;;  %v582_v34 = vmax.f32 %v499_v11, %v502_v25  ;;  %v503_v35 = vmax.f32 %v177_v2, %v361_v30  ;;  %v504_v36 = vmax.f32 %v178_v7, %v363_v31 }
  0x4b   : > { %649 = vst [vmem:[%s793_s15 + $0x1b0] sm:$0xff] %v580_v23  ;;  %v365_v37 = vrot.slane %v181_v22, 1  ;;  %v581_v39 = vmax.f32 %v498_v10, %v501_v29  ;;  %v367_v41 = vrot.slane %v182_v27, 1  ;;  %v369_v42 = vrot.slane %v183_v28, 1 }
  0x4c   : > { %v585_v40 = vmax.f32 %v502_v25, %v505_v32  ;;  %651 = vst [vmem:[%s793_s15 + $0x1c0] sm:$0x7f] %v582_v34  ;;  %v583_v45 = vmax.f32 %v500_v15, %v503_v35  ;;  %v584_v46 = vmax.f32 %v501_v29, %v504_v36  ;;  %v370_v48 = vrot.slane %v184_v33, 1 }
  0x4d   : > { %v366_v47 = vsel %vm258_vm0, %v364_v26, %v365_v37  ;;  %650 = vst [vmem:[%s793_s15 + $0x1b8] sm:$0xff] %v581_v39  ;;  %v368_v50 = vsel %vm258_vm0, %v365_v37, %v367_v41  ;;  %v508_v51 = vmax.f32 %v182_v27, %v367_v41  ;;  %v372_v52 = vrot.slane %v185_v38, 1 }
  0x4e   : > { %654 = vst [vmem:[%s793_s15 + $0x1d8] sm:$0x7f] %v585_v40  ;;  %v506_v49 = vmax.f32 %v180_v13, %v366_v47  ;;  %652 = vst [vmem:[%s793_s15 + $0x1c8] sm:$0xff] %v583_v45  ;;  %v507_v53 = vmax.f32 %v181_v22, %v368_v50  ;;  %v371_v54 = vsel %vm258_vm0, %v369_v42, %v370_v48  ;;  %v515_v55 = vrot.slane %v186_v43, 1 }
  0x4f   : > { %653 = vst [vmem:[%s793_s15 + $0x1d0] sm:$0xff] %v584_v46  ;;  %v516_v56 = vrot.slane %v187_v44, 1  ;;  %v588_v59 = vmax.f32 %v505_v32, %v508_v51  ;;  %v509_v60 = vmax.f32 %v183_v28, %v371_v54  ;;  %v373_v61 = vsel %vm258_vm0, %v370_v48, %v372_v52 }
  0x50   : > { %v586_v58 = vmax.f32 %v503_v35, %v506_v49  ;;  %v587_v62 = vmax.f32 %v504_v36, %v507_v53  ;;  %v510_v63 = vmax.f32 %v184_v33, %v373_v61  ;;  %v511_v0 = vmax.f32 %v185_v38, %v372_v52 }
  0x51   : > { %v517_v1 = vsel %vm258_vm0, %v515_v55, %v516_v56  ;;  %657 = vst [vmem:[%s793_s15 + $0x1f0] sm:$0x7f] %v588_v59  ;;  %v589_v2 = vmax.f32 %v506_v49, %v509_v60  ;;  %v518_v4 = vrot.slane %v188_v57, 1 }
  0x52   : > { %655 = vst [vmem:[%s793_s15 + $0x1e0] sm:$0xff] %v586_v58  ;;  %v523_v3 = vmax.f32 %v186_v43, %v517_v1  ;;  %656 = vst [vmem:[%s793_s15 + $0x1e8] sm:$0xff] %v587_v62  ;;  %v590_v5 = vmax.f32 %v507_v53, %v510_v63  ;;  %v591_v6 = vmax.f32 %v508_v51, %v511_v0 }
  0x53   : > { %658 = vst [vmem:[%s793_s15 + $0x1f8] sm:$0xff] %v589_v2  ;;  %v519_v8 = vsel %vm258_vm0, %v516_v56, %v518_v4  ;;  %v525_v9 = vmax.f32 %v188_v57, %v518_v4 }
  0x54   : > { %v592_v7 = vmax.f32 %v509_v60, %v523_v3  ;;  %659 = vst [vmem:[%s793_s15 + $0x200] sm:$0xff] %v590_v5  ;;  %660 = vst [vmem:[%s793_s15 + $0x208] sm:$0x7f] %v591_v6  ;;  %v524_v10 = vmax.f32 %v187_v44, %v519_v8 }
  0x55   : > { %v594_v11 = vmax.f32 %v511_v0, %v525_v9 }
  0x56   : > { %661 = vst [vmem:[%s793_s15 + $0x210] sm:$0xff] %v592_v7  ;;  %v593_v12 = vmax.f32 %v510_v63, %v524_v10 }
  0x57   : > { %663 = vst [vmem:[%s793_s15 + $0x220] sm:$0x7f] %v594_v11 }
  0x58   : > { %662 = vst [vmem:[%s793_s15 + $0x218] sm:$0xff] %v593_v12 }
  0x59 PF: > { %s11_s6 = sadd.s32 1, %s744_s6  }
  0x5a   : > { %p8_p4 = scmp.ge.s32.totalorder %s11_s6, 4  }
  0x5c   :  { %10 = sbr.rel (!%p8_p4) target bundleno = 1 (0x1), region = 54 }

// kernel: _lambda_.6
= control target key start
LH: loop header
LB: loop body
LE: loop exit
PB: predicated region body
PF: predicated region fallthrough
CT: control target
= control target key end

     0   :  { %8 = vsyncpa [#allocation3], 0  ;;  %s2554_s0 = inlined_call_operand.vmem [shape: f32[2,576,25], index: 0, kind: input, shape index: {}]   ;;  %s2555_s1 = inlined_call_operand.hbm [shape: f32[25,128], index: 1, kind: input, shape index: {}]   ;;  %s2556_s2 = inlined_call_operand.hbm [shape: f32[1,128], index: 2, kind: input, shape index: {}]   ;;  %s2557_s3 = inlined_call_operand.vmem [shape: f32[2,576,128], index: 3, kind: output, shape index: {}]  }
   0x1   :  { %9 = vsyncpa [#allocation5], 0  ;;  %s2139_s12 = smov 0   ;;  %s2141_s13 = smov 0  }
   0x2   :  { %s2143_s14 = smov 0  }
   0x3 LB: > { %s1683_s15 = sadd.s32 4294967295, %s2112_s14   ;;  %s34_s16 = sadd.s32 1, %s2108_s13  ;;  %s2112_s14 = sphi %s2143_s14, %s15_s14   ;;  %s2108_s13 = sphi %s2141_s13, %s2567_s13   ;;  %s2104_s12 = sphi %s2139_s12, %s2566_s12  }
   0x4   : > { %p36_p0 = scmp.ge.s32.totalorder %s34_s16, 2  ;;  %p1685_p1 = scmp.ge.s32.totalorder %s2112_s14, 1 }
   0x5   : > { %p149_p2 = scmp.lt.s32.totalorder %s2112_s14, 3  ;;  %p2164_p4 = scmp.eq.s32.totalorder %s1683_s15, 0 }
   0x6   : > { %s2569_s16 = smov (%p36_p0, %s34_s16), 0  ;;  %s2114_s19 = smov [#allocation2]  }
   0x7   : > { %p2160_p3 = pnand %p1685_p1, %p149_p2  ;;  %s165_s20 = sshll.u32 %s2114_s19, 4  ;;  %s166_s20 = int_to_ptr.vmem [resolvable:$true] %s165_s20 }
   0x8   : > { %s2562_s18 = scalar_select %p2164_p4, 1, 0 }
   0x9   : > { %s2561_s17 = scalar_select %p2160_p3, 1, 0 }
   0xa   : > { %p1985_p5 = pneg %p2160_p3  ;;  %s2115_s22 = smov [#allocation4]  }
   0xb   : > { %s181_s23 = sshll.u32 %s2115_s22, 4  ;;  %s2026_s26 = scalar_lea.hbm %s2555_s1, 512  ;;  %s2176_s23 = int_to_ptr.vmem [resolvable:$true] %s181_s23 }
   0xc   : > { %p2172_p6 = pnand %p2164_p4, %p1985_p5  ;;  %p2027_p7 = scmp.ne.s32.totalorder %s2555_s1, %s2026_s26 }
   0xd   : > { %p2033_p11 = scmp.lt.u32.totalorder %s2026_s26, %s2555_s1 }
   0xe   : > { %p2028_p8 = pneg %p2172_p6 }
  0x10   : > { %p2029_p9 = pnand %p2028_p8, %p2027_p7 }
  0x12   : > { %p2030_p10 = pneg %p2029_p9 }
  0x14   : > { %p2035_p12 = pnand %p2033_p11, %p2030_p10 }
  0x16   : > { %2038 = shalt.err (!%p2035_p12)
}
  0x17   : > { %s2039_s4 = scalar_lea.vmem %s166_s20, 512  ;;  %p2047_p2 = scmp.lt.s32.totalorder %s166_s20, %s166_s20 }
  0x18   : > { %p2040_p13 = scmp.ne.s32.totalorder %s166_s20, %s2039_s4  ;;  %p2048_p5 = scmp.lt.s32.totalorder %s2039_s4, %s2039_s4 }
  0x1a   : > { %p2042_p0 = pnand %p2040_p13, %p2028_p8  ;;  %p2049_p4 = por %p2048_p5, %p2047_p2 }
  0x1c   : > { %p2043_p1 = pneg %p2042_p0 }
  0x1e   : > { %p2050_p3 = pnand %p2049_p4, %p2043_p1 }
  0x20   : > { %2053 = shalt.err (!%p2050_p3)
}
  0x21   : > { %s2116_s5 = smov 128   ;;  %s2117_s6 = smov 8  }
  0x22   : > { %1988 = dma.hbm_to_vmem [thread:$0]  (!%p2172_p6), %s2555_s1, 512, %s166_s20, [#allocation3], %s2116_s5, %s2116_s5, %s2117_s6  }
  0x23   : > { %s2054_s11 = scalar_lea.hbm %s2556_s2, 16 }
  0x24   : > { %p2055_p7 = scmp.ne.s32.totalorder %s2556_s2, %s2054_s11  ;;  %p2061_p9 = scmp.lt.u32.totalorder %s2054_s11, %s2556_s2 }
  0x26   : > { %p2057_p3 = pnand %p2055_p7, %p2028_p8 }
  0x28   : > { %p2058_p4 = pneg %p2057_p3 }
  0x2a   : > { %p2063_p10 = pnand %p2061_p9, %p2058_p4 }
  0x2c   : > { %2066 = shalt.err (!%p2063_p10)
}
  0x2d   : > { %s2067_s20 = scalar_lea.vmem %s2176_s23, 16  ;;  %s2074_s25 = scalar_lea.vmem %s2176_s23, 32 }
  0x2e   : > { %p2068_p11 = scmp.ne.s32.totalorder %s2176_s23, %s2067_s20  ;;  %p2075_p0 = scmp.lt.s32.totalorder %s2176_s23, %s2176_s23 }
  0x2f   : > { %p2076_p1 = scmp.lt.s32.totalorder %s2074_s25, %s2067_s20 }
  0x30   : > { %p2070_p12 = pnand %p2068_p11, %p2028_p8 }
  0x31   : > { %p2077_p2 = por %p2076_p1, %p2075_p0 }
  0x32   : > { %p2071_p13 = pneg %p2070_p12 }
  0x34   : > { %p2078_p5 = pnand %p2077_p2, %p2071_p13 }
  0x36   : > { %2081 = shalt.err (!%p2078_p5)
}
  0x37   : > { %1991 = dma.hbm_to_vmem [thread:$0]  (!%p2172_p6), %s2556_s2, 16, %s2176_s23, [#allocation5]  }
  0x38   : > { %p2564_p7 = scmp.ne.s32.totalorder %s2561_s17, 0 }
  0x39   : > { %p2565_p8 = scmp.ne.s32.totalorder (!%p2564_p7), %s2562_s18, 0 }
  0x3a   : > { %205 = sbr.rel (%p2564_p7) target bundleno = 366 (0x16e), region = 32 }
  0x41   : > { %2095 = dma.done.wait (%p2565_p8), [#allocation3], 512  }
  0x42   : > { %2097 = vsyncadd (%p2565_p8), [#allocation3], 4294966784 }
  0x43   : > { %2099 = dma.done.wait (%p2565_p8), [#allocation5], 16  }
  0x44   : > { %2101 = vsyncadd (%p2565_p8), [#allocation5], 4294967280  ;;  %p239_p3 = scmp.lt.s32.totalorder %s2104_s12, 1  ;;  %vm697_vm0 = vcmask 1040384   ;;  %vm480_vm1 = vcmask 203776   ;;  %v476_v0 = vld [vmem:[#allocation2] sm:$0xff] }
  0x45   : > { %v477_v1 = vld [vmem:[#allocation2 + $0x8] sm:$0xff]  ;;  %v478_v2 = vld [vmem:[#allocation2 + $0x10] sm:$0xff]  ;;  %v479_v4 = vld [vmem:[#allocation2 + $0x18] sm:$0x1]  ;;  %vm2118_vm2 = vmmov 1  }
  0x46   : > { %s2571_s12 = smov (!%p239_p3, %s2104_s12), 1  ;;  %v1962_v3 = vpack.c.bf16 %v477_v1, %v476_v0  ;;  %v1966_v7 = vpack.c.bf16 %v479_v4, %v478_v2  ;;  %vm1967_vm3 = vmpackc.low %vm697_vm0, %vm2118_vm2 }
  0x47   : > { %s1976_s17 = smul.u32 576, %s2571_s12 }
  0x48   : > { %1963 = vmatprep.subr.bf16.mxu0 %v1962_v3  ;;  %1972 = vmatprep.subr.bf16.mxu1 %v1962_v3 }
  0x49   : > { %s2246_s28 = scalar_lea.vmem %s2554_s0, %s1976_s17  ;;  %1965 = vmatpush3.bf16.msra.mxu0 %v1962_v3  ;;  %1974 = vmatpush3.bf16.msra.mxu1 %v1962_v3  ;;  %s2401_s30 = scalar_lea.vmem %s2557_s3, %s1976_s17 }
  0x4a   : > { %v404_v5 = vld [vmem:[%s2246_s28] sm:$0xff]  ;;  %1968 = vmatprep.subr.msk.bf16.mxu0 %vm1967_vm3, %v1966_v7  ;;  %1973 = vmatprep.subr.msk.bf16.mxu1 %vm1967_vm3, %v1966_v7  ;;  %v405_v8 = vld [vmem:[%s2246_s28 + $0x8] sm:$0xff]  ;;  %v406_v10 = vld [vmem:[%s2246_s28 + $0x10] sm:$0xff] }
  0x4b   : > { %v440_v6 = vld [vmem:[%s2246_s28 + $0x120] sm:$0xff]  ;;  %1854 = vmatprep.mubr.msk.f32.mxu0 %vm480_vm1, %v404_v5  ;;  %v441_v9 = vld [vmem:[%s2246_s28 + $0x128] sm:$0xff]  ;;  %v442_v11 = vld [vmem:[%s2246_s28 + $0x130] sm:$0xff] }
  0x4c   : > { %1908 = vmatprep.mubr.msk.f32.mxu1 %vm480_vm1, %v440_v6  ;;  %v407_v12 = vld [vmem:[%s2246_s28 + $0x18] sm:$0xff]  ;;  %v408_v14 = vld [vmem:[%s2246_s28 + $0x20] sm:$0xff]  ;;  %v409_v16 = vld [vmem:[%s2246_s28 + $0x28] sm:$0xff] }
  0x4d   : > { %1971 = vmatpush3.bf16.msk.msra.mxu0 %vm1967_vm3, %v1966_v7  ;;  %1975 = vmatpush3.bf16.msk.msra.mxu1 %vm1967_vm3, %v1966_v7  ;;  %v443_v13 = vld [vmem:[%s2246_s28 + $0x138] sm:$0xff]  ;;  %v444_v15 = vld [vmem:[%s2246_s28 + $0x140] sm:$0xff]  ;;  %v445_v17 = vld [vmem:[%s2246_s28 + $0x148] sm:$0xff] }
  0x4e   : > { %v410_v18 = vld [vmem:[%s2246_s28 + $0x30] sm:$0xff]  ;;  %v411_v20 = vld [vmem:[%s2246_s28 + $0x38] sm:$0xff]  ;;  %v412_v22 = vld [vmem:[%s2246_s28 + $0x40] sm:$0xff] }
  0x4f   : > { %v446_v19 = vld [vmem:[%s2246_s28 + $0x150] sm:$0xff]  ;;  %v447_v21 = vld [vmem:[%s2246_s28 + $0x158] sm:$0xff]  ;;  %v448_v23 = vld [vmem:[%s2246_s28 + $0x160] sm:$0xff] }
  0x50   : > { %1855 = vmatmul.mubr.msk.f32.vlgmr.msra.gmra.mrb[0].mxu0 %vm480_vm1, %v405_v8  ;;  %1909 = vmatmul.mubr.msk.f32.vlgmr.msra.gmra.mrb[0].mxu1 %vm480_vm1, %v441_v9  ;;  %v413_v24 = vld [vmem:[%s2246_s28 + $0x48] sm:$0xff]  ;;  %v414_v26 = vld [vmem:[%s2246_s28 + $0x50] sm:$0xff]  ;;  %v415_v28 = vld [vmem:[%s2246_s28 + $0x58] sm:$0xff] }
  0x51   : > { %1857 = vmatprep.mubr.msk.f32.mxu0 %vm480_vm1, %v406_v10  ;;  %1911 = vmatprep.mubr.msk.f32.mxu1 %vm480_vm1, %v442_v11  ;;  %v449_v25 = vld [vmem:[%s2246_s28 + $0x168] sm:$0xff]  ;;  %v450_v27 = vld [vmem:[%s2246_s28 + $0x170] sm:$0xff]  ;;  %v451_v29 = vld [vmem:[%s2246_s28 + $0x178] sm:$0xff] }
  0x52   : > { %v416_v30 = vld [vmem:[%s2246_s28 + $0x60] sm:$0xff]  ;;  %v417_v32 = vld [vmem:[%s2246_s28 + $0x68] sm:$0xff]  ;;  %v418_v34 = vld [vmem:[%s2246_s28 + $0x70] sm:$0xff] }
  0x53   : > { %v452_v31 = vld [vmem:[%s2246_s28 + $0x180] sm:$0xff]  ;;  %v453_v33 = vld [vmem:[%s2246_s28 + $0x188] sm:$0xff]  ;;  %v454_v35 = vld [vmem:[%s2246_s28 + $0x190] sm:$0xff] }
  0x54   : > { %1858 = vmatmul.mubr.msk.f32.gmra.mrb[2].mxu0 %vm480_vm1, %v407_v12  ;;  %1912 = vmatmul.mubr.msk.f32.gmra.mrb[2].mxu1 %vm480_vm1, %v443_v13  ;;  %v419_v36 = vld [vmem:[%s2246_s28 + $0x78] sm:$0xff]  ;;  %v420_v38 = vld [vmem:[%s2246_s28 + $0x80] sm:$0xff]  ;;  %v421_v40 = vld [vmem:[%s2246_s28 + $0x88] sm:$0xff] }
  0x55   : > { %1860 = vmatprep.mubr.msk.f32.mxu0 %vm480_vm1, %v408_v14  ;;  %1914 = vmatprep.mubr.msk.f32.mxu1 %vm480_vm1, %v444_v15  ;;  %v455_v37 = vld [vmem:[%s2246_s28 + $0x198] sm:$0xff]  ;;  %v456_v39 = vld [vmem:[%s2246_s28 + $0x1a0] sm:$0xff]  ;;  %v457_v41 = vld [vmem:[%s2246_s28 + $0x1a8] sm:$0xff] }
  0x56   : > { %v422_v42 = vld [vmem:[%s2246_s28 + $0x90] sm:$0xff]  ;;  %v423_v44 = vld [vmem:[%s2246_s28 + $0x98] sm:$0xff]  ;;  %v424_v46 = vld [vmem:[%s2246_s28 + $0xa0] sm:$0xff] }
  0x57   : > { %v458_v43 = vld [vmem:[%s2246_s28 + $0x1b0] sm:$0xff]  ;;  %v459_v45 = vld [vmem:[%s2246_s28 + $0x1b8] sm:$0xff]  ;;  %v460_v47 = vld [vmem:[%s2246_s28 + $0x1c0] sm:$0xff] }
  0x58   : > { %1861 = vmatmul.mubr.msk.f32.gmra.mrb[4].mxu0 %vm480_vm1, %v409_v16  ;;  %1915 = vmatmul.mubr.msk.f32.gmra.mrb[4].mxu1 %vm480_vm1, %v445_v17  ;;  %v425_v48 = vld [vmem:[%s2246_s28 + $0xa8] sm:$0xff]  ;;  %v426_v50 = vld [vmem:[%s2246_s28 + $0xb0] sm:$0xff]  ;;  %v427_v52 = vld [vmem:[%s2246_s28 + $0xb8] sm:$0xff] }
  0x59   : > { %1863 = vmatprep.mubr.msk.f32.mxu0 %vm480_vm1, %v410_v18  ;;  %1917 = vmatprep.mubr.msk.f32.mxu1 %vm480_vm1, %v446_v19  ;;  %v461_v49 = vld [vmem:[%s2246_s28 + $0x1c8] sm:$0xff]  ;;  %v462_v51 = vld [vmem:[%s2246_s28 + $0x1d0] sm:$0xff]  ;;  %v463_v53 = vld [vmem:[%s2246_s28 + $0x1d8] sm:$0xff] }
  0x5a   : > { %v428_v54 = vld [vmem:[%s2246_s28 + $0xc0] sm:$0xff]  ;;  %v429_v56 = vld [vmem:[%s2246_s28 + $0xc8] sm:$0xff]  ;;  %v430_v58 = vld [vmem:[%s2246_s28 + $0xd0] sm:$0xff] }
  0x5b   : > { %v464_v55 = vld [vmem:[%s2246_s28 + $0x1e0] sm:$0xff]  ;;  %v465_v57 = vld [vmem:[%s2246_s28 + $0x1e8] sm:$0xff]  ;;  %v466_v59 = vld [vmem:[%s2246_s28 + $0x1f0] sm:$0xff] }
  0x5c   : > { %1864 = vmatmul.mubr.msk.f32.gmra.mrb[6].mxu0 %vm480_vm1, %v411_v20  ;;  %1918 = vmatmul.mubr.msk.f32.gmra.mrb[6].mxu1 %vm480_vm1, %v447_v21  ;;  %v431_v60 = vld [vmem:[%s2246_s28 + $0xd8] sm:$0xff]  ;;  %v432_v62 = vld [vmem:[%s2246_s28 + $0xe0] sm:$0xff]  ;;  %v433_v0 = vld [vmem:[%s2246_s28 + $0xe8] sm:$0xff] }
  0x5d   : > { %1866 = vmatprep.mubr.msk.f32.mxu0 %vm480_vm1, %v412_v22  ;;  %1920 = vmatprep.mubr.msk.f32.mxu1 %vm480_vm1, %v448_v23  ;;  %v467_v61 = vld [vmem:[%s2246_s28 + $0x1f8] sm:$0xff]  ;;  %v468_v63 = vld [vmem:[%s2246_s28 + $0x200] sm:$0xff]  ;;  %v469_v1 = vld [vmem:[%s2246_s28 + $0x208] sm:$0xff] }
  0x5e   : > { %v434_v2 = vld [vmem:[%s2246_s28 + $0xf0] sm:$0xff]  ;;  %v435_v4 = vld [vmem:[%s2246_s28 + $0xf8] sm:$0xff]  ;;  %v436_v6 = vld [vmem:[%s2246_s28 + $0x100] sm:$0xff] }
  0x5f   : > { %v470_v3 = vld [vmem:[%s2246_s28 + $0x210] sm:$0xff]  ;;  %v471_v5 = vld [vmem:[%s2246_s28 + $0x218] sm:$0xff]  ;;  %v472_v7 = vld [vmem:[%s2246_s28 + $0x220] sm:$0xff] }
  0x60   : > { %1867 = vmatmul.mubr.msk.f32.gmra.mrb[8].mxu0 %vm480_vm1, %v413_v24  ;;  %1921 = vmatmul.mubr.msk.f32.gmra.mrb[8].mxu1 %vm480_vm1, %v449_v25  ;;  %v437_v8 = vld [vmem:[%s2246_s28 + $0x108] sm:$0xff]  ;;  %v438_v10 = vld [vmem:[%s2246_s28 + $0x110] sm:$0xff]  ;;  %v439_v12 = vld [vmem:[%s2246_s28 + $0x118] sm:$0xff] }
  0x61   : > { %1869 = vmatprep.mubr.msk.f32.mxu0 %vm480_vm1, %v414_v26  ;;  %1923 = vmatprep.mubr.msk.f32.mxu1 %vm480_vm1, %v450_v27  ;;  %v473_v9 = vld [vmem:[%s2246_s28 + $0x228] sm:$0xff]  ;;  %v474_v11 = vld [vmem:[%s2246_s28 + $0x230] sm:$0xff]  ;;  %v475_v13 = vld [vmem:[%s2246_s28 + $0x238] sm:$0xff] }
  0x62   : > { %v2392_v15 = vld [vmem:[#allocation4] ss:$0 sm:$0xff] }
  0x64   : > { %1870 = vmatmul.mubr.msk.f32.gmra.mrb[10].mxu0 %vm480_vm1, %v415_v28  ;;  %1924 = vmatmul.mubr.msk.f32.gmra.mrb[10].mxu1 %vm480_vm1, %v451_v29 }
  0x65   : > { %1872 = vmatprep.mubr.msk.f32.mxu0 %vm480_vm1, %v416_v30  ;;  %1926 = vmatprep.mubr.msk.f32.mxu1 %vm480_vm1, %v452_v31 }
  0x68   : > { %1873 = vmatmul.mubr.msk.f32.gmra.mrb[12].mxu0 %vm480_vm1, %v417_v32  ;;  %1927 = vmatmul.mubr.msk.f32.gmra.mrb[12].mxu1 %vm480_vm1, %v453_v33 }
  0x69   : > { %1875 = vmatprep.mubr.msk.f32.mxu0 %vm480_vm1, %v418_v34  ;;  %1929 = vmatprep.mubr.msk.f32.mxu1 %vm480_vm1, %v454_v35 }
  0x6c   : > { %1876 = vmatmul.mubr.msk.f32.gmra.mrb[14].mxu0 %vm480_vm1, %v419_v36  ;;  %1930 = vmatmul.mubr.msk.f32.gmra.mrb[14].mxu1 %vm480_vm1, %v455_v37 }
  0x6d   : > { %1878 = vmatprep.mubr.msk.f32.mxu0 %vm480_vm1, %v420_v38  ;;  %1932 = vmatprep.mubr.msk.f32.mxu1 %vm480_vm1, %v456_v39 }
  0x70   : > { %1879 = vmatmul.mubr.msk.f32.gmra.mrb[16].mxu0 %vm480_vm1, %v421_v40  ;;  %1933 = vmatmul.mubr.msk.f32.gmra.mrb[16].mxu1 %vm480_vm1, %v457_v41 }
  0x71   : > { %1881 = vmatprep.mubr.msk.f32.mxu0 %vm480_vm1, %v422_v42  ;;  %1935 = vmatprep.mubr.msk.f32.mxu1 %vm480_vm1, %v458_v43 }
  0x74   : > { %1882 = vmatmul.mubr.msk.f32.gmra.mrb[18].mxu0 %vm480_vm1, %v423_v44  ;;  %1936 = vmatmul.mubr.msk.f32.gmra.mrb[18].mxu1 %vm480_vm1, %v459_v45 }
  0x75   : > { %1884 = vmatprep.mubr.msk.f32.mxu0 %vm480_vm1, %v424_v46  ;;  %1938 = vmatprep.mubr.msk.f32.mxu1 %vm480_vm1, %v460_v47 }
  0x78   : > { %1885 = vmatmul.mubr.msk.f32.gmra.mrb[20].mxu0 %vm480_vm1, %v425_v48  ;;  %1939 = vmatmul.mubr.msk.f32.gmra.mrb[20].mxu1 %vm480_vm1, %v461_v49 }
  0x79   : > { %1887 = vmatprep.mubr.msk.f32.mxu0 %vm480_vm1, %v426_v50  ;;  %1941 = vmatprep.mubr.msk.f32.mxu1 %vm480_vm1, %v462_v51 }
  0x7c   : > { %1888 = vmatmul.mubr.msk.f32.gmra.mrb[22].mxu0 %vm480_vm1, %v427_v52  ;;  %1942 = vmatmul.mubr.msk.f32.gmra.mrb[22].mxu1 %vm480_vm1, %v463_v53 }
  0x7d   : > { %1890 = vmatprep.mubr.msk.f32.mxu0 %vm480_vm1, %v428_v54  ;;  %1944 = vmatprep.mubr.msk.f32.mxu1 %vm480_vm1, %v464_v55 }
  0x80   : > { %1891 = vmatmul.mubr.msk.f32.gmra.mrb[24].mxu0 %vm480_vm1, %v429_v56  ;;  %1945 = vmatmul.mubr.msk.f32.gmra.mrb[24].mxu1 %vm480_vm1, %v465_v57 }
  0x81   : > { %1893 = vmatprep.mubr.msk.f32.mxu0 %vm480_vm1, %v430_v58  ;;  %1947 = vmatprep.mubr.msk.f32.mxu1 %vm480_vm1, %v466_v59 }
  0x84   : > { %1894 = vmatmul.mubr.msk.f32.gmra.mrb[26].mxu0 %vm480_vm1, %v431_v60  ;;  %1948 = vmatmul.mubr.msk.f32.gmra.mrb[26].mxu1 %vm480_vm1, %v467_v61 }
  0x85   : > { %1896 = vmatprep.mubr.msk.f32.mxu0 %vm480_vm1, %v432_v62  ;;  %1950 = vmatprep.mubr.msk.f32.mxu1 %vm480_vm1, %v468_v63 }
  0x88   : > { %1897 = vmatmul.mubr.msk.f32.gmra.mrb[28].mxu0 %vm480_vm1, %v433_v0  ;;  %1951 = vmatmul.mubr.msk.f32.gmra.mrb[28].mxu1 %vm480_vm1, %v469_v1 }
  0x89   : > { %1899 = vmatprep.mubr.msk.f32.mxu0 %vm480_vm1, %v434_v2  ;;  %1953 = vmatprep.mubr.msk.f32.mxu1 %vm480_vm1, %v470_v3 }
  0x8c   : > { %1900 = vmatmul.mubr.msk.f32.gmra.mrb[30].mxu0 %vm480_vm1, %v435_v4  ;;  %1954 = vmatmul.mubr.msk.f32.gmra.mrb[30].mxu1 %vm480_vm1, %v471_v5 }
  0x8d   : > { %1902 = vmatprep.mubr.msk.f32.mxu0 %vm480_vm1, %v436_v6  ;;  %1956 = vmatprep.mubr.msk.f32.mxu1 %vm480_vm1, %v472_v7 }
  0x90   : > { %1903 = vmatmul.mubr.msk.f32.gmra.mrb[32].mxu0 %vm480_vm1, %v437_v8  ;;  %1957 = vmatmul.mubr.msk.f32.gmra.mrb[32].mxu1 %vm480_vm1, %v473_v9 }
  0x91   : > { %1905 = vmatprep.mubr.msk.f32.mxu0 %vm480_vm1, %v438_v10  ;;  %1959 = vmatprep.mubr.msk.f32.mxu1 %vm480_vm1, %v474_v11 }
  0x94   : > { %1906 = vmatmul.mubr.msk.f32.gmra.mrb[34].mxu0 %vm480_vm1, %v439_v12  ;;  %1960 = vmatmul.mubr.msk.f32.gmra.mrb[34].mxu1 %vm480_vm1, %v475_v13 }
 0x123   : > { %v1856_v14 = vpop.f32.mrb[0].mxu0  ;;  %v1910_v16 = vpop.f32.mrb[0].mxu1 }
 0x124   : > { %v767_v17 = vpop.f32.mrb[1].mxu0  ;;  %v947_v18 = vpop.f32.mrb[1].mxu1  ;;  %v1353_v19 = vadd.f32 %v1856_v14, %v2392_v15  ;;  %v1389_v20 = vadd.f32 %v1910_v16, %v2392_v15 }
 0x125   : > { %v1352_v21 = vadd.f32 %v2392_v15, %v767_v17  ;;  %v1388_v22 = vadd.f32 %v2392_v15, %v947_v18 }
 0x126   : > { %v1425_v25 = vmax.f32 %v1353_v19, 0.0  ;;  %v1461_v26 = vmax.f32 %v1389_v20, 0.0 }
 0x127   : > { %v1859_v23 = vpop.f32.mrb[2].mxu0  ;;  %v1913_v24 = vpop.f32.mrb[2].mxu1  ;;  %v1424_v29 = vmax.f32 %v1352_v21, 0.0  ;;  %v1460_v30 = vmax.f32 %v1388_v22, 0.0 }
 0x128   : > { %v777_v27 = vpop.f32.mrb[3].mxu0  ;;  %v957_v28 = vpop.f32.mrb[3].mxu1  ;;  %1497 = vst [vmem:[%s2401_s30 + $0x8] sm:$0xff] %v1425_v25  ;;  %1533 = vst [vmem:[%s2401_s30 + $0x128] sm:$0xff] %v1461_v26  ;;  %v1355_v31 = vadd.f32 %v1859_v23, %v2392_v15  ;;  %v1391_v32 = vadd.f32 %v1913_v24, %v2392_v15 }
 0x129   : > { %1496 = vst [vmem:[%s2401_s30] sm:$0xff] %v1424_v29  ;;  %1532 = vst [vmem:[%s2401_s30 + $0x120] sm:$0xff] %v1460_v30  ;;  %v1354_v33 = vadd.f32 %v2392_v15, %v777_v27  ;;  %v1390_v34 = vadd.f32 %v2392_v15, %v957_v28 }
 0x12a   : > { %v1427_v37 = vmax.f32 %v1355_v31, 0.0  ;;  %v1463_v38 = vmax.f32 %v1391_v32, 0.0 }
 0x12b   : > { %v1862_v35 = vpop.f32.mrb[4].mxu0  ;;  %v1916_v36 = vpop.f32.mrb[4].mxu1  ;;  %v1426_v41 = vmax.f32 %v1354_v33, 0.0  ;;  %v1462_v42 = vmax.f32 %v1390_v34, 0.0 }
 0x12c   : > { %v787_v39 = vpop.f32.mrb[5].mxu0  ;;  %v967_v40 = vpop.f32.mrb[5].mxu1  ;;  %1499 = vst [vmem:[%s2401_s30 + $0x18] sm:$0xff] %v1427_v37  ;;  %1535 = vst [vmem:[%s2401_s30 + $0x138] sm:$0xff] %v1463_v38  ;;  %v1357_v43 = vadd.f32 %v1862_v35, %v2392_v15  ;;  %v1393_v44 = vadd.f32 %v1916_v36, %v2392_v15 }
 0x12d   : > { %1498 = vst [vmem:[%s2401_s30 + $0x10] sm:$0xff] %v1426_v41  ;;  %1534 = vst [vmem:[%s2401_s30 + $0x130] sm:$0xff] %v1462_v42  ;;  %v1356_v45 = vadd.f32 %v2392_v15, %v787_v39  ;;  %v1392_v46 = vadd.f32 %v2392_v15, %v967_v40 }
 0x12e   : > { %v1429_v49 = vmax.f32 %v1357_v43, 0.0  ;;  %v1465_v50 = vmax.f32 %v1393_v44, 0.0 }
 0x12f   : > { %v1865_v47 = vpop.f32.mrb[6].mxu0  ;;  %v1919_v48 = vpop.f32.mrb[6].mxu1  ;;  %v1428_v53 = vmax.f32 %v1356_v45, 0.0  ;;  %v1464_v54 = vmax.f32 %v1392_v46, 0.0 }
 0x130   : > { %v797_v51 = vpop.f32.mrb[7].mxu0  ;;  %v977_v52 = vpop.f32.mrb[7].mxu1  ;;  %1501 = vst [vmem:[%s2401_s30 + $0x28] sm:$0xff] %v1429_v49  ;;  %1537 = vst [vmem:[%s2401_s30 + $0x148] sm:$0xff] %v1465_v50  ;;  %v1359_v55 = vadd.f32 %v1865_v47, %v2392_v15  ;;  %v1395_v56 = vadd.f32 %v1919_v48, %v2392_v15 }
 0x131   : > { %1500 = vst [vmem:[%s2401_s30 + $0x20] sm:$0xff] %v1428_v53  ;;  %1536 = vst [vmem:[%s2401_s30 + $0x140] sm:$0xff] %v1464_v54  ;;  %v1358_v57 = vadd.f32 %v2392_v15, %v797_v51  ;;  %v1394_v58 = vadd.f32 %v2392_v15, %v977_v52 }
 0x132   : > { %v1431_v61 = vmax.f32 %v1359_v55, 0.0  ;;  %v1467_v62 = vmax.f32 %v1395_v56, 0.0 }
 0x133   : > { %v1868_v59 = vpop.f32.mrb[8].mxu0  ;;  %v1922_v60 = vpop.f32.mrb[8].mxu1  ;;  %v1430_v1 = vmax.f32 %v1358_v57, 0.0  ;;  %v1466_v2 = vmax.f32 %v1394_v58, 0.0 }
 0x134   : > { %v807_v63 = vpop.f32.mrb[9].mxu0  ;;  %v987_v0 = vpop.f32.mrb[9].mxu1  ;;  %1503 = vst [vmem:[%s2401_s30 + $0x38] sm:$0xff] %v1431_v61  ;;  %1539 = vst [vmem:[%s2401_s30 + $0x158] sm:$0xff] %v1467_v62  ;;  %v1361_v3 = vadd.f32 %v1868_v59, %v2392_v15  ;;  %v1397_v4 = vadd.f32 %v1922_v60, %v2392_v15 }
 0x135   : > { %1502 = vst [vmem:[%s2401_s30 + $0x30] sm:$0xff] %v1430_v1  ;;  %1538 = vst [vmem:[%s2401_s30 + $0x150] sm:$0xff] %v1466_v2  ;;  %v1360_v5 = vadd.f32 %v2392_v15, %v807_v63  ;;  %v1396_v6 = vadd.f32 %v2392_v15, %v987_v0 }
 0x136   : > { %v1433_v9 = vmax.f32 %v1361_v3, 0.0  ;;  %v1469_v10 = vmax.f32 %v1397_v4, 0.0 }
 0x137   : > { %v1871_v7 = vpop.f32.mrb[10].mxu0  ;;  %v1925_v8 = vpop.f32.mrb[10].mxu1  ;;  %v1432_v13 = vmax.f32 %v1360_v5, 0.0  ;;  %v1468_v14 = vmax.f32 %v1396_v6, 0.0 }
 0x138   : > { %v817_v11 = vpop.f32.mrb[11].mxu0  ;;  %v997_v12 = vpop.f32.mrb[11].mxu1  ;;  %1505 = vst [vmem:[%s2401_s30 + $0x48] sm:$0xff] %v1433_v9  ;;  %1541 = vst [vmem:[%s2401_s30 + $0x168] sm:$0xff] %v1469_v10  ;;  %v1363_v16 = vadd.f32 %v1871_v7, %v2392_v15  ;;  %v1399_v17 = vadd.f32 %v1925_v8, %v2392_v15 }
 0x139   : > { %1504 = vst [vmem:[%s2401_s30 + $0x40] sm:$0xff] %v1432_v13  ;;  %1540 = vst [vmem:[%s2401_s30 + $0x160] sm:$0xff] %v1468_v14  ;;  %v1362_v18 = vadd.f32 %v2392_v15, %v817_v11  ;;  %v1398_v19 = vadd.f32 %v2392_v15, %v997_v12 }
 0x13a   : > { %v1435_v22 = vmax.f32 %v1363_v16, 0.0  ;;  %v1471_v23 = vmax.f32 %v1399_v17, 0.0 }
 0x13b   : > { %v1874_v20 = vpop.f32.mrb[12].mxu0  ;;  %v1928_v21 = vpop.f32.mrb[12].mxu1  ;;  %v1434_v26 = vmax.f32 %v1362_v18, 0.0  ;;  %v1470_v27 = vmax.f32 %v1398_v19, 0.0 }
 0x13c   : > { %v827_v24 = vpop.f32.mrb[13].mxu0  ;;  %v1007_v25 = vpop.f32.mrb[13].mxu1  ;;  %1507 = vst [vmem:[%s2401_s30 + $0x58] sm:$0xff] %v1435_v22  ;;  %1543 = vst [vmem:[%s2401_s30 + $0x178] sm:$0xff] %v1471_v23  ;;  %v1365_v28 = vadd.f32 %v1874_v20, %v2392_v15  ;;  %v1401_v29 = vadd.f32 %v1928_v21, %v2392_v15 }
 0x13d   : > { %1506 = vst [vmem:[%s2401_s30 + $0x50] sm:$0xff] %v1434_v26  ;;  %1542 = vst [vmem:[%s2401_s30 + $0x170] sm:$0xff] %v1470_v27  ;;  %v1364_v30 = vadd.f32 %v2392_v15, %v827_v24  ;;  %v1400_v31 = vadd.f32 %v2392_v15, %v1007_v25 }
 0x13e   : > { %v1437_v34 = vmax.f32 %v1365_v28, 0.0  ;;  %v1473_v35 = vmax.f32 %v1401_v29, 0.0 }
 0x13f   : > { %v1877_v32 = vpop.f32.mrb[14].mxu0  ;;  %v1931_v33 = vpop.f32.mrb[14].mxu1  ;;  %v1436_v38 = vmax.f32 %v1364_v30, 0.0  ;;  %v1472_v39 = vmax.f32 %v1400_v31, 0.0 }
 0x140   : > { %v837_v36 = vpop.f32.mrb[15].mxu0  ;;  %v1017_v37 = vpop.f32.mrb[15].mxu1  ;;  %1509 = vst [vmem:[%s2401_s30 + $0x68] sm:$0xff] %v1437_v34  ;;  %1545 = vst [vmem:[%s2401_s30 + $0x188] sm:$0xff] %v1473_v35  ;;  %v1367_v40 = vadd.f32 %v1877_v32, %v2392_v15  ;;  %v1403_v41 = vadd.f32 %v1931_v33, %v2392_v15 }
 0x141   : > { %1508 = vst [vmem:[%s2401_s30 + $0x60] sm:$0xff] %v1436_v38  ;;  %1544 = vst [vmem:[%s2401_s30 + $0x180] sm:$0xff] %v1472_v39  ;;  %v1366_v42 = vadd.f32 %v2392_v15, %v837_v36  ;;  %v1402_v43 = vadd.f32 %v2392_v15, %v1017_v37 }
 0x142   : > { %v1439_v46 = vmax.f32 %v1367_v40, 0.0  ;;  %v1475_v47 = vmax.f32 %v1403_v41, 0.0 }
 0x143   : > { %v1880_v44 = vpop.f32.mrb[16].mxu0  ;;  %v1934_v45 = vpop.f32.mrb[16].mxu1  ;;  %v1438_v50 = vmax.f32 %v1366_v42, 0.0  ;;  %v1474_v51 = vmax.f32 %v1402_v43, 0.0 }
 0x144   : > { %v847_v48 = vpop.f32.mrb[17].mxu0  ;;  %v1027_v49 = vpop.f32.mrb[17].mxu1  ;;  %1511 = vst [vmem:[%s2401_s30 + $0x78] sm:$0xff] %v1439_v46  ;;  %1547 = vst [vmem:[%s2401_s30 + $0x198] sm:$0xff] %v1475_v47  ;;  %v1369_v52 = vadd.f32 %v1880_v44, %v2392_v15  ;;  %v1405_v53 = vadd.f32 %v1934_v45, %v2392_v15 }
 0x145   : > { %1510 = vst [vmem:[%s2401_s30 + $0x70] sm:$0xff] %v1438_v50  ;;  %1546 = vst [vmem:[%s2401_s30 + $0x190] sm:$0xff] %v1474_v51  ;;  %v1368_v54 = vadd.f32 %v2392_v15, %v847_v48  ;;  %v1404_v55 = vadd.f32 %v2392_v15, %v1027_v49 }
 0x146   : > { %v1441_v58 = vmax.f32 %v1369_v52, 0.0  ;;  %v1477_v59 = vmax.f32 %v1405_v53, 0.0 }
 0x147   : > { %v1883_v56 = vpop.f32.mrb[18].mxu0  ;;  %v1937_v57 = vpop.f32.mrb[18].mxu1  ;;  %v1440_v62 = vmax.f32 %v1368_v54, 0.0  ;;  %v1476_v63 = vmax.f32 %v1404_v55, 0.0 }
 0x148   : > { %v857_v60 = vpop.f32.mrb[19].mxu0  ;;  %v1037_v61 = vpop.f32.mrb[19].mxu1  ;;  %1513 = vst [vmem:[%s2401_s30 + $0x88] sm:$0xff] %v1441_v58  ;;  %1549 = vst [vmem:[%s2401_s30 + $0x1a8] sm:$0xff] %v1477_v59  ;;  %v1371_v0 = vadd.f32 %v1883_v56, %v2392_v15  ;;  %v1407_v1 = vadd.f32 %v1937_v57, %v2392_v15 }
 0x149   : > { %1512 = vst [vmem:[%s2401_s30 + $0x80] sm:$0xff] %v1440_v62  ;;  %1548 = vst [vmem:[%s2401_s30 + $0x1a0] sm:$0xff] %v1476_v63  ;;  %v1370_v2 = vadd.f32 %v2392_v15, %v857_v60  ;;  %v1406_v3 = vadd.f32 %v2392_v15, %v1037_v61 }
 0x14a   : > { %v1443_v6 = vmax.f32 %v1371_v0, 0.0  ;;  %v1479_v7 = vmax.f32 %v1407_v1, 0.0 }
 0x14b   : > { %v1886_v4 = vpop.f32.mrb[20].mxu0  ;;  %v1940_v5 = vpop.f32.mrb[20].mxu1  ;;  %v1442_v10 = vmax.f32 %v1370_v2, 0.0  ;;  %v1478_v11 = vmax.f32 %v1406_v3, 0.0 }
 0x14c   : > { %v867_v8 = vpop.f32.mrb[21].mxu0  ;;  %v1047_v9 = vpop.f32.mrb[21].mxu1  ;;  %1515 = vst [vmem:[%s2401_s30 + $0x98] sm:$0xff] %v1443_v6  ;;  %1551 = vst [vmem:[%s2401_s30 + $0x1b8] sm:$0xff] %v1479_v7  ;;  %v1373_v12 = vadd.f32 %v1886_v4, %v2392_v15  ;;  %v1409_v13 = vadd.f32 %v1940_v5, %v2392_v15 }
 0x14d   : > { %1514 = vst [vmem:[%s2401_s30 + $0x90] sm:$0xff] %v1442_v10  ;;  %1550 = vst [vmem:[%s2401_s30 + $0x1b0] sm:$0xff] %v1478_v11  ;;  %v1372_v14 = vadd.f32 %v2392_v15, %v867_v8  ;;  %v1408_v16 = vadd.f32 %v2392_v15, %v1047_v9 }
 0x14e   : > { %v1445_v19 = vmax.f32 %v1373_v12, 0.0  ;;  %v1481_v20 = vmax.f32 %v1409_v13, 0.0 }
 0x14f   : > { %v1889_v17 = vpop.f32.mrb[22].mxu0  ;;  %v1943_v18 = vpop.f32.mrb[22].mxu1  ;;  %v1444_v23 = vmax.f32 %v1372_v14, 0.0  ;;  %v1480_v24 = vmax.f32 %v1408_v16, 0.0 }
 0x150   : > { %v877_v21 = vpop.f32.mrb[23].mxu0  ;;  %v1057_v22 = vpop.f32.mrb[23].mxu1  ;;  %1517 = vst [vmem:[%s2401_s30 + $0xa8] sm:$0xff] %v1445_v19  ;;  %1553 = vst [vmem:[%s2401_s30 + $0x1c8] sm:$0xff] %v1481_v20  ;;  %v1375_v25 = vadd.f32 %v1889_v17, %v2392_v15  ;;  %v1411_v26 = vadd.f32 %v1943_v18, %v2392_v15 }
 0x151   : > { %1516 = vst [vmem:[%s2401_s30 + $0xa0] sm:$0xff] %v1444_v23  ;;  %1552 = vst [vmem:[%s2401_s30 + $0x1c0] sm:$0xff] %v1480_v24  ;;  %v1374_v27 = vadd.f32 %v2392_v15, %v877_v21  ;;  %v1410_v28 = vadd.f32 %v2392_v15, %v1057_v22 }
 0x152   : > { %v1447_v31 = vmax.f32 %v1375_v25, 0.0  ;;  %v1483_v32 = vmax.f32 %v1411_v26, 0.0 }
 0x153   : > { %v1892_v29 = vpop.f32.mrb[24].mxu0  ;;  %v1946_v30 = vpop.f32.mrb[24].mxu1  ;;  %v1446_v35 = vmax.f32 %v1374_v27, 0.0  ;;  %v1482_v36 = vmax.f32 %v1410_v28, 0.0 }
 0x154   : > { %v887_v33 = vpop.f32.mrb[25].mxu0  ;;  %v1067_v34 = vpop.f32.mrb[25].mxu1  ;;  %1519 = vst [vmem:[%s2401_s30 + $0xb8] sm:$0xff] %v1447_v31  ;;  %1555 = vst [vmem:[%s2401_s30 + $0x1d8] sm:$0xff] %v1483_v32  ;;  %v1377_v37 = vadd.f32 %v1892_v29, %v2392_v15  ;;  %v1413_v38 = vadd.f32 %v1946_v30, %v2392_v15 }
 0x155   : > { %1518 = vst [vmem:[%s2401_s30 + $0xb0] sm:$0xff] %v1446_v35  ;;  %1554 = vst [vmem:[%s2401_s30 + $0x1d0] sm:$0xff] %v1482_v36  ;;  %v1376_v39 = vadd.f32 %v2392_v15, %v887_v33  ;;  %v1412_v40 = vadd.f32 %v2392_v15, %v1067_v34 }
 0x156   : > { %v1449_v43 = vmax.f32 %v1377_v37, 0.0  ;;  %v1485_v44 = vmax.f32 %v1413_v38, 0.0 }
 0x157   : > { %v1895_v41 = vpop.f32.mrb[26].mxu0  ;;  %v1949_v42 = vpop.f32.mrb[26].mxu1  ;;  %v1448_v47 = vmax.f32 %v1376_v39, 0.0  ;;  %v1484_v48 = vmax.f32 %v1412_v40, 0.0 }
 0x158   : > { %v897_v45 = vpop.f32.mrb[27].mxu0  ;;  %v1077_v46 = vpop.f32.mrb[27].mxu1  ;;  %1521 = vst [vmem:[%s2401_s30 + $0xc8] sm:$0xff] %v1449_v43  ;;  %1557 = vst [vmem:[%s2401_s30 + $0x1e8] sm:$0xff] %v1485_v44  ;;  %v1379_v49 = vadd.f32 %v1895_v41, %v2392_v15  ;;  %v1415_v50 = vadd.f32 %v1949_v42, %v2392_v15 }
 0x159   : > { %1520 = vst [vmem:[%s2401_s30 + $0xc0] sm:$0xff] %v1448_v47  ;;  %1556 = vst [vmem:[%s2401_s30 + $0x1e0] sm:$0xff] %v1484_v48  ;;  %v1378_v51 = vadd.f32 %v2392_v15, %v897_v45  ;;  %v1414_v52 = vadd.f32 %v2392_v15, %v1077_v46 }
 0x15a   : > { %v1451_v55 = vmax.f32 %v1379_v49, 0.0  ;;  %v1487_v56 = vmax.f32 %v1415_v50, 0.0 }
 0x15b   : > { %v1898_v53 = vpop.f32.mrb[28].mxu0  ;;  %v1952_v54 = vpop.f32.mrb[28].mxu1  ;;  %v1450_v59 = vmax.f32 %v1378_v51, 0.0  ;;  %v1486_v60 = vmax.f32 %v1414_v52, 0.0 }
 0x15c   : > { %v907_v57 = vpop.f32.mrb[29].mxu0  ;;  %v1087_v58 = vpop.f32.mrb[29].mxu1  ;;  %1523 = vst [vmem:[%s2401_s30 + $0xd8] sm:$0xff] %v1451_v55  ;;  %1559 = vst [vmem:[%s2401_s30 + $0x1f8] sm:$0xff] %v1487_v56  ;;  %v1381_v61 = vadd.f32 %v1898_v53, %v2392_v15  ;;  %v1417_v62 = vadd.f32 %v1952_v54, %v2392_v15 }
 0x15d   : > { %1522 = vst [vmem:[%s2401_s30 + $0xd0] sm:$0xff] %v1450_v59  ;;  %1558 = vst [vmem:[%s2401_s30 + $0x1f0] sm:$0xff] %v1486_v60  ;;  %v1380_v63 = vadd.f32 %v2392_v15, %v907_v57  ;;  %v1416_v0 = vadd.f32 %v2392_v15, %v1087_v58 }
 0x15e   : > { %v1453_v3 = vmax.f32 %v1381_v61, 0.0  ;;  %v1489_v4 = vmax.f32 %v1417_v62, 0.0 }
 0x15f   : > { %v1901_v1 = vpop.f32.mrb[30].mxu0  ;;  %v1955_v2 = vpop.f32.mrb[30].mxu1  ;;  %v1452_v7 = vmax.f32 %v1380_v63, 0.0  ;;  %v1488_v8 = vmax.f32 %v1416_v0, 0.0 }
 0x160   : > { %v917_v5 = vpop.f32.mrb[31].mxu0  ;;  %v1097_v6 = vpop.f32.mrb[31].mxu1  ;;  %1525 = vst [vmem:[%s2401_s30 + $0xe8] sm:$0xff] %v1453_v3  ;;  %1561 = vst [vmem:[%s2401_s30 + $0x208] sm:$0xff] %v1489_v4  ;;  %v1383_v9 = vadd.f32 %v1901_v1, %v2392_v15  ;;  %v1419_v10 = vadd.f32 %v1955_v2, %v2392_v15 }
 0x161   : > { %1524 = vst [vmem:[%s2401_s30 + $0xe0] sm:$0xff] %v1452_v7  ;;  %1560 = vst [vmem:[%s2401_s30 + $0x200] sm:$0xff] %v1488_v8  ;;  %v1382_v11 = vadd.f32 %v2392_v15, %v917_v5  ;;  %v1418_v12 = vadd.f32 %v2392_v15, %v1097_v6 }
 0x162   : > { %v1455_v16 = vmax.f32 %v1383_v9, 0.0  ;;  %v1491_v17 = vmax.f32 %v1419_v10, 0.0 }
 0x163   : > { %v1904_v13 = vpop.f32.mrb[32].mxu0  ;;  %v1958_v14 = vpop.f32.mrb[32].mxu1  ;;  %v1454_v20 = vmax.f32 %v1382_v11, 0.0  ;;  %v1490_v21 = vmax.f32 %v1418_v12, 0.0 }
 0x164   : > { %v927_v18 = vpop.f32.mrb[33].mxu0  ;;  %v1107_v19 = vpop.f32.mrb[33].mxu1  ;;  %1527 = vst [vmem:[%s2401_s30 + $0xf8] sm:$0xff] %v1455_v16  ;;  %1563 = vst [vmem:[%s2401_s30 + $0x218] sm:$0xff] %v1491_v17  ;;  %v1385_v22 = vadd.f32 %v1904_v13, %v2392_v15  ;;  %v1421_v23 = vadd.f32 %v1958_v14, %v2392_v15 }
 0x165   : > { %1526 = vst [vmem:[%s2401_s30 + $0xf0] sm:$0xff] %v1454_v20  ;;  %1562 = vst [vmem:[%s2401_s30 + $0x210] sm:$0xff] %v1490_v21  ;;  %v1384_v24 = vadd.f32 %v2392_v15, %v927_v18  ;;  %v1420_v25 = vadd.f32 %v2392_v15, %v1107_v19 }
 0x166   : > { %v1457_v28 = vmax.f32 %v1385_v22, 0.0  ;;  %v1493_v29 = vmax.f32 %v1421_v23, 0.0 }
 0x167   : > { %v1907_v26 = vpop.f32.mrb[34].mxu0  ;;  %v1961_v27 = vpop.f32.mrb[34].mxu1  ;;  %v1456_v32 = vmax.f32 %v1384_v24, 0.0  ;;  %v1492_v33 = vmax.f32 %v1420_v25, 0.0 }
 0x168   : > { %v937_v30 = vpop.f32.mrb[35].mxu0  ;;  %v1117_v31 = vpop.f32.mrb[35].mxu1  ;;  %1529 = vst [vmem:[%s2401_s30 + $0x108] sm:$0xff] %v1457_v28  ;;  %1565 = vst [vmem:[%s2401_s30 + $0x228] sm:$0xff] %v1493_v29  ;;  %v1387_v34 = vadd.f32 %v1907_v26, %v2392_v15  ;;  %v1423_v35 = vadd.f32 %v1961_v27, %v2392_v15 }
 0x169   : > { %1528 = vst [vmem:[%s2401_s30 + $0x100] sm:$0xff] %v1456_v32  ;;  %1564 = vst [vmem:[%s2401_s30 + $0x220] sm:$0xff] %v1492_v33  ;;  %v1386_v36 = vadd.f32 %v2392_v15, %v937_v30  ;;  %v1422_v37 = vadd.f32 %v2392_v15, %v1117_v31 }
 0x16a   : > { %v1459_v38 = vmax.f32 %v1387_v34, 0.0  ;;  %v1495_v39 = vmax.f32 %v1423_v35, 0.0 }
 0x16b   : > { %v1458_v40 = vmax.f32 %v1386_v36, 0.0  ;;  %v1494_v41 = vmax.f32 %v1422_v37, 0.0 }
 0x16c   : > { %1531 = vst [vmem:[%s2401_s30 + $0x118] sm:$0xff] %v1459_v38  ;;  %1567 = vst [vmem:[%s2401_s30 + $0x238] sm:$0xff] %v1495_v39 }
 0x16d   : > { %1530 = vst [vmem:[%s2401_s30 + $0x110] sm:$0xff] %v1458_v40  ;;  %1566 = vst [vmem:[%s2401_s30 + $0x230] sm:$0xff] %v1494_v41 }
 0x16e PF: > { %s15_s14 = sadd.s32 1, %s2112_s14   ;;  %s2566_s12 = smov %s2108_s13 }
 0x16f   : > { %p12_p6 = scmp.ge.s32.totalorder %s15_s14, 4   ;;  %s2567_s13 = smov %s2569_s16 }
 0x171   :  { %14 = sbr.rel (!%p12_p6) target bundleno = 3 (0x3), region = 81 }
 0x178   :  { %1595 = vsyncpa [#allocation3], 1 }
 0x179   :  { %1597 = vsyncpa [#allocation3 + $0x1], 1 }
 0x17a   :  { %1598 = vsyncpa [#allocation5], 1 }

// kernel: _lambda_.8
= control target key start
LH: loop header
LB: loop body
LE: loop exit
PB: predicated region body
PF: predicated region fallthrough
CT: control target
= control target key end

     0   :  { %s2961_s12 = smov 0   ;;  %s2963_s13 = smov 0   ;;  %s4382_s0 = inlined_call_operand.vmem [shape: f32[2,361,3200], index: 0, kind: input, shape index: {}]   ;;  %s4383_s1 = inlined_call_operand.vmem [shape: f32[3200,128], index: 1, kind: input, shape index: {}]   ;;  %s4384_s2 = inlined_call_operand.vmem [shape: f32[1,128], index: 2, kind: input, shape index: {}]   ;;  %s4385_s3 = inlined_call_operand.vmem [shape: f32[2,361,128], index: 3, kind: output, shape index: {}]  }
   0x1   :  { %s2965_s14 = smov 0   ;;  %s2967_s15 = smov 0  }
   0x2   :  { %s2969_s16 = smov 0   ;;  %s2971_s17 = smov 0  }
   0x3   :  { %s2973_s18 = smov 0  }
   0x4 LB: > { %s25_s19 = sadd.s32 1, %s2929_s16  ;;  %s32_s20 = sadd.s32 1, %s2933_s17  ;;  %s2937_s18 = sphi %s2973_s18, %s13_s18   ;;  %s2933_s17 = sphi %s2971_s17, %s4391_s17   ;;  %s2929_s16 = sphi %s2969_s16, %s4390_s16   ;;  %s2925_s15 = sphi %s2967_s15, %s4389_s15   ;;  %s2921_s14 = sphi %s2965_s14, %s4388_s14   ;;  %s2917_s13 = sphi %s2963_s13, %s4387_s13   ;;  %s2913_s12 = sphi %s2961_s12, %s4386_s12  }
   0x5   : > { %p26_p0 = scmp.ge.s32.totalorder %s25_s19, 5  ;;  %p48_p1 = scmp.ne.s32.totalorder %s2917_s13, %s2913_s12 }
   0x6   : > { %p49_p2 = scmp.eq.s32.totalorder %s2937_s18, 0  ;;  %s41_s24 = sadd.s32 1, %s2917_s13 }
   0x7   : > { %s4393_s19 = smov (%p26_p0, %s25_s19), 0  ;;  %s4395_s20 = smov (!%p26_p0, %s32_s20), %s2933_s17 }
   0x8   : > { %p50_p3 = por %p49_p2, %p48_p1  ;;  %p34_p4 = scmp.ge.s32.totalorder %s4395_s20, 2 }
   0x9   : > { %s37_s21 = ssub.s32 %s2929_s16, %s4393_s19  ;;  %p2430_p6 = scmp.ge.s32.totalorder %s2937_s18, 10 }
   0xa   : > { %s4397_s20 = smov (%p34_p4, %s4395_s20), 0 }
   0xb   : > { %s36_s22 = ssub.s32 %s2933_s17, %s4397_s20  ;;  %162 = sbr.rel (%p2430_p6) target bundleno = 142 (0x8e), region = 20 }
   0xc   : > { %s38_s23 = sor.u32 %s37_s21, %s36_s22 }
   0xd   : > { %p39_p5 = scmp.eq.s32.totalorder %s38_s23, 0 }
   0xf   : > { %s3012_s25 = scalar_select %p39_p5, %s2917_s13, %s41_s24  }
  0x12   : > { %165 = sbr.rel (!%p50_p3) target bundleno = 142 (0x8e), region = 24  ;;  %s167_s26 = sand.u32 (%p50_p3), 1, %s2917_s13  }
  0x13   : > { %s170_s27 = smul.u32 (%p50_p3), 5, %s2929_s16 }
  0x14   : > { %s2821_s28 = smul.u32 (%p50_p3), 1840, %s167_s26 }
  0x15   : > { %s2822_s29 = smul.u32 (%p50_p3), 1150, %s2933_s17 }
  0x16   : > { %s3026_s8 = scalar_lea.vmem (%p50_p3), [#allocation2], %s2821_s28 }
  0x17   : > { %s172_s30 = sadd.s32 (%p50_p3), %s2822_s29, %s170_s27 }
  0x18   : > { %s2431_s4 = sshll.u32 (%p50_p3), %s172_s30, 3 }
  0x19   : > { %s3021_s7 = scalar_lea.vmem %s4382_s0, %s2431_s4 }
  0x1a   : > { %v187_v0 = vld [vmem:[%s3021_s7] sm:$0xff]  ;;  %v189_v1 = vld [vmem:[%s3021_s7 + $0x8] sm:$0xff]  ;;  %v191_v2 = vld [vmem:[%s3021_s7 + $0x10] sm:$0xff] }
  0x1b   : > { %188 = vst [vmem:[%s3026_s8] sm:$0xff] %v187_v0  ;;  %190 = vst [vmem:[%s3026_s8 + $0x8] sm:$0xff] %v189_v1  ;;  %v193_v3 = vld [vmem:[%s3021_s7 + $0x18] sm:$0xff]  ;;  %v195_v4 = vld [vmem:[%s3021_s7 + $0x20] sm:$0xff] }
  0x1c   : > { %192 = vst [vmem:[%s3026_s8 + $0x10] sm:$0xff] %v191_v2  ;;  %v197_v5 = vld [vmem:[%s3021_s7 + $0xc8] sm:$0xff]  ;;  %194 = vst [vmem:[%s3026_s8 + $0x18] sm:$0xff] %v193_v3  ;;  %v199_v6 = vld [vmem:[%s3021_s7 + $0xd0] sm:$0xff] }
  0x1d   : > { %196 = vst [vmem:[%s3026_s8 + $0x20] sm:$0xff] %v195_v4  ;;  %198 = vst [vmem:[%s3026_s8 + $0x28] sm:$0xff] %v197_v5  ;;  %v201_v7 = vld [vmem:[%s3021_s7 + $0xd8] sm:$0xff]  ;;  %v203_v8 = vld [vmem:[%s3021_s7 + $0xe0] sm:$0xff] }
  0x1e   : > { %200 = vst [vmem:[%s3026_s8 + $0x30] sm:$0xff] %v199_v6  ;;  %202 = vst [vmem:[%s3026_s8 + $0x38] sm:$0xff] %v201_v7  ;;  %v205_v9 = vld [vmem:[%s3021_s7 + $0xe8] sm:$0xff]  ;;  %v207_v10 = vld [vmem:[%s3021_s7 + $0x190] sm:$0xff] }
  0x1f   : > { %204 = vst [vmem:[%s3026_s8 + $0x40] sm:$0xff] %v203_v8  ;;  %v209_v11 = vld [vmem:[%s3021_s7 + $0x198] sm:$0xff]  ;;  %206 = vst [vmem:[%s3026_s8 + $0x48] sm:$0xff] %v205_v9  ;;  %v211_v12 = vld [vmem:[%s3021_s7 + $0x1a0] sm:$0xff] }
  0x20   : > { %208 = vst [vmem:[%s3026_s8 + $0x50] sm:$0xff] %v207_v10  ;;  %210 = vst [vmem:[%s3026_s8 + $0x58] sm:$0xff] %v209_v11  ;;  %v213_v13 = vld [vmem:[%s3021_s7 + $0x1a8] sm:$0xff]  ;;  %v215_v14 = vld [vmem:[%s3021_s7 + $0x1b0] sm:$0xff] }
  0x21   : > { %212 = vst [vmem:[%s3026_s8 + $0x60] sm:$0xff] %v211_v12  ;;  %214 = vst [vmem:[%s3026_s8 + $0x68] sm:$0xff] %v213_v13  ;;  %v217_v15 = vld [vmem:[%s3021_s7 + $0x258] sm:$0xff]  ;;  %v219_v16 = vld [vmem:[%s3021_s7 + $0x260] sm:$0xff] }
  0x22   : > { %216 = vst [vmem:[%s3026_s8 + $0x70] sm:$0xff] %v215_v14  ;;  %v221_v17 = vld [vmem:[%s3021_s7 + $0x268] sm:$0xff]  ;;  %218 = vst [vmem:[%s3026_s8 + $0x78] sm:$0xff] %v217_v15  ;;  %v223_v18 = vld [vmem:[%s3021_s7 + $0x270] sm:$0xff] }
  0x23   : > { %220 = vst [vmem:[%s3026_s8 + $0x80] sm:$0xff] %v219_v16  ;;  %222 = vst [vmem:[%s3026_s8 + $0x88] sm:$0xff] %v221_v17  ;;  %v225_v19 = vld [vmem:[%s3021_s7 + $0x278] sm:$0xff]  ;;  %v227_v20 = vld [vmem:[%s3021_s7 + $0x320] sm:$0xff] }
  0x24   : > { %224 = vst [vmem:[%s3026_s8 + $0x90] sm:$0xff] %v223_v18  ;;  %226 = vst [vmem:[%s3026_s8 + $0x98] sm:$0xff] %v225_v19  ;;  %v229_v21 = vld [vmem:[%s3021_s7 + $0x328] sm:$0xff]  ;;  %v231_v22 = vld [vmem:[%s3021_s7 + $0x330] sm:$0xff] }
  0x25   : > { %228 = vst [vmem:[%s3026_s8 + $0xa0] sm:$0xff] %v227_v20  ;;  %v233_v23 = vld [vmem:[%s3021_s7 + $0x338] sm:$0xff]  ;;  %230 = vst [vmem:[%s3026_s8 + $0xa8] sm:$0xff] %v229_v21  ;;  %v235_v24 = vld [vmem:[%s3021_s7 + $0x340] sm:$0xff] }
  0x26   : > { %232 = vst [vmem:[%s3026_s8 + $0xb0] sm:$0xff] %v231_v22  ;;  %234 = vst [vmem:[%s3026_s8 + $0xb8] sm:$0xff] %v233_v23  ;;  %v237_v25 = vld [vmem:[%s3021_s7 + $0x3e8] sm:$0xff]  ;;  %v239_v26 = vld [vmem:[%s3021_s7 + $0x3f0] sm:$0xff] }
  0x27   : > { %236 = vst [vmem:[%s3026_s8 + $0xc0] sm:$0xff] %v235_v24  ;;  %238 = vst [vmem:[%s3026_s8 + $0xc8] sm:$0xff] %v237_v25  ;;  %v241_v27 = vld [vmem:[%s3021_s7 + $0x3f8] sm:$0xff]  ;;  %v243_v28 = vld [vmem:[%s3021_s7 + $0x400] sm:$0xff] }
  0x28   : > { %240 = vst [vmem:[%s3026_s8 + $0xd0] sm:$0xff] %v239_v26  ;;  %v245_v29 = vld [vmem:[%s3021_s7 + $0x408] sm:$0xff]  ;;  %242 = vst [vmem:[%s3026_s8 + $0xd8] sm:$0xff] %v241_v27  ;;  %v247_v30 = vld [vmem:[%s3021_s7 + $0x4b0] sm:$0xff] }
  0x29   : > { %244 = vst [vmem:[%s3026_s8 + $0xe0] sm:$0xff] %v243_v28  ;;  %246 = vst [vmem:[%s3026_s8 + $0xe8] sm:$0xff] %v245_v29  ;;  %v249_v31 = vld [vmem:[%s3021_s7 + $0x4b8] sm:$0xff]  ;;  %v251_v32 = vld [vmem:[%s3021_s7 + $0x4c0] sm:$0xff] }
  0x2a   : > { %248 = vst [vmem:[%s3026_s8 + $0xf0] sm:$0xff] %v247_v30  ;;  %250 = vst [vmem:[%s3026_s8 + $0xf8] sm:$0xff] %v249_v31  ;;  %v253_v33 = vld [vmem:[%s3021_s7 + $0x4c8] sm:$0xff]  ;;  %v255_v34 = vld [vmem:[%s3021_s7 + $0x4d0] sm:$0xff] }
  0x2b   : > { %252 = vst [vmem:[%s3026_s8 + $0x100] sm:$0xff] %v251_v32  ;;  %v257_v35 = vld [vmem:[%s3021_s7 + $0x578] sm:$0xff]  ;;  %254 = vst [vmem:[%s3026_s8 + $0x108] sm:$0xff] %v253_v33  ;;  %v259_v36 = vld [vmem:[%s3021_s7 + $0x580] sm:$0xff] }
  0x2c   : > { %256 = vst [vmem:[%s3026_s8 + $0x110] sm:$0xff] %v255_v34  ;;  %258 = vst [vmem:[%s3026_s8 + $0x118] sm:$0xff] %v257_v35  ;;  %v261_v37 = vld [vmem:[%s3021_s7 + $0x588] sm:$0xff]  ;;  %v263_v38 = vld [vmem:[%s3021_s7 + $0x590] sm:$0xff] }
  0x2d   : > { %260 = vst [vmem:[%s3026_s8 + $0x120] sm:$0xff] %v259_v36  ;;  %262 = vst [vmem:[%s3026_s8 + $0x128] sm:$0xff] %v261_v37  ;;  %v265_v39 = vld [vmem:[%s3021_s7 + $0x598] sm:$0xff]  ;;  %v267_v40 = vld [vmem:[%s3021_s7 + $0x640] sm:$0xff] }
  0x2e   : > { %264 = vst [vmem:[%s3026_s8 + $0x130] sm:$0xff] %v263_v38  ;;  %v269_v41 = vld [vmem:[%s3021_s7 + $0x648] sm:$0xff]  ;;  %266 = vst [vmem:[%s3026_s8 + $0x138] sm:$0xff] %v265_v39  ;;  %v271_v42 = vld [vmem:[%s3021_s7 + $0x650] sm:$0xff] }
  0x2f   : > { %268 = vst [vmem:[%s3026_s8 + $0x140] sm:$0xff] %v267_v40  ;;  %270 = vst [vmem:[%s3026_s8 + $0x148] sm:$0xff] %v269_v41  ;;  %v273_v43 = vld [vmem:[%s3021_s7 + $0x658] sm:$0xff]  ;;  %v275_v44 = vld [vmem:[%s3021_s7 + $0x660] sm:$0xff] }
  0x30   : > { %272 = vst [vmem:[%s3026_s8 + $0x150] sm:$0xff] %v271_v42  ;;  %274 = vst [vmem:[%s3026_s8 + $0x158] sm:$0xff] %v273_v43  ;;  %v277_v45 = vld [vmem:[%s3021_s7 + $0x708] sm:$0xff]  ;;  %v279_v46 = vld [vmem:[%s3021_s7 + $0x710] sm:$0xff] }
  0x31   : > { %276 = vst [vmem:[%s3026_s8 + $0x160] sm:$0xff] %v275_v44  ;;  %v281_v47 = vld [vmem:[%s3021_s7 + $0x718] sm:$0xff]  ;;  %278 = vst [vmem:[%s3026_s8 + $0x168] sm:$0xff] %v277_v45  ;;  %v283_v48 = vld [vmem:[%s3021_s7 + $0x720] sm:$0xff] }
  0x32   : > { %280 = vst [vmem:[%s3026_s8 + $0x170] sm:$0xff] %v279_v46  ;;  %282 = vst [vmem:[%s3026_s8 + $0x178] sm:$0xff] %v281_v47  ;;  %v285_v49 = vld [vmem:[%s3021_s7 + $0x728] sm:$0xff]  ;;  %v287_v50 = vld [vmem:[%s3021_s7 + $0x7d0] sm:$0xff] }
  0x33   : > { %284 = vst [vmem:[%s3026_s8 + $0x180] sm:$0xff] %v283_v48  ;;  %286 = vst [vmem:[%s3026_s8 + $0x188] sm:$0xff] %v285_v49  ;;  %v289_v51 = vld [vmem:[%s3021_s7 + $0x7d8] sm:$0xff]  ;;  %v291_v52 = vld [vmem:[%s3021_s7 + $0x7e0] sm:$0xff] }
  0x34   : > { %288 = vst [vmem:[%s3026_s8 + $0x190] sm:$0xff] %v287_v50  ;;  %v293_v53 = vld [vmem:[%s3021_s7 + $0x7e8] sm:$0xff]  ;;  %290 = vst [vmem:[%s3026_s8 + $0x198] sm:$0xff] %v289_v51  ;;  %v295_v54 = vld [vmem:[%s3021_s7 + $0x7f0] sm:$0xff] }
  0x35   : > { %292 = vst [vmem:[%s3026_s8 + $0x1a0] sm:$0xff] %v291_v52  ;;  %294 = vst [vmem:[%s3026_s8 + $0x1a8] sm:$0xff] %v293_v53  ;;  %v297_v55 = vld [vmem:[%s3021_s7 + $0x898] sm:$0xff]  ;;  %v299_v56 = vld [vmem:[%s3021_s7 + $0x8a0] sm:$0xff] }
  0x36   : > { %296 = vst [vmem:[%s3026_s8 + $0x1b0] sm:$0xff] %v295_v54  ;;  %298 = vst [vmem:[%s3026_s8 + $0x1b8] sm:$0xff] %v297_v55  ;;  %v301_v57 = vld [vmem:[%s3021_s7 + $0x8a8] sm:$0xff]  ;;  %v303_v58 = vld [vmem:[%s3021_s7 + $0x8b0] sm:$0xff] }
  0x37   : > { %300 = vst [vmem:[%s3026_s8 + $0x1c0] sm:$0xff] %v299_v56  ;;  %v305_v59 = vld [vmem:[%s3021_s7 + $0x8b8] sm:$0xff]  ;;  %302 = vst [vmem:[%s3026_s8 + $0x1c8] sm:$0xff] %v301_v57  ;;  %v307_v60 = vld [vmem:[%s3021_s7 + $0x960] sm:$0xff] }
  0x38   : > { %304 = vst [vmem:[%s3026_s8 + $0x1d0] sm:$0xff] %v303_v58  ;;  %306 = vst [vmem:[%s3026_s8 + $0x1d8] sm:$0xff] %v305_v59  ;;  %v309_v61 = vld [vmem:[%s3021_s7 + $0x968] sm:$0xff]  ;;  %v311_v62 = vld [vmem:[%s3021_s7 + $0x970] sm:$0xff] }
  0x39   : > { %308 = vst [vmem:[%s3026_s8 + $0x1e0] sm:$0xff] %v307_v60  ;;  %310 = vst [vmem:[%s3026_s8 + $0x1e8] sm:$0xff] %v309_v61  ;;  %v313_v63 = vld [vmem:[%s3021_s7 + $0x978] sm:$0xff]  ;;  %v315_v0 = vld [vmem:[%s3021_s7 + $0x980] sm:$0xff] }
  0x3a   : > { %312 = vst [vmem:[%s3026_s8 + $0x1f0] sm:$0xff] %v311_v62  ;;  %v317_v1 = vld [vmem:[%s3021_s7 + $0xa28] sm:$0xff]  ;;  %314 = vst [vmem:[%s3026_s8 + $0x1f8] sm:$0xff] %v313_v63  ;;  %v319_v2 = vld [vmem:[%s3021_s7 + $0xa30] sm:$0xff] }
  0x3b   : > { %316 = vst [vmem:[%s3026_s8 + $0x200] sm:$0xff] %v315_v0  ;;  %318 = vst [vmem:[%s3026_s8 + $0x208] sm:$0xff] %v317_v1  ;;  %v321_v3 = vld [vmem:[%s3021_s7 + $0xa38] sm:$0xff]  ;;  %v323_v4 = vld [vmem:[%s3021_s7 + $0xa40] sm:$0xff] }
  0x3c   : > { %320 = vst [vmem:[%s3026_s8 + $0x210] sm:$0xff] %v319_v2  ;;  %322 = vst [vmem:[%s3026_s8 + $0x218] sm:$0xff] %v321_v3  ;;  %v325_v5 = vld [vmem:[%s3021_s7 + $0xa48] sm:$0xff]  ;;  %v327_v6 = vld [vmem:[%s3021_s7 + $0xaf0] sm:$0xff] }
  0x3d   : > { %324 = vst [vmem:[%s3026_s8 + $0x220] sm:$0xff] %v323_v4  ;;  %v329_v7 = vld [vmem:[%s3021_s7 + $0xaf8] sm:$0xff]  ;;  %326 = vst [vmem:[%s3026_s8 + $0x228] sm:$0xff] %v325_v5  ;;  %v331_v8 = vld [vmem:[%s3021_s7 + $0xb00] sm:$0xff] }
  0x3e   : > { %328 = vst [vmem:[%s3026_s8 + $0x230] sm:$0xff] %v327_v6  ;;  %330 = vst [vmem:[%s3026_s8 + $0x238] sm:$0xff] %v329_v7  ;;  %v333_v9 = vld [vmem:[%s3021_s7 + $0xb08] sm:$0xff]  ;;  %v335_v10 = vld [vmem:[%s3021_s7 + $0xb10] sm:$0xff] }
  0x3f   : > { %332 = vst [vmem:[%s3026_s8 + $0x240] sm:$0xff] %v331_v8  ;;  %334 = vst [vmem:[%s3026_s8 + $0x248] sm:$0xff] %v333_v9  ;;  %v337_v11 = vld [vmem:[%s3021_s7 + $0xbb8] sm:$0xff]  ;;  %v339_v12 = vld [vmem:[%s3021_s7 + $0xbc0] sm:$0xff] }
  0x40   : > { %336 = vst [vmem:[%s3026_s8 + $0x250] sm:$0xff] %v335_v10  ;;  %v341_v13 = vld [vmem:[%s3021_s7 + $0xbc8] sm:$0xff]  ;;  %338 = vst [vmem:[%s3026_s8 + $0x258] sm:$0xff] %v337_v11  ;;  %v343_v14 = vld [vmem:[%s3021_s7 + $0xbd0] sm:$0xff] }
  0x41   : > { %340 = vst [vmem:[%s3026_s8 + $0x260] sm:$0xff] %v339_v12  ;;  %342 = vst [vmem:[%s3026_s8 + $0x268] sm:$0xff] %v341_v13  ;;  %v345_v15 = vld [vmem:[%s3021_s7 + $0xbd8] sm:$0xff]  ;;  %v347_v16 = vld [vmem:[%s3021_s7 + $0xc80] sm:$0xff] }
  0x42   : > { %344 = vst [vmem:[%s3026_s8 + $0x270] sm:$0xff] %v343_v14  ;;  %346 = vst [vmem:[%s3026_s8 + $0x278] sm:$0xff] %v345_v15  ;;  %v349_v17 = vld [vmem:[%s3021_s7 + $0xc88] sm:$0xff]  ;;  %v351_v18 = vld [vmem:[%s3021_s7 + $0xc90] sm:$0xff] }
  0x43   : > { %348 = vst [vmem:[%s3026_s8 + $0x280] sm:$0xff] %v347_v16  ;;  %v353_v19 = vld [vmem:[%s3021_s7 + $0xc98] sm:$0xff]  ;;  %350 = vst [vmem:[%s3026_s8 + $0x288] sm:$0xff] %v349_v17  ;;  %v355_v20 = vld [vmem:[%s3021_s7 + $0xca0] sm:$0xff] }
  0x44   : > { %352 = vst [vmem:[%s3026_s8 + $0x290] sm:$0xff] %v351_v18  ;;  %354 = vst [vmem:[%s3026_s8 + $0x298] sm:$0xff] %v353_v19  ;;  %v357_v21 = vld [vmem:[%s3021_s7 + $0xd48] sm:$0xff]  ;;  %v359_v22 = vld [vmem:[%s3021_s7 + $0xd50] sm:$0xff] }
  0x45   : > { %356 = vst [vmem:[%s3026_s8 + $0x2a0] sm:$0xff] %v355_v20  ;;  %358 = vst [vmem:[%s3026_s8 + $0x2a8] sm:$0xff] %v357_v21  ;;  %v361_v23 = vld [vmem:[%s3021_s7 + $0xd58] sm:$0xff]  ;;  %v363_v24 = vld [vmem:[%s3021_s7 + $0xd60] sm:$0xff] }
  0x46   : > { %360 = vst [vmem:[%s3026_s8 + $0x2b0] sm:$0xff] %v359_v22  ;;  %v365_v25 = vld [vmem:[%s3021_s7 + $0xd68] sm:$0xff]  ;;  %362 = vst [vmem:[%s3026_s8 + $0x2b8] sm:$0xff] %v361_v23  ;;  %v367_v26 = vld [vmem:[%s3021_s7 + $0xe10] sm:$0xff] }
  0x47   : > { %364 = vst [vmem:[%s3026_s8 + $0x2c0] sm:$0xff] %v363_v24  ;;  %366 = vst [vmem:[%s3026_s8 + $0x2c8] sm:$0xff] %v365_v25  ;;  %v369_v27 = vld [vmem:[%s3021_s7 + $0xe18] sm:$0xff]  ;;  %v371_v28 = vld [vmem:[%s3021_s7 + $0xe20] sm:$0xff] }
  0x48   : > { %368 = vst [vmem:[%s3026_s8 + $0x2d0] sm:$0xff] %v367_v26  ;;  %370 = vst [vmem:[%s3026_s8 + $0x2d8] sm:$0xff] %v369_v27  ;;  %v373_v29 = vld [vmem:[%s3021_s7 + $0xe28] sm:$0xff]  ;;  %v375_v30 = vld [vmem:[%s3021_s7 + $0xe30] sm:$0xff] }
  0x49   : > { %372 = vst [vmem:[%s3026_s8 + $0x2e0] sm:$0xff] %v371_v28  ;;  %v377_v31 = vld [vmem:[%s3021_s7 + $0xed8] sm:$0xff]  ;;  %374 = vst [vmem:[%s3026_s8 + $0x2e8] sm:$0xff] %v373_v29  ;;  %v379_v32 = vld [vmem:[%s3021_s7 + $0xee0] sm:$0xff] }
  0x4a   : > { %376 = vst [vmem:[%s3026_s8 + $0x2f0] sm:$0xff] %v375_v30  ;;  %378 = vst [vmem:[%s3026_s8 + $0x2f8] sm:$0xff] %v377_v31  ;;  %v381_v33 = vld [vmem:[%s3021_s7 + $0xee8] sm:$0xff]  ;;  %v383_v34 = vld [vmem:[%s3021_s7 + $0xef0] sm:$0xff] }
  0x4b   : > { %380 = vst [vmem:[%s3026_s8 + $0x300] sm:$0xff] %v379_v32  ;;  %382 = vst [vmem:[%s3026_s8 + $0x308] sm:$0xff] %v381_v33  ;;  %v385_v35 = vld [vmem:[%s3021_s7 + $0xef8] sm:$0xff]  ;;  %v387_v36 = vld [vmem:[%s3021_s7 + $0xfa0] sm:$0xff] }
  0x4c   : > { %384 = vst [vmem:[%s3026_s8 + $0x310] sm:$0xff] %v383_v34  ;;  %v389_v37 = vld [vmem:[%s3021_s7 + $0xfa8] sm:$0xff]  ;;  %386 = vst [vmem:[%s3026_s8 + $0x318] sm:$0xff] %v385_v35  ;;  %v391_v38 = vld [vmem:[%s3021_s7 + $0xfb0] sm:$0xff] }
  0x4d   : > { %388 = vst [vmem:[%s3026_s8 + $0x320] sm:$0xff] %v387_v36  ;;  %390 = vst [vmem:[%s3026_s8 + $0x328] sm:$0xff] %v389_v37  ;;  %v393_v39 = vld [vmem:[%s3021_s7 + $0xfb8] sm:$0xff]  ;;  %v395_v40 = vld [vmem:[%s3021_s7 + $0xfc0] sm:$0xff] }
  0x4e   : > { %392 = vst [vmem:[%s3026_s8 + $0x330] sm:$0xff] %v391_v38  ;;  %394 = vst [vmem:[%s3026_s8 + $0x338] sm:$0xff] %v393_v39  ;;  %v397_v41 = vld [vmem:[%s3021_s7 + $0x1068] sm:$0xff]  ;;  %v399_v42 = vld [vmem:[%s3021_s7 + $0x1070] sm:$0xff] }
  0x4f   : > { %396 = vst [vmem:[%s3026_s8 + $0x340] sm:$0xff] %v395_v40  ;;  %v401_v43 = vld [vmem:[%s3021_s7 + $0x1078] sm:$0xff]  ;;  %398 = vst [vmem:[%s3026_s8 + $0x348] sm:$0xff] %v397_v41  ;;  %v403_v44 = vld [vmem:[%s3021_s7 + $0x1080] sm:$0xff] }
  0x50   : > { %400 = vst [vmem:[%s3026_s8 + $0x350] sm:$0xff] %v399_v42  ;;  %402 = vst [vmem:[%s3026_s8 + $0x358] sm:$0xff] %v401_v43  ;;  %v405_v45 = vld [vmem:[%s3021_s7 + $0x1088] sm:$0xff]  ;;  %v407_v46 = vld [vmem:[%s3021_s7 + $0x1130] sm:$0xff] }
  0x51   : > { %404 = vst [vmem:[%s3026_s8 + $0x360] sm:$0xff] %v403_v44  ;;  %406 = vst [vmem:[%s3026_s8 + $0x368] sm:$0xff] %v405_v45  ;;  %v409_v47 = vld [vmem:[%s3021_s7 + $0x1138] sm:$0xff]  ;;  %v411_v48 = vld [vmem:[%s3021_s7 + $0x1140] sm:$0xff] }
  0x52   : > { %408 = vst [vmem:[%s3026_s8 + $0x370] sm:$0xff] %v407_v46  ;;  %v413_v49 = vld [vmem:[%s3021_s7 + $0x1148] sm:$0xff]  ;;  %410 = vst [vmem:[%s3026_s8 + $0x378] sm:$0xff] %v409_v47  ;;  %v415_v50 = vld [vmem:[%s3021_s7 + $0x1150] sm:$0xff] }
  0x53   : > { %412 = vst [vmem:[%s3026_s8 + $0x380] sm:$0xff] %v411_v48  ;;  %414 = vst [vmem:[%s3026_s8 + $0x388] sm:$0xff] %v413_v49  ;;  %v417_v51 = vld [vmem:[%s3021_s7 + $0x11f8] sm:$0xff]  ;;  %v419_v52 = vld [vmem:[%s3021_s7 + $0x1200] sm:$0xff] }
  0x54   : > { %416 = vst [vmem:[%s3026_s8 + $0x390] sm:$0xff] %v415_v50  ;;  %418 = vst [vmem:[%s3026_s8 + $0x398] sm:$0xff] %v417_v51  ;;  %v421_v53 = vld [vmem:[%s3021_s7 + $0x1208] sm:$0xff]  ;;  %v423_v54 = vld [vmem:[%s3021_s7 + $0x1210] sm:$0xff] }
  0x55   : > { %420 = vst [vmem:[%s3026_s8 + $0x3a0] sm:$0xff] %v419_v52  ;;  %v425_v55 = vld [vmem:[%s3021_s7 + $0x1218] sm:$0xff]  ;;  %422 = vst [vmem:[%s3026_s8 + $0x3a8] sm:$0xff] %v421_v53  ;;  %v427_v56 = vld [vmem:[%s3021_s7 + $0x12c0] sm:$0xff] }
  0x56   : > { %424 = vst [vmem:[%s3026_s8 + $0x3b0] sm:$0xff] %v423_v54  ;;  %426 = vst [vmem:[%s3026_s8 + $0x3b8] sm:$0xff] %v425_v55  ;;  %v429_v57 = vld [vmem:[%s3021_s7 + $0x12c8] sm:$0xff]  ;;  %v431_v58 = vld [vmem:[%s3021_s7 + $0x12d0] sm:$0xff] }
  0x57   : > { %428 = vst [vmem:[%s3026_s8 + $0x3c0] sm:$0xff] %v427_v56  ;;  %430 = vst [vmem:[%s3026_s8 + $0x3c8] sm:$0xff] %v429_v57  ;;  %v433_v59 = vld [vmem:[%s3021_s7 + $0x12d8] sm:$0xff]  ;;  %v435_v60 = vld [vmem:[%s3021_s7 + $0x12e0] sm:$0xff] }
  0x58   : > { %432 = vst [vmem:[%s3026_s8 + $0x3d0] sm:$0xff] %v431_v58  ;;  %v437_v61 = vld [vmem:[%s3021_s7 + $0x1388] sm:$0xff]  ;;  %434 = vst [vmem:[%s3026_s8 + $0x3d8] sm:$0xff] %v433_v59  ;;  %v439_v62 = vld [vmem:[%s3021_s7 + $0x1390] sm:$0xff] }
  0x59   : > { %436 = vst [vmem:[%s3026_s8 + $0x3e0] sm:$0xff] %v435_v60  ;;  %438 = vst [vmem:[%s3026_s8 + $0x3e8] sm:$0xff] %v437_v61  ;;  %v441_v63 = vld [vmem:[%s3021_s7 + $0x1398] sm:$0xff]  ;;  %v443_v0 = vld [vmem:[%s3021_s7 + $0x13a0] sm:$0xff] }
  0x5a   : > { %440 = vst [vmem:[%s3026_s8 + $0x3f0] sm:$0xff] %v439_v62  ;;  %442 = vst [vmem:[%s3026_s8 + $0x3f8] sm:$0xff] %v441_v63  ;;  %v445_v1 = vld [vmem:[%s3021_s7 + $0x13a8] sm:$0xff]  ;;  %v447_v2 = vld [vmem:[%s3021_s7 + $0x1450] sm:$0xff] }
  0x5b   : > { %444 = vst [vmem:[%s3026_s8 + $0x400] sm:$0xff] %v443_v0  ;;  %v449_v3 = vld [vmem:[%s3021_s7 + $0x1458] sm:$0xff]  ;;  %446 = vst [vmem:[%s3026_s8 + $0x408] sm:$0xff] %v445_v1  ;;  %v451_v4 = vld [vmem:[%s3021_s7 + $0x1460] sm:$0xff] }
  0x5c   : > { %448 = vst [vmem:[%s3026_s8 + $0x410] sm:$0xff] %v447_v2  ;;  %450 = vst [vmem:[%s3026_s8 + $0x418] sm:$0xff] %v449_v3  ;;  %v453_v5 = vld [vmem:[%s3021_s7 + $0x1468] sm:$0xff]  ;;  %v455_v6 = vld [vmem:[%s3021_s7 + $0x1470] sm:$0xff] }
  0x5d   : > { %452 = vst [vmem:[%s3026_s8 + $0x420] sm:$0xff] %v451_v4  ;;  %454 = vst [vmem:[%s3026_s8 + $0x428] sm:$0xff] %v453_v5  ;;  %v457_v7 = vld [vmem:[%s3021_s7 + $0x1518] sm:$0xff]  ;;  %v459_v8 = vld [vmem:[%s3021_s7 + $0x1520] sm:$0xff] }
  0x5e   : > { %456 = vst [vmem:[%s3026_s8 + $0x430] sm:$0xff] %v455_v6  ;;  %v461_v9 = vld [vmem:[%s3021_s7 + $0x1528] sm:$0xff]  ;;  %458 = vst [vmem:[%s3026_s8 + $0x438] sm:$0xff] %v457_v7  ;;  %v463_v10 = vld [vmem:[%s3021_s7 + $0x1530] sm:$0xff] }
  0x5f   : > { %460 = vst [vmem:[%s3026_s8 + $0x440] sm:$0xff] %v459_v8  ;;  %462 = vst [vmem:[%s3026_s8 + $0x448] sm:$0xff] %v461_v9  ;;  %v465_v11 = vld [vmem:[%s3021_s7 + $0x1538] sm:$0xff]  ;;  %v467_v12 = vld [vmem:[%s3021_s7 + $0x15e0] sm:$0xff] }
  0x60   : > { %464 = vst [vmem:[%s3026_s8 + $0x450] sm:$0xff] %v463_v10  ;;  %466 = vst [vmem:[%s3026_s8 + $0x458] sm:$0xff] %v465_v11  ;;  %v469_v13 = vld [vmem:[%s3021_s7 + $0x15e8] sm:$0xff]  ;;  %v471_v14 = vld [vmem:[%s3021_s7 + $0x15f0] sm:$0xff] }
  0x61   : > { %468 = vst [vmem:[%s3026_s8 + $0x460] sm:$0xff] %v467_v12  ;;  %v473_v15 = vld [vmem:[%s3021_s7 + $0x15f8] sm:$0xff]  ;;  %470 = vst [vmem:[%s3026_s8 + $0x468] sm:$0xff] %v469_v13  ;;  %v475_v16 = vld [vmem:[%s3021_s7 + $0x1600] sm:$0xff] }
  0x62   : > { %472 = vst [vmem:[%s3026_s8 + $0x470] sm:$0xff] %v471_v14  ;;  %474 = vst [vmem:[%s3026_s8 + $0x478] sm:$0xff] %v473_v15  ;;  %v477_v17 = vld [vmem:[%s3021_s7 + $0x16a8] sm:$0xff]  ;;  %v479_v18 = vld [vmem:[%s3021_s7 + $0x16b0] sm:$0xff] }
  0x63   : > { %476 = vst [vmem:[%s3026_s8 + $0x480] sm:$0xff] %v475_v16  ;;  %478 = vst [vmem:[%s3026_s8 + $0x488] sm:$0xff] %v477_v17  ;;  %v481_v19 = vld [vmem:[%s3021_s7 + $0x16b8] sm:$0xff]  ;;  %v483_v20 = vld [vmem:[%s3021_s7 + $0x16c0] sm:$0xff] }
  0x64   : > { %480 = vst [vmem:[%s3026_s8 + $0x490] sm:$0xff] %v479_v18  ;;  %v485_v21 = vld [vmem:[%s3021_s7 + $0x16c8] sm:$0xff]  ;;  %482 = vst [vmem:[%s3026_s8 + $0x498] sm:$0xff] %v481_v19  ;;  %v487_v22 = vld [vmem:[%s3021_s7 + $0x1770] sm:$0xff] }
  0x65   : > { %484 = vst [vmem:[%s3026_s8 + $0x4a0] sm:$0xff] %v483_v20  ;;  %486 = vst [vmem:[%s3026_s8 + $0x4a8] sm:$0xff] %v485_v21  ;;  %v489_v23 = vld [vmem:[%s3021_s7 + $0x1778] sm:$0xff]  ;;  %v491_v24 = vld [vmem:[%s3021_s7 + $0x1780] sm:$0xff] }
  0x66   : > { %488 = vst [vmem:[%s3026_s8 + $0x4b0] sm:$0xff] %v487_v22  ;;  %490 = vst [vmem:[%s3026_s8 + $0x4b8] sm:$0xff] %v489_v23  ;;  %v493_v25 = vld [vmem:[%s3021_s7 + $0x1788] sm:$0xff]  ;;  %v495_v26 = vld [vmem:[%s3021_s7 + $0x1790] sm:$0xff] }
  0x67   : > { %492 = vst [vmem:[%s3026_s8 + $0x4c0] sm:$0xff] %v491_v24  ;;  %v497_v27 = vld [vmem:[%s3021_s7 + $0x1838] sm:$0xff]  ;;  %494 = vst [vmem:[%s3026_s8 + $0x4c8] sm:$0xff] %v493_v25  ;;  %v499_v28 = vld [vmem:[%s3021_s7 + $0x1840] sm:$0xff] }
  0x68   : > { %496 = vst [vmem:[%s3026_s8 + $0x4d0] sm:$0xff] %v495_v26  ;;  %498 = vst [vmem:[%s3026_s8 + $0x4d8] sm:$0xff] %v497_v27  ;;  %v501_v29 = vld [vmem:[%s3021_s7 + $0x1848] sm:$0xff]  ;;  %v503_v30 = vld [vmem:[%s3021_s7 + $0x1850] sm:$0xff] }
  0x69   : > { %500 = vst [vmem:[%s3026_s8 + $0x4e0] sm:$0xff] %v499_v28  ;;  %502 = vst [vmem:[%s3026_s8 + $0x4e8] sm:$0xff] %v501_v29  ;;  %v505_v31 = vld [vmem:[%s3021_s7 + $0x1858] sm:$0xff]  ;;  %v507_v32 = vld [vmem:[%s3021_s7 + $0x1900] sm:$0xff] }
  0x6a   : > { %504 = vst [vmem:[%s3026_s8 + $0x4f0] sm:$0xff] %v503_v30  ;;  %v509_v33 = vld [vmem:[%s3021_s7 + $0x1908] sm:$0xff]  ;;  %506 = vst [vmem:[%s3026_s8 + $0x4f8] sm:$0xff] %v505_v31  ;;  %v511_v34 = vld [vmem:[%s3021_s7 + $0x1910] sm:$0xff] }
  0x6b   : > { %508 = vst [vmem:[%s3026_s8 + $0x500] sm:$0xff] %v507_v32  ;;  %510 = vst [vmem:[%s3026_s8 + $0x508] sm:$0xff] %v509_v33  ;;  %v513_v35 = vld [vmem:[%s3021_s7 + $0x1918] sm:$0xff]  ;;  %v515_v36 = vld [vmem:[%s3021_s7 + $0x1920] sm:$0xff] }
  0x6c   : > { %512 = vst [vmem:[%s3026_s8 + $0x510] sm:$0xff] %v511_v34  ;;  %514 = vst [vmem:[%s3026_s8 + $0x518] sm:$0xff] %v513_v35  ;;  %v517_v37 = vld [vmem:[%s3021_s7 + $0x19c8] sm:$0xff]  ;;  %v519_v38 = vld [vmem:[%s3021_s7 + $0x19d0] sm:$0xff] }
  0x6d   : > { %516 = vst [vmem:[%s3026_s8 + $0x520] sm:$0xff] %v515_v36  ;;  %v521_v39 = vld [vmem:[%s3021_s7 + $0x19d8] sm:$0xff]  ;;  %518 = vst [vmem:[%s3026_s8 + $0x528] sm:$0xff] %v517_v37  ;;  %v523_v40 = vld [vmem:[%s3021_s7 + $0x19e0] sm:$0xff] }
  0x6e   : > { %520 = vst [vmem:[%s3026_s8 + $0x530] sm:$0xff] %v519_v38  ;;  %522 = vst [vmem:[%s3026_s8 + $0x538] sm:$0xff] %v521_v39  ;;  %v525_v41 = vld [vmem:[%s3021_s7 + $0x19e8] sm:$0xff]  ;;  %v527_v42 = vld [vmem:[%s3021_s7 + $0x1a90] sm:$0xff] }
  0x6f   : > { %524 = vst [vmem:[%s3026_s8 + $0x540] sm:$0xff] %v523_v40  ;;  %526 = vst [vmem:[%s3026_s8 + $0x548] sm:$0xff] %v525_v41  ;;  %v529_v43 = vld [vmem:[%s3021_s7 + $0x1a98] sm:$0xff]  ;;  %v531_v44 = vld [vmem:[%s3021_s7 + $0x1aa0] sm:$0xff] }
  0x70   : > { %528 = vst [vmem:[%s3026_s8 + $0x550] sm:$0xff] %v527_v42  ;;  %v533_v45 = vld [vmem:[%s3021_s7 + $0x1aa8] sm:$0xff]  ;;  %530 = vst [vmem:[%s3026_s8 + $0x558] sm:$0xff] %v529_v43  ;;  %v535_v46 = vld [vmem:[%s3021_s7 + $0x1ab0] sm:$0xff] }
  0x71   : > { %532 = vst [vmem:[%s3026_s8 + $0x560] sm:$0xff] %v531_v44  ;;  %534 = vst [vmem:[%s3026_s8 + $0x568] sm:$0xff] %v533_v45  ;;  %v537_v47 = vld [vmem:[%s3021_s7 + $0x1b58] sm:$0xff]  ;;  %v539_v48 = vld [vmem:[%s3021_s7 + $0x1b60] sm:$0xff] }
  0x72   : > { %536 = vst [vmem:[%s3026_s8 + $0x570] sm:$0xff] %v535_v46  ;;  %538 = vst [vmem:[%s3026_s8 + $0x578] sm:$0xff] %v537_v47  ;;  %v541_v49 = vld [vmem:[%s3021_s7 + $0x1b68] sm:$0xff]  ;;  %v543_v50 = vld [vmem:[%s3021_s7 + $0x1b70] sm:$0xff] }
  0x73   : > { %540 = vst [vmem:[%s3026_s8 + $0x580] sm:$0xff] %v539_v48  ;;  %v545_v51 = vld [vmem:[%s3021_s7 + $0x1b78] sm:$0xff]  ;;  %542 = vst [vmem:[%s3026_s8 + $0x588] sm:$0xff] %v541_v49  ;;  %v547_v52 = vld [vmem:[%s3021_s7 + $0x1c20] sm:$0xff] }
  0x74   : > { %544 = vst [vmem:[%s3026_s8 + $0x590] sm:$0xff] %v543_v50  ;;  %546 = vst [vmem:[%s3026_s8 + $0x598] sm:$0xff] %v545_v51  ;;  %v549_v53 = vld [vmem:[%s3021_s7 + $0x1c28] sm:$0xff]  ;;  %v551_v54 = vld [vmem:[%s3021_s7 + $0x1c30] sm:$0xff] }
  0x75   : > { %548 = vst [vmem:[%s3026_s8 + $0x5a0] sm:$0xff] %v547_v52  ;;  %550 = vst [vmem:[%s3026_s8 + $0x5a8] sm:$0xff] %v549_v53  ;;  %v553_v55 = vld [vmem:[%s3021_s7 + $0x1c38] sm:$0xff]  ;;  %v555_v56 = vld [vmem:[%s3021_s7 + $0x1c40] sm:$0xff] }
  0x76   : > { %552 = vst [vmem:[%s3026_s8 + $0x5b0] sm:$0xff] %v551_v54  ;;  %v557_v57 = vld [vmem:[%s3021_s7 + $0x1ce8] sm:$0xff]  ;;  %554 = vst [vmem:[%s3026_s8 + $0x5b8] sm:$0xff] %v553_v55  ;;  %v559_v58 = vld [vmem:[%s3021_s7 + $0x1cf0] sm:$0xff] }
  0x77   : > { %556 = vst [vmem:[%s3026_s8 + $0x5c0] sm:$0xff] %v555_v56  ;;  %558 = vst [vmem:[%s3026_s8 + $0x5c8] sm:$0xff] %v557_v57  ;;  %v561_v59 = vld [vmem:[%s3021_s7 + $0x1cf8] sm:$0xff]  ;;  %v563_v60 = vld [vmem:[%s3021_s7 + $0x1d00] sm:$0xff] }
  0x78   : > { %560 = vst [vmem:[%s3026_s8 + $0x5d0] sm:$0xff] %v559_v58  ;;  %562 = vst [vmem:[%s3026_s8 + $0x5d8] sm:$0xff] %v561_v59  ;;  %v565_v61 = vld [vmem:[%s3021_s7 + $0x1d08] sm:$0xff]  ;;  %v567_v62 = vld [vmem:[%s3021_s7 + $0x1db0] sm:$0xff] }
  0x79   : > { %564 = vst [vmem:[%s3026_s8 + $0x5e0] sm:$0xff] %v563_v60  ;;  %v569_v63 = vld [vmem:[%s3021_s7 + $0x1db8] sm:$0xff]  ;;  %566 = vst [vmem:[%s3026_s8 + $0x5e8] sm:$0xff] %v565_v61  ;;  %v571_v0 = vld [vmem:[%s3021_s7 + $0x1dc0] sm:$0xff] }
  0x7a   : > { %568 = vst [vmem:[%s3026_s8 + $0x5f0] sm:$0xff] %v567_v62  ;;  %570 = vst [vmem:[%s3026_s8 + $0x5f8] sm:$0xff] %v569_v63  ;;  %v573_v1 = vld [vmem:[%s3021_s7 + $0x1dc8] sm:$0xff]  ;;  %v575_v2 = vld [vmem:[%s3021_s7 + $0x1dd0] sm:$0xff] }
  0x7b   : > { %572 = vst [vmem:[%s3026_s8 + $0x600] sm:$0xff] %v571_v0  ;;  %574 = vst [vmem:[%s3026_s8 + $0x608] sm:$0xff] %v573_v1  ;;  %v577_v3 = vld [vmem:[%s3021_s7 + $0x1e78] sm:$0xff]  ;;  %v579_v4 = vld [vmem:[%s3021_s7 + $0x1e80] sm:$0xff] }
  0x7c   : > { %576 = vst [vmem:[%s3026_s8 + $0x610] sm:$0xff] %v575_v2  ;;  %v581_v5 = vld [vmem:[%s3021_s7 + $0x1e88] sm:$0xff]  ;;  %578 = vst [vmem:[%s3026_s8 + $0x618] sm:$0xff] %v577_v3  ;;  %v583_v6 = vld [vmem:[%s3021_s7 + $0x1e90] sm:$0xff] }
  0x7d   : > { %580 = vst [vmem:[%s3026_s8 + $0x620] sm:$0xff] %v579_v4  ;;  %582 = vst [vmem:[%s3026_s8 + $0x628] sm:$0xff] %v581_v5  ;;  %v585_v7 = vld [vmem:[%s3021_s7 + $0x1e98] sm:$0xff]  ;;  %v587_v8 = vld [vmem:[%s3021_s7 + $0x1f40] sm:$0xff] }
  0x7e   : > { %584 = vst [vmem:[%s3026_s8 + $0x630] sm:$0xff] %v583_v6  ;;  %586 = vst [vmem:[%s3026_s8 + $0x638] sm:$0xff] %v585_v7  ;;  %v589_v9 = vld [vmem:[%s3021_s7 + $0x1f48] sm:$0xff]  ;;  %v591_v10 = vld [vmem:[%s3021_s7 + $0x1f50] sm:$0xff] }
  0x7f   : > { %588 = vst [vmem:[%s3026_s8 + $0x640] sm:$0xff] %v587_v8  ;;  %v593_v11 = vld [vmem:[%s3021_s7 + $0x1f58] sm:$0xff]  ;;  %590 = vst [vmem:[%s3026_s8 + $0x648] sm:$0xff] %v589_v9  ;;  %v595_v12 = vld [vmem:[%s3021_s7 + $0x1f60] sm:$0xff] }
  0x80   : > { %592 = vst [vmem:[%s3026_s8 + $0x650] sm:$0xff] %v591_v10  ;;  %594 = vst [vmem:[%s3026_s8 + $0x658] sm:$0xff] %v593_v11  ;;  %v597_v13 = vld [vmem:[%s3021_s7 + $0x2008] sm:$0xff]  ;;  %v599_v14 = vld [vmem:[%s3021_s7 + $0x2010] sm:$0xff] }
  0x81   : > { %596 = vst [vmem:[%s3026_s8 + $0x660] sm:$0xff] %v595_v12  ;;  %598 = vst [vmem:[%s3026_s8 + $0x668] sm:$0xff] %v597_v13  ;;  %v601_v15 = vld [vmem:[%s3021_s7 + $0x2018] sm:$0xff]  ;;  %v603_v16 = vld [vmem:[%s3021_s7 + $0x2020] sm:$0xff] }
  0x82   : > { %600 = vst [vmem:[%s3026_s8 + $0x670] sm:$0xff] %v599_v14  ;;  %v605_v17 = vld [vmem:[%s3021_s7 + $0x2028] sm:$0xff]  ;;  %602 = vst [vmem:[%s3026_s8 + $0x678] sm:$0xff] %v601_v15  ;;  %v607_v18 = vld [vmem:[%s3021_s7 + $0x20d0] sm:$0xff] }
  0x83   : > { %604 = vst [vmem:[%s3026_s8 + $0x680] sm:$0xff] %v603_v16  ;;  %606 = vst [vmem:[%s3026_s8 + $0x688] sm:$0xff] %v605_v17  ;;  %v609_v19 = vld [vmem:[%s3021_s7 + $0x20d8] sm:$0xff]  ;;  %v611_v20 = vld [vmem:[%s3021_s7 + $0x20e0] sm:$0xff] }
  0x84   : > { %608 = vst [vmem:[%s3026_s8 + $0x690] sm:$0xff] %v607_v18  ;;  %610 = vst [vmem:[%s3026_s8 + $0x698] sm:$0xff] %v609_v19  ;;  %v613_v21 = vld [vmem:[%s3021_s7 + $0x20e8] sm:$0xff]  ;;  %v615_v22 = vld [vmem:[%s3021_s7 + $0x20f0] sm:$0xff] }
  0x85   : > { %612 = vst [vmem:[%s3026_s8 + $0x6a0] sm:$0xff] %v611_v20  ;;  %v617_v23 = vld [vmem:[%s3021_s7 + $0x2198] sm:$0xff]  ;;  %614 = vst [vmem:[%s3026_s8 + $0x6a8] sm:$0xff] %v613_v21  ;;  %v619_v24 = vld [vmem:[%s3021_s7 + $0x21a0] sm:$0xff] }
  0x86   : > { %616 = vst [vmem:[%s3026_s8 + $0x6b0] sm:$0xff] %v615_v22  ;;  %618 = vst [vmem:[%s3026_s8 + $0x6b8] sm:$0xff] %v617_v23  ;;  %v621_v25 = vld [vmem:[%s3021_s7 + $0x21a8] sm:$0xff]  ;;  %v623_v26 = vld [vmem:[%s3021_s7 + $0x21b0] sm:$0xff] }
  0x87   : > { %620 = vst [vmem:[%s3026_s8 + $0x6c0] sm:$0xff] %v619_v24  ;;  %622 = vst [vmem:[%s3026_s8 + $0x6c8] sm:$0xff] %v621_v25  ;;  %v625_v27 = vld [vmem:[%s3021_s7 + $0x21b8] sm:$0xff]  ;;  %v627_v28 = vld [vmem:[%s3021_s7 + $0x2260] sm:$0xff] }
  0x88   : > { %624 = vst [vmem:[%s3026_s8 + $0x6d0] sm:$0xff] %v623_v26  ;;  %v629_v29 = vld [vmem:[%s3021_s7 + $0x2268] sm:$0xff]  ;;  %626 = vst [vmem:[%s3026_s8 + $0x6d8] sm:$0xff] %v625_v27  ;;  %v631_v30 = vld [vmem:[%s3021_s7 + $0x2270] sm:$0xff] }
  0x89   : > { %628 = vst [vmem:[%s3026_s8 + $0x6e0] sm:$0xff] %v627_v28  ;;  %630 = vst [vmem:[%s3026_s8 + $0x6e8] sm:$0xff] %v629_v29  ;;  %v633_v31 = vld [vmem:[%s3021_s7 + $0x2278] sm:$0xff]  ;;  %v635_v32 = vld [vmem:[%s3021_s7 + $0x2280] sm:$0xff] }
  0x8a   : > { %632 = vst [vmem:[%s3026_s8 + $0x6f0] sm:$0xff] %v631_v30  ;;  %634 = vst [vmem:[%s3026_s8 + $0x6f8] sm:$0xff] %v633_v31  ;;  %v637_v33 = vld [vmem:[%s3021_s7 + $0x2328] sm:$0xff]  ;;  %v639_v34 = vld [vmem:[%s3021_s7 + $0x2330] sm:$0xff] }
  0x8b   : > { %636 = vst [vmem:[%s3026_s8 + $0x700] sm:$0xff] %v635_v32  ;;  %v641_v35 = vld [vmem:[%s3021_s7 + $0x2338] sm:$0xff]  ;;  %638 = vst [vmem:[%s3026_s8 + $0x708] sm:$0xff] %v637_v33  ;;  %v643_v36 = vld [vmem:[%s3021_s7 + $0x2340] sm:$0xff] }
  0x8c   : > { %640 = vst [vmem:[%s3026_s8 + $0x710] sm:$0xff] %v639_v34  ;;  %642 = vst [vmem:[%s3026_s8 + $0x718] sm:$0xff] %v641_v35  ;;  %v645_v37 = vld [vmem:[%s3021_s7 + $0x2348] sm:$0xff] }
  0x8d   : > { %644 = vst [vmem:[%s3026_s8 + $0x720] sm:$0xff] %v643_v36  ;;  %646 = vst [vmem:[%s3026_s8 + $0x728] sm:$0xff] %v645_v37 }
  0x8e PF: > { %p2432_p7 = scmp.ge.s32.totalorder %s2937_s18, 1  ;;  %p663_p8 = scmp.lt.s32.totalorder %s2937_s18, 11 }
  0x90   : > { %p664_p9 = pnand %p2432_p7, %p663_p8 }
  0x91   : > { %s670_s9 = sand.u32 (!%p664_p9), 1, %s2913_s12   ;;  %s708_s10 = smul.u32 (!%p664_p9), 80, %s2921_s14 }
  0x92   : > { %667 = sbr.rel (%p664_p9) target bundleno = 714 (0x2ca), region = 51  ;;  %p720_p10 = scmp.lt.s32.totalorder (!%p664_p9), %s2925_s15, 1 }
  0x93   : > { %s2823_s11 = smul.u32 (!%p664_p9), 1840, %s670_s9  ;;  %p709_p11 = scmp.lt.s32.totalorder (!%p664_p9), %s708_s10, 399 }
  0x94   : > { %p2435_p12 = scmp.ne.s32.totalorder (!%p664_p9), %s2921_s14, 0 }
  0x95   : > { %s3501_s30 = scalar_lea.vmem (!%p664_p9), [#allocation2], %s2823_s11 }
  0x99   : > { %s4399_s10 = smov (!%p709_p11, %s708_s10), 399  ;;  %s4401_s15 = smov (!%p720_p10, %s2925_s15), 1 }
  0x9a   : > { %s2433_s21 = sshll.u32 %s4399_s10, 3  ;;  %s2824_s26 = smul.u32 368, %s4401_s15  ;;  %v2939_v38 = vmov (!%p2435_p12), 0.0  }
  0x9b   : > { %s3494_s24 = scalar_lea.vmem %s4383_s1, %s2433_s21  ;;  %731 = sbr.rel (%p2435_p12) target bundleno = 180 (0xb4), region = 59 }
  0x9c   : > { %s3499_s29 = scalar_lea.vmem %s4385_s3, %s2824_s26 }
  0x9d   : > { %732 = vst [vmem:[%s3499_s29] sm:$0xff] (!%p2435_p12), %v2939_v38  ;;  %733 = vst [vmem:[%s3499_s29 + $0x8] sm:$0xff] (!%p2435_p12), %v2939_v38 }
  0x9e   : > { %734 = vst [vmem:[%s3499_s29 + $0x10] sm:$0xff] (!%p2435_p12), %v2939_v38  ;;  %735 = vst [vmem:[%s3499_s29 + $0x18] sm:$0xff] (!%p2435_p12), %v2939_v38 }
  0x9f   : > { %736 = vst [vmem:[%s3499_s29 + $0x20] sm:$0xff] (!%p2435_p12), %v2939_v38  ;;  %737 = vst [vmem:[%s3499_s29 + $0x28] sm:$0xff] (!%p2435_p12), %v2939_v38 }
  0xa0   : > { %738 = vst [vmem:[%s3499_s29 + $0x30] sm:$0xff] (!%p2435_p12), %v2939_v38  ;;  %739 = vst [vmem:[%s3499_s29 + $0x38] sm:$0xff] (!%p2435_p12), %v2939_v38 }
  0xa1   : > { %740 = vst [vmem:[%s3499_s29 + $0x40] sm:$0xff] (!%p2435_p12), %v2939_v38  ;;  %741 = vst [vmem:[%s3499_s29 + $0x48] sm:$0xff] (!%p2435_p12), %v2939_v38 }
  0xa2   : > { %742 = vst [vmem:[%s3499_s29 + $0x50] sm:$0xff] %v2939_v38  ;;  %743 = vst [vmem:[%s3499_s29 + $0x58] sm:$0xff] %v2939_v38 }
  0xa3   : > { %744 = vst [vmem:[%s3499_s29 + $0x60] sm:$0xff] %v2939_v38  ;;  %745 = vst [vmem:[%s3499_s29 + $0x68] sm:$0xff] %v2939_v38 }
  0xa4   : > { %746 = vst [vmem:[%s3499_s29 + $0x70] sm:$0xff] %v2939_v38  ;;  %747 = vst [vmem:[%s3499_s29 + $0x78] sm:$0xff] %v2939_v38 }
  0xa5   : > { %748 = vst [vmem:[%s3499_s29 + $0x80] sm:$0xff] %v2939_v38  ;;  %749 = vst [vmem:[%s3499_s29 + $0x88] sm:$0xff] %v2939_v38 }
  0xa6   : > { %750 = vst [vmem:[%s3499_s29 + $0x90] sm:$0xff] %v2939_v38  ;;  %751 = vst [vmem:[%s3499_s29 + $0x98] sm:$0xff] %v2939_v38 }
  0xa7   : > { %752 = vst [vmem:[%s3499_s29 + $0xa0] sm:$0xff] %v2939_v38  ;;  %753 = vst [vmem:[%s3499_s29 + $0xa8] sm:$0xff] %v2939_v38 }
  0xa8   : > { %754 = vst [vmem:[%s3499_s29 + $0xb0] sm:$0xff] %v2939_v38  ;;  %755 = vst [vmem:[%s3499_s29 + $0xb8] sm:$0xff] %v2939_v38 }
  0xa9   : > { %756 = vst [vmem:[%s3499_s29 + $0xc0] sm:$0xff] %v2939_v38  ;;  %757 = vst [vmem:[%s3499_s29 + $0xc8] sm:$0xff] %v2939_v38 }
  0xaa   : > { %758 = vst [vmem:[%s3499_s29 + $0xd0] sm:$0xff] %v2939_v38  ;;  %759 = vst [vmem:[%s3499_s29 + $0xd8] sm:$0xff] %v2939_v38 }
  0xab   : > { %760 = vst [vmem:[%s3499_s29 + $0xe0] sm:$0xff] %v2939_v38  ;;  %761 = vst [vmem:[%s3499_s29 + $0xe8] sm:$0xff] %v2939_v38 }
  0xac   : > { %762 = vst [vmem:[%s3499_s29 + $0xf0] sm:$0xff] %v2939_v38  ;;  %763 = vst [vmem:[%s3499_s29 + $0xf8] sm:$0xff] %v2939_v38 }
  0xad   : > { %764 = vst [vmem:[%s3499_s29 + $0x100] sm:$0xff] %v2939_v38  ;;  %765 = vst [vmem:[%s3499_s29 + $0x108] sm:$0xff] %v2939_v38 }
  0xae   : > { %766 = vst [vmem:[%s3499_s29 + $0x110] sm:$0xff] %v2939_v38  ;;  %767 = vst [vmem:[%s3499_s29 + $0x118] sm:$0xff] %v2939_v38 }
  0xaf   : > { %768 = vst [vmem:[%s3499_s29 + $0x120] sm:$0xff] %v2939_v38  ;;  %769 = vst [vmem:[%s3499_s29 + $0x128] sm:$0xff] %v2939_v38 }
  0xb0   : > { %770 = vst [vmem:[%s3499_s29 + $0x130] sm:$0xff] %v2939_v38  ;;  %771 = vst [vmem:[%s3499_s29 + $0x138] sm:$0xff] %v2939_v38 }
  0xb1   : > { %772 = vst [vmem:[%s3499_s29 + $0x140] sm:$0xff] %v2939_v38  ;;  %773 = vst [vmem:[%s3499_s29 + $0x148] sm:$0xff] %v2939_v38 }
  0xb2   : > { %774 = vst [vmem:[%s3499_s29 + $0x150] sm:$0xff] %v2939_v38  ;;  %775 = vst [vmem:[%s3499_s29 + $0x158] sm:$0xff] %v2939_v38 }
  0xb3   : > { %776 = vst [vmem:[%s3499_s29 + $0x160] sm:$0xff] %v2939_v38  ;;  %777 = vst [vmem:[%s3499_s29 + $0x168] sm:$0x1] %v2939_v38 }
  0xb4 PF: > { %v1054_v39 = vld [vmem:[%s3494_s24] sm:$0xff]  ;;  %v1055_v40 = vld [vmem:[%s3494_s24 + $0x8] sm:$0xff]  ;;  %v2940_v42 = vmov 0.0|0.0   ;;  %v1056_v45 = vld [vmem:[%s3494_s24 + $0x10] sm:$0xff]  ;;  %p2436_p13 = scmp.ne.s32.totalorder %s2921_s14, 4 }
  0xb5   : > { %v1086_v41 = vld [vmem:[%s3494_s24 + $0x100] sm:$0xff]  ;;  %2603 = vmatprep.subr.bf16.mxu0 %v2940_v42  ;;  %2731 = vmatprep.subr.bf16.mxu1 %v2940_v42  ;;  %v2604_v43 = vpack.c.bf16 %v1055_v40, %v1054_v39  ;;  %v1087_v44 = vld [vmem:[%s3494_s24 + $0x108] sm:$0xff]  ;;  %v1057_v46 = vld [vmem:[%s3494_s24 + $0x18] sm:$0xff] }
  0xb6   : > { %v3558_v47 = vpack.c.bf16 %v1087_v44, %v1086_v41  ;;  %v1088_v48 = vld [vmem:[%s3494_s24 + $0x110] sm:$0xff]  ;;  %v1089_v49 = vld [vmem:[%s3494_s24 + $0x118] sm:$0xff]  ;;  %v2607_v50 = vpack.c.bf16 %v1057_v46, %v1056_v45  ;;  %v1058_v52 = vld [vmem:[%s3494_s24 + $0x20] sm:$0xff] }
  0xb7   : > { %2605 = vmatpush1.bf16.msra.mxu0 %v2604_v43  ;;  %v3564_v51 = vpack.c.bf16 %v1089_v49, %v1088_v48  ;;  %v1059_v53 = vld [vmem:[%s3494_s24 + $0x28] sm:$0xff]  ;;  %v1090_v54 = vld [vmem:[%s3494_s24 + $0x120] sm:$0xff]  ;;  %v1060_v58 = vld [vmem:[%s3494_s24 + $0x30] sm:$0xff] }
  0xb8   : > { %2747 = vmatpush1.bf16.msra.mxu1 %v3558_v47  ;;  %2606 = vmatprep.subr.bf16.mxu0 %v2940_v42  ;;  %v1091_v55 = vld [vmem:[%s3494_s24 + $0x128] sm:$0xff]  ;;  %v2610_v56 = vpack.c.bf16 %v1059_v53, %v1058_v52  ;;  %v1061_v59 = vld [vmem:[%s3494_s24 + $0x38] sm:$0xff]  ;;  %v1092_v60 = vld [vmem:[%s3494_s24 + $0x130] sm:$0xff] }
  0xb9   : > { %2732 = vmatprep.subr.bf16.mxu1 %v2940_v42  ;;  %v3573_v57 = vpack.c.bf16 %v1091_v55, %v1090_v54  ;;  %v1093_v61 = vld [vmem:[%s3494_s24 + $0x138] sm:$0xff]  ;;  %v2613_v62 = vpack.c.bf16 %v1061_v59, %v1060_v58  ;;  %v1062_v0 = vld [vmem:[%s3494_s24 + $0x40] sm:$0xff]  ;;  %v1063_v1 = vld [vmem:[%s3494_s24 + $0x48] sm:$0xff] }
  0xba   : > { %v3582_v63 = vpack.c.bf16 %v1093_v61, %v1092_v60  ;;  %v1094_v2 = vld [vmem:[%s3494_s24 + $0x140] sm:$0xff]  ;;  %v1095_v3 = vld [vmem:[%s3494_s24 + $0x148] sm:$0xff]  ;;  %v2616_v4 = vpack.c.bf16 %v1063_v1, %v1062_v0  ;;  %v1064_v6 = vld [vmem:[%s3494_s24 + $0x50] sm:$0xff] }
  0xbb   : > { %2608 = vmatpush1.bf16.msra.mxu0 %v2607_v50  ;;  %v3591_v5 = vpack.c.bf16 %v1095_v3, %v1094_v2  ;;  %v1065_v7 = vld [vmem:[%s3494_s24 + $0x58] sm:$0xff]  ;;  %v1096_v8 = vld [vmem:[%s3494_s24 + $0x150] sm:$0xff]  ;;  %v1066_v12 = vld [vmem:[%s3494_s24 + $0x60] sm:$0xff] }
  0xbc   : > { %2748 = vmatpush1.bf16.msra.mxu1 %v3564_v51  ;;  %2609 = vmatprep.subr.bf16.mxu0 %v2940_v42  ;;  %v1097_v9 = vld [vmem:[%s3494_s24 + $0x158] sm:$0xff]  ;;  %v2619_v10 = vpack.c.bf16 %v1065_v7, %v1064_v6  ;;  %v1067_v13 = vld [vmem:[%s3494_s24 + $0x68] sm:$0xff]  ;;  %v1098_v14 = vld [vmem:[%s3494_s24 + $0x160] sm:$0xff] }
  0xbd   : > { %2733 = vmatprep.subr.bf16.mxu1 %v2940_v42  ;;  %v3600_v11 = vpack.c.bf16 %v1097_v9, %v1096_v8  ;;  %v1099_v15 = vld [vmem:[%s3494_s24 + $0x168] sm:$0xff]  ;;  %v2622_v18 = vpack.c.bf16 %v1067_v13, %v1066_v12  ;;  %v1068_v20 = vld [vmem:[%s3494_s24 + $0x70] sm:$0xff]  ;;  %v1069_v21 = vld [vmem:[%s3494_s24 + $0x78] sm:$0xff] }
  0xbe   : > { %v825_v16 = vld [vmem:[%s3501_s30 + $0x8] sm:$0xff]  ;;  %v887_v17 = vld [vmem:[%s3501_s30 + $0x1f8] sm:$0xff]  ;;  %v3611_v19 = vpack.c.bf16 %v1099_v15, %v1098_v14  ;;  %v1100_v22 = vld [vmem:[%s3494_s24 + $0x170] sm:$0xff]  ;;  %v2625_v24 = vpack.c.bf16 %v1069_v21, %v1068_v20 }
  0xbf   : > { %2611 = vmatpush1.bf16.msra.mxu0 %v2610_v56  ;;  %1198 = vmatprep.mubr.f32.mxu0 %v825_v16  ;;  %v1101_v23 = vld [vmem:[%s3494_s24 + $0x178] sm:$0xff]  ;;  %v1070_v26 = vld [vmem:[%s3494_s24 + $0x80] sm:$0xff]  ;;  %v1071_v27 = vld [vmem:[%s3494_s24 + $0x88] sm:$0xff] }
  0xc0   : > { %2749 = vmatpush1.bf16.msra.mxu1 %v3573_v57  ;;  %2612 = vmatprep.subr.bf16.mxu0 %v2940_v42  ;;  %v3620_v25 = vpack.c.bf16 %v1101_v23, %v1100_v22  ;;  %v1102_v28 = vld [vmem:[%s3494_s24 + $0x180] sm:$0xff]  ;;  %v1103_v29 = vld [vmem:[%s3494_s24 + $0x188] sm:$0xff]  ;;  %v2628_v30 = vpack.c.bf16 %v1071_v27, %v1070_v26  ;;  %v1072_v32 = vld [vmem:[%s3494_s24 + $0x90] sm:$0xff] }
  0xc1   : > { %2734 = vmatprep.subr.bf16.mxu1 %v2940_v42  ;;  %1553 = vmatprep.mubr.f32.mxu1 %v887_v17  ;;  %v3629_v31 = vpack.c.bf16 %v1103_v29, %v1102_v28  ;;  %v1073_v33 = vld [vmem:[%s3494_s24 + $0x98] sm:$0xff]  ;;  %v1104_v34 = vld [vmem:[%s3494_s24 + $0x190] sm:$0xff]  ;;  %v1074_v38 = vld [vmem:[%s3494_s24 + $0xa0] sm:$0xff] }
  0xc2   : > { %v1105_v35 = vld [vmem:[%s3494_s24 + $0x198] sm:$0xff]  ;;  %v2631_v36 = vpack.c.bf16 %v1073_v33, %v1072_v32  ;;  %v1075_v39 = vld [vmem:[%s3494_s24 + $0xa8] sm:$0xff]  ;;  %v1106_v40 = vld [vmem:[%s3494_s24 + $0x1a0] sm:$0xff] }
  0xc3   : > { %2614 = vmatpush1.bf16.msra.mxu0 %v2613_v62  ;;  %v3638_v37 = vpack.c.bf16 %v1105_v35, %v1104_v34  ;;  %v1107_v41 = vld [vmem:[%s3494_s24 + $0x1a8] sm:$0xff]  ;;  %v2634_v43 = vpack.c.bf16 %v1075_v39, %v1074_v38  ;;  %v1076_v45 = vld [vmem:[%s3494_s24 + $0xb0] sm:$0xff]  ;;  %v1077_v46 = vld [vmem:[%s3494_s24 + $0xb8] sm:$0xff] }
  0xc4   : > { %2750 = vmatpush1.bf16.msra.mxu1 %v3582_v63  ;;  %2615 = vmatprep.subr.bf16.mxu0 %v2940_v42  ;;  %v3647_v44 = vpack.c.bf16 %v1107_v41, %v1106_v40  ;;  %v1108_v48 = vld [vmem:[%s3494_s24 + $0x1b0] sm:$0xff]  ;;  %v1109_v49 = vld [vmem:[%s3494_s24 + $0x1b8] sm:$0xff]  ;;  %v2637_v50 = vpack.c.bf16 %v1077_v46, %v1076_v45  ;;  %v1078_v53 = vld [vmem:[%s3494_s24 + $0xc0] sm:$0xff] }
  0xc5   : > { %2735 = vmatprep.subr.bf16.mxu1 %v2940_v42  ;;  %v3656_v52 = vpack.c.bf16 %v1109_v49, %v1108_v48  ;;  %v1079_v54 = vld [vmem:[%s3494_s24 + $0xc8] sm:$0xff]  ;;  %v1110_v55 = vld [vmem:[%s3494_s24 + $0x1c0] sm:$0xff]  ;;  %v1080_v60 = vld [vmem:[%s3494_s24 + $0xd0] sm:$0xff] }
  0xc6   : > { %v1111_v56 = vld [vmem:[%s3494_s24 + $0x1c8] sm:$0xff]  ;;  %v2640_v58 = vpack.c.bf16 %v1079_v54, %v1078_v53  ;;  %v1081_v61 = vld [vmem:[%s3494_s24 + $0xd8] sm:$0xff]  ;;  %v1112_v62 = vld [vmem:[%s3494_s24 + $0x1d0] sm:$0xff] }
  0xc7   : > { %2617 = vmatpush1.bf16.msra.mxu0 %v2616_v4  ;;  %v3665_v59 = vpack.c.bf16 %v1111_v56, %v1110_v55  ;;  %v1113_v0 = vld [vmem:[%s3494_s24 + $0x1d8] sm:$0xff]  ;;  %v2643_v1 = vpack.c.bf16 %v1081_v61, %v1080_v60  ;;  %v1082_v3 = vld [vmem:[%s3494_s24 + $0xe0] sm:$0xff]  ;;  %v1083_v4 = vld [vmem:[%s3494_s24 + $0xe8] sm:$0xff] }
  0xc8   : > { %2751 = vmatpush1.bf16.msra.mxu1 %v3591_v5  ;;  %2618 = vmatprep.subr.bf16.mxu0 %v2940_v42  ;;  %v3674_v2 = vpack.c.bf16 %v1113_v0, %v1112_v62  ;;  %v1114_v6 = vld [vmem:[%s3494_s24 + $0x1e0] sm:$0xff]  ;;  %v1115_v7 = vld [vmem:[%s3494_s24 + $0x1e8] sm:$0xff]  ;;  %v2646_v8 = vpack.c.bf16 %v1083_v4, %v1082_v3  ;;  %v1085_v12 = vld [vmem:[%s3494_s24 + $0xf8] sm:$0xff] }
  0xc9   : > { %2736 = vmatprep.subr.bf16.mxu1 %v2940_v42  ;;  %v3683_v9 = vpack.c.bf16 %v1115_v7, %v1114_v6  ;;  %v1116_v13 = vld [vmem:[%s3494_s24 + $0x1f0] sm:$0xff]  ;;  %v1117_v14 = vld [vmem:[%s3494_s24 + $0x1f8] sm:$0xff]  ;;  %v1118_v15 = vld [vmem:[%s3494_s24 + $0x200] sm:$0xff] }
  0xca   : > { %v1119_v16 = vld [vmem:[%s3494_s24 + $0x208] sm:$0xff]  ;;  %v824_v21 = vld [vmem:[%s3501_s30] sm:$0xff]  ;;  %v1121_v23 = vld [vmem:[%s3494_s24 + $0x218] sm:$0xff] }
  0xcb   : > { %2620 = vmatpush1.bf16.msra.mxu0 %v2619_v10  ;;  %v1084_v10 = vld [vmem:[%s3494_s24 + $0xf0] sm:$0xff]  ;;  %v2699_v20 = vpack.c.bf16 %v1119_v16, %v1118_v15  ;;  %v829_v29 = vld [vmem:[%s3501_s30 + $0x28] sm:$0xff]  ;;  %v891_v33 = vld [vmem:[%s3501_s30 + $0x218] sm:$0xff] }
  0xcc   : > { %2752 = vmatpush1.bf16.msra.mxu1 %v3600_v11  ;;  %2621 = vmatprep.subr.bf16.mxu0 %v2940_v42  ;;  %v2649_v17 = vpack.c.bf16 %v1085_v12, %v1084_v10  ;;  %v1120_v22 = vld [vmem:[%s3494_s24 + $0x210] sm:$0xff]  ;;  %v1123_v32 = vld [vmem:[%s3494_s24 + $0x228] sm:$0xff]  ;;  %v1125_v39 = vld [vmem:[%s3494_s24 + $0x238] sm:$0xff] }
  0xcd   : > { %2737 = vmatprep.subr.bf16.mxu1 %v2940_v42  ;;  %v830_v26 = vld [vmem:[%s3501_s30 + $0x30] sm:$0xff]  ;;  %v892_v27 = vld [vmem:[%s3501_s30 + $0x220] sm:$0xff]  ;;  %v2703_v28 = vpack.c.bf16 %v1121_v23, %v1120_v22  ;;  %v835_v34 = vld [vmem:[%s3501_s30 + $0x58] sm:$0xff] }
  0xce   : > { %v897_v35 = vld [vmem:[%s3501_s30 + $0x248] sm:$0xff]  ;;  %v1124_v38 = vld [vmem:[%s3494_s24 + $0x230] sm:$0xff]  ;;  %v839_v46 = vld [vmem:[%s3501_s30 + $0x78] sm:$0xff] }
  0xcf   : > { %2623 = vmatpush1.bf16.msra.mxu0 %v2622_v18  ;;  %v3694_v18 = vpack.c.bf16 %v1117_v14, %v1116_v13  ;;  %v896_v40 = vld [vmem:[%s3501_s30 + $0x240] sm:$0xff]  ;;  %v2711_v45 = vpack.c.bf16 %v1125_v39, %v1124_v38  ;;  %v1127_v49 = vld [vmem:[%s3494_s24 + $0x248] sm:$0xff]  ;;  %v906_v60 = vld [vmem:[%s3501_s30 + $0x290] sm:$0xff] }
  0xd0   : > { %2753 = vmatpush1.bf16.msra.mxu1 %v3611_v19  ;;  %2624 = vmatprep.subr.bf16.mxu0 %v2940_v42  ;;  %v840_v41 = vld [vmem:[%s3501_s30 + $0x80] sm:$0xff]  ;;  %v907_v53 = vld [vmem:[%s3501_s30 + $0x298] sm:$0xff]  ;;  %v849_v0 = vld [vmem:[%s3501_s30 + $0xc8] sm:$0xff] }
  0xd1   : > { %2738 = vmatprep.subr.bf16.mxu1 %v2940_v42  ;;  %v1126_v48 = vld [vmem:[%s3494_s24 + $0x240] sm:$0xff]  ;;  %v1128_v56 = vld [vmem:[%s3494_s24 + $0x250] sm:$0xff]  ;;  %v1131_v3 = vld [vmem:[%s3494_s24 + $0x268] sm:$0xff] }
  0xd2   : > { %v2715_v54 = vpack.c.bf16 %v1127_v49, %v1126_v48  ;;  %v844_v55 = vld [vmem:[%s3501_s30 + $0xa0] sm:$0xff]  ;;  %v911_v4 = vld [vmem:[%s3501_s30 + $0x2b8] sm:$0xff]  ;;  %v917_v6 = vld [vmem:[%s3501_s30 + $0x2e8] sm:$0xff] }
  0xd3   : > { %2626 = vmatpush1.bf16.msra.mxu0 %v2625_v24  ;;  %v886_v24 = vld [vmem:[%s3501_s30 + $0x1f0] sm:$0xff]  ;;  %v912_v61 = vld [vmem:[%s3501_s30 + $0x2c0] sm:$0xff]  ;;  %v1133_v12 = vld [vmem:[%s3494_s24 + $0x278] sm:$0xff] }
  0xd4   : > { %2754 = vmatpush1.bf16.msra.mxu1 %v3620_v25  ;;  %2627 = vmatprep.subr.bf16.mxu0 %v2940_v42  ;;  %v1132_v10 = vld [vmem:[%s3494_s24 + $0x270] sm:$0xff]  ;;  %v859_v16 = vld [vmem:[%s3501_s30 + $0x118] sm:$0xff]  ;;  %v961_v48 = vld [vmem:[%s3501_s30 + $0x448] sm:$0xff] }
  0xd5   : > { %2739 = vmatprep.subr.bf16.mxu1 %v2940_v42  ;;  %v916_v13 = vld [vmem:[%s3501_s30 + $0x2e0] sm:$0xff]  ;;  %v922_v14 = vld [vmem:[%s3501_s30 + $0x310] sm:$0xff]  ;;  %v2727_v15 = vpack.c.bf16 %v1133_v12, %v1132_v10  ;;  %v951_v39 = vld [vmem:[%s3501_s30 + $0x3f8] sm:$0xff] }
  0xd6   : > { %v926_v22 = vld [vmem:[%s3501_s30 + $0x330] sm:$0xff]  ;;  %v952_v38 = vld [vmem:[%s3501_s30 + $0x400] sm:$0xff]  ;;  %v905_v49 = vld [vmem:[%s3501_s30 + $0x288] sm:$0xff] }
  0xd7   : > { %2629 = vmatpush1.bf16.msra.mxu0 %v2628_v30  ;;  %v1122_v30 = vld [vmem:[%s3494_s24 + $0x220] sm:$0xff]  ;;  %v935_v10 = vld [vmem:[%s3501_s30 + $0x378] sm:$0xff]  ;;  %v997_v12 = vld [vmem:[%s3501_s30 + $0x568] sm:$0xff] }
  0xd8   : > { %2755 = vmatpush1.bf16.msra.mxu1 %v3629_v31  ;;  %2630 = vmatprep.subr.bf16.mxu0 %v2940_v42  ;;  %v870_v23 = vld [vmem:[%s3501_s30 + $0x170] sm:$0xff] }
  0xd9   : > { %2740 = vmatprep.subr.bf16.mxu1 %v2940_v42 }
  0xdb   : > { %2632 = vmatpush1.bf16.msra.mxu0 %v2631_v36  ;;  %v834_v36 = vld [vmem:[%s3501_s30 + $0x50] sm:$0xff] }
  0xdc   : > { %2756 = vmatpush1.bf16.msra.mxu1 %v3638_v37  ;;  %2633 = vmatprep.subr.bf16.mxu0 %v2940_v42 }
  0xdd   : > { %2741 = vmatprep.subr.bf16.mxu1 %v2940_v42 }
  0xdf   : > { %2635 = vmatpush1.bf16.msra.mxu0 %v2634_v43  ;;  %v902_v43 = vld [vmem:[%s3501_s30 + $0x270] sm:$0xff] }
  0xe0   : > { %2757 = vmatpush1.bf16.msra.mxu1 %v3647_v44  ;;  %2636 = vmatprep.subr.bf16.mxu0 %v2940_v42 }
  0xe1   : > { %2742 = vmatprep.subr.bf16.mxu1 %v2940_v42 }
  0xe3   : > { %2638 = vmatpush1.bf16.msra.mxu0 %v2637_v50  ;;  %v901_v50 = vld [vmem:[%s3501_s30 + $0x268] sm:$0xff] }
  0xe4   : > { %2758 = vmatpush1.bf16.msra.mxu1 %v3656_v52  ;;  %2639 = vmatprep.subr.bf16.mxu0 %v2940_v42 }
  0xe5   : > { %2743 = vmatprep.subr.bf16.mxu1 %v2940_v42 }
  0xe7   : > { %2641 = vmatpush1.bf16.msra.mxu0 %v2640_v58  ;;  %v1129_v58 = vld [vmem:[%s3494_s24 + $0x258] sm:$0xff] }
  0xe8   : > { %2759 = vmatpush1.bf16.msra.mxu1 %v3665_v59  ;;  %2642 = vmatprep.subr.bf16.mxu0 %v2940_v42  ;;  %v2719_v62 = vpack.c.bf16 %v1129_v58, %v1128_v56  ;;  %v977_v56 = vld [vmem:[%s3501_s30 + $0x4c8] sm:$0xff]  ;;  %v914_v58 = vld [vmem:[%s3501_s30 + $0x2d0] sm:$0xff] }
  0xe9   : > { %2744 = vmatprep.subr.bf16.mxu1 %v2940_v42 }
  0xeb   : > { %2644 = vmatpush1.bf16.msra.mxu0 %v2643_v1  ;;  %v1130_v1 = vld [vmem:[%s3494_s24 + $0x260] sm:$0xff] }
  0xec   : > { %2760 = vmatpush1.bf16.msra.mxu1 %v3674_v2  ;;  %2645 = vmatprep.subr.bf16.mxu0 %v2940_v42  ;;  %v2723_v7 = vpack.c.bf16 %v1131_v3, %v1130_v1  ;;  %v987_v1 = vld [vmem:[%s3501_s30 + $0x518] sm:$0xff]  ;;  %v924_v3 = vld [vmem:[%s3501_s30 + $0x320] sm:$0xff] }
  0xed   : > { %2745 = vmatprep.subr.bf16.mxu1 %v2940_v42 }
  0xef   : > { %2647 = vmatpush1.bf16.msra.mxu0 %v2646_v8  ;;  %v854_v8 = vld [vmem:[%s3501_s30 + $0xf0] sm:$0xff] }
  0xf0   : > { %2761 = vmatpush1.bf16.msra.mxu1 %v3683_v9  ;;  %2648 = vmatprep.subr.bf16.mxu0 %v2940_v42 }
  0xf1   : > { %2746 = vmatprep.subr.bf16.mxu1 %v2940_v42 }
  0xf3   : > { %2650 = vmatpush1.bf16.msra.mxu0 %v2649_v17  ;;  %v921_v17 = vld [vmem:[%s3501_s30 + $0x308] sm:$0xff] }
  0xf4   : > { %2762 = vmatpush1.bf16.msra.mxu1 %v3694_v18  ;;  %2651 = vmatprep.subr.bf16.mxu0 %v2940_v42 }
  0xf5   : > { %2700 = vmatprep.subr.bf16.mxu1 %v2699_v20 }
  0xf6   : > { %1199 = vmatmul.mubr.f32.vlgmr.msra.gmra.mrb[0].mxu0 %v824_v21  ;;  %v864_v21 = vld [vmem:[%s3501_s30 + $0x140] sm:$0xff] }
  0xf7   : > { %1554 = vmatmul.mubr.f32.vlgmr.msra.gmra.mrb[0].mxu1 %v886_v24  ;;  %2653 = vmatpush1.bf16.msra.mxu0 %v3558_v47  ;;  %v2707_v47 = vpack.c.bf16 %v1123_v32, %v1122_v30  ;;  %v932_v24 = vld [vmem:[%s3501_s30 + $0x360] sm:$0xff]  ;;  %v942_v32 = vld [vmem:[%s3501_s30 + $0x3b0] sm:$0xff] }
  0xf8   : > { %1203 = vmatprep.mubr.f32.mxu0 %v830_v26  ;;  %1558 = vmatprep.mubr.f32.mxu1 %v892_v27  ;;  %v931_v26 = vld [vmem:[%s3501_s30 + $0x358] sm:$0xff]  ;;  %v880_v30 = vld [vmem:[%s3501_s30 + $0x1c0] sm:$0xff] }
  0xf9   : > { %2702 = vmatpush3.bf16.msra.mxu1 %v2699_v20  ;;  %2654 = vmatprep.subr.bf16.mxu0 %v2940_v42  ;;  %v865_v20 = vld [vmem:[%s3501_s30 + $0x148] sm:$0xff]  ;;  %v875_v27 = vld [vmem:[%s3501_s30 + $0x198] sm:$0xff] }
  0xfa   : > { %1204 = vmatmul.mubr.f32.gmra.mrb[2].mxu0 %v829_v29  ;;  %2704 = vmatprep.subr.bf16.mxu1 %v2703_v28  ;;  %v936_v29 = vld [vmem:[%s3501_s30 + $0x380] sm:$0xff] }
  0xfb   : > { %1559 = vmatmul.mubr.f32.gmra.mrb[2].mxu1 %v891_v33  ;;  %1208 = vmatprep.mubr.f32.mxu0 %v835_v34  ;;  %v941_v33 = vld [vmem:[%s3501_s30 + $0x3a8] sm:$0xff] }
  0xfc   : > { %1563 = vmatprep.mubr.f32.mxu1 %v897_v35  ;;  %2656 = vmatpush1.bf16.msra.mxu0 %v3564_v51  ;;  %v845_v51 = vld [vmem:[%s3501_s30 + $0xa8] sm:$0xff]  ;;  %v947_v35 = vld [vmem:[%s3501_s30 + $0x3d8] sm:$0xff] }
  0xfd   : > { %2706 = vmatpush3.bf16.msra.mxu1 %v2703_v28  ;;  %2657 = vmatprep.subr.bf16.mxu0 %v2940_v42  ;;  %v937_v28 = vld [vmem:[%s3501_s30 + $0x388] sm:$0xff] }
  0xfe   : > { %1209 = vmatmul.mubr.f32.gmra.mrb[4].mxu0 %v834_v36  ;;  %2708 = vmatprep.subr.bf16.mxu1 %v2707_v47  ;;  %v885_v34 = vld [vmem:[%s3501_s30 + $0x1e8] sm:$0xff]  ;;  %v890_v36 = vld [vmem:[%s3501_s30 + $0x210] sm:$0xff] }
  0xff   : > { %1564 = vmatmul.mubr.f32.gmra.mrb[4].mxu1 %v896_v40  ;;  %1213 = vmatprep.mubr.f32.mxu0 %v840_v41  ;;  %v895_v40 = vld [vmem:[%s3501_s30 + $0x238] sm:$0xff]  ;;  %v957_v41 = vld [vmem:[%s3501_s30 + $0x428] sm:$0xff] }
 0x100   : > { %1568 = vmatprep.mubr.f32.mxu1 %v902_v43  ;;  %2659 = vmatpush1.bf16.msra.mxu0 %v3573_v57  ;;  %v850_v57 = vld [vmem:[%s3501_s30 + $0xd0] sm:$0xff]  ;;  %v956_v43 = vld [vmem:[%s3501_s30 + $0x420] sm:$0xff] }
 0x101   : > { %2660 = vmatprep.subr.bf16.mxu0 %v2940_v42  ;;  %2710 = vmatpush3.bf16.msra.mxu1 %v2707_v47  ;;  %v946_v47 = vld [vmem:[%s3501_s30 + $0x3d0] sm:$0xff] }
 0x102   : > { %1214 = vmatmul.mubr.f32.gmra.mrb[6].mxu0 %v839_v46  ;;  %2712 = vmatprep.subr.bf16.mxu1 %v2711_v45  ;;  %v962_v46 = vld [vmem:[%s3501_s30 + $0x450] sm:$0xff] }
 0x103   : > { %1569 = vmatmul.mubr.f32.gmra.mrb[6].mxu1 %v901_v50  ;;  %1218 = vmatprep.mubr.f32.mxu0 %v845_v51  ;;  %v967_v50 = vld [vmem:[%s3501_s30 + $0x478] sm:$0xff]  ;;  %v966_v51 = vld [vmem:[%s3501_s30 + $0x470] sm:$0xff] }
 0x104   : > { %1573 = vmatprep.mubr.f32.mxu1 %v907_v53  ;;  %2662 = vmatpush1.bf16.msra.mxu0 %v3582_v63  ;;  %v855_v63 = vld [vmem:[%s3501_s30 + $0xf8] sm:$0xff]  ;;  %v910_v53 = vld [vmem:[%s3501_s30 + $0x2b0] sm:$0xff] }
 0x105   : > { %2663 = vmatprep.subr.bf16.mxu0 %v2940_v42  ;;  %2714 = vmatpush3.bf16.msra.mxu1 %v2711_v45  ;;  %v900_v45 = vld [vmem:[%s3501_s30 + $0x260] sm:$0xff] }
 0x106   : > { %1219 = vmatmul.mubr.f32.gmra.mrb[8].mxu0 %v844_v55  ;;  %2716 = vmatprep.subr.bf16.mxu1 %v2715_v54  ;;  %v915_v55 = vld [vmem:[%s3501_s30 + $0x2d8] sm:$0xff] }
 0x107   : > { %1574 = vmatmul.mubr.f32.gmra.mrb[8].mxu1 %v906_v60  ;;  %1223 = vmatprep.mubr.f32.mxu0 %v850_v57  ;;  %v920_v60 = vld [vmem:[%s3501_s30 + $0x300] sm:$0xff]  ;;  %v982_v57 = vld [vmem:[%s3501_s30 + $0x4f0] sm:$0xff] }
 0x108   : > { %1578 = vmatprep.mubr.f32.mxu1 %v912_v61  ;;  %2665 = vmatpush1.bf16.msra.mxu0 %v3591_v5  ;;  %v860_v5 = vld [vmem:[%s3501_s30 + $0x120] sm:$0xff]  ;;  %v919_v61 = vld [vmem:[%s3501_s30 + $0x2f8] sm:$0xff] }
 0x109   : > { %2666 = vmatprep.subr.bf16.mxu0 %v2940_v42  ;;  %2718 = vmatpush3.bf16.msra.mxu1 %v2715_v54  ;;  %v972_v54 = vld [vmem:[%s3501_s30 + $0x4a0] sm:$0xff] }
 0x10a   : > { %1224 = vmatmul.mubr.f32.gmra.mrb[10].mxu0 %v849_v0  ;;  %2720 = vmatprep.subr.bf16.mxu1 %v2719_v62  ;;  %v925_v0 = vld [vmem:[%s3501_s30 + $0x328] sm:$0xff] }
 0x10b   : > { %1579 = vmatmul.mubr.f32.gmra.mrb[10].mxu1 %v911_v4  ;;  %1228 = vmatprep.mubr.f32.mxu0 %v855_v63  ;;  %v986_v4 = vld [vmem:[%s3501_s30 + $0x510] sm:$0xff] }
 0x10c   : > { %1583 = vmatprep.mubr.f32.mxu1 %v917_v6  ;;  %2668 = vmatpush1.bf16.msra.mxu0 %v3600_v11  ;;  %v927_v11 = vld [vmem:[%s3501_s30 + $0x338] sm:$0xff]  ;;  %v930_v63 = vld [vmem:[%s3501_s30 + $0x350] sm:$0xff]  ;;  %v992_v6 = vld [vmem:[%s3501_s30 + $0x540] sm:$0xff] }
 0x10d   : > { %2669 = vmatprep.subr.bf16.mxu0 %v2940_v42  ;;  %2722 = vmatpush3.bf16.msra.mxu1 %v2719_v62  ;;  %v981_v62 = vld [vmem:[%s3501_s30 + $0x4e8] sm:$0xff] }
 0x10e   : > { %1229 = vmatmul.mubr.f32.gmra.mrb[12].mxu0 %v854_v8  ;;  %2724 = vmatprep.subr.bf16.mxu1 %v2723_v7  ;;  %v991_v8 = vld [vmem:[%s3501_s30 + $0x538] sm:$0xff] }
 0x10f   : > { %1584 = vmatmul.mubr.f32.gmra.mrb[12].mxu1 %v916_v13  ;;  %1233 = vmatprep.mubr.f32.mxu0 %v860_v5  ;;  %v934_v13 = vld [vmem:[%s3501_s30 + $0x370] sm:$0xff]  ;;  %v996_v5 = vld [vmem:[%s3501_s30 + $0x560] sm:$0xff] }
 0x110   : > { %1588 = vmatprep.mubr.f32.mxu1 %v922_v14  ;;  %2671 = vmatpush1.bf16.msra.mxu0 %v3611_v19  ;;  %v869_v19 = vld [vmem:[%s3501_s30 + $0x168] sm:$0xff]  ;;  %v940_v14 = vld [vmem:[%s3501_s30 + $0x3a0] sm:$0xff] }
 0x111   : > { %2672 = vmatprep.subr.bf16.mxu0 %v2940_v42  ;;  %2726 = vmatpush3.bf16.msra.mxu1 %v2723_v7  ;;  %v929_v7 = vld [vmem:[%s3501_s30 + $0x348] sm:$0xff] }
 0x112   : > { %1234 = vmatmul.mubr.f32.gmra.mrb[14].mxu0 %v859_v16  ;;  %2728 = vmatprep.subr.bf16.mxu1 %v2727_v15  ;;  %v939_v16 = vld [vmem:[%s3501_s30 + $0x398] sm:$0xff] }
 0x113   : > { %1589 = vmatmul.mubr.f32.gmra.mrb[14].mxu1 %v921_v17  ;;  %1238 = vmatprep.mubr.f32.mxu0 %v865_v20  ;;  %v1001_v17 = vld [vmem:[%s3501_s30 + $0x588] sm:$0xff] }
 0x114   : > { %1593 = vmatprep.mubr.f32.mxu1 %v927_v11  ;;  %2674 = vmatpush1.bf16.msra.mxu0 %v3620_v25  ;;  %v874_v25 = vld [vmem:[%s3501_s30 + $0x190] sm:$0xff]  ;;  %v945_v20 = vld [vmem:[%s3501_s30 + $0x3c8] sm:$0xff]  ;;  %v1007_v11 = vld [vmem:[%s3501_s30 + $0x5b8] sm:$0xff] }
 0x115   : > { %2675 = vmatprep.subr.bf16.mxu0 %v2940_v42  ;;  %2730 = vmatpush3.bf16.msra.mxu1 %v2727_v15  ;;  %v1002_v15 = vld [vmem:[%s3501_s30 + $0x590] sm:$0xff] }
 0x116   : > { %1239 = vmatmul.mubr.f32.gmra.mrb[16].mxu0 %v864_v21  ;;  %v944_v21 = vld [vmem:[%s3501_s30 + $0x3c0] sm:$0xff] }
 0x117   : > { %1594 = vmatmul.mubr.f32.gmra.mrb[16].mxu1 %v926_v22  ;;  %1243 = vmatprep.mubr.f32.mxu0 %v870_v23  ;;  %v1006_v22 = vld [vmem:[%s3501_s30 + $0x5b0] sm:$0xff] }
 0x118   : > { %1598 = vmatprep.mubr.f32.mxu1 %v932_v24  ;;  %2677 = vmatpush1.bf16.msra.mxu0 %v3629_v31  ;;  %v879_v31 = vld [vmem:[%s3501_s30 + $0x1b8] sm:$0xff]  ;;  %v950_v23 = vld [vmem:[%s3501_s30 + $0x3f0] sm:$0xff]  ;;  %v1012_v24 = vld [vmem:[%s3501_s30 + $0x5e0] sm:$0xff] }
 0x119   : > { %2678 = vmatprep.subr.bf16.mxu0 %v2940_v42 }
 0x11a   : > { %1244 = vmatmul.mubr.f32.gmra.mrb[18].mxu0 %v869_v19  ;;  %v949_v19 = vld [vmem:[%s3501_s30 + $0x3e8] sm:$0xff] }
 0x11b   : > { %1599 = vmatmul.mubr.f32.gmra.mrb[18].mxu1 %v931_v26  ;;  %1248 = vmatprep.mubr.f32.mxu0 %v875_v27  ;;  %v1011_v26 = vld [vmem:[%s3501_s30 + $0x5d8] sm:$0xff] }
 0x11c   : > { %1603 = vmatprep.mubr.f32.mxu1 %v937_v28  ;;  %2680 = vmatpush1.bf16.msra.mxu0 %v3638_v37  ;;  %v884_v37 = vld [vmem:[%s3501_s30 + $0x1e0] sm:$0xff]  ;;  %v955_v27 = vld [vmem:[%s3501_s30 + $0x418] sm:$0xff]  ;;  %v1017_v28 = vld [vmem:[%s3501_s30 + $0x608] sm:$0xff] }
 0x11d   : > { %2681 = vmatprep.subr.bf16.mxu0 %v2940_v42 }
 0x11e   : > { %1249 = vmatmul.mubr.f32.gmra.mrb[20].mxu0 %v874_v25  ;;  %v954_v25 = vld [vmem:[%s3501_s30 + $0x410] sm:$0xff] }
 0x11f   : > { %1604 = vmatmul.mubr.f32.gmra.mrb[20].mxu1 %v936_v29  ;;  %1253 = vmatprep.mubr.f32.mxu0 %v880_v30  ;;  %v1016_v29 = vld [vmem:[%s3501_s30 + $0x600] sm:$0xff] }
 0x120   : > { %1608 = vmatprep.mubr.f32.mxu1 %v942_v32  ;;  %2683 = vmatpush1.bf16.msra.mxu0 %v3647_v44  ;;  %v889_v44 = vld [vmem:[%s3501_s30 + $0x208] sm:$0xff]  ;;  %v960_v30 = vld [vmem:[%s3501_s30 + $0x440] sm:$0xff]  ;;  %v1022_v32 = vld [vmem:[%s3501_s30 + $0x630] sm:$0xff] }
 0x121   : > { %2684 = vmatprep.subr.bf16.mxu0 %v2940_v42 }
 0x122   : > { %1254 = vmatmul.mubr.f32.gmra.mrb[22].mxu0 %v879_v31  ;;  %v959_v31 = vld [vmem:[%s3501_s30 + $0x438] sm:$0xff] }
 0x123   : > { %1609 = vmatmul.mubr.f32.gmra.mrb[22].mxu1 %v941_v33  ;;  %1258 = vmatprep.mubr.f32.mxu0 %v885_v34  ;;  %v1021_v33 = vld [vmem:[%s3501_s30 + $0x628] sm:$0xff] }
 0x124   : > { %1613 = vmatprep.mubr.f32.mxu1 %v947_v35  ;;  %2686 = vmatpush1.bf16.msra.mxu0 %v3656_v52  ;;  %v894_v52 = vld [vmem:[%s3501_s30 + $0x230] sm:$0xff]  ;;  %v965_v34 = vld [vmem:[%s3501_s30 + $0x468] sm:$0xff]  ;;  %v1027_v35 = vld [vmem:[%s3501_s30 + $0x658] sm:$0xff] }
 0x125   : > { %2687 = vmatprep.subr.bf16.mxu0 %v2940_v42 }
 0x126   : > { %1259 = vmatmul.mubr.f32.gmra.mrb[24].mxu0 %v884_v37  ;;  %v964_v37 = vld [vmem:[%s3501_s30 + $0x460] sm:$0xff] }
 0x127   : > { %1614 = vmatmul.mubr.f32.gmra.mrb[24].mxu1 %v946_v47  ;;  %1263 = vmatprep.mubr.f32.mxu0 %v890_v36  ;;  %v1026_v47 = vld [vmem:[%s3501_s30 + $0x650] sm:$0xff] }
 0x128   : > { %1618 = vmatprep.mubr.f32.mxu1 %v952_v38  ;;  %2689 = vmatpush1.bf16.msra.mxu0 %v3665_v59  ;;  %v899_v59 = vld [vmem:[%s3501_s30 + $0x258] sm:$0xff]  ;;  %v970_v36 = vld [vmem:[%s3501_s30 + $0x490] sm:$0xff]  ;;  %v1032_v38 = vld [vmem:[%s3501_s30 + $0x680] sm:$0xff] }
 0x129   : > { %2690 = vmatprep.subr.bf16.mxu0 %v2940_v42 }
 0x12a   : > { %1264 = vmatmul.mubr.f32.gmra.mrb[26].mxu0 %v889_v44  ;;  %v969_v44 = vld [vmem:[%s3501_s30 + $0x488] sm:$0xff] }
 0x12b   : > { %1619 = vmatmul.mubr.f32.gmra.mrb[26].mxu1 %v951_v39  ;;  %1268 = vmatprep.mubr.f32.mxu0 %v895_v40  ;;  %v1031_v39 = vld [vmem:[%s3501_s30 + $0x678] sm:$0xff] }
 0x12c   : > { %1623 = vmatprep.mubr.f32.mxu1 %v957_v41  ;;  %2692 = vmatpush1.bf16.msra.mxu0 %v3674_v2  ;;  %v904_v2 = vld [vmem:[%s3501_s30 + $0x280] sm:$0xff]  ;;  %v975_v40 = vld [vmem:[%s3501_s30 + $0x4b8] sm:$0xff]  ;;  %v1037_v41 = vld [vmem:[%s3501_s30 + $0x6a8] sm:$0xff] }
 0x12d   : > { %2693 = vmatprep.subr.bf16.mxu0 %v2940_v42 }
 0x12e   : > { %1269 = vmatmul.mubr.f32.gmra.mrb[28].mxu0 %v894_v52  ;;  %v974_v52 = vld [vmem:[%s3501_s30 + $0x4b0] sm:$0xff] }
 0x12f   : > { %1624 = vmatmul.mubr.f32.gmra.mrb[28].mxu1 %v956_v43  ;;  %1273 = vmatprep.mubr.f32.mxu0 %v900_v45  ;;  %v1036_v43 = vld [vmem:[%s3501_s30 + $0x6a0] sm:$0xff] }
 0x130   : > { %1628 = vmatprep.mubr.f32.mxu1 %v962_v46  ;;  %2695 = vmatpush1.bf16.msra.mxu0 %v3683_v9  ;;  %v971_v9 = vld [vmem:[%s3501_s30 + $0x498] sm:$0xff]  ;;  %v980_v45 = vld [vmem:[%s3501_s30 + $0x4e0] sm:$0xff]  ;;  %v1042_v46 = vld [vmem:[%s3501_s30 + $0x6d0] sm:$0xff] }
 0x131   : > { %2696 = vmatprep.subr.bf16.mxu0 %v2940_v42  ;;  %v909_v42 = vld [vmem:[%s3501_s30 + $0x2a8] sm:$0xff] }
 0x132   : > { %1274 = vmatmul.mubr.f32.gmra.mrb[30].mxu0 %v899_v59  ;;  %v979_v59 = vld [vmem:[%s3501_s30 + $0x4d8] sm:$0xff] }
 0x133   : > { %1629 = vmatmul.mubr.f32.gmra.mrb[30].mxu1 %v961_v48  ;;  %1278 = vmatprep.mubr.f32.mxu0 %v905_v49  ;;  %v1041_v48 = vld [vmem:[%s3501_s30 + $0x6c8] sm:$0xff] }
 0x134   : > { %1633 = vmatprep.mubr.f32.mxu1 %v967_v50  ;;  %2698 = vmatpush1.bf16.msra.mxu0 %v3694_v18  ;;  %v976_v18 = vld [vmem:[%s3501_s30 + $0x4c0] sm:$0xff]  ;;  %v985_v49 = vld [vmem:[%s3501_s30 + $0x508] sm:$0xff]  ;;  %v1047_v50 = vld [vmem:[%s3501_s30 + $0x6f8] sm:$0xff] }
 0x136   : > { %1279 = vmatmul.mubr.f32.gmra.mrb[32].mxu0 %v904_v2  ;;  %v984_v2 = vld [vmem:[%s3501_s30 + $0x500] sm:$0xff] }
 0x137   : > { %1634 = vmatmul.mubr.f32.gmra.mrb[32].mxu1 %v966_v51  ;;  %1283 = vmatprep.mubr.f32.mxu0 %v910_v53  ;;  %v1046_v51 = vld [vmem:[%s3501_s30 + $0x6f0] sm:$0xff] }
 0x138   : > { %1638 = vmatprep.mubr.f32.mxu1 %v972_v54  ;;  %v990_v53 = vld [vmem:[%s3501_s30 + $0x530] sm:$0xff]  ;;  %v1052_v54 = vld [vmem:[%s3501_s30 + $0x720] sm:$0x1] }
 0x13a   : > { %1284 = vmatmul.mubr.f32.gmra.mrb[34].mxu0 %v909_v42  ;;  %v989_v42 = vld [vmem:[%s3501_s30 + $0x528] sm:$0xff] }
 0x13b   : > { %1639 = vmatmul.mubr.f32.gmra.mrb[34].mxu1 %v971_v9  ;;  %1288 = vmatprep.mubr.f32.mxu0 %v915_v55  ;;  %v1051_v9 = vld [vmem:[%s3501_s30 + $0x718] sm:$0x1] }
 0x13c   : > { %1643 = vmatprep.mubr.f32.mxu1 %v977_v56  ;;  %v995_v55 = vld [vmem:[%s3501_s30 + $0x558] sm:$0xff]  ;;  %v828_v56 = vld [vmem:[%s3501_s30 + $0x20] sm:$0xff] }
 0x13e   : > { %1289 = vmatmul.mubr.f32.gmra.mrb[36].mxu0 %v914_v58  ;;  %v994_v58 = vld [vmem:[%s3501_s30 + $0x550] sm:$0xff] }
 0x13f   : > { %1644 = vmatmul.mubr.f32.gmra.mrb[36].mxu1 %v976_v18  ;;  %1293 = vmatprep.mubr.f32.mxu0 %v920_v60  ;;  %v833_v18 = vld [vmem:[%s3501_s30 + $0x48] sm:$0xff]  ;;  %v1000_v60 = vld [vmem:[%s3501_s30 + $0x580] sm:$0xff] }
 0x140   : > { %1648 = vmatprep.mubr.f32.mxu1 %v982_v57  ;;  %v838_v57 = vld [vmem:[%s3501_s30 + $0x70] sm:$0xff] }
 0x142   : > { %1294 = vmatmul.mubr.f32.gmra.mrb[38].mxu0 %v919_v61  ;;  %v999_v61 = vld [vmem:[%s3501_s30 + $0x578] sm:$0xff] }
 0x143   : > { %1649 = vmatmul.mubr.f32.gmra.mrb[38].mxu1 %v981_v62  ;;  %1298 = vmatprep.mubr.f32.mxu0 %v925_v0  ;;  %v843_v62 = vld [vmem:[%s3501_s30 + $0x98] sm:$0xff]  ;;  %v1005_v0 = vld [vmem:[%s3501_s30 + $0x5a8] sm:$0xff] }
 0x144   : > { %1653 = vmatprep.mubr.f32.mxu1 %v987_v1  ;;  %v848_v1 = vld [vmem:[%s3501_s30 + $0xc0] sm:$0xff] }
 0x146   : > { %1299 = vmatmul.mubr.f32.gmra.mrb[40].mxu0 %v924_v3  ;;  %v1004_v3 = vld [vmem:[%s3501_s30 + $0x5a0] sm:$0xff] }
 0x147   : > { %1654 = vmatmul.mubr.f32.gmra.mrb[40].mxu1 %v986_v4  ;;  %1303 = vmatprep.mubr.f32.mxu0 %v930_v63  ;;  %v853_v4 = vld [vmem:[%s3501_s30 + $0xe8] sm:$0xff]  ;;  %v1010_v63 = vld [vmem:[%s3501_s30 + $0x5d0] sm:$0xff] }
 0x148   : > { %1658 = vmatprep.mubr.f32.mxu1 %v992_v6  ;;  %v858_v6 = vld [vmem:[%s3501_s30 + $0x110] sm:$0xff] }
 0x14a   : > { %1304 = vmatmul.mubr.f32.gmra.mrb[42].mxu0 %v929_v7  ;;  %v1009_v7 = vld [vmem:[%s3501_s30 + $0x5c8] sm:$0xff] }
 0x14b   : > { %1659 = vmatmul.mubr.f32.gmra.mrb[42].mxu1 %v991_v8  ;;  %1308 = vmatprep.mubr.f32.mxu0 %v935_v10  ;;  %v863_v8 = vld [vmem:[%s3501_s30 + $0x138] sm:$0xff] }
 0x14c   : > { %1663 = vmatprep.mubr.f32.mxu1 %v997_v12  ;;  %v1015_v10 = vld [vmem:[%s3501_s30 + $0x5f8] sm:$0xff]  ;;  %v868_v12 = vld [vmem:[%s3501_s30 + $0x160] sm:$0xff] }
 0x14e   : > { %1309 = vmatmul.mubr.f32.gmra.mrb[44].mxu0 %v934_v13  ;;  %v1014_v13 = vld [vmem:[%s3501_s30 + $0x5f0] sm:$0xff] }
 0x14f   : > { %1664 = vmatmul.mubr.f32.gmra.mrb[44].mxu1 %v996_v5  ;;  %1313 = vmatprep.mubr.f32.mxu0 %v940_v14  ;;  %v873_v5 = vld [vmem:[%s3501_s30 + $0x188] sm:$0xff]  ;;  %v1020_v14 = vld [vmem:[%s3501_s30 + $0x620] sm:$0xff] }
 0x150   : > { %1668 = vmatprep.mubr.f32.mxu1 %v1002_v15  ;;  %v878_v15 = vld [vmem:[%s3501_s30 + $0x1b0] sm:$0xff] }
 0x152   : > { %1314 = vmatmul.mubr.f32.gmra.mrb[46].mxu0 %v939_v16  ;;  %v1019_v16 = vld [vmem:[%s3501_s30 + $0x618] sm:$0xff] }
 0x153   : > { %1669 = vmatmul.mubr.f32.gmra.mrb[46].mxu1 %v1001_v17  ;;  %1318 = vmatprep.mubr.f32.mxu0 %v945_v20  ;;  %v883_v17 = vld [vmem:[%s3501_s30 + $0x1d8] sm:$0xff]  ;;  %v1025_v20 = vld [vmem:[%s3501_s30 + $0x648] sm:$0xff] }
 0x154   : > { %1673 = vmatprep.mubr.f32.mxu1 %v1007_v11  ;;  %v888_v11 = vld [vmem:[%s3501_s30 + $0x200] sm:$0xff] }
 0x156   : > { %1319 = vmatmul.mubr.f32.gmra.mrb[48].mxu0 %v944_v21  ;;  %v1024_v21 = vld [vmem:[%s3501_s30 + $0x640] sm:$0xff] }
 0x157   : > { %1674 = vmatmul.mubr.f32.gmra.mrb[48].mxu1 %v1006_v22  ;;  %1323 = vmatprep.mubr.f32.mxu0 %v950_v23  ;;  %v893_v22 = vld [vmem:[%s3501_s30 + $0x228] sm:$0xff]  ;;  %v1030_v23 = vld [vmem:[%s3501_s30 + $0x670] sm:$0xff] }
 0x158   : > { %1678 = vmatprep.mubr.f32.mxu1 %v1012_v24  ;;  %v898_v24 = vld [vmem:[%s3501_s30 + $0x250] sm:$0xff] }
 0x15a   : > { %1324 = vmatmul.mubr.f32.gmra.mrb[50].mxu0 %v949_v19  ;;  %v1029_v19 = vld [vmem:[%s3501_s30 + $0x668] sm:$0xff] }
 0x15b   : > { %1679 = vmatmul.mubr.f32.gmra.mrb[50].mxu1 %v1011_v26  ;;  %1328 = vmatprep.mubr.f32.mxu0 %v955_v27  ;;  %v903_v26 = vld [vmem:[%s3501_s30 + $0x278] sm:$0xff] }
 0x15c   : > { %1683 = vmatprep.mubr.f32.mxu1 %v1017_v28  ;;  %v1035_v27 = vld [vmem:[%s3501_s30 + $0x698] sm:$0xff]  ;;  %v908_v28 = vld [vmem:[%s3501_s30 + $0x2a0] sm:$0xff] }
 0x15e   : > { %1329 = vmatmul.mubr.f32.gmra.mrb[52].mxu0 %v954_v25  ;;  %v1034_v25 = vld [vmem:[%s3501_s30 + $0x690] sm:$0xff] }
 0x15f   : > { %1684 = vmatmul.mubr.f32.gmra.mrb[52].mxu1 %v1016_v29  ;;  %1333 = vmatprep.mubr.f32.mxu0 %v960_v30  ;;  %v913_v29 = vld [vmem:[%s3501_s30 + $0x2c8] sm:$0xff]  ;;  %v1040_v30 = vld [vmem:[%s3501_s30 + $0x6c0] sm:$0xff] }
 0x160   : > { %1688 = vmatprep.mubr.f32.mxu1 %v1022_v32  ;;  %v918_v32 = vld [vmem:[%s3501_s30 + $0x2f0] sm:$0xff] }
 0x162   : > { %1334 = vmatmul.mubr.f32.gmra.mrb[54].mxu0 %v959_v31  ;;  %v1039_v31 = vld [vmem:[%s3501_s30 + $0x6b8] sm:$0xff] }
 0x163   : > { %1689 = vmatmul.mubr.f32.gmra.mrb[54].mxu1 %v1021_v33  ;;  %1338 = vmatprep.mubr.f32.mxu0 %v965_v34  ;;  %v923_v33 = vld [vmem:[%s3501_s30 + $0x318] sm:$0xff]  ;;  %v1045_v34 = vld [vmem:[%s3501_s30 + $0x6e8] sm:$0xff] }
 0x164   : > { %1693 = vmatprep.mubr.f32.mxu1 %v1027_v35  ;;  %v928_v35 = vld [vmem:[%s3501_s30 + $0x340] sm:$0xff] }
 0x166   : > { %1339 = vmatmul.mubr.f32.gmra.mrb[56].mxu0 %v964_v37  ;;  %v1044_v37 = vld [vmem:[%s3501_s30 + $0x6e0] sm:$0xff] }
 0x167   : > { %1694 = vmatmul.mubr.f32.gmra.mrb[56].mxu1 %v1026_v47  ;;  %1343 = vmatprep.mubr.f32.mxu0 %v970_v36  ;;  %v933_v47 = vld [vmem:[%s3501_s30 + $0x368] sm:$0xff]  ;;  %v1050_v36 = vld [vmem:[%s3501_s30 + $0x710] sm:$0x1] }
 0x168   : > { %1698 = vmatprep.mubr.f32.mxu1 %v1032_v38  ;;  %v938_v38 = vld [vmem:[%s3501_s30 + $0x390] sm:$0xff] }
 0x16a   : > { %1344 = vmatmul.mubr.f32.gmra.mrb[58].mxu0 %v969_v44  ;;  %v1049_v44 = vld [vmem:[%s3501_s30 + $0x708] sm:$0x1] }
 0x16b   : > { %1699 = vmatmul.mubr.f32.gmra.mrb[58].mxu1 %v1031_v39  ;;  %1348 = vmatprep.mubr.f32.mxu0 %v975_v40  ;;  %v943_v39 = vld [vmem:[%s3501_s30 + $0x3b8] sm:$0xff] }
 0x16c   : > { %1703 = vmatprep.mubr.f32.mxu1 %v1037_v41  ;;  %v827_v40 = vld [vmem:[%s3501_s30 + $0x18] sm:$0xff]  ;;  %v948_v41 = vld [vmem:[%s3501_s30 + $0x3e0] sm:$0xff] }
 0x16e   : > { %1349 = vmatmul.mubr.f32.gmra.mrb[60].mxu0 %v974_v52  ;;  %v826_v52 = vld [vmem:[%s3501_s30 + $0x10] sm:$0xff] }
 0x16f   : > { %1704 = vmatmul.mubr.f32.gmra.mrb[60].mxu1 %v1036_v43  ;;  %1353 = vmatprep.mubr.f32.mxu0 %v980_v45  ;;  %v953_v43 = vld [vmem:[%s3501_s30 + $0x408] sm:$0xff]  ;;  %v832_v45 = vld [vmem:[%s3501_s30 + $0x40] sm:$0xff] }
 0x170   : > { %1708 = vmatprep.mubr.f32.mxu1 %v1042_v46  ;;  %v958_v46 = vld [vmem:[%s3501_s30 + $0x430] sm:$0xff] }
 0x172   : > { %1354 = vmatmul.mubr.f32.gmra.mrb[62].mxu0 %v979_v59  ;;  %v831_v59 = vld [vmem:[%s3501_s30 + $0x38] sm:$0xff] }
 0x173   : > { %1709 = vmatmul.mubr.f32.gmra.mrb[62].mxu1 %v1041_v48  ;;  %1358 = vmatprep.mubr.f32.mxu0 %v985_v49  ;;  %v963_v48 = vld [vmem:[%s3501_s30 + $0x458] sm:$0xff]  ;;  %v837_v49 = vld [vmem:[%s3501_s30 + $0x68] sm:$0xff] }
 0x174   : > { %1713 = vmatprep.mubr.f32.mxu1 %v1047_v50  ;;  %v968_v50 = vld [vmem:[%s3501_s30 + $0x480] sm:$0xff] }
 0x176   : > { %1359 = vmatmul.mubr.f32.gmra.mrb[64].mxu0 %v984_v2  ;;  %v836_v2 = vld [vmem:[%s3501_s30 + $0x60] sm:$0xff] }
 0x177   : > { %1714 = vmatmul.mubr.f32.gmra.mrb[64].mxu1 %v1046_v51  ;;  %1363 = vmatprep.mubr.f32.mxu0 %v990_v53  ;;  %v973_v51 = vld [vmem:[%s3501_s30 + $0x4a8] sm:$0xff]  ;;  %v842_v53 = vld [vmem:[%s3501_s30 + $0x90] sm:$0xff] }
 0x178   : > { %1718 = vmatprep.mubr.f32.mxu1 %v1052_v54  ;;  %v978_v54 = vld [vmem:[%s3501_s30 + $0x4d0] sm:$0xff] }
 0x17a   : > { %1364 = vmatmul.mubr.f32.gmra.mrb[66].mxu0 %v989_v42  ;;  %v841_v42 = vld [vmem:[%s3501_s30 + $0x88] sm:$0xff] }
 0x17b   : > { %1719 = vmatmul.mubr.f32.gmra.mrb[66].mxu1 %v1051_v9  ;;  %1368 = vmatprep.mubr.f32.mxu0 %v995_v55  ;;  %v983_v9 = vld [vmem:[%s3501_s30 + $0x4f8] sm:$0xff] }
 0x17c   : > { %2534 = vmatprep.mubr.f32.mxu1 %v828_v56  ;;  %v847_v55 = vld [vmem:[%s3501_s30 + $0xb8] sm:$0xff]  ;;  %v988_v56 = vld [vmem:[%s3501_s30 + $0x520] sm:$0xff] }
 0x17e   : > { %1369 = vmatmul.mubr.f32.gmra.mrb[68].mxu0 %v994_v58  ;;  %v846_v58 = vld [vmem:[%s3501_s30 + $0xb0] sm:$0xff] }
 0x17f   : > { %2535 = vmatmul.mubr.f32.vlgmr.msra.gmra.mrb[68].mxu1 %v833_v18  ;;  %1373 = vmatprep.mubr.f32.mxu0 %v1000_v60  ;;  %v993_v18 = vld [vmem:[%s3501_s30 + $0x548] sm:$0xff]  ;;  %v852_v60 = vld [vmem:[%s3501_s30 + $0xe0] sm:$0xff] }
 0x180   : > { %2537 = vmatprep.mubr.f32.mxu1 %v838_v57  ;;  %v998_v57 = vld [vmem:[%s3501_s30 + $0x570] sm:$0xff] }
 0x182   : > { %1374 = vmatmul.mubr.f32.gmra.mrb[70].mxu0 %v999_v61  ;;  %v851_v61 = vld [vmem:[%s3501_s30 + $0xd8] sm:$0xff] }
 0x183   : > { %2538 = vmatmul.mubr.f32.gmra.mrb[70].mxu1 %v843_v62  ;;  %1378 = vmatprep.mubr.f32.mxu0 %v1005_v0  ;;  %v1003_v62 = vld [vmem:[%s3501_s30 + $0x598] sm:$0xff]  ;;  %v857_v0 = vld [vmem:[%s3501_s30 + $0x108] sm:$0xff] }
 0x184   : > { %2540 = vmatprep.mubr.f32.mxu1 %v848_v1  ;;  %v1008_v1 = vld [vmem:[%s3501_s30 + $0x5c0] sm:$0xff] }
 0x186   : > { %1379 = vmatmul.mubr.f32.gmra.mrb[72].mxu0 %v1004_v3  ;;  %v856_v3 = vld [vmem:[%s3501_s30 + $0x100] sm:$0xff] }
 0x187   : > { %2541 = vmatmul.mubr.f32.gmra.mrb[72].mxu1 %v853_v4  ;;  %1383 = vmatprep.mubr.f32.mxu0 %v1010_v63  ;;  %v1013_v4 = vld [vmem:[%s3501_s30 + $0x5e8] sm:$0xff]  ;;  %v862_v63 = vld [vmem:[%s3501_s30 + $0x130] sm:$0xff] }
 0x188   : > { %2543 = vmatprep.mubr.f32.mxu1 %v858_v6  ;;  %v1018_v6 = vld [vmem:[%s3501_s30 + $0x610] sm:$0xff] }
 0x18a   : > { %1384 = vmatmul.mubr.f32.gmra.mrb[74].mxu0 %v1009_v7  ;;  %v861_v7 = vld [vmem:[%s3501_s30 + $0x128] sm:$0xff] }
 0x18b   : > { %2544 = vmatmul.mubr.f32.gmra.mrb[74].mxu1 %v863_v8  ;;  %1388 = vmatprep.mubr.f32.mxu0 %v1015_v10  ;;  %v1023_v8 = vld [vmem:[%s3501_s30 + $0x638] sm:$0xff] }
 0x18c   : > { %2546 = vmatprep.mubr.f32.mxu1 %v868_v12  ;;  %v867_v10 = vld [vmem:[%s3501_s30 + $0x158] sm:$0xff]  ;;  %v1028_v12 = vld [vmem:[%s3501_s30 + $0x660] sm:$0xff] }
 0x18e   : > { %1389 = vmatmul.mubr.f32.gmra.mrb[76].mxu0 %v1014_v13 }
 0x18f   : > { %2547 = vmatmul.mubr.f32.gmra.mrb[76].mxu1 %v873_v5  ;;  %1393 = vmatprep.mubr.f32.mxu0 %v1020_v14  ;;  %v866_v14 = vld [vmem:[%s3501_s30 + $0x150] sm:$0xff] }
 0x190   : > { %2549 = vmatprep.mubr.f32.mxu1 %v878_v15  ;;  %v1033_v15 = vld [vmem:[%s3501_s30 + $0x688] sm:$0xff] }
 0x192   : > { %1394 = vmatmul.mubr.f32.gmra.mrb[78].mxu0 %v1019_v16  ;;  %v872_v16 = vld [vmem:[%s3501_s30 + $0x180] sm:$0xff] }
 0x193   : > { %2550 = vmatmul.mubr.f32.gmra.mrb[78].mxu1 %v883_v17  ;;  %1398 = vmatprep.mubr.f32.mxu0 %v1025_v20  ;;  %v1038_v17 = vld [vmem:[%s3501_s30 + $0x6b0] sm:$0xff] }
 0x194   : > { %2552 = vmatprep.mubr.f32.mxu1 %v888_v11 }
 0x196   : > { %1399 = vmatmul.mubr.f32.gmra.mrb[80].mxu0 %v1024_v21  ;;  %v871_v21 = vld [vmem:[%s3501_s30 + $0x178] sm:$0xff] }
 0x197   : > { %2553 = vmatmul.mubr.f32.gmra.mrb[80].mxu1 %v893_v22  ;;  %1403 = vmatprep.mubr.f32.mxu0 %v1030_v23  ;;  %v1043_v22 = vld [vmem:[%s3501_s30 + $0x6d8] sm:$0xff]  ;;  %v877_v23 = vld [vmem:[%s3501_s30 + $0x1a8] sm:$0xff] }
 0x198   : > { %2555 = vmatprep.mubr.f32.mxu1 %v898_v24  ;;  %v1048_v24 = vld [vmem:[%s3501_s30 + $0x700] sm:$0xff] }
 0x19a   : > { %1404 = vmatmul.mubr.f32.gmra.mrb[82].mxu0 %v1029_v19 }
 0x19b   : > { %2556 = vmatmul.mubr.f32.gmra.mrb[82].mxu1 %v903_v26  ;;  %1408 = vmatprep.mubr.f32.mxu0 %v1035_v27  ;;  %v876_v27 = vld [vmem:[%s3501_s30 + $0x1a0] sm:$0xff] }
 0x19c   : > { %2558 = vmatprep.mubr.f32.mxu1 %v908_v28  ;;  %v1053_v28 = vld [vmem:[%s3501_s30 + $0x728] sm:$0x1] }
 0x19e   : > { %1409 = vmatmul.mubr.f32.gmra.mrb[84].mxu0 %v1034_v25  ;;  %v882_v25 = vld [vmem:[%s3501_s30 + $0x1d0] sm:$0xff] }
 0x19f   : > { %2559 = vmatmul.mubr.f32.gmra.mrb[84].mxu1 %v913_v29  ;;  %1413 = vmatprep.mubr.f32.mxu0 %v1040_v30 }
 0x1a0   : > { %2561 = vmatprep.mubr.f32.mxu1 %v918_v32  ;;  %v881_v32 = vld [vmem:[%s3501_s30 + $0x1c8] sm:$0xff] }
 0x1a2   : > { %1414 = vmatmul.mubr.f32.gmra.mrb[86].mxu0 %v1039_v31 }
 0x1a3   : > { %2562 = vmatmul.mubr.f32.gmra.mrb[86].mxu1 %v923_v33  ;;  %1418 = vmatprep.mubr.f32.mxu0 %v1045_v34 }
 0x1a4   : > { %2564 = vmatprep.mubr.f32.mxu1 %v928_v35 }
 0x1a6   : > { %1419 = vmatmul.mubr.f32.gmra.mrb[88].mxu0 %v1044_v37 }
 0x1a7   : > { %2565 = vmatmul.mubr.f32.gmra.mrb[88].mxu1 %v933_v47  ;;  %1423 = vmatprep.mubr.f32.mxu0 %v1050_v36 }
 0x1a8   : > { %2567 = vmatprep.mubr.f32.mxu1 %v938_v38 }
 0x1aa   : > { %1424 = vmatmul.mubr.f32.gmra.mrb[90].mxu0 %v1049_v44 }
 0x1ab   : > { %2568 = vmatmul.mubr.f32.gmra.mrb[90].mxu1 %v943_v39  ;;  %1493 = vmatprep.mubr.f32.mxu0 %v827_v40 }
 0x1ac   : > { %2570 = vmatprep.mubr.f32.mxu1 %v948_v41 }
 0x1ae   : > { %1494 = vmatmul.mubr.f32.vlgmr.msra.gmra.mrb[0].mxu0 %v826_v52 }
 0x1af   : > { %2571 = vmatmul.mubr.f32.gmra.mrb[92].mxu1 %v953_v43  ;;  %1498 = vmatprep.mubr.f32.mxu0 %v832_v45 }
 0x1b0   : > { %2573 = vmatprep.mubr.f32.mxu1 %v958_v46 }
 0x1b2   : > { %1499 = vmatmul.mubr.f32.gmra.mrb[2].mxu0 %v831_v59 }
 0x1b3   : > { %2574 = vmatmul.mubr.f32.gmra.mrb[94].mxu1 %v963_v48  ;;  %1503 = vmatprep.mubr.f32.mxu0 %v837_v49 }
 0x1b4   : > { %2576 = vmatprep.mubr.f32.mxu1 %v968_v50 }
 0x1b6   : > { %1504 = vmatmul.mubr.f32.gmra.mrb[4].mxu0 %v836_v2 }
 0x1b7   : > { %2577 = vmatmul.mubr.f32.gmra.mrb[96].mxu1 %v973_v51  ;;  %1508 = vmatprep.mubr.f32.mxu0 %v842_v53 }
 0x1b8   : > { %2579 = vmatprep.mubr.f32.mxu1 %v978_v54 }
 0x1ba   : > { %1509 = vmatmul.mubr.f32.gmra.mrb[6].mxu0 %v841_v42 }
 0x1bb   : > { %2580 = vmatmul.mubr.f32.gmra.mrb[98].mxu1 %v983_v9  ;;  %1513 = vmatprep.mubr.f32.mxu0 %v847_v55 }
 0x1bc   : > { %2582 = vmatprep.mubr.f32.mxu1 %v988_v56 }
 0x1be   : > { %1514 = vmatmul.mubr.f32.gmra.mrb[8].mxu0 %v846_v58 }
 0x1bf   : > { %2583 = vmatmul.mubr.f32.gmra.mrb[100].mxu1 %v993_v18  ;;  %1518 = vmatprep.mubr.f32.mxu0 %v852_v60 }
 0x1c0   : > { %2585 = vmatprep.mubr.f32.mxu1 %v998_v57 }
 0x1c2   : > { %1519 = vmatmul.mubr.f32.gmra.mrb[10].mxu0 %v851_v61 }
 0x1c3   : > { %2586 = vmatmul.mubr.f32.gmra.mrb[102].mxu1 %v1003_v62  ;;  %1523 = vmatprep.mubr.f32.mxu0 %v857_v0 }
 0x1c4   : > { %2588 = vmatprep.mubr.f32.mxu1 %v1008_v1 }
 0x1c6   : > { %1524 = vmatmul.mubr.f32.gmra.mrb[12].mxu0 %v856_v3 }
 0x1c7   : > { %2589 = vmatmul.mubr.f32.gmra.mrb[104].mxu1 %v1013_v4  ;;  %1528 = vmatprep.mubr.f32.mxu0 %v862_v63 }
 0x1c8   : > { %2591 = vmatprep.mubr.f32.mxu1 %v1018_v6 }
 0x1ca   : > { %1529 = vmatmul.mubr.f32.gmra.mrb[14].mxu0 %v861_v7  ;;  %v1555_v13 = vpop.f32.mrb[0].mxu1 }
 0x1cb   : > { %2592 = vmatmul.mubr.f32.gmra.mrb[106].mxu1 %v1023_v8  ;;  %1533 = vmatprep.mubr.f32.mxu0 %v867_v10  ;;  %v1557_v5 = vpop.f32.mrb[1].mxu1 }
 0x1cc   : > { %2594 = vmatprep.mubr.f32.mxu1 %v1028_v12 }
 0x1ce   : > { %1534 = vmatmul.mubr.f32.gmra.mrb[16].mxu0 %v866_v14  ;;  %v1560_v20 = vpop.f32.mrb[2].mxu1 }
 0x1cf   : > { %2595 = vmatmul.mubr.f32.gmra.mrb[108].mxu1 %v1033_v15  ;;  %1538 = vmatprep.mubr.f32.mxu0 %v872_v16  ;;  %v1562_v11 = vpop.f32.mrb[3].mxu1 }
 0x1d0   : > { %2597 = vmatprep.mubr.f32.mxu1 %v1038_v17 }
 0x1d2   : > { %1539 = vmatmul.mubr.f32.gmra.mrb[18].mxu0 %v871_v21  ;;  %v1565_v19 = vpop.f32.mrb[4].mxu1 }
 0x1d3   : > { %2598 = vmatmul.mubr.f32.gmra.mrb[110].mxu1 %v1043_v22  ;;  %1543 = vmatprep.mubr.f32.mxu0 %v877_v23  ;;  %v1567_v26 = vpop.f32.mrb[5].mxu1 }
 0x1d4   : > { %2600 = vmatprep.mubr.f32.mxu1 %v1048_v24 }
 0x1d6   : > { %1544 = vmatmul.mubr.f32.gmra.mrb[20].mxu0 %v876_v27  ;;  %v1570_v29 = vpop.f32.mrb[6].mxu1 }
 0x1d7   : > { %2601 = vmatmul.mubr.f32.gmra.mrb[112].mxu1 %v1053_v28  ;;  %1548 = vmatprep.mubr.f32.mxu0 %v882_v25  ;;  %v1572_v30 = vpop.f32.mrb[7].mxu1 }
 0x1da   : > { %1549 = vmatmul.mubr.f32.gmra.mrb[22].mxu0 %v881_v32  ;;  %v1575_v31 = vpop.f32.mrb[8].mxu1 }
 0x1db   : > { %v1577_v33 = vpop.f32.mrb[9].mxu1 }
 0x1de   : > { %v1580_v34 = vpop.f32.mrb[10].mxu1 }
 0x1df   : > { %v1582_v35 = vpop.f32.mrb[11].mxu1 }
 0x1e2   : > { %v1585_v37 = vpop.f32.mrb[12].mxu1 }
 0x1e3   : > { %v1587_v47 = vpop.f32.mrb[13].mxu1 }
 0x1e6   : > { %v1590_v36 = vpop.f32.mrb[14].mxu1 }
 0x1e7   : > { %v1592_v38 = vpop.f32.mrb[15].mxu1 }
 0x1ea   : > { %v1595_v44 = vpop.f32.mrb[16].mxu1 }
 0x1eb   : > { %v1597_v39 = vpop.f32.mrb[17].mxu1 }
 0x1ee   : > { %v1600_v40 = vpop.f32.mrb[18].mxu1 }
 0x1ef   : > { %v1602_v41 = vpop.f32.mrb[19].mxu1 }
 0x1f2   : > { %v1605_v52 = vpop.f32.mrb[20].mxu1 }
 0x1f3   : > { %v1607_v43 = vpop.f32.mrb[21].mxu1 }
 0x1f6   : > { %v1610_v45 = vpop.f32.mrb[22].mxu1 }
 0x1f7   : > { %v1612_v46 = vpop.f32.mrb[23].mxu1 }
 0x1f9   : > { %v1260_v59 = vpop.f32.mrb[24].mxu0 }
 0x1fa   : > { %v3972_v48 = vadd.f32 %v1555_v13, %v1260_v59  ;;  %v1262_v49 = vpop.f32.mrb[25].mxu0  ;;  %v1615_v50 = vpop.f32.mrb[24].mxu1 }
 0x1fb   : > { %v1617_v2 = vpop.f32.mrb[25].mxu1 }
 0x1fd   : > { %v1265_v51 = vpop.f32.mrb[26].mxu0 }
 0x1fe   : > { %v3974_v53 = vadd.f32 %v1560_v20, %v1265_v51  ;;  %v1267_v54 = vpop.f32.mrb[27].mxu0  ;;  %v1620_v42 = vpop.f32.mrb[26].mxu1 }
 0x1ff   : > { %v1622_v9 = vpop.f32.mrb[27].mxu1 }
 0x201   : > { %v1270_v55 = vpop.f32.mrb[28].mxu0 }
 0x202   : > { %v3976_v56 = vadd.f32 %v1565_v19, %v1270_v55  ;;  %v1272_v58 = vpop.f32.mrb[29].mxu0  ;;  %v1625_v18 = vpop.f32.mrb[28].mxu1 }
 0x203   : > { %v1627_v60 = vpop.f32.mrb[29].mxu1 }
 0x205   : > { %v1275_v57 = vpop.f32.mrb[30].mxu0 }
 0x206   : > { %v3978_v61 = vadd.f32 %v1570_v29, %v1275_v57  ;;  %v1277_v62 = vpop.f32.mrb[31].mxu0  ;;  %v1630_v0 = vpop.f32.mrb[30].mxu1 }
 0x207   : > { %v1632_v1 = vpop.f32.mrb[31].mxu1 }
 0x209   : > { %v1280_v3 = vpop.f32.mrb[32].mxu0 }
 0x20a   : > { %v3980_v4 = vadd.f32 %v1575_v31, %v1280_v3  ;;  %v1282_v63 = vpop.f32.mrb[33].mxu0  ;;  %v1635_v6 = vpop.f32.mrb[32].mxu1 }
 0x20b   : > { %v1637_v7 = vpop.f32.mrb[33].mxu1 }
 0x20d   : > { %v1285_v8 = vpop.f32.mrb[34].mxu0 }
 0x20e   : > { %v3982_v10 = vadd.f32 %v1580_v34, %v1285_v8  ;;  %v1287_v12 = vpop.f32.mrb[35].mxu0  ;;  %v1640_v13 = vpop.f32.mrb[34].mxu1 }
 0x20f   : > { %v1642_v5 = vpop.f32.mrb[35].mxu1 }
 0x211   : > { %v1290_v14 = vpop.f32.mrb[36].mxu0 }
 0x212   : > { %v3984_v15 = vadd.f32 %v1585_v37, %v1290_v14  ;;  %v1292_v16 = vpop.f32.mrb[37].mxu0  ;;  %v1645_v17 = vpop.f32.mrb[36].mxu1 }
 0x213   : > { %v1647_v20 = vpop.f32.mrb[37].mxu1 }
 0x215   : > { %v1295_v11 = vpop.f32.mrb[38].mxu0 }
 0x216   : > { %v3986_v21 = vadd.f32 %v1590_v36, %v1295_v11  ;;  %v1297_v22 = vpop.f32.mrb[39].mxu0  ;;  %v1650_v23 = vpop.f32.mrb[38].mxu1 }
 0x217   : > { %v1652_v24 = vpop.f32.mrb[39].mxu1 }
 0x219   : > { %v1300_v19 = vpop.f32.mrb[40].mxu0 }
 0x21a   : > { %v3988_v26 = vadd.f32 %v1595_v44, %v1300_v19  ;;  %v1302_v27 = vpop.f32.mrb[41].mxu0  ;;  %v1655_v28 = vpop.f32.mrb[40].mxu1 }
 0x21b   : > { %v1657_v25 = vpop.f32.mrb[41].mxu1 }
 0x21d   : > { %v1305_v29 = vpop.f32.mrb[42].mxu0 }
 0x21e   : > { %v3990_v30 = vadd.f32 %v1600_v40, %v1305_v29  ;;  %v1307_v32 = vpop.f32.mrb[43].mxu0  ;;  %v1660_v31 = vpop.f32.mrb[42].mxu1 }
 0x21f   : > { %v1662_v33 = vpop.f32.mrb[43].mxu1 }
 0x221   : > { %v1310_v34 = vpop.f32.mrb[44].mxu0 }
 0x222   : > { %v3992_v35 = vadd.f32 %v1605_v52, %v1310_v34  ;;  %v1312_v37 = vpop.f32.mrb[45].mxu0  ;;  %v1665_v47 = vpop.f32.mrb[44].mxu1 }
 0x223   : > { %v1667_v36 = vpop.f32.mrb[45].mxu1 }
 0x225   : > { %v1315_v38 = vpop.f32.mrb[46].mxu0 }
 0x226   : > { %v3994_v39 = vadd.f32 %v1610_v45, %v1315_v38  ;;  %v1317_v44 = vpop.f32.mrb[47].mxu0  ;;  %v1670_v41 = vpop.f32.mrb[46].mxu1 }
 0x227   : > { %v1672_v43 = vpop.f32.mrb[47].mxu1 }
 0x229   : > { %v1320_v46 = vpop.f32.mrb[48].mxu0 }
 0x22a   : > { %v3996_v59 = vadd.f32 %v1615_v50, %v1320_v46  ;;  %v1322_v40 = vpop.f32.mrb[49].mxu0  ;;  %v1675_v49 = vpop.f32.mrb[48].mxu1 }
 0x22b   : > { %v1677_v2 = vpop.f32.mrb[49].mxu1 }
 0x22d   : > { %v1325_v51 = vpop.f32.mrb[50].mxu0 }
 0x22e   : > { %v3998_v54 = vadd.f32 %v1620_v42, %v1325_v51  ;;  %v1327_v52 = vpop.f32.mrb[51].mxu0  ;;  %v1680_v9 = vpop.f32.mrb[50].mxu1 }
 0x22f   : > { %v1682_v55 = vpop.f32.mrb[51].mxu1 }
 0x231   : > { %v1330_v58 = vpop.f32.mrb[52].mxu0 }
 0x232   : > { %v4000_v60 = vadd.f32 %v1625_v18, %v1330_v58  ;;  %v1332_v45 = vpop.f32.mrb[53].mxu0  ;;  %v1685_v57 = vpop.f32.mrb[52].mxu1 }
 0x233   : > { %v1687_v62 = vpop.f32.mrb[53].mxu1 }
 0x235   : > { %v1335_v1 = vpop.f32.mrb[54].mxu0 }
 0x236   : > { %v4002_v3 = vadd.f32 %v1630_v0, %v1335_v1  ;;  %v1337_v50 = vpop.f32.mrb[55].mxu0  ;;  %v1690_v63 = vpop.f32.mrb[54].mxu1 }
 0x237   : > { %v1692_v7 = vpop.f32.mrb[55].mxu1 }
 0x239   : > { %v1340_v8 = vpop.f32.mrb[56].mxu0 }
 0x23a   : > { %v4004_v12 = vadd.f32 %v1635_v6, %v1340_v8  ;;  %v1342_v42 = vpop.f32.mrb[57].mxu0  ;;  %v1695_v5 = vpop.f32.mrb[56].mxu1 }
 0x23b   : > { %v1697_v14 = vpop.f32.mrb[57].mxu1 }
 0x23d   : > { %v1345_v16 = vpop.f32.mrb[58].mxu0 }
 0x23e   : > { %v4006_v20 = vadd.f32 %v1640_v13, %v1345_v16  ;;  %v1347_v18 = vpop.f32.mrb[59].mxu0  ;;  %v4008_v11 = vpop.f32.mrb[58].mxu1 }
 0x23f   : > { %v1702_v22 = vpop.f32.mrb[59].mxu1 }
 0x241   : > { %v1350_v24 = vpop.f32.mrb[60].mxu0 }
 0x242   : > { %v4010_v19 = vadd.f32 %v1645_v17, %v1350_v24  ;;  %v1352_v0 = vpop.f32.mrb[61].mxu0  ;;  %v4012_v27 = vpop.f32.mrb[60].mxu1 }
 0x243   : > { %v1707_v25 = vpop.f32.mrb[61].mxu1 }
 0x245   : > { %v1355_v29 = vpop.f32.mrb[62].mxu0 }
 0x246   : > { %v4014_v6 = vadd.f32 %v1650_v23, %v1355_v29  ;;  %v1357_v32 = vpop.f32.mrb[63].mxu0  ;;  %v4016_v33 = vpop.f32.mrb[62].mxu1 }
 0x247   : > { %v1712_v34 = vpop.f32.mrb[63].mxu1 }
 0x249   : > { %v1360_v13 = vpop.f32.mrb[64].mxu0 }
 0x24a   : > { %v4018_v37 = vadd.f32 %v1655_v28, %v1360_v13  ;;  %v1362_v36 = vpop.f32.mrb[65].mxu0  ;;  %v4020_v38 = vpop.f32.mrb[64].mxu1 }
 0x24b   : > { %v1717_v44 = vpop.f32.mrb[65].mxu1 }
 0x24d   : > { %v1365_v17 = vpop.f32.mrb[66].mxu0 }
 0x24e   : > { %v4022_v43 = vadd.f32 %v1660_v31, %v1365_v17  ;;  %v1367_v46 = vpop.f32.mrb[67].mxu0  ;;  %v4024_v40 = vpop.f32.mrb[66].mxu1 }
 0x24f   : > { %v1722_v2 = vpop.f32.mrb[67].mxu1 }
 0x251   : > { %v1370_v23 = vpop.f32.mrb[68].mxu0 }
 0x252   : > { %v4026_v51 = vadd.f32 %v1665_v47, %v1370_v23  ;;  %v1372_v52 = vpop.f32.mrb[69].mxu0  ;;  %v4028_v55 = vpop.f32.mrb[68].mxu1 }
 0x253   : > { %v4030_v58 = vpop.f32.mrb[69].mxu1  ;;  %v790_v52 = vld [vmem:[%s3499_s29 + $0x60] sm:$0xff] }
 0x255   : > { %v1375_v28 = vpop.f32.mrb[70].mxu0 }
 0x256   : > { %v4032_v45 = vadd.f32 %v1670_v41, %v1375_v28  ;;  %v1377_v62 = vpop.f32.mrb[71].mxu0  ;;  %v4034_v1 = vpop.f32.mrb[70].mxu1 }
 0x257   : > { %v4036_v31 = vpop.f32.mrb[71].mxu1 }
 0x259   : > { %v1380_v50 = vpop.f32.mrb[72].mxu0 }
 0x25a   : > { %v4038_v7 = vadd.f32 %v1675_v49, %v1380_v50  ;;  %v1382_v8 = vpop.f32.mrb[73].mxu0  ;;  %v4040_v42 = vpop.f32.mrb[72].mxu1 }
 0x25b   : > { %v4042_v47 = vpop.f32.mrb[73].mxu1 }
 0x25d   : > { %v1385_v14 = vpop.f32.mrb[74].mxu0 }
 0x25e   : > { %v4044_v16 = vadd.f32 %v1680_v9, %v1385_v14  ;;  %v1387_v18 = vpop.f32.mrb[75].mxu0  ;;  %v4046_v41 = vpop.f32.mrb[74].mxu1 }
 0x25f   : > { %v4048_v22 = vpop.f32.mrb[75].mxu1 }
 0x261   : > { %v1390_v24 = vpop.f32.mrb[76].mxu0 }
 0x262   : > { %v4050_v0 = vadd.f32 %v1685_v57, %v1390_v24  ;;  %v1392_v49 = vpop.f32.mrb[77].mxu0  ;;  %v4052_v25 = vpop.f32.mrb[76].mxu1  ;;  %v791_v57 = vld [vmem:[%s3499_s29 + $0x68] sm:$0xff] }
 0x263   : > { %v4054_v29 = vpop.f32.mrb[77].mxu1 }
 0x265   : > { %v1395_v32 = vpop.f32.mrb[78].mxu0 }
 0x266   : > { %v4056_v34 = vadd.f32 %v1690_v63, %v1395_v32  ;;  %v1397_v9 = vpop.f32.mrb[79].mxu0  ;;  %v4058_v13 = vpop.f32.mrb[78].mxu1 }
 0x267   : > { %v4060_v36 = vpop.f32.mrb[79].mxu1 }
 0x269   : > { %v1400_v44 = vpop.f32.mrb[80].mxu0 }
 0x26a   : > { %v4062_v17 = vadd.f32 %v1695_v5, %v1400_v44  ;;  %v2554_v46 = vpop.f32.mrb[80].mxu1  ;;  %v1402_v2 = vpop.f32.mrb[81].mxu0  ;;  %v793_v5 = vld [vmem:[%s3499_s29 + $0x78] sm:$0xff] }
 0x26b   : > { %v1856_v23 = vadd.f32 %v2554_v46, %v3974_v53  ;;  %v1850_v63 = vpop.f32.mrb[81].mxu1  ;;  %v792_v53 = vld [vmem:[%s3499_s29 + $0x70] sm:$0xff]  ;;  %v795_v46 = vld [vmem:[%s3499_s29 + $0x88] sm:$0xff] }
 0x26c   : > { %v1851_v28 = vadd.f32 %v1850_v63, %v3972_v48 }
 0x26d   : > { %v2032_v62 = vadd.f32 %v1856_v23, %v791_v57  ;;  %v1405_v50 = vpop.f32.mrb[82].mxu0 }
 0x26e   : > { %v2031_v8 = vadd.f32 %v1851_v28, %v790_v52  ;;  %v4069_v14 = vadd.f32 %v4008_v11, %v1405_v50  ;;  %v2557_v18 = vpop.f32.mrb[82].mxu1  ;;  %v1407_v24 = vpop.f32.mrb[83].mxu0  ;;  %v794_v52 = vld [vmem:[%s3499_s29 + $0x80] sm:$0xff] }
 0x26f   : > { %2078 = vst [vmem:[%s3499_s29 + $0x68] sm:$0xff] %v2032_v62  ;;  %v1866_v49 = vadd.f32 %v2557_v18, %v3978_v61  ;;  %v1860_v32 = vpop.f32.mrb[83].mxu1  ;;  %v796_v24 = vld [vmem:[%s3499_s29 + $0x90] sm:$0xff] }
 0x270   : > { %2077 = vst [vmem:[%s3499_s29 + $0x60] sm:$0xff] %v2031_v8  ;;  %v1861_v48 = vadd.f32 %v1860_v32, %v3976_v56  ;;  %v797_v8 = vld [vmem:[%s3499_s29 + $0x98] sm:$0xff] }
 0x271   : > { %v2034_v9 = vadd.f32 %v1866_v49, %v793_v5  ;;  %v1410_v44 = vpop.f32.mrb[84].mxu0 }
 0x272   : > { %v2033_v57 = vadd.f32 %v1861_v48, %v792_v53  ;;  %v4078_v11 = vadd.f32 %v4012_v27, %v1410_v44  ;;  %v2560_v2 = vpop.f32.mrb[84].mxu1  ;;  %v1412_v23 = vpop.f32.mrb[85].mxu0 }
 0x273   : > { %2080 = vst [vmem:[%s3499_s29 + $0x78] sm:$0xff] %v2034_v9  ;;  %v1876_v61 = vadd.f32 %v2560_v2, %v3982_v10  ;;  %v1870_v63 = vpop.f32.mrb[85].mxu1  ;;  %v799_v9 = vld [vmem:[%s3499_s29 + $0xa8] sm:$0xff] }
 0x274   : > { %2079 = vst [vmem:[%s3499_s29 + $0x70] sm:$0xff] %v2033_v57  ;;  %v1871_v56 = vadd.f32 %v1870_v63, %v3980_v4  ;;  %v801_v63 = vld [vmem:[%s3499_s29 + $0xb8] sm:$0xff] }
 0x275   : > { %v2036_v28 = vadd.f32 %v1876_v61, %v795_v46  ;;  %v1415_v62 = vpop.f32.mrb[86].mxu0  ;;  %v798_v46 = vld [vmem:[%s3499_s29 + $0xa0] sm:$0xff] }
 0x276   : > { %v2035_v50 = vadd.f32 %v1871_v56, %v794_v52  ;;  %v4087_v27 = vadd.f32 %v4016_v33, %v1415_v62  ;;  %v2563_v5 = vpop.f32.mrb[86].mxu1  ;;  %v1417_v18 = vpop.f32.mrb[87].mxu0  ;;  %v800_v62 = vld [vmem:[%s3499_s29 + $0xb0] sm:$0xff] }
 0x277   : > { %2082 = vst [vmem:[%s3499_s29 + $0x88] sm:$0xff] %v2036_v28  ;;  %v1886_v10 = vadd.f32 %v2563_v5, %v3986_v21  ;;  %v1880_v49 = vpop.f32.mrb[87].mxu1  ;;  %v778_v5 = vld [vmem:[%s3499_s29] sm:$0xff] }
 0x278   : > { %2081 = vst [vmem:[%s3499_s29 + $0x80] sm:$0xff] %v2035_v50  ;;  %v1881_v4 = vadd.f32 %v1880_v49, %v3984_v15 }
 0x279   : > { %v2038_v53 = vadd.f32 %v1886_v10, %v797_v8  ;;  %v1420_v32 = vpop.f32.mrb[88].mxu0 }
 0x27a   : > { %v2037_v48 = vadd.f32 %v1881_v4, %v796_v24  ;;  %v4096_v33 = vadd.f32 %v4020_v38, %v1420_v32  ;;  %v2566_v44 = vpop.f32.mrb[88].mxu1  ;;  %v1422_v57 = vpop.f32.mrb[89].mxu0  ;;  %v803_v24 = vld [vmem:[%s3499_s29 + $0xc8] sm:$0xff] }
 0x27b   : > { %2084 = vst [vmem:[%s3499_s29 + $0x98] sm:$0xff] %v2038_v53  ;;  %v1896_v21 = vadd.f32 %v2566_v44, %v3990_v30  ;;  %v1890_v2 = vpop.f32.mrb[89].mxu1  ;;  %v802_v53 = vld [vmem:[%s3499_s29 + $0xc0] sm:$0xff]  ;;  %v779_v44 = vld [vmem:[%s3499_s29 + $0x8] sm:$0xff] }
 0x27c   : > { %2083 = vst [vmem:[%s3499_s29 + $0x90] sm:$0xff] %v2037_v48  ;;  %v1891_v15 = vadd.f32 %v1890_v2, %v3988_v26 }
 0x27d   : > { %v2040_v23 = vadd.f32 %v1896_v21, %v799_v9  ;;  %v1425_v61 = vpop.f32.mrb[90].mxu0 }
 0x27e   : > { %v2039_v52 = vadd.f32 %v1891_v15, %v798_v46  ;;  %v4105_v38 = vadd.f32 %v4024_v40, %v1425_v61  ;;  %v2569_v56 = vpop.f32.mrb[90].mxu1  ;;  %v1427_v28 = vpop.f32.mrb[91].mxu0  ;;  %v805_v46 = vld [vmem:[%s3499_s29 + $0xd8] sm:$0xff] }
 0x27f   : > { %2086 = vst [vmem:[%s3499_s29 + $0xa8] sm:$0xff] %v2040_v23  ;;  %v1906_v30 = vadd.f32 %v2569_v56, %v3994_v39  ;;  %v1900_v50 = vpop.f32.mrb[91].mxu1  ;;  %v804_v23 = vld [vmem:[%s3499_s29 + $0xd0] sm:$0xff] }
 0x280   : > { %2085 = vst [vmem:[%s3499_s29 + $0xa0] sm:$0xff] %v2039_v52  ;;  %v1901_v26 = vadd.f32 %v1900_v50, %v3992_v35  ;;  %v780_v56 = vld [vmem:[%s3499_s29 + $0x10] sm:$0xff] }
 0x281   : > { %v2042_v8 = vadd.f32 %v1906_v30, %v801_v63  ;;  %v1495_v18 = vpop.f32.mrb[0].mxu0 }
 0x282   : > { %v2041_v40 = vadd.f32 %v1901_v26, %v800_v62  ;;  %v1791_v10 = vadd.f32 %v4030_v58, %v1495_v18  ;;  %v2572_v49 = vpop.f32.mrb[92].mxu1  ;;  %v1497_v4 = vpop.f32.mrb[1].mxu0  ;;  %v807_v62 = vld [vmem:[%s3499_s29 + $0xe8] sm:$0xff] }
 0x283   : > { %2088 = vst [vmem:[%s3499_s29 + $0xb8] sm:$0xff] %v2042_v8  ;;  %v1916_v39 = vadd.f32 %v2572_v49, %v3998_v54  ;;  %v1910_v32 = vpop.f32.mrb[93].mxu1  ;;  %v806_v8 = vld [vmem:[%s3499_s29 + $0xe0] sm:$0xff]  ;;  %v809_v4 = vld [vmem:[%s3499_s29 + $0xf8] sm:$0xff] }
 0x284   : > { %2087 = vst [vmem:[%s3499_s29 + $0xb0] sm:$0xff] %v2041_v40  ;;  %v2019_v35 = vadd.f32 %v1791_v10, %v778_v5  ;;  %v1911_v48 = vadd.f32 %v1910_v32, %v3996_v59  ;;  %v781_v10 = vld [vmem:[%s3499_s29 + $0x18] sm:$0xff]  ;;  %v808_v32 = vld [vmem:[%s3499_s29 + $0xf0] sm:$0xff] }
 0x285   : > { %v2044_v9 = vadd.f32 %v1916_v39, %v803_v24  ;;  %v1500_v58 = vpop.f32.mrb[2].mxu0 }
 0x286   : > { %2065 = vst [vmem:[%s3499_s29] sm:$0xff] %v2019_v35  ;;  %v2043_v57 = vadd.f32 %v1911_v48, %v802_v53  ;;  %v1796_v21 = vadd.f32 %v4028_v55, %v1500_v58  ;;  %v2575_v54 = vpop.f32.mrb[94].mxu1  ;;  %v1502_v2 = vpop.f32.mrb[3].mxu0 }
 0x287   : > { %2090 = vst [vmem:[%s3499_s29 + $0xc8] sm:$0xff] %v2044_v9  ;;  %v1926_v15 = vadd.f32 %v2575_v54, %v4002_v3  ;;  %v1920_v59 = vpop.f32.mrb[95].mxu1  ;;  %v810_v2 = vld [vmem:[%s3499_s29 + $0x100] sm:$0xff] }
 0x288   : > { %2089 = vst [vmem:[%s3499_s29 + $0xc0] sm:$0xff] %v2043_v57  ;;  %v2020_v61 = vadd.f32 %v1796_v21, %v779_v44  ;;  %v1921_v52 = vadd.f32 %v1920_v59, %v4000_v60  ;;  %v782_v44 = vld [vmem:[%s3499_s29 + $0x20] sm:$0xff]  ;;  %v811_v21 = vld [vmem:[%s3499_s29 + $0x108] sm:$0xff] }
 0x289   : > { %v2046_v63 = vadd.f32 %v1926_v15, %v805_v46  ;;  %v1505_v55 = vpop.f32.mrb[4].mxu0 }
 0x28a   : > { %2066 = vst [vmem:[%s3499_s29 + $0x8] sm:$0xff] %v2020_v61  ;;  %v2045_v28 = vadd.f32 %v1921_v52, %v804_v23  ;;  %v1801_v30 = vadd.f32 %v4036_v31, %v1505_v55  ;;  %v2578_v3 = vpop.f32.mrb[96].mxu1  ;;  %v1507_v50 = vpop.f32.mrb[5].mxu0  ;;  %v783_v61 = vld [vmem:[%s3499_s29 + $0x28] sm:$0xff] }
 0x28b   : > { %2092 = vst [vmem:[%s3499_s29 + $0xd8] sm:$0xff] %v2046_v63  ;;  %v1936_v26 = vadd.f32 %v2578_v3, %v4006_v20  ;;  %v1930_v60 = vpop.f32.mrb[97].mxu1 }
 0x28c   : > { %2091 = vst [vmem:[%s3499_s29 + $0xd0] sm:$0xff] %v2045_v28  ;;  %v2021_v5 = vadd.f32 %v1801_v30, %v780_v56  ;;  %v1931_v18 = vadd.f32 %v1930_v60, %v4004_v12  ;;  %v813_v56 = vld [vmem:[%s3499_s29 + $0x118] sm:$0xff]  ;;  %v812_v30 = vld [vmem:[%s3499_s29 + $0x110] sm:$0xff] }
 0x28d   : > { %v2048_v40 = vadd.f32 %v1936_v26, %v807_v62  ;;  %v1510_v31 = vpop.f32.mrb[6].mxu0  ;;  %v784_v26 = vld [vmem:[%s3499_s29 + $0x30] sm:$0xff] }
 0x28e   : > { %2067 = vst [vmem:[%s3499_s29 + $0x10] sm:$0xff] %v2021_v5  ;;  %v2047_v24 = vadd.f32 %v1931_v18, %v806_v8  ;;  %v1806_v49 = vadd.f32 %v4034_v1, %v1510_v31  ;;  %v2581_v20 = vpop.f32.mrb[98].mxu1  ;;  %v1512_v39 = vpop.f32.mrb[7].mxu0  ;;  %v815_v5 = vld [vmem:[%s3499_s29 + $0x128] sm:$0xff] }
 0x28f   : > { %2094 = vst [vmem:[%s3499_s29 + $0xe8] sm:$0xff] %v2048_v40  ;;  %v1946_v53 = vadd.f32 %v2581_v20, %v4014_v6  ;;  %v1940_v12 = vpop.f32.mrb[99].mxu1 }
 0x290   : > { %2093 = vst [vmem:[%s3499_s29 + $0xe0] sm:$0xff] %v2047_v24  ;;  %v2022_v35 = vadd.f32 %v1806_v49, %v781_v10  ;;  %v1941_v48 = vadd.f32 %v1940_v12, %v4010_v19  ;;  %v814_v10 = vld [vmem:[%s3499_s29 + $0x120] sm:$0xff] }
 0x291   : > { %v2050_v9 = vadd.f32 %v1946_v53, %v809_v4  ;;  %v1515_v1 = vpop.f32.mrb[8].mxu0  ;;  %v785_v4 = vld [vmem:[%s3499_s29 + $0x38] sm:$0xff] }
 0x292   : > { %2068 = vst [vmem:[%s3499_s29 + $0x18] sm:$0xff] %v2022_v35  ;;  %v2049_v58 = vadd.f32 %v1941_v48, %v808_v32  ;;  %v1811_v57 = vadd.f32 %v4042_v47, %v1515_v1  ;;  %v2584_v6 = vpop.f32.mrb[100].mxu1  ;;  %v1517_v46 = vpop.f32.mrb[9].mxu0  ;;  %v817_v53 = vld [vmem:[%s3499_s29 + $0x138] sm:$0xff]  ;;  %v816_v35 = vld [vmem:[%s3499_s29 + $0x130] sm:$0xff]  ;;  %v786_v1 = vld [vmem:[%s3499_s29 + $0x40] sm:$0xff] }
 0x293   : > { %2096 = vst [vmem:[%s3499_s29 + $0xf8] sm:$0xff] %v2050_v9  ;;  %v1956_v54 = vadd.f32 %v2584_v6, %v4022_v43  ;;  %v1950_v19 = vpop.f32.mrb[101].mxu1 }
 0x294   : > { %2095 = vst [vmem:[%s3499_s29 + $0xf0] sm:$0xff] %v2049_v58  ;;  %v2023_v15 = vadd.f32 %v1811_v57, %v782_v44  ;;  %v1951_v23 = vadd.f32 %v1950_v19, %v4018_v37 }
 0x295   : > { %v2052_v59 = vadd.f32 %v1956_v54, %v811_v21  ;;  %v1520_v47 = vpop.f32.mrb[10].mxu0  ;;  %v819_v21 = vld [vmem:[%s3499_s29 + $0x148] sm:$0xff]  ;;  %v818_v54 = vld [vmem:[%s3499_s29 + $0x140] sm:$0xff] }
 0x296   : > { %2069 = vst [vmem:[%s3499_s29 + $0x20] sm:$0xff] %v2023_v15  ;;  %v2051_v52 = vadd.f32 %v1951_v23, %v810_v2  ;;  %v1816_v63 = vadd.f32 %v4040_v42, %v1520_v47  ;;  %v2587_v43 = vpop.f32.mrb[102].mxu1  ;;  %v1522_v55 = vpop.f32.mrb[11].mxu0  ;;  %v787_v23 = vld [vmem:[%s3499_s29 + $0x48] sm:$0xff]  ;;  %v821_v47 = vld [vmem:[%s3499_s29 + $0x158] sm:$0xff] }
 0x297   : > { %2098 = vst [vmem:[%s3499_s29 + $0x108] sm:$0xff] %v2052_v59  ;;  %v1966_v28 = vadd.f32 %v2587_v43, %v4032_v45  ;;  %v1960_v37 = vpop.f32.mrb[103].mxu1 }
 0x298   : > { %2097 = vst [vmem:[%s3499_s29 + $0x100] sm:$0xff] %v2051_v52  ;;  %v2024_v62 = vadd.f32 %v1816_v63, %v783_v61  ;;  %v1961_v3 = vadd.f32 %v1960_v37, %v4026_v51 }
 0x299   : > { %v2054_v50 = vadd.f32 %v1966_v28, %v813_v56  ;;  %v1525_v42 = vpop.f32.mrb[12].mxu0  ;;  %v820_v56 = vld [vmem:[%s3499_s29 + $0x150] sm:$0xff] }
 0x29a   : > { %2070 = vst [vmem:[%s3499_s29 + $0x28] sm:$0xff] %v2024_v62  ;;  %v2053_v8 = vadd.f32 %v1961_v3, %v812_v30  ;;  %v1821_v60 = vadd.f32 %v4048_v22, %v1525_v42  ;;  %v2590_v45 = vpop.f32.mrb[104].mxu1  ;;  %v1527_v18 = vpop.f32.mrb[13].mxu0  ;;  %v788_v30 = vld [vmem:[%s3499_s29 + $0x50] sm:$0xff]  ;;  %v823_v3 = vld [vmem:[%s3499_s29 + $0x168] sm:$0x1] }
 0x29b   : > { %2100 = vst [vmem:[%s3499_s29 + $0x118] sm:$0xff] %v2054_v50  ;;  %v1976_v40 = vadd.f32 %v2590_v45, %v4044_v16  ;;  %v1970_v51 = vpop.f32.mrb[105].mxu1  ;;  %v822_v42 = vld [vmem:[%s3499_s29 + $0x160] sm:$0xff]  ;;  %v789_v45 = vld [vmem:[%s3499_s29 + $0x58] sm:$0xff] }
 0x29c   : > { %2099 = vst [vmem:[%s3499_s29 + $0x110] sm:$0xff] %v2053_v8  ;;  %v2025_v31 = vadd.f32 %v1821_v60, %v784_v26  ;;  %v1971_v24 = vadd.f32 %v1970_v51, %v4038_v7 }
 0x29d   : > { %v2056_v49 = vadd.f32 %v1976_v40, %v815_v5  ;;  %v1530_v22 = vpop.f32.mrb[14].mxu0 }
 0x29e   : > { %2071 = vst [vmem:[%s3499_s29 + $0x30] sm:$0xff] %v2025_v31  ;;  %v2055_v20 = vadd.f32 %v1971_v24, %v814_v10  ;;  %v1826_v39 = vadd.f32 %v4046_v41, %v1530_v22  ;;  %v2593_v16 = vpop.f32.mrb[106].mxu1  ;;  %v1532_v32 = vpop.f32.mrb[15].mxu0  ;;  %v2119_v22 = vld [vmem:[%s3499_s29 + $0x20] sm:$0xff] (!%p2436_p13) }
 0x29f   : > { %2102 = vst [vmem:[%s3499_s29 + $0x128] sm:$0xff] %v2056_v49  ;;  %v1986_v12 = vadd.f32 %v2593_v16, %v4056_v34  ;;  %v1980_v7 = vpop.f32.mrb[107].mxu1  ;;  %v2117_v49 = vld [vmem:[%s3499_s29 + $0x10] sm:$0xff] (!%p2436_p13) }
 0x2a0   : > { %2101 = vst [vmem:[%s3499_s29 + $0x120] sm:$0xff] %v2055_v20  ;;  %v2026_v48 = vadd.f32 %v1826_v39, %v785_v4  ;;  %v1981_v9 = vadd.f32 %v1980_v7, %v4050_v0  ;;  %v2118_v4 = vld [vmem:[%s3499_s29 + $0x18] sm:$0xff] (!%p2436_p13) }
 0x2a1   : > { %v2058_v44 = vadd.f32 %v1986_v12, %v817_v53  ;;  %v1535_v41 = vpop.f32.mrb[16].mxu0  ;;  %v2120_v16 = vld [vmem:[%s3499_s29 + $0x28] sm:$0xff] (!%p2436_p13) }
 0x2a2   : > { %2072 = vst [vmem:[%s3499_s29 + $0x38] sm:$0xff] %v2026_v48  ;;  %v2057_v58 = vadd.f32 %v1981_v9, %v816_v35  ;;  %v1831_v57 = vadd.f32 %v4054_v29, %v1535_v41  ;;  %v2596_v34 = vpop.f32.mrb[108].mxu1  ;;  %v1537_v6 = vpop.f32.mrb[17].mxu0 }
 0x2a3   : > { %2104 = vst [vmem:[%s3499_s29 + $0x138] sm:$0xff] %v2058_v44  ;;  %v1996_v46 = vadd.f32 %v2596_v34, %v4069_v14  ;;  %v1990_v0 = vpop.f32.mrb[109].mxu1 }
 0x2a4   : > { %2103 = vst [vmem:[%s3499_s29 + $0x130] sm:$0xff] %v2057_v58  ;;  %v2027_v2 = vadd.f32 %v1831_v57, %v786_v1  ;;  %v1991_v19 = vadd.f32 %v1990_v0, %v4062_v17 }
 0x2a5   : > { %v2060_v15 = vadd.f32 %v1996_v46, %v819_v21  ;;  %v1540_v29 = vpop.f32.mrb[18].mxu0  ;;  %v2121_v32 = vld [vmem:[%s3499_s29 + $0x30] sm:$0xff] (!%p2436_p13)  ;;  %v2127_v46 = vld [vmem:[%s3499_s29 + $0x60] sm:$0xff] (!%p2436_p13) }
 0x2a6   : > { %2073 = vst [vmem:[%s3499_s29 + $0x40] sm:$0xff] %v2027_v2  ;;  %v2059_v59 = vadd.f32 %v1991_v19, %v818_v54  ;;  %v1836_v61 = vadd.f32 %v4052_v25, %v1540_v29  ;;  %v2599_v14 = vpop.f32.mrb[110].mxu1  ;;  %v1542_v52 = vpop.f32.mrb[19].mxu0  ;;  %v2128_v54 = vld [vmem:[%s3499_s29 + $0x68] sm:$0xff] (!%p2436_p13)  ;;  %v2130_v29 = vld [vmem:[%s3499_s29 + $0x78] sm:$0xff] (!%p2436_p13) }
 0x2a7   : > { %2106 = vst [vmem:[%s3499_s29 + $0x148] sm:$0xff] %v2060_v15  ;;  %v2006_v63 = vadd.f32 %v2599_v14, %v4087_v27  ;;  %v2000_v17 = vpop.f32.mrb[111].mxu1  ;;  %v2131_v52 = vld [vmem:[%s3499_s29 + $0x80] sm:$0xff] (!%p2436_p13) }
 0x2a8   : > { %2105 = vst [vmem:[%s3499_s29 + $0x140] sm:$0xff] %v2059_v59  ;;  %v2028_v43 = vadd.f32 %v1836_v61, %v787_v23  ;;  %v2001_v55 = vadd.f32 %v2000_v17, %v4078_v11  ;;  %v2129_v23 = vld [vmem:[%s3499_s29 + $0x70] sm:$0xff] (!%p2436_p13) }
 0x2a9   : > { %v2062_v28 = vadd.f32 %v2006_v63, %v821_v47  ;;  %v1545_v25 = vpop.f32.mrb[20].mxu0  ;;  %v2122_v12 = vld [vmem:[%s3499_s29 + $0x38] sm:$0xff] (!%p2436_p13)  ;;  %v2132_v63 = vld [vmem:[%s3499_s29 + $0x88] sm:$0xff] (!%p2436_p13) }
 0x2aa   : > { %2074 = vst [vmem:[%s3499_s29 + $0x48] sm:$0xff] %v2028_v43  ;;  %v2061_v37 = vadd.f32 %v2001_v55, %v820_v56  ;;  %v1841_v62 = vadd.f32 %v4060_v36, %v1545_v25  ;;  %v2602_v50 = vpop.f32.mrb[112].mxu1  ;;  %v1547_v27 = vpop.f32.mrb[21].mxu0  ;;  %v2135_v25 = vld [vmem:[%s3499_s29 + $0xa0] sm:$0xff] (!%p2436_p13) }
 0x2ab   : > { %2108 = vst [vmem:[%s3499_s29 + $0x158] sm:$0xff] %v2062_v28  ;;  %v2016_v26 = vadd.f32 %v2602_v50, %v4105_v38  ;;  %v2010_v11 = vpop.f32.mrb[113].mxu1  ;;  %v2116_v38 = vld [vmem:[%s3499_s29 + $0x8] sm:$0xff] (!%p2436_p13)  ;;  %v2133_v28 = vld [vmem:[%s3499_s29 + $0x90] sm:$0xff] (!%p2436_p13) }
 0x2ac   : > { %2107 = vst [vmem:[%s3499_s29 + $0x150] sm:$0xff] %v2061_v37  ;;  %v2029_v8 = vadd.f32 %v1841_v62, %v788_v30  ;;  %v2011_v60 = vadd.f32 %v2010_v11, %v4096_v33  ;;  %2114 = sbr.rel (%p2436_p13) target bundleno = 714 (0x2ca), region = 63  ;;  %v2115_v33 = vld [vmem:[%s3499_s29] sm:$0xff] (!%p2436_p13)  ;;  %v2134_v30 = vld [vmem:[%s3499_s29 + $0x98] sm:$0xff] (!%p2436_p13)  ;;  %v2136_v27 = vld [vmem:[%s3499_s29 + $0xa8] sm:$0xff] (!%p2436_p13) }
 0x2ad   : > { %v2064_v5 = vadd.f32 %v2016_v26, %v823_v3  ;;  %v1550_v18 = vpop.f32.mrb[22].mxu0  ;;  %v2123_v44 = vld [vmem:[%s3499_s29 + $0x40] sm:$0xff] (!%p2436_p13)  ;;  %v2137_v26 = vld [vmem:[%s3499_s29 + $0xb0] sm:$0xff] (!%p2436_p13) }
 0x2ae   : > { %2075 = vst [vmem:[%s3499_s29 + $0x50] sm:$0xff] %v2029_v8  ;;  %v2063_v36 = vadd.f32 %v2011_v60, %v822_v42  ;;  %v1846_v40 = vadd.f32 %v4058_v13, %v1550_v18  ;;  %v1552_v10 = vpop.f32.mrb[23].mxu0  ;;  %v4222_v13 = vld [vmem:[%s4384_s2] ss:$0 sm:$0xff] (!%p2436_p13) }
 0x2af   : > { %2110 = vst [vmem:[%s3499_s29 + $0x168] sm:$0x1] %v2064_v5  ;;  %v2168_v31 = vadd.f32 (!%p2436_p13), %v4222_v13, %v2115_v33  ;;  %v2169_v24 = vadd.f32 (!%p2436_p13), %v4222_v13, %v2116_v38  ;;  %v2170_v20 = vadd.f32 (!%p2436_p13), %v4222_v13, %v2117_v49  ;;  %v2171_v39 = vadd.f32 (!%p2436_p13), %v4222_v13, %v2118_v4  ;;  %v2138_v5 = vld [vmem:[%s3499_s29 + $0xb8] sm:$0xff] (!%p2436_p13)  ;;  %v2139_v10 = vld [vmem:[%s3499_s29 + $0xc0] sm:$0xff] (!%p2436_p13)  ;;  %v2141_v49 = vld [vmem:[%s3499_s29 + $0xd0] sm:$0xff] (!%p2436_p13) }
 0x2b0   : > { %2109 = vst [vmem:[%s3499_s29 + $0x160] sm:$0xff] %v2063_v36  ;;  %v2030_v51 = vadd.f32 %v1846_v40, %v789_v45  ;;  %v2172_v53 = vadd.f32 (!%p2436_p13), %v4222_v13, %v2119_v22  ;;  %v2173_v48 = vadd.f32 (!%p2436_p13), %v4222_v13, %v2120_v16  ;;  %v2174_v9 = vadd.f32 (!%p2436_p13), %v4222_v13, %v2121_v32  ;;  %v2142_v4 = vld [vmem:[%s3499_s29 + $0xd8] sm:$0xff] (!%p2436_p13)  ;;  %v2143_v22 = vld [vmem:[%s3499_s29 + $0xe0] sm:$0xff] (!%p2436_p13)  ;;  %v2144_v32 = vld [vmem:[%s3499_s29 + $0xe8] sm:$0xff] (!%p2436_p13) }
 0x2b1   : > { %v2214_v35 = vmax.f32 (!%p2436_p13), %v2168_v31, 0.0  ;;  %v2215_v7 = vmax.f32 (!%p2436_p13), %v2169_v24, 0.0  ;;  %v2124_v1 = vld [vmem:[%s3499_s29 + $0x48] sm:$0xff] (!%p2436_p13)  ;;  %v2216_v58 = vmax.f32 (!%p2436_p13), %v2170_v20, 0.0  ;;  %v2217_v57 = vmax.f32 (!%p2436_p13), %v2171_v39, 0.0 }
 0x2b2   : > { %2076 = vst [vmem:[%s3499_s29 + $0x58] sm:$0xff] %v2030_v51  ;;  %v2218_v21 = vmax.f32 (!%p2436_p13), %v2172_v53, 0.0  ;;  %v2175_v34 = vadd.f32 (!%p2436_p13), %v4222_v13, %v2122_v12  ;;  %v2219_v0 = vmax.f32 (!%p2436_p13), %v2173_v48, 0.0  ;;  %v2220_v2 = vmax.f32 (!%p2436_p13), %v2174_v9, 0.0  ;;  %v2140_v51 = vld [vmem:[%s3499_s29 + $0xc8] sm:$0xff] (!%p2436_p13)  ;;  %v2145_v12 = vld [vmem:[%s3499_s29 + $0xf0] sm:$0xff] (!%p2436_p13) }
 0x2b3   : > { %2260 = vst [vmem:[%s3499_s29] sm:$0xff] %v2214_v35  ;;  %2261 = vst [vmem:[%s3499_s29 + $0x8] sm:$0xff] %v2215_v7  ;;  %v2176_v19 = vadd.f32 %v4222_v13, %v2123_v44  ;;  %v2177_v15 = vadd.f32 %v4222_v13, %v2124_v1  ;;  %v2180_v14 = vadd.f32 %v4222_v13, %v2127_v46  ;;  %v2146_v44 = vld [vmem:[%s3499_s29 + $0xf8] sm:$0xff] }
 0x2b4   : > { %2262 = vst [vmem:[%s3499_s29 + $0x10] sm:$0xff] %v2216_v58  ;;  %2263 = vst [vmem:[%s3499_s29 + $0x18] sm:$0xff] %v2217_v57  ;;  %v2221_v59 = vmax.f32 %v2175_v34, 0.0  ;;  %v2181_v43 = vadd.f32 %v4222_v13, %v2128_v54  ;;  %v2182_v55 = vadd.f32 %v4222_v13, %v2129_v23  ;;  %v2183_v50 = vadd.f32 %v4222_v13, %v2130_v29  ;;  %v2148_v34 = vld [vmem:[%s3499_s29 + $0x108] sm:$0xff] }
 0x2b5   : > { %v2125_v41 = vld [vmem:[%s3499_s29 + $0x50] sm:$0xff]  ;;  %2264 = vst [vmem:[%s3499_s29 + $0x20] sm:$0xff] %v2218_v21  ;;  %2265 = vst [vmem:[%s3499_s29 + $0x28] sm:$0xff] %v2219_v0  ;;  %v2222_v56 = vmax.f32 %v2176_v19, 0.0  ;;  %v2223_v17 = vmax.f32 %v2177_v15, 0.0  ;;  %v2226_v3 = vmax.f32 %v2180_v14, 0.0  ;;  %v2184_v8 = vadd.f32 %v4222_v13, %v2131_v52 }
 0x2b6   : > { %v2178_v61 = vadd.f32 %v4222_v13, %v2125_v41  ;;  %2266 = vst [vmem:[%s3499_s29 + $0x30] sm:$0xff] %v2220_v2  ;;  %2267 = vst [vmem:[%s3499_s29 + $0x38] sm:$0xff] %v2221_v59  ;;  %v2227_v42 = vmax.f32 %v2181_v43, 0.0  ;;  %v2228_v11 = vmax.f32 %v2182_v55, 0.0  ;;  %v2185_v60 = vadd.f32 %v4222_v13, %v2132_v63  ;;  %v2147_v21 = vld [vmem:[%s3499_s29 + $0x100] sm:$0xff]  ;;  %v2149_v2 = vld [vmem:[%s3499_s29 + $0x110] sm:$0xff] }
 0x2b7   : > { %2268 = vst [vmem:[%s3499_s29 + $0x40] sm:$0xff] %v2222_v56  ;;  %2269 = vst [vmem:[%s3499_s29 + $0x48] sm:$0xff] %v2223_v17  ;;  %v2229_v45 = vmax.f32 %v2183_v50, 0.0  ;;  %v2186_v18 = vadd.f32 %v4222_v13, %v2133_v28  ;;  %v2187_v36 = vadd.f32 %v4222_v13, %v2134_v30  ;;  %v2188_v40 = vadd.f32 %v4222_v13, %v2135_v25  ;;  %v2150_v19 = vld [vmem:[%s3499_s29 + $0x118] sm:$0xff]  ;;  %v2151_v15 = vld [vmem:[%s3499_s29 + $0x120] sm:$0xff] }
 0x2b8   : > { %v2224_v37 = vmax.f32 %v2178_v61, 0.0  ;;  %2272 = vst [vmem:[%s3499_s29 + $0x60] sm:$0xff] %v2226_v3  ;;  %2273 = vst [vmem:[%s3499_s29 + $0x68] sm:$0xff] %v2227_v42  ;;  %v2230_v33 = vmax.f32 %v2184_v8, 0.0  ;;  %v2231_v38 = vmax.f32 %v2185_v60, 0.0  ;;  %v2189_v31 = vadd.f32 %v4222_v13, %v2136_v27  ;;  %v2153_v14 = vld [vmem:[%s3499_s29 + $0x130] sm:$0xff] }
 0x2b9   : > { %v2126_v6 = vld [vmem:[%s3499_s29 + $0x58] sm:$0xff]  ;;  %2274 = vst [vmem:[%s3499_s29 + $0x70] sm:$0xff] %v2228_v11  ;;  %v2190_v24 = vadd.f32 %v4222_v13, %v2137_v26  ;;  %2275 = vst [vmem:[%s3499_s29 + $0x78] sm:$0xff] %v2229_v45  ;;  %v2232_v20 = vmax.f32 %v2186_v18, 0.0  ;;  %v2233_v39 = vmax.f32 %v2187_v36, 0.0  ;;  %v2234_v53 = vmax.f32 %v2188_v40, 0.0 }
 0x2ba   : > { %v2179_v47 = vadd.f32 %v4222_v13, %v2126_v6  ;;  %2270 = vst [vmem:[%s3499_s29 + $0x50] sm:$0xff] %v2224_v37  ;;  %v2191_v16 = vadd.f32 %v4222_v13, %v2138_v5  ;;  %2276 = vst [vmem:[%s3499_s29 + $0x80] sm:$0xff] %v2230_v33  ;;  %v2235_v35 = vmax.f32 %v2189_v31, 0.0  ;;  %v2192_v48 = vadd.f32 %v4222_v13, %v2139_v10  ;;  %v2154_v43 = vld [vmem:[%s3499_s29 + $0x138] sm:$0xff]  ;;  %v2155_v37 = vld [vmem:[%s3499_s29 + $0x140] sm:$0xff] }
 0x2bb   : > { %2277 = vst [vmem:[%s3499_s29 + $0x88] sm:$0xff] %v2231_v38  ;;  %v2236_v7 = vmax.f32 %v2190_v24, 0.0  ;;  %v2193_v9 = vadd.f32 %v4222_v13, %v2140_v51  ;;  %2278 = vst [vmem:[%s3499_s29 + $0x90] sm:$0xff] %v2232_v20  ;;  %v2194_v41 = vadd.f32 %v4222_v13, %v2141_v49  ;;  %v2195_v58 = vadd.f32 %v4222_v13, %v2142_v4  ;;  %v2157_v42 = vld [vmem:[%s3499_s29 + $0x150] sm:$0xff]  ;;  %v2158_v11 = vld [vmem:[%s3499_s29 + $0x158] sm:$0xff] }
 0x2bc   : > { %v2225_v62 = vmax.f32 %v2179_v47, 0.0  ;;  %2279 = vst [vmem:[%s3499_s29 + $0x98] sm:$0xff] %v2233_v39  ;;  %2280 = vst [vmem:[%s3499_s29 + $0xa0] sm:$0xff] %v2234_v53  ;;  %v2237_v1 = vmax.f32 %v2191_v16, 0.0  ;;  %v2196_v57 = vadd.f32 %v4222_v13, %v2143_v22  ;;  %v2238_v6 = vmax.f32 %v2192_v48, 0.0  ;;  %v2152_v47 = vld [vmem:[%s3499_s29 + $0x128] sm:$0xff] }
 0x2bd   : > { %2281 = vst [vmem:[%s3499_s29 + $0xa8] sm:$0xff] %v2235_v35  ;;  %2282 = vst [vmem:[%s3499_s29 + $0xb0] sm:$0xff] %v2236_v7  ;;  %v2239_v46 = vmax.f32 %v2193_v9, 0.0  ;;  %v2197_v54 = vadd.f32 %v4222_v13, %v2144_v32  ;;  %v2198_v0 = vadd.f32 %v4222_v13, %v2145_v12  ;;  %v2240_v23 = vmax.f32 %v2194_v41, 0.0  ;;  %v2159_v8 = vld [vmem:[%s3499_s29 + $0x160] sm:$0xff] }
 0x2be   : > { %2271 = vst [vmem:[%s3499_s29 + $0x58] sm:$0xff] %v2225_v62  ;;  %2283 = vst [vmem:[%s3499_s29 + $0xb8] sm:$0xff] %v2237_v1  ;;  %v2241_v29 = vmax.f32 %v2195_v58, 0.0  ;;  %v2242_v59 = vmax.f32 %v2196_v57, 0.0  ;;  %v2199_v61 = vadd.f32 %v4222_v13, %v2146_v44  ;;  %v2200_v56 = vadd.f32 %v4222_v13, %v2147_v21  ;;  %v2156_v62 = vld [vmem:[%s3499_s29 + $0x148] sm:$0xff] }
 0x2bf   : > { %2284 = vst [vmem:[%s3499_s29 + $0xc0] sm:$0xff] %v2238_v6  ;;  %2285 = vst [vmem:[%s3499_s29 + $0xc8] sm:$0xff] %v2239_v46  ;;  %v2243_v52 = vmax.f32 %v2197_v54, 0.0  ;;  %v2244_v63 = vmax.f32 %v2198_v0, 0.0  ;;  %v2201_v17 = vadd.f32 %v4222_v13, %v2148_v34  ;;  %v2202_v28 = vadd.f32 %v4222_v13, %v2149_v2  ;;  %v2160_v36 = vld [vmem:[%s3499_s29 + $0x168] sm:$0x1] }
 0x2c0   : > { %2286 = vst [vmem:[%s3499_s29 + $0xd0] sm:$0xff] %v2240_v23  ;;  %2287 = vst [vmem:[%s3499_s29 + $0xd8] sm:$0xff] %v2241_v29  ;;  %v2245_v55 = vmax.f32 %v2199_v61, 0.0  ;;  %v2203_v30 = vadd.f32 %v4222_v13, %v2150_v19  ;;  %v2204_v25 = vadd.f32 %v4222_v13, %v2151_v15  ;;  %v2246_v3 = vmax.f32 %v2200_v56, 0.0 }
 0x2c1   : > { %2288 = vst [vmem:[%s3499_s29 + $0xe0] sm:$0xff] %v2242_v59  ;;  %2289 = vst [vmem:[%s3499_s29 + $0xe8] sm:$0xff] %v2243_v52  ;;  %v2247_v50 = vmax.f32 %v2201_v17, 0.0  ;;  %v2205_v27 = vadd.f32 %v4222_v13, %v2152_v47  ;;  %v2206_v26 = vadd.f32 %v4222_v13, %v2153_v14  ;;  %v2248_v60 = vmax.f32 %v2202_v28, 0.0 }
 0x2c2   : > { %2290 = vst [vmem:[%s3499_s29 + $0xf0] sm:$0xff] %v2244_v63  ;;  %2291 = vst [vmem:[%s3499_s29 + $0xf8] sm:$0xff] %v2245_v55  ;;  %v2249_v5 = vmax.f32 %v2203_v30, 0.0  ;;  %v2250_v45 = vmax.f32 %v2204_v25, 0.0  ;;  %v2207_v18 = vadd.f32 %v4222_v13, %v2154_v43  ;;  %v2208_v51 = vadd.f32 %v4222_v13, %v2155_v37 }
 0x2c3   : > { %2292 = vst [vmem:[%s3499_s29 + $0x100] sm:$0xff] %v2246_v3  ;;  %2293 = vst [vmem:[%s3499_s29 + $0x108] sm:$0xff] %v2247_v50  ;;  %v2251_v40 = vmax.f32 %v2205_v27, 0.0  ;;  %v2252_v10 = vmax.f32 %v2206_v26, 0.0  ;;  %v2209_v33 = vadd.f32 %v4222_v13, %v2156_v62  ;;  %v2210_v31 = vadd.f32 %v4222_v13, %v2157_v42 }
 0x2c4   : > { %2294 = vst [vmem:[%s3499_s29 + $0x110] sm:$0xff] %v2248_v60  ;;  %2295 = vst [vmem:[%s3499_s29 + $0x118] sm:$0xff] %v2249_v5  ;;  %v2253_v38 = vmax.f32 %v2207_v18, 0.0  ;;  %v2211_v24 = vadd.f32 %v4222_v13, %v2158_v11  ;;  %v2212_v49 = vadd.f32 %v4222_v13, %v2159_v8  ;;  %v2254_v4 = vmax.f32 %v2208_v51, 0.0 }
 0x2c5   : > { %2296 = vst [vmem:[%s3499_s29 + $0x120] sm:$0xff] %v2250_v45  ;;  %2297 = vst [vmem:[%s3499_s29 + $0x128] sm:$0xff] %v2251_v40  ;;  %v2255_v22 = vmax.f32 %v2209_v33, 0.0  ;;  %v2213_v20 = vadd.f32 %v4222_v13, %v2160_v36  ;;  %v2256_v39 = vmax.f32 %v2210_v31, 0.0 }
 0x2c6   : > { %2298 = vst [vmem:[%s3499_s29 + $0x130] sm:$0xff] %v2252_v10  ;;  %2299 = vst [vmem:[%s3499_s29 + $0x138] sm:$0xff] %v2253_v38  ;;  %v2257_v53 = vmax.f32 %v2211_v24, 0.0  ;;  %v2258_v16 = vmax.f32 %v2212_v49, 0.0 }
 0x2c7   : > { %2300 = vst [vmem:[%s3499_s29 + $0x140] sm:$0xff] %v2254_v4  ;;  %2301 = vst [vmem:[%s3499_s29 + $0x148] sm:$0xff] %v2255_v22  ;;  %v2259_v32 = vmax.f32 %v2213_v20, 0.0 }
 0x2c8   : > { %2302 = vst [vmem:[%s3499_s29 + $0x150] sm:$0xff] %v2256_v39  ;;  %2303 = vst [vmem:[%s3499_s29 + $0x158] sm:$0xff] %v2257_v53 }
 0x2c9   : > { %2304 = vst [vmem:[%s3499_s29 + $0x160] sm:$0xff] %v2258_v16  ;;  %2305 = vst [vmem:[%s3499_s29 + $0x168] sm:$0x1] %v2259_v32 }
 0x2ca PF: > { %s13_s18 = sadd.s32 1, %s2937_s18   ;;  %s4386_s12 = smov %s2917_s13 }
 0x2cb   : > { %p10_p0 = scmp.ge.s32.totalorder %s13_s18, 12   ;;  %s4387_s13 = smov %s3012_s25 }
 0x2cc   : > { %s4388_s14 = smov %s2929_s16  ;;  %s4389_s15 = smov %s2933_s17 }
 0x2cd   : > { %s4390_s16 = smov %s4393_s19  ;;  %s4391_s17 = smov %s4397_s20 }
 0x2ce   :  { %12 = sbr.rel (!%p10_p0) target bundleno = 4 (0x4), region = 104 }

// kernel: _lambda_.9
= control target key start
LH: loop header
LB: loop body
LE: loop exit
PB: predicated region body
PF: predicated region fallthrough
CT: control target
= control target key end

     0   :  { %s641_s6 = smov 0   ;;  %s817_s0 = inlined_call_operand.vmem [shape: f32[2,19,19,128], index: 0, kind: input, shape index: {}]   ;;  %s818_s1 = inlined_call_operand.vmem [shape: f32[2,18,18,128], index: 1, kind: output, shape index: {}]  }
   0x1 LB: > { %s604_s7 = sadd.s32 4294967295, %s629_s6   ;;  %p608_p0 = scmp.ge.s32.totalorder %s629_s6, 1  ;;  %s629_s6 = sphi %s641_s6, %s11_s6  }
   0x2   : > { %p87_p1 = scmp.lt.s32.totalorder %s629_s6, 3 }
   0x4   : > { %p88_p2 = pnand %p608_p0, %p87_p1 }
   0x5   : > { %p107_p3 = scmp.lt.s32.totalorder (!%p88_p2), %s604_s7, 1  ;;  %vm228_vm0 = vcmask (!%p88_p2), 1046528  }
   0x6   : > { %91 = sbr.rel (%p88_p2) target bundleno = 75 (0x4b), region = 24 }
   0xd   : > { %s820_s7 = smov (!%p107_p3, %s604_s7), 1 }
   0xe   : > { %s613_s8 = smul.u32 456, %s820_s7 }
   0xf   : > { %s614_s12 = smul.u32 432, %s820_s7 }
  0x10   : > { %s655_s11 = scalar_lea.vmem %s817_s0, %s613_s8 }
  0x11   : > { %v117_v0 = vld [vmem:[%s655_s11] sm:$0xff]  ;;  %v118_v1 = vld [vmem:[%s655_s11 + $0x8] sm:$0xff]  ;;  %v120_v2 = vld [vmem:[%s655_s11 + $0x18] sm:$0xff]  ;;  %s679_s15 = scalar_lea.vmem %s818_s1, %s614_s12 }
  0x12   : > { %v121_v3 = vld [vmem:[%s655_s11 + $0x20] sm:$0xff]  ;;  %v229_v4 = vrot.slane %v117_v0, 1  ;;  %v230_v5 = vrot.slane %v118_v1, 1  ;;  %v234_v6 = vrot.slane %v120_v2, 1  ;;  %v119_v7 = vld [vmem:[%s655_s11 + $0x10] sm:$0x7] }
  0x13   : > { %v235_v8 = vrot.slane %v121_v3, 1  ;;  %v122_v9 = vld [vmem:[%s655_s11 + $0x28] sm:$0x7]  ;;  %v232_v10 = vrot.slane %v119_v7, 1  ;;  %v123_v11 = vld [vmem:[%s655_s11 + $0x30] sm:$0xff]  ;;  %v124_v12 = vld [vmem:[%s655_s11 + $0x38] sm:$0xff] }
  0x14   : > { %v231_v13 = vsel %vm228_vm0, %v229_v4, %v230_v5  ;;  %v237_v14 = vrot.slane %v122_v9, 1  ;;  %v239_v15 = vrot.slane %v123_v11, 1  ;;  %v240_v16 = vrot.slane %v124_v12, 1  ;;  %v125_v17 = vld [vmem:[%s655_s11 + $0x40] sm:$0x7]  ;;  %v126_v18 = vld [vmem:[%s655_s11 + $0x48] sm:$0xff] }
  0x15   : > { %v236_v19 = vsel %vm228_vm0, %v234_v6, %v235_v8  ;;  %v373_v20 = vmax.f32 %v117_v0, %v231_v13  ;;  %v233_v21 = vsel %vm228_vm0, %v230_v5, %v232_v10  ;;  %v375_v22 = vmax.f32 %v119_v7, %v232_v10  ;;  %v127_v23 = vld [vmem:[%s655_s11 + $0x50] sm:$0xff]  ;;  %v128_v28 = vld [vmem:[%s655_s11 + $0x58] sm:$0x7]  ;;  %v129_v33 = vld [vmem:[%s655_s11 + $0x60] sm:$0xff] }
  0x16   : > { %v376_v24 = vmax.f32 %v120_v2, %v236_v19  ;;  %v238_v25 = vsel %vm228_vm0, %v235_v8, %v237_v14  ;;  %v374_v26 = vmax.f32 %v118_v1, %v233_v21  ;;  %v378_v27 = vmax.f32 %v122_v9, %v237_v14  ;;  %v130_v42 = vld [vmem:[%s655_s11 + $0x68] sm:$0xff]  ;;  %v131_v43 = vld [vmem:[%s655_s11 + $0x70] sm:$0x7]  ;;  %v132_v48 = vld [vmem:[%s655_s11 + $0x78] sm:$0xff] }
  0x17   : > { %v377_v29 = vmax.f32 %v121_v3, %v238_v25  ;;  %v241_v30 = vsel %vm228_vm0, %v239_v15, %v240_v16  ;;  %v242_v31 = vrot.slane %v125_v17, 1  ;;  %v244_v32 = vrot.slane %v126_v18, 1  ;;  %v133_v49 = vld [vmem:[%s655_s11 + $0x80] sm:$0xff]  ;;  %v134_v58 = vld [vmem:[%s655_s11 + $0x88] sm:$0x7]  ;;  %v135_v63 = vld [vmem:[%s655_s11 + $0x90] sm:$0xff] }
  0x18   : > { %v441_v34 = vmax.f32 %v373_v20, %v376_v24  ;;  %v443_v35 = vmax.f32 %v375_v22, %v378_v27  ;;  %v379_v36 = vmax.f32 %v123_v11, %v241_v30  ;;  %v245_v37 = vrot.slane %v127_v23, 1  ;;  %v136_v0 = vld [vmem:[%s655_s11 + $0x98] sm:$0xff]  ;;  %v137_v9 = vld [vmem:[%s655_s11 + $0xa0] sm:$0x7]  ;;  %v138_v14 = vld [vmem:[%s655_s11 + $0xa8] sm:$0xff] }
  0x19   : > { %v442_v38 = vmax.f32 %v374_v26, %v377_v29  ;;  %v243_v39 = vsel %vm228_vm0, %v240_v16, %v242_v31  ;;  %v381_v40 = vmax.f32 %v125_v17, %v242_v31  ;;  %v247_v41 = vrot.slane %v128_v28, 1  ;;  %v139_v15 = vld [vmem:[%s655_s11 + $0xb0] sm:$0xff]  ;;  %v140_v20 = vld [vmem:[%s655_s11 + $0xb8] sm:$0x7]  ;;  %v141_v25 = vld [vmem:[%s655_s11 + $0xc0] sm:$0xff] }
  0x1a   : > { %495 = vst [vmem:[%s679_s15] sm:$0xff] %v441_v34  ;;  %497 = vst [vmem:[%s679_s15 + $0x10] sm:$0x3] %v443_v35  ;;  %v444_v44 = vmax.f32 %v376_v24, %v379_v36  ;;  %v380_v45 = vmax.f32 %v124_v12, %v243_v39  ;;  %v246_v46 = vsel %vm228_vm0, %v244_v32, %v245_v37  ;;  %v249_v47 = vrot.slane %v129_v33, 1  ;;  %v142_v34 = vld [vmem:[%s655_s11 + $0xc8] sm:$0xff]  ;;  %v143_v35 = vld [vmem:[%s655_s11 + $0xd0] sm:$0x7] }
  0x1b   : > { %496 = vst [vmem:[%s679_s15 + $0x8] sm:$0xff] %v442_v38  ;;  %v446_v50 = vmax.f32 %v378_v27, %v381_v40  ;;  %v382_v51 = vmax.f32 %v126_v18, %v246_v46  ;;  %v248_v52 = vsel %vm228_vm0, %v245_v37, %v247_v41  ;;  %v384_v53 = vmax.f32 %v128_v28, %v247_v41  ;;  %v145_v41 = vld [vmem:[%s655_s11 + $0xe0] sm:$0xff] }
  0x1c   : > { %498 = vst [vmem:[%s679_s15 + $0x18] sm:$0xff] %v444_v44  ;;  %v445_v54 = vmax.f32 %v377_v29, %v380_v45  ;;  %v383_v55 = vmax.f32 %v127_v23, %v248_v52  ;;  %v250_v56 = vrot.slane %v130_v42, 1  ;;  %v252_v57 = vrot.slane %v131_v43, 1 }
  0x1d   : > { %500 = vst [vmem:[%s679_s15 + $0x28] sm:$0x3] %v446_v50  ;;  %v447_v59 = vmax.f32 %v379_v36, %v382_v51  ;;  %v449_v60 = vmax.f32 %v381_v40, %v384_v53  ;;  %v254_v61 = vrot.slane %v132_v48, 1  ;;  %v255_v62 = vrot.slane %v133_v49, 1  ;;  %v144_v40 = vld [vmem:[%s655_s11 + $0xd8] sm:$0xff] }
  0x1e   : > { %499 = vst [vmem:[%s679_s15 + $0x20] sm:$0xff] %v445_v54  ;;  %v448_v1 = vmax.f32 %v380_v45, %v383_v55  ;;  %v251_v2 = vsel %vm228_vm0, %v249_v47, %v250_v56  ;;  %v253_v3 = vsel %vm228_vm0, %v250_v56, %v252_v57  ;;  %v387_v4 = vmax.f32 %v131_v43, %v252_v57  ;;  %v146_v50 = vld [vmem:[%s655_s11 + $0xe8] sm:$0x7]  ;;  %v148_v56 = vld [vmem:[%s655_s11 + $0xf8] sm:$0xff] }
  0x1f   : > { %501 = vst [vmem:[%s679_s15 + $0x30] sm:$0xff] %v447_v59  ;;  %503 = vst [vmem:[%s679_s15 + $0x40] sm:$0x3] %v449_v60  ;;  %v385_v5 = vmax.f32 %v129_v33, %v251_v2  ;;  %v386_v6 = vmax.f32 %v130_v42, %v253_v3  ;;  %v256_v7 = vsel %vm228_vm0, %v254_v61, %v255_v62  ;;  %v257_v8 = vrot.slane %v134_v58, 1 }
  0x20   : > { %502 = vst [vmem:[%s679_s15 + $0x38] sm:$0xff] %v448_v1  ;;  %v452_v10 = vmax.f32 %v384_v53, %v387_v4  ;;  %v388_v11 = vmax.f32 %v132_v48, %v256_v7  ;;  %v259_v12 = vrot.slane %v135_v63, 1  ;;  %v260_v13 = vrot.slane %v136_v0, 1  ;;  %v149_v1 = vld [vmem:[%s655_s11 + $0x100] sm:$0x7]  ;;  %v151_v7 = vld [vmem:[%s655_s11 + $0x110] sm:$0xff] }
  0x21   : > { %v450_v16 = vmax.f32 %v382_v51, %v385_v5  ;;  %v451_v17 = vmax.f32 %v383_v55, %v386_v6  ;;  %v258_v18 = vsel %vm228_vm0, %v255_v62, %v257_v8  ;;  %v390_v19 = vmax.f32 %v134_v58, %v257_v8  ;;  %v147_v55 = vld [vmem:[%s655_s11 + $0xf0] sm:$0xff] }
  0x22   : > { %506 = vst [vmem:[%s679_s15 + $0x58] sm:$0x3] %v452_v10  ;;  %v453_v21 = vmax.f32 %v385_v5, %v388_v11  ;;  %v389_v22 = vmax.f32 %v133_v49, %v258_v18  ;;  %v261_v23 = vsel %vm228_vm0, %v259_v12, %v260_v13  ;;  %v262_v24 = vrot.slane %v137_v9, 1  ;;  %v152_v12 = vld [vmem:[%s655_s11 + $0x118] sm:$0x7] }
  0x23   : > { %504 = vst [vmem:[%s679_s15 + $0x48] sm:$0xff] %v450_v16  ;;  %505 = vst [vmem:[%s679_s15 + $0x50] sm:$0xff] %v451_v17  ;;  %v455_v26 = vmax.f32 %v387_v4, %v390_v19  ;;  %v391_v27 = vmax.f32 %v135_v63, %v261_v23  ;;  %v264_v28 = vrot.slane %v138_v14, 1  ;;  %v265_v29 = vrot.slane %v139_v15, 1  ;;  %v153_v17 = vld [vmem:[%s655_s11 + $0x120] sm:$0xff] }
  0x24   : > { %507 = vst [vmem:[%s679_s15 + $0x60] sm:$0xff] %v453_v21  ;;  %v454_v30 = vmax.f32 %v386_v6, %v389_v22  ;;  %v263_v31 = vsel %vm228_vm0, %v260_v13, %v262_v24  ;;  %v393_v32 = vmax.f32 %v137_v9, %v262_v24  ;;  %v267_v33 = vrot.slane %v140_v20, 1  ;;  %v150_v6 = vld [vmem:[%s655_s11 + $0x108] sm:$0xff] }
  0x25   : > { %509 = vst [vmem:[%s679_s15 + $0x70] sm:$0x3] %v455_v26  ;;  %v456_v36 = vmax.f32 %v388_v11, %v391_v27  ;;  %v392_v37 = vmax.f32 %v136_v0, %v263_v31  ;;  %v266_v38 = vsel %vm228_vm0, %v264_v28, %v265_v29  ;;  %v269_v39 = vrot.slane %v141_v25, 1  ;;  %v154_v26 = vld [vmem:[%s655_s11 + $0x128] sm:$0xff] }
  0x26   : > { %508 = vst [vmem:[%s679_s15 + $0x68] sm:$0xff] %v454_v30  ;;  %v458_v42 = vmax.f32 %v390_v19, %v393_v32  ;;  %v394_v43 = vmax.f32 %v138_v14, %v266_v38  ;;  %v268_v44 = vsel %vm228_vm0, %v265_v29, %v267_v33  ;;  %v396_v45 = vmax.f32 %v140_v20, %v267_v33  ;;  %v157_v33 = vld [vmem:[%s655_s11 + $0x140] sm:$0xff] }
  0x27   : > { %510 = vst [vmem:[%s679_s15 + $0x78] sm:$0xff] %v456_v36  ;;  %v457_v46 = vmax.f32 %v389_v22, %v392_v37  ;;  %v395_v47 = vmax.f32 %v139_v15, %v268_v44  ;;  %v270_v48 = vrot.slane %v142_v34, 1  ;;  %v272_v49 = vrot.slane %v143_v35, 1 }
  0x28   : > { %512 = vst [vmem:[%s679_s15 + $0x88] sm:$0x3] %v458_v42  ;;  %v459_v51 = vmax.f32 %v391_v27, %v394_v43  ;;  %v461_v52 = vmax.f32 %v393_v32, %v396_v45  ;;  %v274_v53 = vrot.slane %v144_v40, 1  ;;  %v275_v54 = vrot.slane %v145_v41, 1  ;;  %v155_v27 = vld [vmem:[%s655_s11 + $0x130] sm:$0x7] }
  0x29   : > { %511 = vst [vmem:[%s679_s15 + $0x80] sm:$0xff] %v457_v46  ;;  %v460_v57 = vmax.f32 %v392_v37, %v395_v47  ;;  %v271_v58 = vsel %vm228_vm0, %v269_v39, %v270_v48  ;;  %v273_v59 = vsel %vm228_vm0, %v270_v48, %v272_v49  ;;  %v399_v60 = vmax.f32 %v143_v35, %v272_v49  ;;  %v156_v32 = vld [vmem:[%s655_s11 + $0x138] sm:$0xff]  ;;  %v158_v42 = vld [vmem:[%s655_s11 + $0x148] sm:$0x7] }
  0x2a   : > { %513 = vst [vmem:[%s679_s15 + $0x90] sm:$0xff] %v459_v51  ;;  %515 = vst [vmem:[%s679_s15 + $0xa0] sm:$0x3] %v461_v52  ;;  %v397_v61 = vmax.f32 %v141_v25, %v271_v58  ;;  %v398_v62 = vmax.f32 %v142_v34, %v273_v59  ;;  %v276_v63 = vsel %vm228_vm0, %v274_v53, %v275_v54  ;;  %v277_v0 = vrot.slane %v146_v50, 1  ;;  %v160_v48 = vld [vmem:[%s655_s11 + $0x158] sm:$0xff] }
  0x2b   : > { %514 = vst [vmem:[%s679_s15 + $0x98] sm:$0xff] %v460_v57  ;;  %v464_v2 = vmax.f32 %v396_v45, %v399_v60  ;;  %v400_v3 = vmax.f32 %v144_v40, %v276_v63  ;;  %v279_v4 = vrot.slane %v147_v55, 1  ;;  %v280_v5 = vrot.slane %v148_v56, 1  ;;  %v161_v57 = vld [vmem:[%s655_s11 + $0x160] sm:$0x7]  ;;  %v163_v63 = vld [vmem:[%s655_s11 + $0x170] sm:$0xff] }
  0x2c   : > { %v462_v8 = vmax.f32 %v394_v43, %v397_v61  ;;  %v463_v9 = vmax.f32 %v395_v47, %v398_v62  ;;  %v278_v10 = vsel %vm228_vm0, %v275_v54, %v277_v0  ;;  %v402_v11 = vmax.f32 %v146_v50, %v277_v0  ;;  %v159_v47 = vld [vmem:[%s655_s11 + $0x150] sm:$0xff] }
  0x2d   : > { %518 = vst [vmem:[%s679_s15 + $0xb8] sm:$0x3] %v464_v2  ;;  %v465_v13 = vmax.f32 %v397_v61, %v400_v3  ;;  %v401_v14 = vmax.f32 %v145_v41, %v278_v10  ;;  %v281_v15 = vsel %vm228_vm0, %v279_v4, %v280_v5  ;;  %v282_v16 = vrot.slane %v149_v1, 1  ;;  %v164_v4 = vld [vmem:[%s655_s11 + $0x178] sm:$0x7] }
  0x2e   : > { %516 = vst [vmem:[%s679_s15 + $0xa8] sm:$0xff] %v462_v8  ;;  %517 = vst [vmem:[%s679_s15 + $0xb0] sm:$0xff] %v463_v9  ;;  %v467_v18 = vmax.f32 %v399_v60, %v402_v11  ;;  %v403_v19 = vmax.f32 %v147_v55, %v281_v15  ;;  %v284_v20 = vrot.slane %v150_v6, 1  ;;  %v285_v21 = vrot.slane %v151_v7, 1  ;;  %v165_v9 = vld [vmem:[%s655_s11 + $0x180] sm:$0xff] }
  0x2f   : > { %519 = vst [vmem:[%s679_s15 + $0xc0] sm:$0xff] %v465_v13  ;;  %v466_v22 = vmax.f32 %v398_v62, %v401_v14  ;;  %v283_v23 = vsel %vm228_vm0, %v280_v5, %v282_v16  ;;  %v405_v24 = vmax.f32 %v149_v1, %v282_v16  ;;  %v287_v25 = vrot.slane %v152_v12, 1  ;;  %v162_v62 = vld [vmem:[%s655_s11 + $0x168] sm:$0xff] }
  0x30   : > { %521 = vst [vmem:[%s679_s15 + $0xd0] sm:$0x3] %v467_v18  ;;  %v468_v28 = vmax.f32 %v400_v3, %v403_v19  ;;  %v404_v29 = vmax.f32 %v148_v56, %v283_v23  ;;  %v286_v30 = vsel %vm228_vm0, %v284_v20, %v285_v21  ;;  %v289_v31 = vrot.slane %v153_v17, 1  ;;  %v166_v18 = vld [vmem:[%s655_s11 + $0x188] sm:$0xff] }
  0x31   : > { %520 = vst [vmem:[%s679_s15 + $0xc8] sm:$0xff] %v466_v22  ;;  %v470_v34 = vmax.f32 %v402_v11, %v405_v24  ;;  %v406_v35 = vmax.f32 %v150_v6, %v286_v30  ;;  %v288_v36 = vsel %vm228_vm0, %v285_v21, %v287_v25  ;;  %v408_v37 = vmax.f32 %v152_v12, %v287_v25  ;;  %v169_v25 = vld [vmem:[%s655_s11 + $0x1a0] sm:$0xff] }
  0x32   : > { %522 = vst [vmem:[%s679_s15 + $0xd8] sm:$0xff] %v468_v28  ;;  %v469_v38 = vmax.f32 %v401_v14, %v404_v29  ;;  %v407_v39 = vmax.f32 %v151_v7, %v288_v36  ;;  %v290_v40 = vrot.slane %v154_v26, 1  ;;  %v292_v41 = vrot.slane %v155_v27, 1 }
  0x33   : > { %524 = vst [vmem:[%s679_s15 + $0xe8] sm:$0x3] %v470_v34  ;;  %v471_v43 = vmax.f32 %v403_v19, %v406_v35  ;;  %v473_v44 = vmax.f32 %v405_v24, %v408_v37  ;;  %v294_v45 = vrot.slane %v156_v32, 1  ;;  %v295_v46 = vrot.slane %v157_v33, 1  ;;  %v167_v19 = vld [vmem:[%s655_s11 + $0x190] sm:$0x7] }
  0x34   : > { %523 = vst [vmem:[%s679_s15 + $0xe0] sm:$0xff] %v469_v38  ;;  %v472_v49 = vmax.f32 %v404_v29, %v407_v39  ;;  %v291_v50 = vsel %vm228_vm0, %v289_v31, %v290_v40  ;;  %v293_v51 = vsel %vm228_vm0, %v290_v40, %v292_v41  ;;  %v411_v52 = vmax.f32 %v155_v27, %v292_v41  ;;  %v168_v24 = vld [vmem:[%s655_s11 + $0x198] sm:$0xff]  ;;  %v170_v34 = vld [vmem:[%s655_s11 + $0x1a8] sm:$0x7] }
  0x35   : > { %525 = vst [vmem:[%s679_s15 + $0xf0] sm:$0xff] %v471_v43  ;;  %527 = vst [vmem:[%s679_s15 + $0x100] sm:$0x3] %v473_v44  ;;  %v409_v53 = vmax.f32 %v153_v17, %v291_v50  ;;  %v410_v54 = vmax.f32 %v154_v26, %v293_v51  ;;  %v296_v55 = vsel %vm228_vm0, %v294_v45, %v295_v46  ;;  %v297_v56 = vrot.slane %v158_v42, 1  ;;  %v172_v40 = vld [vmem:[%s655_s11 + $0x1b8] sm:$0xff] }
  0x36   : > { %526 = vst [vmem:[%s679_s15 + $0xf8] sm:$0xff] %v472_v49  ;;  %v476_v58 = vmax.f32 %v408_v37, %v411_v52  ;;  %v412_v59 = vmax.f32 %v156_v32, %v296_v55  ;;  %v299_v60 = vrot.slane %v159_v47, 1  ;;  %v300_v61 = vrot.slane %v160_v48, 1  ;;  %v173_v49 = vld [vmem:[%s655_s11 + $0x1c0] sm:$0x7] }
  0x37   : > { %v474_v0 = vmax.f32 %v406_v35, %v409_v53  ;;  %v475_v1 = vmax.f32 %v407_v39, %v410_v54  ;;  %v298_v2 = vsel %vm228_vm0, %v295_v46, %v297_v56  ;;  %v414_v3 = vmax.f32 %v158_v42, %v297_v56  ;;  %v171_v39 = vld [vmem:[%s655_s11 + $0x1b0] sm:$0xff] }
  0x38   : > { %530 = vst [vmem:[%s679_s15 + $0x118] sm:$0x3] %v476_v58  ;;  %v477_v5 = vmax.f32 %v409_v53, %v412_v59  ;;  %v413_v6 = vmax.f32 %v157_v33, %v298_v2  ;;  %v301_v7 = vsel %vm228_vm0, %v299_v60, %v300_v61  ;;  %v302_v8 = vrot.slane %v161_v57, 1 }
  0x39   : > { %528 = vst [vmem:[%s679_s15 + $0x108] sm:$0xff] %v474_v0  ;;  %529 = vst [vmem:[%s679_s15 + $0x110] sm:$0xff] %v475_v1  ;;  %v479_v10 = vmax.f32 %v411_v52, %v414_v3  ;;  %v415_v11 = vmax.f32 %v159_v47, %v301_v7  ;;  %v304_v12 = vrot.slane %v162_v62, 1  ;;  %v305_v13 = vrot.slane %v163_v63, 1 }
  0x3a   : > { %531 = vst [vmem:[%s679_s15 + $0x120] sm:$0xff] %v477_v5  ;;  %v478_v14 = vmax.f32 %v410_v54, %v413_v6  ;;  %v303_v15 = vsel %vm228_vm0, %v300_v61, %v302_v8  ;;  %v417_v16 = vmax.f32 %v161_v57, %v302_v8  ;;  %v307_v17 = vrot.slane %v164_v4, 1 }
  0x3b   : > { %533 = vst [vmem:[%s679_s15 + $0x130] sm:$0x3] %v479_v10  ;;  %v480_v20 = vmax.f32 %v412_v59, %v415_v11  ;;  %v416_v21 = vmax.f32 %v160_v48, %v303_v15  ;;  %v306_v22 = vsel %vm228_vm0, %v304_v12, %v305_v13  ;;  %v309_v23 = vrot.slane %v165_v9, 1 }
  0x3c   : > { %532 = vst [vmem:[%s679_s15 + $0x128] sm:$0xff] %v478_v14  ;;  %v482_v26 = vmax.f32 %v414_v3, %v417_v16  ;;  %v418_v27 = vmax.f32 %v162_v62, %v306_v22  ;;  %v308_v28 = vsel %vm228_vm0, %v305_v13, %v307_v17  ;;  %v420_v29 = vmax.f32 %v164_v4, %v307_v17 }
  0x3d   : > { %534 = vst [vmem:[%s679_s15 + $0x138] sm:$0xff] %v480_v20  ;;  %v481_v30 = vmax.f32 %v413_v6, %v416_v21  ;;  %v419_v31 = vmax.f32 %v163_v63, %v308_v28  ;;  %v310_v32 = vrot.slane %v166_v18, 1  ;;  %v312_v33 = vrot.slane %v167_v19, 1 }
  0x3e   : > { %536 = vst [vmem:[%s679_s15 + $0x148] sm:$0x3] %v482_v26  ;;  %v483_v35 = vmax.f32 %v415_v11, %v418_v27  ;;  %v485_v36 = vmax.f32 %v417_v16, %v420_v29  ;;  %v314_v37 = vrot.slane %v168_v24, 1  ;;  %v315_v38 = vrot.slane %v169_v25, 1 }
  0x3f   : > { %535 = vst [vmem:[%s679_s15 + $0x140] sm:$0xff] %v481_v30  ;;  %v484_v41 = vmax.f32 %v416_v21, %v419_v31  ;;  %v311_v42 = vsel %vm228_vm0, %v309_v23, %v310_v32  ;;  %v313_v43 = vsel %vm228_vm0, %v310_v32, %v312_v33  ;;  %v423_v44 = vmax.f32 %v167_v19, %v312_v33 }
  0x40   : > { %537 = vst [vmem:[%s679_s15 + $0x150] sm:$0xff] %v483_v35  ;;  %539 = vst [vmem:[%s679_s15 + $0x160] sm:$0x3] %v485_v36  ;;  %v421_v45 = vmax.f32 %v165_v9, %v311_v42  ;;  %v422_v46 = vmax.f32 %v166_v18, %v313_v43  ;;  %v316_v47 = vsel %vm228_vm0, %v314_v37, %v315_v38  ;;  %v317_v48 = vrot.slane %v170_v34, 1 }
  0x41   : > { %538 = vst [vmem:[%s679_s15 + $0x158] sm:$0xff] %v484_v41  ;;  %v488_v50 = vmax.f32 %v420_v29, %v423_v44  ;;  %v424_v51 = vmax.f32 %v168_v24, %v316_v47  ;;  %v430_v52 = vrot.slane %v171_v39, 1  ;;  %v431_v53 = vrot.slane %v172_v40, 1 }
  0x42   : > { %v486_v54 = vmax.f32 %v418_v27, %v421_v45  ;;  %v487_v55 = vmax.f32 %v419_v31, %v422_v46  ;;  %v318_v56 = vsel %vm228_vm0, %v315_v38, %v317_v48  ;;  %v426_v57 = vmax.f32 %v170_v34, %v317_v48 }
  0x43   : > { %542 = vst [vmem:[%s679_s15 + $0x178] sm:$0x3] %v488_v50  ;;  %v489_v58 = vmax.f32 %v421_v45, %v424_v51  ;;  %v425_v59 = vmax.f32 %v169_v25, %v318_v56  ;;  %v432_v60 = vsel %vm228_vm0, %v430_v52, %v431_v53  ;;  %v433_v61 = vrot.slane %v173_v49, 1 }
  0x44   : > { %540 = vst [vmem:[%s679_s15 + $0x168] sm:$0xff] %v486_v54  ;;  %541 = vst [vmem:[%s679_s15 + $0x170] sm:$0xff] %v487_v55  ;;  %v491_v62 = vmax.f32 %v423_v44, %v426_v57  ;;  %v438_v63 = vmax.f32 %v171_v39, %v432_v60 }
  0x45   : > { %543 = vst [vmem:[%s679_s15 + $0x180] sm:$0xff] %v489_v58  ;;  %v490_v0 = vmax.f32 %v422_v46, %v425_v59  ;;  %v434_v1 = vsel %vm228_vm0, %v431_v53, %v433_v61  ;;  %v440_v2 = vmax.f32 %v173_v49, %v433_v61 }
  0x46   : > { %545 = vst [vmem:[%s679_s15 + $0x190] sm:$0x3] %v491_v62  ;;  %v492_v3 = vmax.f32 %v424_v51, %v438_v63  ;;  %v439_v4 = vmax.f32 %v172_v40, %v434_v1 }
  0x47   : > { %544 = vst [vmem:[%s679_s15 + $0x188] sm:$0xff] %v490_v0  ;;  %v494_v5 = vmax.f32 %v426_v57, %v440_v2 }
  0x48   : > { %546 = vst [vmem:[%s679_s15 + $0x198] sm:$0xff] %v492_v3  ;;  %v493_v6 = vmax.f32 %v425_v59, %v439_v4 }
  0x49   : > { %548 = vst [vmem:[%s679_s15 + $0x1a8] sm:$0x3] %v494_v5 }
  0x4a   : > { %547 = vst [vmem:[%s679_s15 + $0x1a0] sm:$0xff] %v493_v6 }
  0x4b PF: > { %s11_s6 = sadd.s32 1, %s629_s6  }
  0x4c   : > { %p8_p4 = scmp.ge.s32.totalorder %s11_s6, 4  }
  0x4e   :  { %10 = sbr.rel (!%p8_p4) target bundleno = 1 (0x1), region = 54 }

// kernel: _lambda_.11
= control target key start
LH: loop header
LB: loop body
LE: loop exit
PB: predicated region body
PF: predicated region fallthrough
CT: control target
= control target key end

     0   :  { %v442_v47 = vmov 1983009808   ;;  %v92_v49 = vlaneseq  ;;  %s678_s0 = inlined_call_operand.vmem [shape: f32[1,2,512], index: 0, kind: input, shape index: {}]   ;;  %s679_s1 = inlined_call_operand.vmem [shape: f32[512,10], index: 1, kind: input, shape index: {}]   ;;  %s680_s2 = inlined_call_operand.vmem [shape: f32[1,10], index: 2, kind: input, shape index: {}]   ;;  %s681_s3 = inlined_call_operand.hbm [shape: f32[1,2,10], index: 3, kind: output, shape index: {}]  }
   0x1   :  { %v39_v0 = vld [vmem:[%s679_s1 + $0x80] sm:$0xff]  ;;  %v40_v1 = vld [vmem:[%s679_s1 + $0x88] sm:$0xff]  ;;  %v41_v11 = vld [vmem:[%s679_s1 + $0x90] sm:$0xff]  ;;  %v90_v48 = vunpack.c.l.s4 %v442_v47 }
   0x2   :  { %v71_v2 = vld [vmem:[%s679_s1 + $0x180] sm:$0xff]  ;;  %v350_v3 = vpack.c.bf16 %v40_v1, %v39_v0  ;;  %v72_v4 = vld [vmem:[%s679_s1 + $0x188] sm:$0xff]  ;;  %v42_v13 = vld [vmem:[%s679_s1 + $0x98] sm:$0xff]  ;;  %v93_v0 = vshrl.u32 %v92_v49, 7 }
   0x3   :  { %v23_v5 = vld [vmem:[%s679_s1] sm:$0xff]  ;;  %v24_v6 = vld [vmem:[%s679_s1 + $0x8] sm:$0xff]  ;;  %v382_v7 = vpack.c.bf16 %v72_v4, %v71_v2  ;;  %v73_v14 = vld [vmem:[%s679_s1 + $0x190] sm:$0xff]  ;;  %v354_v16 = vpack.c.bf16 %v42_v13, %v41_v11  ;;  %v91_v63 = vunpack.c.0.s8 %v90_v48 }
   0x4   :  { %v352_v8 = vpack.c.bf16 %v24_v6, %v23_v5  ;;  %v55_v9 = vld [vmem:[%s679_s1 + $0x100] sm:$0xff]  ;;  %v56_v10 = vld [vmem:[%s679_s1 + $0x108] sm:$0xff]  ;;  %351 = vmatprep.subr.bf16.mxu0 %v350_v3  ;;  %v74_v15 = vld [vmem:[%s679_s1 + $0x198] sm:$0xff] }
   0x5   :  { %v384_v12 = vpack.c.bf16 %v56_v10, %v55_v9  ;;  %383 = vmatprep.subr.bf16.mxu1 %v382_v7  ;;  %v386_v17 = vpack.c.bf16 %v74_v15, %v73_v14  ;;  %v25_v18 = vld [vmem:[%s679_s1 + $0x10] sm:$0xff]  ;;  %v26_v19 = vld [vmem:[%s679_s1 + $0x18] sm:$0xff]  ;;  %v43_v23 = vld [vmem:[%s679_s1 + $0xa0] sm:$0xff]  ;;  %v94_v13 = vsub.s32 %v91_v63, %v93_v0 }
   0x6   :  { %353 = vmatpush3.bf16.msra.mxu0 %v352_v8  ;;  %v57_v20 = vld [vmem:[%s679_s1 + $0x110] sm:$0xff]  ;;  %v356_v21 = vpack.c.bf16 %v26_v19, %v25_v18  ;;  %v58_v22 = vld [vmem:[%s679_s1 + $0x118] sm:$0xff]  ;;  %v44_v24 = vld [vmem:[%s679_s1 + $0xa8] sm:$0xff] }
   0x7   :  { %385 = vmatpush3.bf16.msra.mxu1 %v384_v12  ;;  %355 = vmatprep.subr.bf16.mxu0 %v354_v16  ;;  %v388_v25 = vpack.c.bf16 %v58_v22, %v57_v20  ;;  %v358_v26 = vpack.c.bf16 %v44_v24, %v43_v23  ;;  %v75_v27 = vld [vmem:[%s679_s1 + $0x1a0] sm:$0xff]  ;;  %v76_v28 = vld [vmem:[%s679_s1 + $0x1a8] sm:$0xff]  ;;  %v45_v35 = vld [vmem:[%s679_s1 + $0xb0] sm:$0xff] }
   0x8   :  { %387 = vmatprep.subr.bf16.mxu1 %v386_v17  ;;  %v27_v29 = vld [vmem:[%s679_s1 + $0x20] sm:$0xff]  ;;  %v390_v30 = vpack.c.bf16 %v76_v28, %v75_v27  ;;  %v28_v31 = vld [vmem:[%s679_s1 + $0x28] sm:$0xff]  ;;  %v46_v36 = vld [vmem:[%s679_s1 + $0xb8] sm:$0xff] }
   0x9   :  { %v59_v32 = vld [vmem:[%s679_s1 + $0x120] sm:$0xff]  ;;  %v60_v33 = vld [vmem:[%s679_s1 + $0x128] sm:$0xff]  ;;  %v360_v34 = vpack.c.bf16 %v28_v31, %v27_v29  ;;  %v77_v37 = vld [vmem:[%s679_s1 + $0x1b0] sm:$0xff]  ;;  %v362_v39 = vpack.c.bf16 %v46_v36, %v45_v35 }
   0xa   :  { %357 = vmatpush3.bf16.msra.mxu0 %v356_v21  ;;  %v392_v38 = vpack.c.bf16 %v60_v33, %v59_v32  ;;  %v78_v40 = vld [vmem:[%s679_s1 + $0x1b8] sm:$0xff]  ;;  %v29_v41 = vld [vmem:[%s679_s1 + $0x30] sm:$0xff]  ;;  %v47_v46 = vld [vmem:[%s679_s1 + $0xc0] sm:$0xff] }
   0xb   :  { %389 = vmatpush3.bf16.msra.mxu1 %v388_v25  ;;  %359 = vmatprep.subr.bf16.mxu0 %v358_v26  ;;  %v30_v42 = vld [vmem:[%s679_s1 + $0x38] sm:$0xff]  ;;  %v394_v43 = vpack.c.bf16 %v78_v40, %v77_v37  ;;  %v61_v44 = vld [vmem:[%s679_s1 + $0x130] sm:$0xff]  ;;  %v48_v50 = vld [vmem:[%s679_s1 + $0xc8] sm:$0xff] }
   0xc   :  { %391 = vmatprep.subr.bf16.mxu1 %v390_v30  ;;  %v62_v45 = vld [vmem:[%s679_s1 + $0x138] sm:$0xff]  ;;  %v79_v51 = vld [vmem:[%s679_s1 + $0x1c0] sm:$0xff]  ;;  %v80_v52 = vld [vmem:[%s679_s1 + $0x1c8] sm:$0xff]  ;;  %v364_v53 = vpack.c.bf16 %v30_v42, %v29_v41  ;;  %v366_v55 = vpack.c.bf16 %v48_v50, %v47_v46 }
   0xd   :  { %v396_v54 = vpack.c.bf16 %v62_v45, %v61_v44  ;;  %v31_v56 = vld [vmem:[%s679_s1 + $0x40] sm:$0xff]  ;;  %v32_v57 = vld [vmem:[%s679_s1 + $0x48] sm:$0xff]  ;;  %v398_v59 = vpack.c.bf16 %v80_v52, %v79_v51  ;;  %v49_v61 = vld [vmem:[%s679_s1 + $0xd0] sm:$0xff] }
   0xe   :  { %361 = vmatpush3.bf16.msra.mxu0 %v360_v34  ;;  %v63_v58 = vld [vmem:[%s679_s1 + $0x140] sm:$0xff]  ;;  %v64_v60 = vld [vmem:[%s679_s1 + $0x148] sm:$0xff]  ;;  %v50_v62 = vld [vmem:[%s679_s1 + $0xd8] sm:$0xff]  ;;  %v368_v3 = vpack.c.bf16 %v32_v57, %v31_v56 }
   0xf   :  { %393 = vmatpush3.bf16.msra.mxu1 %v392_v38  ;;  %363 = vmatprep.subr.bf16.mxu0 %v362_v39  ;;  %v81_v1 = vld [vmem:[%s679_s1 + $0x1d0] sm:$0xff]  ;;  %v82_v2 = vld [vmem:[%s679_s1 + $0x1d8] sm:$0xff]  ;;  %v400_v4 = vpack.c.bf16 %v64_v60, %v63_v58  ;;  %v370_v5 = vpack.c.bf16 %v50_v62, %v49_v61  ;;  %v51_v11 = vld [vmem:[%s679_s1 + $0xe0] sm:$0xff] }
  0x10   :  { %395 = vmatprep.subr.bf16.mxu1 %v394_v43  ;;  %v33_v6 = vld [vmem:[%s679_s1 + $0x50] sm:$0xff]  ;;  %v34_v7 = vld [vmem:[%s679_s1 + $0x58] sm:$0xff]  ;;  %v402_v9 = vpack.c.bf16 %v82_v2, %v81_v1  ;;  %v52_v12 = vld [vmem:[%s679_s1 + $0xe8] sm:$0xff] }
  0x11   :  { %v65_v8 = vld [vmem:[%s679_s1 + $0x150] sm:$0xff]  ;;  %v66_v10 = vld [vmem:[%s679_s1 + $0x158] sm:$0xff]  ;;  %v83_v14 = vld [vmem:[%s679_s1 + $0x1e0] sm:$0xff]  ;;  %v372_v16 = vpack.c.bf16 %v34_v7, %v33_v6  ;;  %v374_v20 = vpack.c.bf16 %v52_v12, %v51_v11 }
  0x12   :  { %365 = vmatpush3.bf16.msra.mxu0 %v364_v53  ;;  %v84_v15 = vld [vmem:[%s679_s1 + $0x1e8] sm:$0xff]  ;;  %v35_v17 = vld [vmem:[%s679_s1 + $0x60] sm:$0xff]  ;;  %v404_v19 = vpack.c.bf16 %v66_v10, %v65_v8 }
  0x13   :  { %397 = vmatpush3.bf16.msra.mxu1 %v396_v54  ;;  %367 = vmatprep.subr.bf16.mxu0 %v366_v55  ;;  %v36_v18 = vld [vmem:[%s679_s1 + $0x68] sm:$0xff]  ;;  %v67_v21 = vld [vmem:[%s679_s1 + $0x160] sm:$0xff] }
  0x14   :  { %399 = vmatprep.subr.bf16.mxu1 %v398_v59  ;;  %v22_v22 = vld [vmem:[%s678_s0] sm:$0xff] }
  0x16   :  { %369 = vmatpush3.bf16.msra.mxu0 %v368_v3 }
  0x17   :  { %401 = vmatpush3.bf16.msra.mxu1 %v400_v4  ;;  %371 = vmatprep.subr.bf16.mxu0 %v370_v5 }
  0x18   :  { %8 = vsyncpa [#allocation3], 0  ;;  %403 = vmatprep.subr.bf16.mxu1 %v402_v9  ;;  %v406_v23 = vpack.c.bf16 %v84_v15, %v83_v14  ;;  %v68_v24 = vld [vmem:[%s679_s1 + $0x168] sm:$0xff]  ;;  %v53_v25 = vld [vmem:[%s679_s1 + $0xf0] sm:$0xff]  ;;  %v95_v27 = vrot.slane %v22_v22, %v94_v13  ;;  %v88_v28 = vcombine.high %v22_v22, %v22_v22  ;;  %v376_v31 = vpack.c.bf16 %v36_v18, %v35_v17  ;;  %s444_s7 = smov [#allocation2]  }
  0x19   :  { %v54_v26 = vld [vmem:[%s679_s1 + $0xf8] sm:$0xff]  ;;  %v85_v29 = vld [vmem:[%s679_s1 + $0x1f0] sm:$0xff]  ;;  %v408_v34 = vpack.c.bf16 %v68_v24, %v67_v21  ;;  %vm19_vm0 = vcmask 74752   ;;  %v443_v44 = vmov 0.0   ;;  %v279_v54 = vld [vmem:[%s680_s2] ss:$0 sm:$0xff] }
  0x1a   :  { %v86_v30 = vld [vmem:[%s679_s1 + $0x1f8] sm:$0xff]  ;;  %373 = vmatpush3.bf16.msra.mxu0 %v372_v16  ;;  %v103_v32 = vcombine.high %v95_v27, %v95_v27  ;;  %v102_v33 = vrot.slane %v88_v28, %v94_v13  ;;  %v378_v35 = vpack.c.bf16 %v54_v26, %v53_v25  ;;  %v37_v36 = vld [vmem:[%s679_s1 + $0x70] sm:$0xff]  ;;  %20 = vst.msk [vmem:[#allocation2] sm:$0x3] %vm19_vm0, %v443_v44  ;;  %s271_s8 = sshll.u32 %s444_s7, 4  ;;  %s272_s8 = int_to_ptr.vmem [resolvable:$true] %s271_s8 }
  0x1b   :  { %405 = vmatpush3.bf16.msra.mxu1 %v404_v19  ;;  %375 = vmatprep.subr.bf16.mxu0 %v374_v20  ;;  %v38_v37 = vld [vmem:[%s679_s1 + $0x78] sm:$0xff]  ;;  %v410_v38 = vpack.c.bf16 %v86_v30, %v85_v29  ;;  %v69_v39 = vld [vmem:[%s679_s1 + $0x170] sm:$0xff]  ;;  %s418_s9 = scalar_lea.vmem %s272_s8, 32  ;;  %p423_p1 = scmp.lt.s32.totalorder %s272_s8, %s272_s8 }
  0x1c   :  { %407 = vmatprep.subr.bf16.mxu1 %v406_v23  ;;  %v70_v40 = vld [vmem:[%s679_s1 + $0x178] sm:$0xff]  ;;  %173 = vmatprep.mubr.f32.mxu0 %v103_v32  ;;  %v104_v41 = vcombine.high %v102_v33, %v102_v33  ;;  %v380_v42 = vpack.c.bf16 %v38_v37, %v37_v36  ;;  %p419_p0 = scmp.ne.s32.totalorder %s272_s8, %s418_s9  ;;  %p424_p2 = scmp.lt.s32.totalorder %s418_s9, %s418_s9 }
  0x1d   :  { %v412_v43 = vpack.c.bf16 %v70_v40, %v69_v39 }
  0x1e   :  { %377 = vmatpush3.bf16.msra.mxu0 %v376_v31  ;;  %243 = vmatprep.mubr.f32.mxu1 %v104_v41  ;;  %p425_p3 = por %p424_p2, %p423_p1 }
  0x1f   :  { %409 = vmatpush3.bf16.msra.mxu1 %v408_v34  ;;  %379 = vmatprep.subr.bf16.mxu0 %v378_v35 }
  0x20   :  { %411 = vmatprep.subr.bf16.mxu1 %v410_v38  ;;  %p426_p4 = pnand %p425_p3, %p419_p0 }
  0x21   :  { %v21_v51 = vld [vmem:[#allocation2] sm:$0x3] }
  0x22   :  { %381 = vmatpush3.bf16.msra.mxu0 %v380_v42 }
  0x23   :  { %413 = vmatpush3.bf16.msra.mxu1 %v412_v43 }
  0x25   :  { %174 = vmatmul.mubr.f32.vlgmr.msra.gmra.mrb[0].mxu0 %v95_v27 }
  0x26   :  { %244 = vmatmul.mubr.f32.vlgmr.msra.gmra.mrb[0].mxu1 %v102_v33 }
  0xf8   :  { %v312_v45 = vpop.f32.mrb[0].mxu0 }
  0xf9   :  { %v347_v46 = vpop.f32.mrb[0].mxu1  ;;  %v313_v47 = vpop.f32.mrb[1].mxu0 }
  0xfa   :  { %v314_v48 = vadd.f32 %v313_v47, %v312_v45  ;;  %v348_v49 = vpop.f32.mrb[1].mxu1 }
  0xfb   :  { %v349_v50 = vadd.f32 %v348_v49, %v347_v46 }
  0xfd   :  { %v246_v52 = vadd.f32 %v349_v50, %v314_v48 }
  0xff   :  { %v249_v53 = vadd.f32 %v246_v52, %v21_v51 }
 0x101   :  { %251 = vst.msk [vmem:[#allocation2] sm:$0x3] %vm19_vm0, %v249_v53 }
 0x108   :  { %v255_v55 = vld [vmem:[#allocation2] sm:$0x3] }
 0x109   :  { %v263_v56 = vadd.f32 %v279_v54, %v255_v55 }
 0x10b   :  { %264 = vst.msk [vmem:[#allocation2] sm:$0x3] %vm19_vm0, %v263_v56 }
 0x10c   :  { %429 = shalt.err (!%p426_p4)
}
 0x10d   :  { %s430_s12 = scalar_lea.hbm %s681_s3, 32 }
 0x10e   :  { %p431_p5 = scmp.ne.s32.totalorder %s681_s3, %s430_s12  ;;  %p434_p6 = scmp.lt.u32.totalorder %s430_s12, %s681_s3 }
 0x110   :  { %p436_p7 = pnand %p434_p6, %p431_p5 }
 0x112   :  { %439 = shalt.err (!%p436_p7)
}
 0x113   :  { %274 = dma.vmem_to_hbm [thread:$0]  %s272_s8, 32, %s681_s3, [#allocation3]  }
 0x114   :  { %440 = dma.done.wait [#allocation3], 32  }
 0x115   :  { %441 = vsyncadd [#allocation3], 4294967264 }
 0x116   :  { %278 = vsyncpa [#allocation3], 1 }

// kernel: _lambda_.10
= control target key start
LH: loop header
LB: loop body
LE: loop exit
PB: predicated region body
PF: predicated region fallthrough
CT: control target
= control target key end

     0   :  { %8 = vsyncpa [#allocation3], 0  ;;  %s5438_s0 = inlined_call_operand.vmem [shape: f32[1,2,16384], index: 0, kind: input, shape index: {}]   ;;  %s5439_s1 = inlined_call_operand.hbm [shape: f32[16384,512], index: 1, kind: input, shape index: {}]   ;;  %s5440_s2 = inlined_call_operand.vmem [shape: f32[1,512], index: 2, kind: input, shape index: {}]   ;;  %s5441_s3 = inlined_call_operand.vmem [shape: f32[1,2,512], index: 3, kind: output, shape index: {}]  }
   0x1   :  { %10 = vsyncpa [#allocation3 + $0x1], 0  ;;  %s4084_s12 = smov 0   ;;  %s4086_s13 = smov 0  }
   0x2   :  { %s4088_s14 = smov 0   ;;  %s4090_s15 = smov 0  }
   0x3   :  { %s4092_s16 = smov 0   ;;  %s4094_s17 = smov 0  }
   0x4   :  { %s4096_s18 = smov 0   ;;  %s4098_s19 = smov 0  }
   0x5 LB: > { %s2801_s20 = sadd.s32 4294967295, %s4056_s19   ;;  %s28_s21 = sadd.s32 1, %s4048_s17  ;;  %s4056_s19 = sphi %s4098_s19, %s16_s19   ;;  %s4052_s18 = sphi %s4096_s18, %s5451_s18   ;;  %s4048_s17 = sphi %s4094_s17, %s5450_s17   ;;  %s4044_s16 = sphi %s4092_s16, %s5449_s16   ;;  %s4040_s15 = sphi %s4090_s15, %s5448_s15   ;;  %s4036_s14 = sphi %s4088_s14, %s5447_s14   ;;  %s4032_s13 = sphi %s4086_s13, %s5446_s13   ;;  %s4028_s12 = sphi %s4084_s12, %s5445_s12  }
   0x6   : > { %p29_p0 = scmp.ge.s32.totalorder %s28_s21, 4  ;;  %s31_s22 = sadd.s32 1, %s4052_s18 }
   0x7   : > { %s72_s23 = sadd.s32 1, %s4036_s14  ;;  %p79_p1 = scmp.ne.s32.totalorder %s4036_s14, %s4032_s13 }
   0x8   : > { %s5453_s21 = smov (%p29_p0, %s28_s21), 0  ;;  %s5455_s22 = smov (!%p29_p0, %s31_s22), %s4052_s18 }
   0x9   : > { %s67_s24 = ssub.s32 %s4048_s17, %s5453_s21  ;;  %p80_p2 = scmp.eq.s32.totalorder %s4056_s19, 0 }
   0xa   : > { %p33_p3 = scmp.ge.s32.totalorder %s5455_s22, 2  ;;  %p85_p4 = scmp.ne.s32.totalorder %s4032_s13, %s4028_s12 }
   0xb   : > { %p4135_p5 = por %p80_p2, %p79_p1  ;;  %p86_p6 = scmp.eq.s32.totalorder %s2801_s20, 0 }
   0xc   : > { %s5457_s22 = smov (%p33_p3, %s5455_s22), 0  ;;  %p3882_p8 = scmp.lt.s32.totalorder %s4056_s19, 8 }
   0xd   : > { %p4141_p7 = por %p86_p6, %p85_p4  ;;  %s68_s27 = ssub.s32 %s4052_s18, %s5457_s22 }
   0xe   : > { %s69_s28 = sor.u32 %s68_s27, %s67_s24  ;;  %s176_s29 = sand.u32 1, %s4036_s14  }
   0xf   : > { %p70_p9 = scmp.eq.s32.totalorder %s69_s28, 0  ;;  %s2805_s30 = sshll.u32 %s176_s29, 13 }
  0x10   : > { %s2807_s4 = sshll.u32 %s4052_s18, 1  ;;  %s2821_s6 = sshll.u32 %s4048_s17, 11 }
  0x11   : > { %s4151_s5 = scalar_select %p70_p9, %s4036_s14, %s72_s23  }
  0x12   : > { %s187_s7 = sadd.s32 %s2821_s6, %s2807_s4  ;;  %s180_s8 = scalar_lea.vmem [#allocation2], %s2805_s30 }
  0x13   : > { %s190_s9 = sshll.u32 %s180_s8, 4  ;;  %s2809_s10 = sshll.u32 %s187_s7, 7  ;;  %s4154_s9 = int_to_ptr.vmem [resolvable:$true] %s190_s9 }
  0x14   : > { %s4159_s20 = scalar_lea.hbm %s5439_s1, %s2809_s10  ;;  %p4165_p10 = pnand %p3882_p8, %p4135_p5 }
  0x15   : > { %s4169_s24 = scalar_lea.sflag [#allocation3], %s176_s29  ;;  %s3960_s27 = scalar_lea.hbm %s4159_s20, 131072 }
  0x16   : > { %p3961_p11 = scmp.ne.s32.totalorder %s4159_s20, %s3960_s27  ;;  %p3962_p12 = pneg %p4165_p10 }
  0x17   : > { %s3965_s30 = scalar_lea.hbm %s5439_s1, 1048576  ;;  %p3966_p1 = scmp.lt.u32.totalorder %s4159_s20, %s5439_s1 }
  0x18   : > { %p3963_p13 = pnand %p3962_p12, %p3961_p11  ;;  %p3967_p2 = scmp.lt.u32.totalorder %s3965_s30, %s3960_s27 }
  0x19   : > { %p3969_p4 = scmp.lt.u32.totalorder %s3960_s27, %s4159_s20 }
  0x1a   : > { %p3964_p0 = pneg %p3963_p13  ;;  %p3968_p3 = por %p3967_p2, %p3966_p1 }
  0x1c   : > { %p3970_p5 = por %p3969_p4, %p3968_p3 }
  0x1e   : > { %p3971_p6 = pnand %p3970_p5, %p3964_p0 }
  0x20   : > { %3974 = shalt.err (!%p3971_p6)
}
  0x21   : > { %s3975_s29 = scalar_lea.vmem %s4154_s9, 131072  ;;  %s4058_s7 = smov [#allocation2]  }
  0x22   : > { %p3976_p8 = scmp.ne.s32.totalorder %s4154_s9, %s3975_s29  ;;  %s3980_s8 = sshll.u32 %s4058_s7, 4  ;;  %s3981_s8 = int_to_ptr.vmem [resolvable:$false] %s3980_s8 }
  0x23   : > { %s3982_s10 = scalar_lea.vmem %s3981_s8, 262144  ;;  %p3983_p13 = scmp.lt.s32.totalorder %s4154_s9, %s3981_s8 }
  0x24   : > { %p3978_p9 = pnand %p3976_p8, %p3962_p12  ;;  %p3984_p1 = scmp.lt.s32.totalorder %s3982_s10, %s3975_s29 }
  0x26   : > { %p3979_p11 = pneg %p3978_p9  ;;  %p3985_p2 = por %p3984_p1, %p3983_p13 }
  0x28   : > { %p3986_p3 = pnand %p3985_p2, %p3979_p11 }
  0x2a   : > { %3989 = shalt.err (!%p3986_p3)
}
  0x2b   : > { %s4059_s11 = smov 512   ;;  %s4060_s12 = smov 256  }
  0x2c   : > { %s4061_s27 = smov 16   ;;  %p2810_p12 = scmp.ge.s32.totalorder %s4056_s19, 1 }
  0x2d   : > { %3881 = dma.hbm_to_vmem [thread:$0]  (!%p4165_p10), %s4159_s20, 131072, %s4154_s9, %s4169_s24, %s4059_s11, %s4060_s12, %s4061_s27  }
  0x2e   : > { %p206_p0 = scmp.lt.s32.totalorder %s4056_s19, 9 }
  0x30   : > { %p207_p4 = pnand %p2810_p12, %p206_p0 }
  0x31   : > { %s212_s25 = sand.u32 (!%p207_p4), 1, %s4032_s13  }
  0x32   : > { %210 = sbr.rel (%p207_p4) target bundleno = 821 (0x335), region = 32  ;;  %s2811_s28 = sshll.u32 (!%p207_p4), %s212_s25, 13 }
  0x33   : > { %s213_s30 = scalar_lea.sflag (!%p207_p4), [#allocation3], %s212_s25  ;;  %s4200_s4 = scalar_lea.vmem (!%p207_p4), [#allocation2], %s2811_s28 }
  0x39   : > { %4023 = dma.done.wait (%p4141_p7), %s213_s30, 131072  }
  0x3a   : > { %4025 = vsyncadd (%p4141_p7), %s213_s30, 4294836224  ;;  %s2812_s23 = sshll.u32 %s4040_s15, 5  ;;  %s2814_s9 = sshll.u32 %s4044_s16, 1 }
  0x3b   : > { %p259_p10 = scmp.lt.s32.totalorder %s2812_s23, 127  ;;  %p269_p5 = scmp.lt.s32.totalorder %s2814_s9, 3 }
  0x3c   : > { %p2817_p7 = scmp.ne.s32.totalorder %s4040_s15, 0 }
  0x3d   : > { %s5459_s23 = smov (!%p259_p10, %s2812_s23), 127  ;;  %s5461_s9 = smov (!%p269_p5, %s2814_s9), 3 }
  0x3e   : > { %s2813_s20 = sshll.u32 %s5459_s23, 1  ;;  %s271_s8 = scalar_lea.vmem %s5440_s2, %s5461_s9  ;;  %v4062_v0 = vmov (!%p2817_p7), 0.0  }
  0x3f   : > { %s4213_s29 = scalar_lea.vmem %s5438_s0, %s2813_s20  ;;  %s2816_s10 = sshll.u32 %s5461_s9, 1 }
  0x40   : > { %s4223_s12 = scalar_lea.vmem %s5441_s3, %s2816_s10  ;;  %286 = sbr.rel (%p2817_p7) target bundleno = 71 (0x47), region = 40 }
  0x41   : > { %287 = vst [vmem:[%s4223_s12] sm:$0xf] (!%p2817_p7), %v4062_v0 }
  0x47 PF: > { %v298_v1 = vld [vmem:[%s4200_s4 + $0x8] sm:$0xff]  ;;  %v300_v2 = vld [vmem:[%s4200_s4 + $0x18] sm:$0xff]  ;;  %v297_v6 = vld [vmem:[%s4200_s4] sm:$0xff]  ;;  %p2818_p6 = scmp.ne.s32.totalorder %s4040_s15, 3 }
  0x48   : > { %v810_v3 = vld [vmem:[%s4200_s4 + $0x1008] sm:$0xff]  ;;  %v2822_v4 = vpack.c.bf16 %v300_v2, %v298_v1  ;;  %v812_v5 = vld [vmem:[%s4200_s4 + $0x1018] sm:$0xff]  ;;  %v299_v7 = vld [vmem:[%s4200_s4 + $0x10] sm:$0xff] }
  0x49   : > { %v3334_v8 = vpack.c.bf16 %v812_v5, %v810_v3  ;;  %v2824_v9 = vpack.c.bf16 %v299_v7, %v297_v6  ;;  %v809_v10 = vld [vmem:[%s4200_s4 + $0x1000] sm:$0xff]  ;;  %v811_v11 = vld [vmem:[%s4200_s4 + $0x1010] sm:$0xff]  ;;  %v302_v12 = vld [vmem:[%s4200_s4 + $0x28] sm:$0xff] }
  0x4a   : > { %2823 = vmatprep.subr.bf16.mxu1 %v2822_v4  ;;  %v3336_v13 = vpack.c.bf16 %v811_v11, %v809_v10  ;;  %v304_v14 = vld [vmem:[%s4200_s4 + $0x38] sm:$0xff]  ;;  %v814_v15 = vld [vmem:[%s4200_s4 + $0x1028] sm:$0xff]  ;;  %v301_v19 = vld [vmem:[%s4200_s4 + $0x20] sm:$0xff] }
  0x4b   : > { %v816_v16 = vld [vmem:[%s4200_s4 + $0x1038] sm:$0xff]  ;;  %3335 = vmatprep.subr.bf16.mxu0 %v3334_v8  ;;  %2825 = vmatpush1.bf16.msra.mxu1 %v2824_v9  ;;  %v2826_v17 = vpack.c.bf16 %v304_v14, %v302_v12  ;;  %v303_v20 = vld [vmem:[%s4200_s4 + $0x30] sm:$0xff]  ;;  %v813_v21 = vld [vmem:[%s4200_s4 + $0x1020] sm:$0xff] }
  0x4c   : > { %v3338_v18 = vpack.c.bf16 %v816_v16, %v814_v15  ;;  %3337 = vmatpush1.bf16.msra.mxu0 %v3336_v13  ;;  %v2828_v22 = vpack.c.bf16 %v303_v20, %v301_v19  ;;  %v815_v23 = vld [vmem:[%s4200_s4 + $0x1030] sm:$0xff]  ;;  %v306_v24 = vld [vmem:[%s4200_s4 + $0x48] sm:$0xff]  ;;  %v308_v25 = vld [vmem:[%s4200_s4 + $0x58] sm:$0xff] }
  0x4d   : > { %2827 = vmatprep.subr.bf16.mxu1 %v2826_v17  ;;  %v3340_v26 = vpack.c.bf16 %v815_v23, %v813_v21  ;;  %v2830_v27 = vpack.c.bf16 %v308_v25, %v306_v24  ;;  %v818_v28 = vld [vmem:[%s4200_s4 + $0x1048] sm:$0xff]  ;;  %v820_v29 = vld [vmem:[%s4200_s4 + $0x1058] sm:$0xff]  ;;  %v305_v30 = vld [vmem:[%s4200_s4 + $0x40] sm:$0xff] }
  0x4e   : > { %3339 = vmatprep.subr.bf16.mxu0 %v3338_v18  ;;  %v3342_v31 = vpack.c.bf16 %v820_v29, %v818_v28  ;;  %v307_v32 = vld [vmem:[%s4200_s4 + $0x50] sm:$0xff]  ;;  %v817_v33 = vld [vmem:[%s4200_s4 + $0x1040] sm:$0xff]  ;;  %v310_v36 = vld [vmem:[%s4200_s4 + $0x68] sm:$0xff] }
  0x4f   : > { %v819_v34 = vld [vmem:[%s4200_s4 + $0x1050] sm:$0xff]  ;;  %2829 = vmatpush1.bf16.msra.mxu1 %v2828_v22  ;;  %v2832_v35 = vpack.c.bf16 %v307_v32, %v305_v30  ;;  %v312_v37 = vld [vmem:[%s4200_s4 + $0x78] sm:$0xff]  ;;  %v822_v38 = vld [vmem:[%s4200_s4 + $0x1068] sm:$0xff] }
  0x50   : > { %3341 = vmatpush1.bf16.msra.mxu0 %v3340_v26  ;;  %2831 = vmatprep.subr.bf16.mxu1 %v2830_v27  ;;  %v3344_v39 = vpack.c.bf16 %v819_v34, %v817_v33  ;;  %v2834_v40 = vpack.c.bf16 %v312_v37, %v310_v36  ;;  %v824_v41 = vld [vmem:[%s4200_s4 + $0x1078] sm:$0xff]  ;;  %v309_v42 = vld [vmem:[%s4200_s4 + $0x60] sm:$0xff]  ;;  %v311_v43 = vld [vmem:[%s4200_s4 + $0x70] sm:$0xff] }
  0x51   : > { %3343 = vmatprep.subr.bf16.mxu0 %v3342_v31  ;;  %v3346_v44 = vpack.c.bf16 %v824_v41, %v822_v38  ;;  %v821_v45 = vld [vmem:[%s4200_s4 + $0x1060] sm:$0xff]  ;;  %v823_v46 = vld [vmem:[%s4200_s4 + $0x1070] sm:$0xff]  ;;  %v314_v47 = vld [vmem:[%s4200_s4 + $0x88] sm:$0xff]  ;;  %v2836_v51 = vpack.c.bf16 %v311_v43, %v309_v42 }
  0x52   : > { %v316_v48 = vld [vmem:[%s4200_s4 + $0x98] sm:$0xff]  ;;  %v826_v49 = vld [vmem:[%s4200_s4 + $0x1088] sm:$0xff]  ;;  %v3348_v52 = vpack.c.bf16 %v823_v46, %v821_v45  ;;  %v313_v54 = vld [vmem:[%s4200_s4 + $0x80] sm:$0xff] }
  0x53   : > { %v828_v50 = vld [vmem:[%s4200_s4 + $0x1098] sm:$0xff]  ;;  %2833 = vmatpush1.bf16.msra.mxu1 %v2832_v35  ;;  %v2838_v53 = vpack.c.bf16 %v316_v48, %v314_v47  ;;  %v315_v55 = vld [vmem:[%s4200_s4 + $0x90] sm:$0xff]  ;;  %v825_v56 = vld [vmem:[%s4200_s4 + $0x1080] sm:$0xff]  ;;  %v4063_v47 = vmov 1983009808  }
  0x54   : > { %3345 = vmatpush1.bf16.msra.mxu0 %v3344_v39  ;;  %2835 = vmatprep.subr.bf16.mxu1 %v2834_v40  ;;  %v3350_v57 = vpack.c.bf16 %v828_v50, %v826_v49  ;;  %v827_v58 = vld [vmem:[%s4200_s4 + $0x1090] sm:$0xff]  ;;  %v318_v59 = vld [vmem:[%s4200_s4 + $0xa8] sm:$0xff]  ;;  %v320_v60 = vld [vmem:[%s4200_s4 + $0xb8] sm:$0xff]  ;;  %v2840_v63 = vpack.c.bf16 %v315_v55, %v313_v54  ;;  %v1331_v48 = vunpack.c.l.s4 %v4063_v47  ;;  %v1333_v49 = vlaneseq }
  0x55   : > { %3347 = vmatprep.subr.bf16.mxu0 %v3346_v44  ;;  %v830_v61 = vld [vmem:[%s4200_s4 + $0x10a8] sm:$0xff]  ;;  %v832_v62 = vld [vmem:[%s4200_s4 + $0x10b8] sm:$0xff]  ;;  %v3352_v0 = vpack.c.bf16 %v827_v58, %v825_v56  ;;  %v2842_v1 = vpack.c.bf16 %v320_v60, %v318_v59  ;;  %v317_v2 = vld [vmem:[%s4200_s4 + $0xa0] sm:$0xff] }
  0x56   : > { %v319_v3 = vld [vmem:[%s4200_s4 + $0xb0] sm:$0xff]  ;;  %v829_v4 = vld [vmem:[%s4200_s4 + $0x10a0] sm:$0xff]  ;;  %v3354_v5 = vpack.c.bf16 %v832_v62, %v830_v61  ;;  %v322_v7 = vld [vmem:[%s4200_s4 + $0xc8] sm:$0xff]  ;;  %v1332_v62 = vunpack.c.0.s8 %v1331_v48 }
  0x57   : > { %2837 = vmatpush1.bf16.msra.mxu1 %v2836_v51  ;;  %v831_v6 = vld [vmem:[%s4200_s4 + $0x10b0] sm:$0xff]  ;;  %v324_v8 = vld [vmem:[%s4200_s4 + $0xd8] sm:$0xff]  ;;  %v834_v9 = vld [vmem:[%s4200_s4 + $0x10c8] sm:$0xff]  ;;  %v2844_v11 = vpack.c.bf16 %v319_v3, %v317_v2 }
  0x58   : > { %3349 = vmatpush1.bf16.msra.mxu0 %v3348_v52  ;;  %2839 = vmatprep.subr.bf16.mxu1 %v2838_v53  ;;  %v836_v10 = vld [vmem:[%s4200_s4 + $0x10d8] sm:$0xff]  ;;  %v3356_v12 = vpack.c.bf16 %v831_v6, %v829_v4  ;;  %v2846_v13 = vpack.c.bf16 %v324_v8, %v322_v7  ;;  %v321_v14 = vld [vmem:[%s4200_s4 + $0xc0] sm:$0xff]  ;;  %v323_v15 = vld [vmem:[%s4200_s4 + $0xd0] sm:$0xff] }
  0x59   : > { %3351 = vmatprep.subr.bf16.mxu0 %v3350_v57  ;;  %v833_v16 = vld [vmem:[%s4200_s4 + $0x10c0] sm:$0xff]  ;;  %v3358_v17 = vpack.c.bf16 %v836_v10, %v834_v9  ;;  %v835_v18 = vld [vmem:[%s4200_s4 + $0x10d0] sm:$0xff]  ;;  %v326_v19 = vld [vmem:[%s4200_s4 + $0xe8] sm:$0xff]  ;;  %v2848_v23 = vpack.c.bf16 %v323_v15, %v321_v14 }
  0x5a   : > { %v328_v20 = vld [vmem:[%s4200_s4 + $0xf8] sm:$0xff]  ;;  %v838_v21 = vld [vmem:[%s4200_s4 + $0x10e8] sm:$0xff]  ;;  %v3360_v24 = vpack.c.bf16 %v835_v18, %v833_v16  ;;  %v325_v26 = vld [vmem:[%s4200_s4 + $0xe0] sm:$0xff] }
  0x5b   : > { %2841 = vmatpush1.bf16.msra.mxu1 %v2840_v63  ;;  %v840_v22 = vld [vmem:[%s4200_s4 + $0x10f8] sm:$0xff]  ;;  %v2850_v25 = vpack.c.bf16 %v328_v20, %v326_v19  ;;  %v327_v27 = vld [vmem:[%s4200_s4 + $0xf0] sm:$0xff]  ;;  %v837_v28 = vld [vmem:[%s4200_s4 + $0x10e0] sm:$0xff]  ;;  %v4311_v63 = vshrl.u32 %v1333_v49, 7 }
  0x5c   : > { %3353 = vmatpush1.bf16.msra.mxu0 %v3352_v0  ;;  %2843 = vmatprep.subr.bf16.mxu1 %v2842_v1  ;;  %v3362_v29 = vpack.c.bf16 %v840_v22, %v838_v21  ;;  %v839_v30 = vld [vmem:[%s4200_s4 + $0x10f0] sm:$0xff]  ;;  %v330_v31 = vld [vmem:[%s4200_s4 + $0x108] sm:$0xff]  ;;  %v332_v32 = vld [vmem:[%s4200_s4 + $0x118] sm:$0xff]  ;;  %v2852_v35 = vpack.c.bf16 %v327_v27, %v325_v26 }
  0x5d   : > { %3355 = vmatprep.subr.bf16.mxu0 %v3354_v5  ;;  %v842_v33 = vld [vmem:[%s4200_s4 + $0x1108] sm:$0xff]  ;;  %v844_v34 = vld [vmem:[%s4200_s4 + $0x1118] sm:$0xff]  ;;  %v3364_v36 = vpack.c.bf16 %v839_v30, %v837_v28  ;;  %v2854_v37 = vpack.c.bf16 %v332_v32, %v330_v31  ;;  %v329_v38 = vld [vmem:[%s4200_s4 + $0x100] sm:$0xff] }
  0x5e   : > { %v331_v39 = vld [vmem:[%s4200_s4 + $0x110] sm:$0xff]  ;;  %v841_v40 = vld [vmem:[%s4200_s4 + $0x1100] sm:$0xff]  ;;  %v3366_v41 = vpack.c.bf16 %v844_v34, %v842_v33  ;;  %v334_v43 = vld [vmem:[%s4200_s4 + $0x128] sm:$0xff] }
  0x5f   : > { %2845 = vmatpush1.bf16.msra.mxu1 %v2844_v11  ;;  %v843_v42 = vld [vmem:[%s4200_s4 + $0x1110] sm:$0xff]  ;;  %v336_v44 = vld [vmem:[%s4200_s4 + $0x138] sm:$0xff]  ;;  %v846_v45 = vld [vmem:[%s4200_s4 + $0x1128] sm:$0xff]  ;;  %v2856_v50 = vpack.c.bf16 %v331_v39, %v329_v38 }
  0x60   : > { %3357 = vmatpush1.bf16.msra.mxu0 %v3356_v12  ;;  %2847 = vmatprep.subr.bf16.mxu1 %v2846_v13  ;;  %v848_v46 = vld [vmem:[%s4200_s4 + $0x1138] sm:$0xff]  ;;  %v3368_v51 = vpack.c.bf16 %v843_v42, %v841_v40  ;;  %v2858_v52 = vpack.c.bf16 %v336_v44, %v334_v43  ;;  %v333_v53 = vld [vmem:[%s4200_s4 + $0x120] sm:$0xff]  ;;  %v335_v54 = vld [vmem:[%s4200_s4 + $0x130] sm:$0xff]  ;;  %v4322_v12 = vsub.s32 %v1332_v62, %v4311_v63 }
  0x61   : > { %3359 = vmatprep.subr.bf16.mxu0 %v3358_v17  ;;  %v845_v55 = vld [vmem:[%s4200_s4 + $0x1120] sm:$0xff]  ;;  %v3370_v56 = vpack.c.bf16 %v848_v46, %v846_v45  ;;  %v847_v57 = vld [vmem:[%s4200_s4 + $0x1130] sm:$0xff]  ;;  %v338_v58 = vld [vmem:[%s4200_s4 + $0x148] sm:$0xff]  ;;  %v2860_v0 = vpack.c.bf16 %v335_v54, %v333_v53 }
  0x62   : > { %v340_v59 = vld [vmem:[%s4200_s4 + $0x158] sm:$0xff]  ;;  %v850_v60 = vld [vmem:[%s4200_s4 + $0x1148] sm:$0xff]  ;;  %v3372_v1 = vpack.c.bf16 %v847_v57, %v845_v55  ;;  %v337_v3 = vld [vmem:[%s4200_s4 + $0x140] sm:$0xff] }
  0x63   : > { %2849 = vmatpush1.bf16.msra.mxu1 %v2848_v23  ;;  %v852_v61 = vld [vmem:[%s4200_s4 + $0x1158] sm:$0xff]  ;;  %v2862_v2 = vpack.c.bf16 %v340_v59, %v338_v58  ;;  %v339_v4 = vld [vmem:[%s4200_s4 + $0x150] sm:$0xff]  ;;  %v849_v5 = vld [vmem:[%s4200_s4 + $0x1140] sm:$0xff] }
  0x64   : > { %3361 = vmatpush1.bf16.msra.mxu0 %v3360_v24  ;;  %2851 = vmatprep.subr.bf16.mxu1 %v2850_v25  ;;  %v3374_v6 = vpack.c.bf16 %v852_v61, %v850_v60  ;;  %v851_v7 = vld [vmem:[%s4200_s4 + $0x1150] sm:$0xff]  ;;  %v342_v8 = vld [vmem:[%s4200_s4 + $0x168] sm:$0xff]  ;;  %v344_v9 = vld [vmem:[%s4200_s4 + $0x178] sm:$0xff]  ;;  %v2864_v13 = vpack.c.bf16 %v339_v4, %v337_v3 }
  0x65   : > { %3363 = vmatprep.subr.bf16.mxu0 %v3362_v29  ;;  %v854_v10 = vld [vmem:[%s4200_s4 + $0x1168] sm:$0xff]  ;;  %v856_v11 = vld [vmem:[%s4200_s4 + $0x1178] sm:$0xff]  ;;  %v341_v14 = vld [vmem:[%s4200_s4 + $0x160] sm:$0xff]  ;;  %v3376_v15 = vpack.c.bf16 %v851_v7, %v849_v5  ;;  %v2866_v16 = vpack.c.bf16 %v344_v9, %v342_v8 }
  0x66   : > { %v343_v17 = vld [vmem:[%s4200_s4 + $0x170] sm:$0xff]  ;;  %v853_v18 = vld [vmem:[%s4200_s4 + $0x1160] sm:$0xff]  ;;  %v3378_v20 = vpack.c.bf16 %v856_v11, %v854_v10  ;;  %v346_v21 = vld [vmem:[%s4200_s4 + $0x188] sm:$0xff] }
  0x67   : > { %2853 = vmatpush1.bf16.msra.mxu1 %v2852_v35  ;;  %v855_v19 = vld [vmem:[%s4200_s4 + $0x1170] sm:$0xff]  ;;  %v348_v22 = vld [vmem:[%s4200_s4 + $0x198] sm:$0xff]  ;;  %v4331_v23 = vld [vmem:[%s4213_s29] sm:$0xff]  ;;  %v2868_v28 = vpack.c.bf16 %v343_v17, %v341_v14 }
  0x68   : > { %3365 = vmatpush1.bf16.msra.mxu0 %v3364_v36  ;;  %2855 = vmatprep.subr.bf16.mxu1 %v2854_v37  ;;  %v858_v24 = vld [vmem:[%s4200_s4 + $0x1188] sm:$0xff]  ;;  %v860_v25 = vld [vmem:[%s4200_s4 + $0x1198] sm:$0xff]  ;;  %v4337_v26 = vrot.slane %v4331_v23, %v4322_v12  ;;  %v4340_v27 = vld [vmem:[%s4213_s29 + $0x20] sm:$0xff]  ;;  %v3380_v30 = vpack.c.bf16 %v855_v19, %v853_v18  ;;  %v2870_v31 = vpack.c.bf16 %v348_v22, %v346_v21 }
  0x69   : > { %3367 = vmatprep.subr.bf16.mxu0 %v3366_v41  ;;  %v4344_v29 = vrot.slane %v4340_v27, %v4322_v12  ;;  %v345_v32 = vld [vmem:[%s4200_s4 + $0x180] sm:$0xff]  ;;  %v347_v33 = vld [vmem:[%s4200_s4 + $0x190] sm:$0xff]  ;;  %v3382_v36 = vpack.c.bf16 %v860_v25, %v858_v24  ;;  %v350_v38 = vld [vmem:[%s4200_s4 + $0x1a8] sm:$0xff] }
  0x6a   : > { %v857_v34 = vld [vmem:[%s4200_s4 + $0x1180] sm:$0xff]  ;;  %v1344_v35 = vcombine.high %v4337_v26, %v4337_v26  ;;  %v859_v37 = vld [vmem:[%s4200_s4 + $0x1190] sm:$0xff]  ;;  %v352_v39 = vld [vmem:[%s4200_s4 + $0x1b8] sm:$0xff]  ;;  %v2872_v43 = vpack.c.bf16 %v347_v33, %v345_v32 }
  0x6b   : > { %2857 = vmatpush1.bf16.msra.mxu1 %v2856_v50  ;;  %v1412_v40 = vcombine.high %v4344_v29, %v4344_v29  ;;  %v862_v41 = vld [vmem:[%s4200_s4 + $0x11a8] sm:$0xff]  ;;  %v864_v42 = vld [vmem:[%s4200_s4 + $0x11b8] sm:$0xff]  ;;  %v3384_v44 = vpack.c.bf16 %v859_v37, %v857_v34  ;;  %v2874_v45 = vpack.c.bf16 %v352_v39, %v350_v38  ;;  %v349_v46 = vld [vmem:[%s4200_s4 + $0x1a0] sm:$0xff] }
  0x6c   : > { %3369 = vmatpush1.bf16.msra.mxu0 %v3368_v51  ;;  %2859 = vmatprep.subr.bf16.mxu1 %v2858_v52  ;;  %v351_v47 = vld [vmem:[%s4200_s4 + $0x1b0] sm:$0xff]  ;;  %v861_v48 = vld [vmem:[%s4200_s4 + $0x11a0] sm:$0xff]  ;;  %v3386_v49 = vpack.c.bf16 %v864_v42, %v862_v41  ;;  %v354_v51 = vld [vmem:[%s4200_s4 + $0x1c8] sm:$0xff] }
  0x6d   : > { %3371 = vmatprep.subr.bf16.mxu0 %v3370_v56  ;;  %1561 = vmatprep.mubr.f32.mxu1 %v1344_v35  ;;  %v863_v50 = vld [vmem:[%s4200_s4 + $0x11b0] sm:$0xff]  ;;  %v356_v52 = vld [vmem:[%s4200_s4 + $0x1d8] sm:$0xff]  ;;  %v866_v53 = vld [vmem:[%s4200_s4 + $0x11c8] sm:$0xff]  ;;  %v2876_v55 = vpack.c.bf16 %v351_v47, %v349_v46 }
  0x6e   : > { %2129 = vmatprep.mubr.f32.mxu0 %v1412_v40  ;;  %v868_v54 = vld [vmem:[%s4200_s4 + $0x11d8] sm:$0xff]  ;;  %v3388_v56 = vpack.c.bf16 %v863_v50, %v861_v48  ;;  %v2878_v57 = vpack.c.bf16 %v356_v52, %v354_v51  ;;  %v353_v58 = vld [vmem:[%s4200_s4 + $0x1c0] sm:$0xff]  ;;  %v355_v59 = vld [vmem:[%s4200_s4 + $0x1d0] sm:$0xff] }
  0x6f   : > { %2861 = vmatpush1.bf16.msra.mxu1 %v2860_v0  ;;  %v865_v60 = vld [vmem:[%s4200_s4 + $0x11c0] sm:$0xff]  ;;  %v3390_v61 = vpack.c.bf16 %v868_v54, %v866_v53  ;;  %v867_v62 = vld [vmem:[%s4200_s4 + $0x11d0] sm:$0xff]  ;;  %v358_v0 = vld [vmem:[%s4200_s4 + $0x1e8] sm:$0xff]  ;;  %v2880_v4 = vpack.c.bf16 %v355_v59, %v353_v58 }
  0x70   : > { %3373 = vmatpush1.bf16.msra.mxu0 %v3372_v1  ;;  %2863 = vmatprep.subr.bf16.mxu1 %v2862_v2  ;;  %v360_v1 = vld [vmem:[%s4200_s4 + $0x1f8] sm:$0xff]  ;;  %v870_v2 = vld [vmem:[%s4200_s4 + $0x11e8] sm:$0xff]  ;;  %v3392_v5 = vpack.c.bf16 %v867_v62, %v865_v60  ;;  %v357_v7 = vld [vmem:[%s4200_s4 + $0x1e0] sm:$0xff] }
  0x71   : > { %3375 = vmatprep.subr.bf16.mxu0 %v3374_v6  ;;  %v872_v3 = vld [vmem:[%s4200_s4 + $0x11f8] sm:$0xff]  ;;  %v2882_v6 = vpack.c.bf16 %v360_v1, %v358_v0  ;;  %v359_v8 = vld [vmem:[%s4200_s4 + $0x1f0] sm:$0xff]  ;;  %v869_v9 = vld [vmem:[%s4200_s4 + $0x11e0] sm:$0xff] }
  0x72   : > { %v3394_v10 = vpack.c.bf16 %v872_v3, %v870_v2  ;;  %v871_v11 = vld [vmem:[%s4200_s4 + $0x11f0] sm:$0xff]  ;;  %v362_v14 = vld [vmem:[%s4200_s4 + $0x208] sm:$0xff]  ;;  %v876_v18 = vld [vmem:[%s4200_s4 + $0x1218] sm:$0xff]  ;;  %v2884_v19 = vpack.c.bf16 %v359_v8, %v357_v7 }
  0x73   : > { %2865 = vmatpush1.bf16.msra.mxu1 %v2864_v13  ;;  %v1329_v13 = vcombine.high %v4331_v23, %v4331_v23  ;;  %v874_v17 = vld [vmem:[%s4200_s4 + $0x1208] sm:$0xff]  ;;  %v361_v22 = vld [vmem:[%s4200_s4 + $0x200] sm:$0xff]  ;;  %v363_v23 = vld [vmem:[%s4200_s4 + $0x210] sm:$0xff] }
  0x74   : > { %3377 = vmatpush1.bf16.msra.mxu0 %v3376_v15  ;;  %2867 = vmatprep.subr.bf16.mxu1 %v2866_v16  ;;  %v364_v15 = vld [vmem:[%s4200_s4 + $0x218] sm:$0xff]  ;;  %v1397_v16 = vcombine.high %v4340_v27, %v4340_v27  ;;  %v873_v24 = vld [vmem:[%s4200_s4 + $0x1200] sm:$0xff]  ;;  %v3398_v25 = vpack.c.bf16 %v876_v18, %v874_v17  ;;  %v875_v27 = vld [vmem:[%s4200_s4 + $0x1210] sm:$0xff]  ;;  %v2888_v35 = vpack.c.bf16 %v363_v23, %v361_v22 }
  0x75   : > { %3379 = vmatprep.subr.bf16.mxu0 %v3378_v20  ;;  %v3396_v20 = vpack.c.bf16 %v871_v11, %v869_v9  ;;  %v2886_v21 = vpack.c.bf16 %v364_v15, %v362_v14  ;;  %v878_v32 = vld [vmem:[%s4200_s4 + $0x1228] sm:$0xff]  ;;  %v880_v33 = vld [vmem:[%s4200_s4 + $0x1238] sm:$0xff]  ;;  %v365_v38 = vld [vmem:[%s4200_s4 + $0x220] sm:$0xff] }
  0x76   : > { %v4398_v34 = vrot.slane %v1397_v16, %v4322_v12  ;;  %v367_v39 = vld [vmem:[%s4200_s4 + $0x230] sm:$0xff]  ;;  %v877_v40 = vld [vmem:[%s4200_s4 + $0x1220] sm:$0xff]  ;;  %v3402_v41 = vpack.c.bf16 %v880_v33, %v878_v32  ;;  %v882_v46 = vld [vmem:[%s4200_s4 + $0x1248] sm:$0xff] }
  0x77   : > { %2869 = vmatpush1.bf16.msra.mxu1 %v2868_v28  ;;  %v366_v28 = vld [vmem:[%s4200_s4 + $0x228] sm:$0xff]  ;;  %v879_v42 = vld [vmem:[%s4200_s4 + $0x1230] sm:$0xff]  ;;  %v884_v47 = vld [vmem:[%s4200_s4 + $0x1258] sm:$0xff] }
  0x78   : > { %3381 = vmatpush1.bf16.msra.mxu0 %v3380_v30  ;;  %2871 = vmatprep.subr.bf16.mxu1 %v2870_v31  ;;  %v368_v30 = vld [vmem:[%s4200_s4 + $0x238] sm:$0xff]  ;;  %v4393_v31 = vrot.slane %v1329_v13, %v4322_v12  ;;  %v1413_v48 = vcombine.high %v4398_v34, %v4398_v34  ;;  %v3404_v50 = vpack.c.bf16 %v879_v42, %v877_v40  ;;  %v369_v52 = vld [vmem:[%s4200_s4 + $0x240] sm:$0xff]  ;;  %v375_v0 = vld [vmem:[%s4200_s4 + $0x270] sm:$0xff] }
  0x79   : > { %3383 = vmatprep.subr.bf16.mxu0 %v3382_v36  ;;  %v3400_v36 = vpack.c.bf16 %v875_v27, %v873_v24  ;;  %v2890_v37 = vpack.c.bf16 %v368_v30, %v366_v28  ;;  %v881_v53 = vld [vmem:[%s4200_s4 + $0x1240] sm:$0xff]  ;;  %v3406_v54 = vpack.c.bf16 %v884_v47, %v882_v46  ;;  %v888_v58 = vld [vmem:[%s4200_s4 + $0x1278] sm:$0xff]  ;;  %v887_v3 = vld [vmem:[%s4200_s4 + $0x1270] sm:$0xff] }
  0x7a   : > { %v373_v62 = vld [vmem:[%s4200_s4 + $0x260] sm:$0xff]  ;;  %v892_v7 = vld [vmem:[%s4200_s4 + $0x1298] sm:$0xff]  ;;  %v379_v13 = vld [vmem:[%s4200_s4 + $0x290] sm:$0xff] }
  0x7b   : > { %2873 = vmatpush1.bf16.msra.mxu1 %v2872_v43  ;;  %v370_v43 = vld [vmem:[%s4200_s4 + $0x248] sm:$0xff]  ;;  %v885_v1 = vld [vmem:[%s4200_s4 + $0x1260] sm:$0xff]  ;;  %v2900_v8 = vpack.c.bf16 %v375_v0, %v373_v62  ;;  %v891_v16 = vld [vmem:[%s4200_s4 + $0x1290] sm:$0xff] }
  0x7c   : > { %3385 = vmatpush1.bf16.msra.mxu0 %v3384_v44  ;;  %2875 = vmatprep.subr.bf16.mxu1 %v2874_v45  ;;  %v372_v44 = vld [vmem:[%s4200_s4 + $0x258] sm:$0xff]  ;;  %v1345_v45 = vcombine.high %v4393_v31, %v4393_v31  ;;  %v3412_v9 = vpack.c.bf16 %v887_v3, %v885_v1  ;;  %v377_v11 = vld [vmem:[%s4200_s4 + $0x280] sm:$0xff]  ;;  %v382_v17 = vld [vmem:[%s4200_s4 + $0x2a8] sm:$0xff] }
  0x7d   : > { %3387 = vmatprep.subr.bf16.mxu0 %v3386_v49  ;;  %v2892_v49 = vpack.c.bf16 %v367_v39, %v365_v38  ;;  %v2894_v51 = vpack.c.bf16 %v372_v44, %v370_v43  ;;  %v889_v14 = vld [vmem:[%s4200_s4 + $0x1280] sm:$0xff]  ;;  %v384_v18 = vld [vmem:[%s4200_s4 + $0x2b8] sm:$0xff]  ;;  %v895_v30 = vld [vmem:[%s4200_s4 + $0x12b0] sm:$0xff] }
  0x7e   : > { %v3416_v22 = vpack.c.bf16 %v891_v16, %v889_v14  ;;  %v2906_v23 = vpack.c.bf16 %v384_v18, %v382_v17  ;;  %v381_v24 = vld [vmem:[%s4200_s4 + $0x2a0] sm:$0xff]  ;;  %v386_v32 = vld [vmem:[%s4200_s4 + $0x2c8] sm:$0xff]  ;;  %v388_v33 = vld [vmem:[%s4200_s4 + $0x2d8] sm:$0xff] }
  0x7f   : > { %2877 = vmatpush1.bf16.msra.mxu1 %v2876_v55  ;;  %v883_v55 = vld [vmem:[%s4200_s4 + $0x1250] sm:$0xff]  ;;  %v893_v27 = vld [vmem:[%s4200_s4 + $0x12a0] sm:$0xff]  ;;  %v2910_v39 = vpack.c.bf16 %v388_v33, %v386_v32  ;;  %v392_v46 = vld [vmem:[%s4200_s4 + $0x2f8] sm:$0xff] }
  0x80   : > { %3389 = vmatpush1.bf16.msra.mxu0 %v3388_v56  ;;  %2879 = vmatprep.subr.bf16.mxu1 %v2878_v57  ;;  %v374_v56 = vld [vmem:[%s4200_s4 + $0x268] sm:$0xff]  ;;  %v376_v57 = vld [vmem:[%s4200_s4 + $0x278] sm:$0xff]  ;;  %v3408_v60 = vpack.c.bf16 %v883_v55, %v881_v53  ;;  %v3420_v38 = vpack.c.bf16 %v895_v30, %v893_v27  ;;  %v385_v40 = vld [vmem:[%s4200_s4 + $0x2c0] sm:$0xff] }
  0x81   : > { %3391 = vmatprep.subr.bf16.mxu0 %v3390_v61  ;;  %v2898_v61 = vpack.c.bf16 %v376_v57, %v374_v56  ;;  %v897_v42 = vld [vmem:[%s4200_s4 + $0x12c0] sm:$0xff]  ;;  %v899_v44 = vld [vmem:[%s4200_s4 + $0x12d0] sm:$0xff]  ;;  %v902_v47 = vld [vmem:[%s4200_s4 + $0x12e8] sm:$0xff] }
  0x82   : > { %v901_v53 = vld [vmem:[%s4200_s4 + $0x12e0] sm:$0xff]  ;;  %v903_v55 = vld [vmem:[%s4200_s4 + $0x12f0] sm:$0xff]  ;;  %v394_v56 = vld [vmem:[%s4200_s4 + $0x308] sm:$0xff] }
  0x83   : > { %2881 = vmatpush1.bf16.msra.mxu1 %v2880_v4  ;;  %v378_v4 = vld [vmem:[%s4200_s4 + $0x288] sm:$0xff]  ;;  %v396_v57 = vld [vmem:[%s4200_s4 + $0x318] sm:$0xff]  ;;  %v393_v62 = vld [vmem:[%s4200_s4 + $0x300] sm:$0xff] }
  0x84   : > { %3393 = vmatpush1.bf16.msra.mxu0 %v3392_v5  ;;  %2883 = vmatprep.subr.bf16.mxu1 %v2882_v6  ;;  %v380_v5 = vld [vmem:[%s4200_s4 + $0x298] sm:$0xff]  ;;  %v890_v6 = vld [vmem:[%s4200_s4 + $0x1288] sm:$0xff]  ;;  %v395_v0 = vld [vmem:[%s4200_s4 + $0x310] sm:$0xff] }
  0x85   : > { %3395 = vmatprep.subr.bf16.mxu0 %v3394_v10  ;;  %v2902_v10 = vpack.c.bf16 %v380_v5, %v378_v4  ;;  %v3414_v15 = vpack.c.bf16 %v892_v7, %v890_v6  ;;  %v905_v1 = vld [vmem:[%s4200_s4 + $0x1300] sm:$0xff]  ;;  %v907_v3 = vld [vmem:[%s4200_s4 + $0x1310] sm:$0xff]  ;;  %v398_v4 = vld [vmem:[%s4200_s4 + $0x328] sm:$0xff] }
  0x86   : > { %v400_v5 = vld [vmem:[%s4200_s4 + $0x338] sm:$0xff]  ;;  %v910_v6 = vld [vmem:[%s4200_s4 + $0x1328] sm:$0xff]  ;;  %v909_v14 = vld [vmem:[%s4200_s4 + $0x1320] sm:$0xff] }
  0x87   : > { %2885 = vmatpush1.bf16.msra.mxu1 %v2884_v19  ;;  %v894_v19 = vld [vmem:[%s4200_s4 + $0x12a8] sm:$0xff]  ;;  %v912_v7 = vld [vmem:[%s4200_s4 + $0x1338] sm:$0xff]  ;;  %v911_v16 = vld [vmem:[%s4200_s4 + $0x1330] sm:$0xff] }
  0x88   : > { %3397 = vmatpush1.bf16.msra.mxu0 %v3396_v20  ;;  %2887 = vmatprep.subr.bf16.mxu1 %v2886_v21  ;;  %v896_v20 = vld [vmem:[%s4200_s4 + $0x12b8] sm:$0xff]  ;;  %v2904_v21 = vpack.c.bf16 %v379_v13, %v377_v11  ;;  %v397_v11 = vld [vmem:[%s4200_s4 + $0x320] sm:$0xff]  ;;  %v399_v13 = vld [vmem:[%s4200_s4 + $0x330] sm:$0xff] }
  0x89   : > { %3399 = vmatprep.subr.bf16.mxu0 %v3398_v25  ;;  %v383_v25 = vld [vmem:[%s4200_s4 + $0x2b0] sm:$0xff]  ;;  %v3418_v28 = vpack.c.bf16 %v896_v20, %v894_v19  ;;  %v402_v17 = vld [vmem:[%s4200_s4 + $0x348] sm:$0xff]  ;;  %v404_v18 = vld [vmem:[%s4200_s4 + $0x358] sm:$0xff] }
  0x8a   : > { %1562 = vmatmul.mubr.f32.vlgmr.msra.gmra.mrb[0].mxu1 %v4337_v26  ;;  %v371_v26 = vld [vmem:[%s4200_s4 + $0x250] sm:$0xff]  ;;  %v914_v19 = vld [vmem:[%s4200_s4 + $0x1348] sm:$0xff]  ;;  %v916_v20 = vld [vmem:[%s4200_s4 + $0x1358] sm:$0xff] }
  0x8b   : > { %2889 = vmatpush1.bf16.msra.mxu1 %v2888_v35  ;;  %2130 = vmatmul.mubr.f32.vlgmr.msra.gmra.mrb[0].mxu0 %v4344_v29  ;;  %v886_v29 = vld [vmem:[%s4200_s4 + $0x1268] sm:$0xff]  ;;  %v2896_v59 = vpack.c.bf16 %v371_v26, %v369_v52  ;;  %v389_v52 = vld [vmem:[%s4200_s4 + $0x2e0] sm:$0xff]  ;;  %v391_v26 = vld [vmem:[%s4200_s4 + $0x2f0] sm:$0xff] }
  0x8c   : > { %3401 = vmatpush1.bf16.msra.mxu0 %v3400_v36  ;;  %2891 = vmatprep.subr.bf16.mxu1 %v2890_v37  ;;  %v3410_v2 = vpack.c.bf16 %v888_v58, %v886_v29  ;;  %v898_v35 = vld [vmem:[%s4200_s4 + $0x12c8] sm:$0xff]  ;;  %v900_v36 = vld [vmem:[%s4200_s4 + $0x12d8] sm:$0xff]  ;;  %v2908_v37 = vpack.c.bf16 %v383_v25, %v381_v24  ;;  %v401_v24 = vld [vmem:[%s4200_s4 + $0x340] sm:$0xff] }
  0x8d   : > { %3403 = vmatprep.subr.bf16.mxu0 %v3402_v41  ;;  %1632 = vmatprep.mubr.f32.mxu1 %v1345_v45  ;;  %v387_v41 = vld [vmem:[%s4200_s4 + $0x2d0] sm:$0xff]  ;;  %v3422_v43 = vpack.c.bf16 %v900_v36, %v898_v35  ;;  %v390_v45 = vld [vmem:[%s4200_s4 + $0x2e8] sm:$0xff]  ;;  %v908_v58 = vld [vmem:[%s4200_s4 + $0x1318] sm:$0xff] }
  0x8e   : > { %2200 = vmatprep.mubr.f32.mxu0 %v1413_v48  ;;  %v904_v48 = vld [vmem:[%s4200_s4 + $0x12f8] sm:$0xff]  ;;  %v906_v29 = vld [vmem:[%s4200_s4 + $0x1308] sm:$0xff]  ;;  %v403_v25 = vld [vmem:[%s4200_s4 + $0x350] sm:$0xff] }
  0x8f   : > { %2893 = vmatpush1.bf16.msra.mxu1 %v2892_v49  ;;  %v2912_v49 = vpack.c.bf16 %v387_v41, %v385_v40  ;;  %v913_v27 = vld [vmem:[%s4200_s4 + $0x1340] sm:$0xff]  ;;  %v915_v30 = vld [vmem:[%s4200_s4 + $0x1350] sm:$0xff]  ;;  %v406_v32 = vld [vmem:[%s4200_s4 + $0x368] sm:$0xff] }
  0x90   : > { %3405 = vmatpush1.bf16.msra.mxu0 %v3404_v50  ;;  %2895 = vmatprep.subr.bf16.mxu1 %v2894_v51  ;;  %v3424_v50 = vpack.c.bf16 %v899_v44, %v897_v42  ;;  %v2914_v51 = vpack.c.bf16 %v392_v46, %v390_v45  ;;  %v408_v33 = vld [vmem:[%s4200_s4 + $0x378] sm:$0xff]  ;;  %v918_v35 = vld [vmem:[%s4200_s4 + $0x1368] sm:$0xff]  ;;  %v405_v40 = vld [vmem:[%s4200_s4 + $0x360] sm:$0xff] }
  0x91   : > { %3407 = vmatprep.subr.bf16.mxu0 %v3406_v54  ;;  %v3426_v54 = vpack.c.bf16 %v904_v48, %v902_v47  ;;  %v920_v36 = vld [vmem:[%s4200_s4 + $0x1378] sm:$0xff]  ;;  %v407_v41 = vld [vmem:[%s4200_s4 + $0x370] sm:$0xff]  ;;  %v917_v42 = vld [vmem:[%s4200_s4 + $0x1360] sm:$0xff] }
  0x92   : > { %v919_v44 = vld [vmem:[%s4200_s4 + $0x1370] sm:$0xff]  ;;  %v410_v45 = vld [vmem:[%s4200_s4 + $0x388] sm:$0xff]  ;;  %v412_v46 = vld [vmem:[%s4200_s4 + $0x398] sm:$0xff] }
  0x93   : > { %2897 = vmatpush1.bf16.msra.mxu1 %v2896_v59  ;;  %v2916_v59 = vpack.c.bf16 %v391_v26, %v389_v52  ;;  %v922_v47 = vld [vmem:[%s4200_s4 + $0x1388] sm:$0xff]  ;;  %v924_v48 = vld [vmem:[%s4200_s4 + $0x1398] sm:$0xff]  ;;  %v409_v52 = vld [vmem:[%s4200_s4 + $0x380] sm:$0xff] }
  0x94   : > { %3409 = vmatpush1.bf16.msra.mxu0 %v3408_v60  ;;  %2899 = vmatprep.subr.bf16.mxu1 %v2898_v61  ;;  %v3428_v60 = vpack.c.bf16 %v903_v55, %v901_v53  ;;  %v2918_v61 = vpack.c.bf16 %v396_v57, %v394_v56  ;;  %v411_v26 = vld [vmem:[%s4200_s4 + $0x390] sm:$0xff]  ;;  %v921_v53 = vld [vmem:[%s4200_s4 + $0x1380] sm:$0xff]  ;;  %v414_v56 = vld [vmem:[%s4200_s4 + $0x3a8] sm:$0xff] }
  0x95   : > { %3411 = vmatprep.subr.bf16.mxu0 %v3410_v2  ;;  %v3430_v2 = vpack.c.bf16 %v908_v58, %v906_v29  ;;  %v923_v55 = vld [vmem:[%s4200_s4 + $0x1390] sm:$0xff]  ;;  %v416_v57 = vld [vmem:[%s4200_s4 + $0x3b8] sm:$0xff]  ;;  %v926_v29 = vld [vmem:[%s4200_s4 + $0x13a8] sm:$0xff] }
  0x96   : > { %v928_v58 = vld [vmem:[%s4200_s4 + $0x13b8] sm:$0xff] }
  0x97   : > { %2901 = vmatpush1.bf16.msra.mxu1 %v2900_v8  ;;  %v2920_v8 = vpack.c.bf16 %v395_v0, %v393_v62  ;;  %v413_v62 = vld [vmem:[%s4200_s4 + $0x3a0] sm:$0xff]  ;;  %v415_v0 = vld [vmem:[%s4200_s4 + $0x3b0] sm:$0xff] }
  0x98   : > { %3413 = vmatpush1.bf16.msra.mxu0 %v3412_v9  ;;  %2903 = vmatprep.subr.bf16.mxu1 %v2902_v10  ;;  %v3432_v9 = vpack.c.bf16 %v907_v3, %v905_v1  ;;  %v2922_v10 = vpack.c.bf16 %v400_v5, %v398_v4  ;;  %v925_v1 = vld [vmem:[%s4200_s4 + $0x13a0] sm:$0xff]  ;;  %v927_v3 = vld [vmem:[%s4200_s4 + $0x13b0] sm:$0xff]  ;;  %v418_v4 = vld [vmem:[%s4200_s4 + $0x3c8] sm:$0xff] }
  0x99   : > { %3415 = vmatprep.subr.bf16.mxu0 %v3414_v15  ;;  %v3434_v15 = vpack.c.bf16 %v912_v7, %v910_v6  ;;  %v420_v5 = vld [vmem:[%s4200_s4 + $0x3d8] sm:$0xff]  ;;  %v930_v6 = vld [vmem:[%s4200_s4 + $0x13c8] sm:$0xff] }
  0x9a   : > { %v932_v7 = vld [vmem:[%s4200_s4 + $0x13d8] sm:$0xff] }
  0x9b   : > { %2905 = vmatpush1.bf16.msra.mxu1 %v2904_v21  ;;  %v2924_v21 = vpack.c.bf16 %v399_v13, %v397_v11  ;;  %v417_v11 = vld [vmem:[%s4200_s4 + $0x3c0] sm:$0xff]  ;;  %v419_v13 = vld [vmem:[%s4200_s4 + $0x3d0] sm:$0xff] }
  0x9c   : > { %3417 = vmatpush1.bf16.msra.mxu0 %v3416_v22  ;;  %2907 = vmatprep.subr.bf16.mxu1 %v2906_v23  ;;  %v3436_v22 = vpack.c.bf16 %v911_v16, %v909_v14  ;;  %v2926_v23 = vpack.c.bf16 %v404_v18, %v402_v17  ;;  %v929_v14 = vld [vmem:[%s4200_s4 + $0x13c0] sm:$0xff]  ;;  %v931_v16 = vld [vmem:[%s4200_s4 + $0x13d0] sm:$0xff]  ;;  %v422_v17 = vld [vmem:[%s4200_s4 + $0x3e8] sm:$0xff] }
  0x9d   : > { %3419 = vmatprep.subr.bf16.mxu0 %v3418_v28  ;;  %v3438_v28 = vpack.c.bf16 %v916_v20, %v914_v19  ;;  %v424_v18 = vld [vmem:[%s4200_s4 + $0x3f8] sm:$0xff]  ;;  %v934_v19 = vld [vmem:[%s4200_s4 + $0x13e8] sm:$0xff] }
  0x9e   : > { %v936_v20 = vld [vmem:[%s4200_s4 + $0x13f8] sm:$0xff] }
  0x9f   : > { %2909 = vmatpush1.bf16.msra.mxu1 %v2908_v37  ;;  %v2928_v37 = vpack.c.bf16 %v403_v25, %v401_v24  ;;  %v421_v24 = vld [vmem:[%s4200_s4 + $0x3e0] sm:$0xff]  ;;  %v423_v25 = vld [vmem:[%s4200_s4 + $0x3f0] sm:$0xff] }
  0xa0   : > { %3421 = vmatpush1.bf16.msra.mxu0 %v3420_v38  ;;  %2911 = vmatprep.subr.bf16.mxu1 %v2910_v39  ;;  %v3440_v38 = vpack.c.bf16 %v915_v30, %v913_v27  ;;  %v2930_v39 = vpack.c.bf16 %v408_v33, %v406_v32  ;;  %v933_v27 = vld [vmem:[%s4200_s4 + $0x13e0] sm:$0xff]  ;;  %v935_v30 = vld [vmem:[%s4200_s4 + $0x13f0] sm:$0xff]  ;;  %v426_v32 = vld [vmem:[%s4200_s4 + $0x408] sm:$0xff] }
  0xa1   : > { %3423 = vmatprep.subr.bf16.mxu0 %v3422_v43  ;;  %v3442_v43 = vpack.c.bf16 %v920_v36, %v918_v35  ;;  %v428_v33 = vld [vmem:[%s4200_s4 + $0x418] sm:$0xff]  ;;  %v938_v35 = vld [vmem:[%s4200_s4 + $0x1408] sm:$0xff] }
  0xa2   : > { %v940_v36 = vld [vmem:[%s4200_s4 + $0x1418] sm:$0xff] }
  0xa3   : > { %2913 = vmatpush1.bf16.msra.mxu1 %v2912_v49  ;;  %v2932_v49 = vpack.c.bf16 %v407_v41, %v405_v40  ;;  %v425_v40 = vld [vmem:[%s4200_s4 + $0x400] sm:$0xff]  ;;  %v427_v41 = vld [vmem:[%s4200_s4 + $0x410] sm:$0xff] }
  0xa4   : > { %3425 = vmatpush1.bf16.msra.mxu0 %v3424_v50  ;;  %2915 = vmatprep.subr.bf16.mxu1 %v2914_v51  ;;  %v3444_v50 = vpack.c.bf16 %v919_v44, %v917_v42  ;;  %v2934_v51 = vpack.c.bf16 %v412_v46, %v410_v45  ;;  %v937_v42 = vld [vmem:[%s4200_s4 + $0x1400] sm:$0xff]  ;;  %v939_v44 = vld [vmem:[%s4200_s4 + $0x1410] sm:$0xff]  ;;  %v430_v45 = vld [vmem:[%s4200_s4 + $0x428] sm:$0xff] }
  0xa5   : > { %3427 = vmatprep.subr.bf16.mxu0 %v3426_v54  ;;  %v3446_v54 = vpack.c.bf16 %v924_v48, %v922_v47  ;;  %v432_v46 = vld [vmem:[%s4200_s4 + $0x438] sm:$0xff]  ;;  %v942_v47 = vld [vmem:[%s4200_s4 + $0x1428] sm:$0xff] }
  0xa6   : > { %v944_v48 = vld [vmem:[%s4200_s4 + $0x1438] sm:$0xff] }
  0xa7   : > { %2917 = vmatpush1.bf16.msra.mxu1 %v2916_v59  ;;  %v2936_v59 = vpack.c.bf16 %v411_v26, %v409_v52  ;;  %v3464_v52 = vpack.c.bf16 %v939_v44, %v937_v42  ;;  %v2954_v26 = vpack.c.bf16 %v432_v46, %v430_v45  ;;  %v445_v44 = vld [vmem:[%s4200_s4 + $0x4a0] sm:$0xff]  ;;  %v447_v45 = vld [vmem:[%s4200_s4 + $0x4b0] sm:$0xff] }
  0xa8   : > { %3429 = vmatpush1.bf16.msra.mxu0 %v3428_v60  ;;  %2919 = vmatprep.subr.bf16.mxu1 %v2918_v61  ;;  %v3448_v60 = vpack.c.bf16 %v923_v55, %v921_v53  ;;  %v2938_v61 = vpack.c.bf16 %v416_v57, %v414_v56  ;;  %v431_v53 = vld [vmem:[%s4200_s4 + $0x430] sm:$0xff]  ;;  %v4545_v56 = vld [vmem:[%s4213_s29 + $0x28] sm:$0xff]  ;;  %v3466_v57 = vpack.c.bf16 %v944_v48, %v942_v47  ;;  %v957_v46 = vld [vmem:[%s4200_s4 + $0x14a0] sm:$0xff] }
  0xa9   : > { %3431 = vmatprep.subr.bf16.mxu0 %v3430_v2  ;;  %v3450_v2 = vpack.c.bf16 %v928_v58, %v926_v29  ;;  %v943_v29 = vld [vmem:[%s4200_s4 + $0x1430] sm:$0xff]  ;;  %v434_v58 = vld [vmem:[%s4200_s4 + $0x448] sm:$0xff] }
  0xaa   : > { %v959_v48 = vld [vmem:[%s4200_s4 + $0x14b0] sm:$0xff] }
  0xab   : > { %2921 = vmatpush1.bf16.msra.mxu1 %v2920_v8  ;;  %v2940_v8 = vpack.c.bf16 %v415_v0, %v413_v62  ;;  %v948_v62 = vld [vmem:[%s4200_s4 + $0x1458] sm:$0xff] }
  0xac   : > { %3433 = vmatpush1.bf16.msra.mxu0 %v3432_v9  ;;  %2923 = vmatprep.subr.bf16.mxu1 %v2922_v10  ;;  %v3452_v9 = vpack.c.bf16 %v927_v3, %v925_v1  ;;  %v2942_v10 = vpack.c.bf16 %v420_v5, %v418_v4  ;;  %v433_v4 = vld [vmem:[%s4200_s4 + $0x440] sm:$0xff]  ;;  %v435_v5 = vld [vmem:[%s4200_s4 + $0x450] sm:$0xff] }
  0xad   : > { %3435 = vmatprep.subr.bf16.mxu0 %v3434_v15  ;;  %v3454_v15 = vpack.c.bf16 %v932_v7, %v930_v6  ;;  %v945_v6 = vld [vmem:[%s4200_s4 + $0x1440] sm:$0xff] }
  0xaf   : > { %2925 = vmatpush1.bf16.msra.mxu1 %v2924_v21  ;;  %v2944_v21 = vpack.c.bf16 %v419_v13, %v417_v11  ;;  %v952_v11 = vld [vmem:[%s4200_s4 + $0x1478] sm:$0xff]  ;;  %v2960_v13 = vpack.c.bf16 %v435_v5, %v433_v4 }
  0xb0   : > { %3437 = vmatpush1.bf16.msra.mxu0 %v3436_v22  ;;  %2927 = vmatprep.subr.bf16.mxu1 %v2926_v23  ;;  %v3456_v22 = vpack.c.bf16 %v931_v16, %v929_v14  ;;  %v2946_v23 = vpack.c.bf16 %v424_v18, %v422_v17  ;;  %v437_v16 = vld [vmem:[%s4200_s4 + $0x460] sm:$0xff]  ;;  %v439_v17 = vld [vmem:[%s4200_s4 + $0x470] sm:$0xff] }
  0xb1   : > { %3439 = vmatprep.subr.bf16.mxu0 %v3438_v28  ;;  %v3458_v28 = vpack.c.bf16 %v936_v20, %v934_v19  ;;  %v949_v18 = vld [vmem:[%s4200_s4 + $0x1460] sm:$0xff]  ;;  %v951_v20 = vld [vmem:[%s4200_s4 + $0x1470] sm:$0xff] }
  0xb3   : > { %2929 = vmatpush1.bf16.msra.mxu1 %v2928_v37  ;;  %v2948_v37 = vpack.c.bf16 %v423_v25, %v421_v24  ;;  %v956_v24 = vld [vmem:[%s4200_s4 + $0x1498] sm:$0xff]  ;;  %v2964_v25 = vpack.c.bf16 %v439_v17, %v437_v16 }
  0xb4   : > { %3441 = vmatpush1.bf16.msra.mxu0 %v3440_v38  ;;  %2931 = vmatprep.subr.bf16.mxu1 %v2930_v39  ;;  %v3460_v38 = vpack.c.bf16 %v935_v30, %v933_v27  ;;  %v2950_v39 = vpack.c.bf16 %v428_v33, %v426_v32  ;;  %v3476_v27 = vpack.c.bf16 %v951_v20, %v949_v18  ;;  %v441_v30 = vld [vmem:[%s4200_s4 + $0x480] sm:$0xff]  ;;  %v443_v32 = vld [vmem:[%s4200_s4 + $0x490] sm:$0xff] }
  0xb5   : > { %3443 = vmatprep.subr.bf16.mxu0 %v3442_v43  ;;  %v3462_v43 = vpack.c.bf16 %v940_v36, %v938_v35  ;;  %v953_v33 = vld [vmem:[%s4200_s4 + $0x1480] sm:$0xff]  ;;  %v955_v36 = vld [vmem:[%s4200_s4 + $0x1490] sm:$0xff] }
  0xb6   : > { %v3480_v42 = vpack.c.bf16 %v955_v36, %v953_v33  ;;  %v457_v18 = vld [vmem:[%s4200_s4 + $0x500] sm:$0xff] }
  0xb7   : > { %2933 = vmatpush1.bf16.msra.mxu1 %v2932_v49  ;;  %v2952_v49 = vpack.c.bf16 %v427_v41, %v425_v40  ;;  %v960_v40 = vld [vmem:[%s4200_s4 + $0x14b8] sm:$0xff]  ;;  %v2968_v41 = vpack.c.bf16 %v443_v32, %v441_v30  ;;  %v969_v20 = vld [vmem:[%s4200_s4 + $0x1500] sm:$0xff] }
  0xb8   : > { %3445 = vmatpush1.bf16.msra.mxu0 %v3444_v50  ;;  %2935 = vmatprep.subr.bf16.mxu1 %v2934_v51  ;;  %v429_v50 = vld [vmem:[%s4200_s4 + $0x420] sm:$0xff]  ;;  %v4536_v51 = vld [vmem:[%s4213_s29 + $0x8] sm:$0xff] }
  0xb9   : > { %3447 = vmatprep.subr.bf16.mxu0 %v3446_v54  ;;  %v941_v54 = vld [vmem:[%s4200_s4 + $0x1420] sm:$0xff]  ;;  %v4542_v55 = vrot.slane %v4536_v51, %v4322_v12  ;;  %v2956_v1 = vpack.c.bf16 %v431_v53, %v429_v50  ;;  %v452_v50 = vld [vmem:[%s4200_s4 + $0x4d8] sm:$0xff]  ;;  %v2972_v53 = vpack.c.bf16 %v447_v45, %v445_v44 }
  0xba   : > { %v461_v33 = vld [vmem:[%s4200_s4 + $0x520] sm:$0xff] }
  0xbb   : > { %2937 = vmatpush1.bf16.msra.mxu1 %v2936_v59  ;;  %v436_v59 = vld [vmem:[%s4200_s4 + $0x458] sm:$0xff]  ;;  %v1361_v0 = vcombine.high %v4542_v55, %v4542_v55  ;;  %v973_v36 = vld [vmem:[%s4200_s4 + $0x1520] sm:$0xff] }
  0xbc   : > { %3449 = vmatpush1.bf16.msra.mxu0 %v3448_v60  ;;  %2939 = vmatprep.subr.bf16.mxu1 %v2938_v61  ;;  %v4552_v60 = vrot.slane %v4545_v56, %v4322_v12  ;;  %v946_v61 = vld [vmem:[%s4200_s4 + $0x1448] sm:$0xff]  ;;  %v2958_v3 = vpack.c.bf16 %v436_v59, %v434_v58  ;;  %v451_v58 = vld [vmem:[%s4200_s4 + $0x4d0] sm:$0xff]  ;;  %v961_v59 = vld [vmem:[%s4200_s4 + $0x14c0] sm:$0xff] }
  0xbd   : > { %3451 = vmatprep.subr.bf16.mxu0 %v3450_v2  ;;  %v3470_v7 = vpack.c.bf16 %v948_v62, %v946_v61  ;;  %v963_v62 = vld [vmem:[%s4200_s4 + $0x14d0] sm:$0xff] }
  0xbe   : > { %v1429_v2 = vcombine.high %v4552_v60, %v4552_v60  ;;  %v3488_v4 = vpack.c.bf16 %v963_v62, %v961_v59  ;;  %v469_v59 = vld [vmem:[%s4200_s4 + $0x560] sm:$0xff] }
  0xbf   : > { %2941 = vmatpush1.bf16.msra.mxu1 %v2940_v8  ;;  %v947_v8 = vld [vmem:[%s4200_s4 + $0x1450] sm:$0xff]  ;;  %v981_v62 = vld [vmem:[%s4200_s4 + $0x1560] sm:$0xff] }
  0xc0   : > { %3453 = vmatpush1.bf16.msra.mxu0 %v3452_v9  ;;  %2943 = vmatprep.subr.bf16.mxu1 %v2942_v10  ;;  %v440_v9 = vld [vmem:[%s4200_s4 + $0x478] sm:$0xff]  ;;  %v950_v10 = vld [vmem:[%s4200_s4 + $0x1468] sm:$0xff]  ;;  %v3472_v14 = vpack.c.bf16 %v947_v8, %v945_v6  ;;  %v453_v6 = vld [vmem:[%s4200_s4 + $0x4e0] sm:$0xff] }
  0xc1   : > { %3455 = vmatprep.subr.bf16.mxu0 %v3454_v15  ;;  %v3474_v19 = vpack.c.bf16 %v952_v11, %v950_v10  ;;  %v965_v8 = vld [vmem:[%s4200_s4 + $0x14e0] sm:$0xff]  ;;  %v458_v10 = vld [vmem:[%s4200_s4 + $0x508] sm:$0xff]  ;;  %v460_v11 = vld [vmem:[%s4200_s4 + $0x518] sm:$0xff] }
  0xc2   : > { %v2982_v17 = vpack.c.bf16 %v460_v11, %v458_v10  ;;  %v987_v11 = vld [vmem:[%s4200_s4 + $0x1590] sm:$0xff] }
  0xc3   : > { %2945 = vmatpush1.bf16.msra.mxu1 %v2944_v21  ;;  %v442_v21 = vld [vmem:[%s4200_s4 + $0x488] sm:$0xff] }
  0xc4   : > { %3457 = vmatpush1.bf16.msra.mxu0 %v3456_v22  ;;  %2947 = vmatprep.subr.bf16.mxu1 %v2946_v23  ;;  %v444_v22 = vld [vmem:[%s4200_s4 + $0x498] sm:$0xff]  ;;  %v954_v23 = vld [vmem:[%s4200_s4 + $0x1488] sm:$0xff] }
  0xc5   : > { %3459 = vmatprep.subr.bf16.mxu0 %v3458_v28  ;;  %v2966_v28 = vpack.c.bf16 %v444_v22, %v442_v21  ;;  %v3478_v35 = vpack.c.bf16 %v956_v24, %v954_v23  ;;  %v971_v22 = vld [vmem:[%s4200_s4 + $0x1510] sm:$0xff]  ;;  %v462_v23 = vld [vmem:[%s4200_s4 + $0x528] sm:$0xff]  ;;  %v464_v24 = vld [vmem:[%s4200_s4 + $0x538] sm:$0xff] }
  0xc6   : > { %v3496_v30 = vpack.c.bf16 %v971_v22, %v969_v20  ;;  %v2986_v32 = vpack.c.bf16 %v464_v24, %v462_v23  ;;  %v477_v20 = vld [vmem:[%s4200_s4 + $0x5a0] sm:$0xff]  ;;  %v991_v24 = vld [vmem:[%s4200_s4 + $0x15b0] sm:$0xff] }
  0xc7   : > { %2949 = vmatpush1.bf16.msra.mxu1 %v2948_v37  ;;  %v446_v37 = vld [vmem:[%s4200_s4 + $0x4a8] sm:$0xff]  ;;  %v989_v22 = vld [vmem:[%s4200_s4 + $0x15a0] sm:$0xff] }
  0xc8   : > { %3461 = vmatpush1.bf16.msra.mxu0 %v3460_v38  ;;  %2951 = vmatprep.subr.bf16.mxu1 %v2950_v39  ;;  %v448_v38 = vld [vmem:[%s4200_s4 + $0x4b8] sm:$0xff]  ;;  %v958_v39 = vld [vmem:[%s4200_s4 + $0x14a8] sm:$0xff] }
  0xc9   : > { %3463 = vmatprep.subr.bf16.mxu0 %v3462_v43  ;;  %v2970_v43 = vpack.c.bf16 %v448_v38, %v446_v37  ;;  %v3482_v47 = vpack.c.bf16 %v960_v40, %v958_v39  ;;  %v975_v38 = vld [vmem:[%s4200_s4 + $0x1530] sm:$0xff]  ;;  %v466_v39 = vld [vmem:[%s4200_s4 + $0x548] sm:$0xff]  ;;  %v468_v40 = vld [vmem:[%s4200_s4 + $0x558] sm:$0xff] }
  0xca   : > { %1633 = vmatmul.mubr.f32.vlgmr.msra.gmra.mrb[0].mxu1 %v4393_v31  ;;  %v3468_v31 = vpack.c.bf16 %v943_v29, %v941_v54  ;;  %v3484_v54 = vpack.c.bf16 %v959_v48, %v957_v46  ;;  %v449_v29 = vld [vmem:[%s4200_s4 + $0x4c0] sm:$0xff]  ;;  %v3500_v44 = vpack.c.bf16 %v975_v38, %v973_v36  ;;  %v2990_v45 = vpack.c.bf16 %v468_v40, %v466_v39  ;;  %v995_v40 = vld [vmem:[%s4200_s4 + $0x15d0] sm:$0xff] }
  0xcb   : > { %2953 = vmatpush1.bf16.msra.mxu1 %v2952_v49  ;;  %2201 = vmatmul.mubr.f32.vlgmr.msra.gmra.mrb[0].mxu0 %v4398_v34  ;;  %v438_v34 = vld [vmem:[%s4200_s4 + $0x468] sm:$0xff]  ;;  %v465_v46 = vld [vmem:[%s4200_s4 + $0x540] sm:$0xff] }
  0xcc   : > { %3465 = vmatpush1.bf16.msra.mxu0 %v3464_v52  ;;  %2955 = vmatprep.subr.bf16.mxu1 %v2954_v26  ;;  %v2962_v15 = vpack.c.bf16 %v440_v9, %v438_v34  ;;  %v450_v49 = vld [vmem:[%s4200_s4 + $0x4c8] sm:$0xff]  ;;  %v964_v26 = vld [vmem:[%s4200_s4 + $0x14d8] sm:$0xff]  ;;  %v967_v9 = vld [vmem:[%s4200_s4 + $0x14f0] sm:$0xff] }
  0xcd   : > { %3467 = vmatprep.subr.bf16.mxu0 %v3466_v57  ;;  %1703 = vmatprep.mubr.f32.mxu1 %v1361_v0  ;;  %v962_v52 = vld [vmem:[%s4200_s4 + $0x14c8] sm:$0xff]  ;;  %v2974_v57 = vpack.c.bf16 %v452_v50, %v450_v49  ;;  %v3492_v16 = vpack.c.bf16 %v967_v9, %v965_v8  ;;  %v977_v48 = vld [vmem:[%s4200_s4 + $0x1540] sm:$0xff]  ;;  %v979_v50 = vld [vmem:[%s4200_s4 + $0x1550] sm:$0xff] }
  0xce   : > { %2271 = vmatprep.mubr.f32.mxu0 %v1429_v2  ;;  %v3486_v61 = vpack.c.bf16 %v964_v26, %v962_v52  ;;  %v454_v0 = vld [vmem:[%s4200_s4 + $0x4e8] sm:$0xff]  ;;  %v472_v26 = vld [vmem:[%s4200_s4 + $0x578] sm:$0xff]  ;;  %v473_v8 = vld [vmem:[%s4200_s4 + $0x580] sm:$0xff] }
  0xcf   : > { %2957 = vmatpush1.bf16.msra.mxu1 %v2956_v1  ;;  %v456_v1 = vld [vmem:[%s4200_s4 + $0x4f8] sm:$0xff]  ;;  %v966_v2 = vld [vmem:[%s4200_s4 + $0x14e8] sm:$0xff]  ;;  %v985_v9 = vld [vmem:[%s4200_s4 + $0x1580] sm:$0xff] }
  0xd0   : > { %3469 = vmatpush1.bf16.msra.mxu0 %v3468_v31  ;;  %2959 = vmatprep.subr.bf16.mxu1 %v2958_v3  ;;  %v968_v31 = vld [vmem:[%s4200_s4 + $0x14f8] sm:$0xff]  ;;  %v2976_v3 = vpack.c.bf16 %v451_v58, %v449_v29  ;;  %v2978_v5 = vpack.c.bf16 %v456_v1, %v454_v0  ;;  %v470_v52 = vld [vmem:[%s4200_s4 + $0x568] sm:$0xff]  ;;  %v3504_v29 = vpack.c.bf16 %v979_v50, %v977_v48  ;;  %v983_v1 = vld [vmem:[%s4200_s4 + $0x1570] sm:$0xff] }
  0xd1   : > { %3471 = vmatprep.subr.bf16.mxu0 %v3470_v7  ;;  %v455_v7 = vld [vmem:[%s4200_s4 + $0x4f0] sm:$0xff]  ;;  %v3490_v34 = vpack.c.bf16 %v968_v31, %v966_v2  ;;  %v2994_v58 = vpack.c.bf16 %v472_v26, %v470_v52  ;;  %v474_v2 = vld [vmem:[%s4200_s4 + $0x588] sm:$0xff]  ;;  %v476_v31 = vld [vmem:[%s4200_s4 + $0x598] sm:$0xff] }
  0xd2   : > { %v481_v36 = vld [vmem:[%s4200_s4 + $0x5c0] sm:$0xff]  ;;  %v999_v26 = vld [vmem:[%s4200_s4 + $0x15f0] sm:$0xff] }
  0xd3   : > { %2961 = vmatpush1.bf16.msra.mxu1 %v2960_v13  ;;  %v970_v13 = vld [vmem:[%s4200_s4 + $0x1508] sm:$0xff]  ;;  %v993_v38 = vld [vmem:[%s4200_s4 + $0x15c0] sm:$0xff] }
  0xd4   : > { %3473 = vmatpush1.bf16.msra.mxu0 %v3472_v14  ;;  %2963 = vmatprep.subr.bf16.mxu1 %v2962_v15  ;;  %v972_v14 = vld [vmem:[%s4200_s4 + $0x1518] sm:$0xff]  ;;  %v2980_v15 = vpack.c.bf16 %v455_v7, %v453_v6  ;;  %v3508_v6 = vpack.c.bf16 %v983_v1, %v981_v62  ;;  %v2998_v7 = vpack.c.bf16 %v476_v31, %v474_v2  ;;  %v485_v48 = vld [vmem:[%s4200_s4 + $0x5e0] sm:$0xff]  ;;  %v491_v2 = vld [vmem:[%s4200_s4 + $0x610] sm:$0xff] }
  0xd5   : > { %3475 = vmatprep.subr.bf16.mxu0 %v3474_v19  ;;  %v459_v19 = vld [vmem:[%s4200_s4 + $0x510] sm:$0xff]  ;;  %v3494_v21 = vpack.c.bf16 %v972_v14, %v970_v13  ;;  %v478_v13 = vld [vmem:[%s4200_s4 + $0x5a8] sm:$0xff]  ;;  %v480_v14 = vld [vmem:[%s4200_s4 + $0x5b8] sm:$0xff] }
  0xd6   : > { %v997_v50 = vld [vmem:[%s4200_s4 + $0x15e0] sm:$0xff] }
  0xd7   : > { %2965 = vmatpush1.bf16.msra.mxu1 %v2964_v25  ;;  %v974_v25 = vld [vmem:[%s4200_s4 + $0x1528] sm:$0xff]  ;;  %v3524_v62 = vpack.c.bf16 %v999_v26, %v997_v50  ;;  %v489_v1 = vld [vmem:[%s4200_s4 + $0x600] sm:$0xff] }
  0xd8   : > { %3477 = vmatpush1.bf16.msra.mxu0 %v3476_v27  ;;  %2967 = vmatprep.subr.bf16.mxu1 %v2966_v28  ;;  %v976_v27 = vld [vmem:[%s4200_s4 + $0x1538] sm:$0xff]  ;;  %v2984_v28 = vpack.c.bf16 %v459_v19, %v457_v18  ;;  %v3512_v18 = vpack.c.bf16 %v987_v11, %v985_v9  ;;  %v3002_v19 = vpack.c.bf16 %v480_v14, %v478_v13  ;;  %v1001_v31 = vld [vmem:[%s4200_s4 + $0x1600] sm:$0xff]  ;;  %v495_v13 = vld [vmem:[%s4200_s4 + $0x630] sm:$0xff] }
  0xd9   : > { %3479 = vmatprep.subr.bf16.mxu0 %v3478_v35  ;;  %v463_v35 = vld [vmem:[%s4200_s4 + $0x530] sm:$0xff]  ;;  %v3498_v37 = vpack.c.bf16 %v976_v27, %v974_v25  ;;  %v482_v25 = vld [vmem:[%s4200_s4 + $0x5c8] sm:$0xff]  ;;  %v484_v27 = vld [vmem:[%s4200_s4 + $0x5d8] sm:$0xff] }
  0xda   : > { %v493_v11 = vld [vmem:[%s4200_s4 + $0x620] sm:$0xff] }
  0xdb   : > { %2969 = vmatpush1.bf16.msra.mxu1 %v2968_v41  ;;  %v978_v41 = vld [vmem:[%s4200_s4 + $0x1548] sm:$0xff]  ;;  %v1005_v14 = vld [vmem:[%s4200_s4 + $0x1620] sm:$0xff] }
  0xdc   : > { %3481 = vmatpush1.bf16.msra.mxu0 %v3480_v42  ;;  %2971 = vmatprep.subr.bf16.mxu1 %v2970_v43  ;;  %v980_v42 = vld [vmem:[%s4200_s4 + $0x1558] sm:$0xff]  ;;  %v2988_v43 = vpack.c.bf16 %v463_v35, %v461_v33  ;;  %v3516_v33 = vpack.c.bf16 %v991_v24, %v989_v22  ;;  %v3006_v35 = vpack.c.bf16 %v484_v27, %v482_v25  ;;  %v497_v27 = vld [vmem:[%s4200_s4 + $0x640] sm:$0xff] }
  0xdd   : > { %3483 = vmatprep.subr.bf16.mxu0 %v3482_v47  ;;  %v467_v47 = vld [vmem:[%s4200_s4 + $0x550] sm:$0xff]  ;;  %v3502_v49 = vpack.c.bf16 %v980_v42, %v978_v41  ;;  %v486_v41 = vld [vmem:[%s4200_s4 + $0x5e8] sm:$0xff]  ;;  %v488_v42 = vld [vmem:[%s4200_s4 + $0x5f8] sm:$0xff] }
  0xde   : > { %v505_v26 = vld [vmem:[%s4200_s4 + $0x680] sm:$0xff] }
  0xdf   : > { %2973 = vmatpush1.bf16.msra.mxu1 %v2972_v53  ;;  %v982_v53 = vld [vmem:[%s4200_s4 + $0x1568] sm:$0xff] }
  0xe0   : > { %3485 = vmatpush1.bf16.msra.mxu0 %v3484_v54  ;;  %2975 = vmatprep.subr.bf16.mxu1 %v2974_v57  ;;  %v984_v54 = vld [vmem:[%s4200_s4 + $0x1578] sm:$0xff]  ;;  %v2992_v57 = vpack.c.bf16 %v467_v47, %v465_v46  ;;  %v3520_v46 = vpack.c.bf16 %v995_v40, %v993_v38  ;;  %v3010_v47 = vpack.c.bf16 %v488_v42, %v486_v41  ;;  %v501_v40 = vld [vmem:[%s4200_s4 + $0x660] sm:$0xff]  ;;  %v503_v41 = vld [vmem:[%s4200_s4 + $0x670] sm:$0xff] }
  0xe1   : > { %3487 = vmatprep.subr.bf16.mxu0 %v3486_v61  ;;  %v471_v61 = vld [vmem:[%s4200_s4 + $0x570] sm:$0xff]  ;;  %v3506_v0 = vpack.c.bf16 %v984_v54, %v982_v53  ;;  %v490_v53 = vld [vmem:[%s4200_s4 + $0x608] sm:$0xff]  ;;  %v492_v54 = vld [vmem:[%s4200_s4 + $0x618] sm:$0xff] }
  0xe2   : > { %v1013_v42 = vld [vmem:[%s4200_s4 + $0x1660] sm:$0xff] }
  0xe3   : > { %2977 = vmatpush1.bf16.msra.mxu1 %v2976_v3  ;;  %v986_v3 = vld [vmem:[%s4200_s4 + $0x1588] sm:$0xff] }
  0xe4   : > { %3489 = vmatpush1.bf16.msra.mxu0 %v3488_v4  ;;  %2979 = vmatprep.subr.bf16.mxu1 %v2978_v5  ;;  %v988_v4 = vld [vmem:[%s4200_s4 + $0x1598] sm:$0xff]  ;;  %v2996_v5 = vpack.c.bf16 %v471_v61, %v469_v59  ;;  %v1414_v59 = vcombine.high %v4545_v56, %v4545_v56 }
  0xe5   : > { %3491 = vmatprep.subr.bf16.mxu0 %v3490_v34  ;;  %v475_v34 = vld [vmem:[%s4200_s4 + $0x590] sm:$0xff]  ;;  %v3510_v10 = vpack.c.bf16 %v988_v4, %v986_v3  ;;  %v494_v4 = vld [vmem:[%s4200_s4 + $0x628] sm:$0xff] }
  0xe6   : > { %v1003_v3 = vld [vmem:[%s4200_s4 + $0x1610] sm:$0xff] }
  0xe7   : > { %2981 = vmatpush1.bf16.msra.mxu1 %v2980_v15  ;;  %v990_v15 = vld [vmem:[%s4200_s4 + $0x15a8] sm:$0xff]  ;;  %v3528_v9 = vpack.c.bf16 %v1003_v3, %v1001_v31  ;;  %v509_v31 = vld [vmem:[%s4200_s4 + $0x6a0] sm:$0xff] }
  0xe8   : > { %3493 = vmatpush1.bf16.msra.mxu0 %v3492_v16  ;;  %2983 = vmatprep.subr.bf16.mxu1 %v2982_v17  ;;  %v992_v16 = vld [vmem:[%s4200_s4 + $0x15b8] sm:$0xff]  ;;  %v3000_v17 = vpack.c.bf16 %v475_v34, %v473_v8  ;;  %v4690_v8 = vrot.slane %v1414_v59, %v4322_v12  ;;  %v3016_v34 = vpack.c.bf16 %v491_v2, %v489_v1  ;;  %v1021_v3 = vld [vmem:[%s4200_s4 + $0x16a0] sm:$0xff] }
  0xe9   : > { %3495 = vmatprep.subr.bf16.mxu0 %v3494_v21  ;;  %v479_v21 = vld [vmem:[%s4200_s4 + $0x5b0] sm:$0xff]  ;;  %v3514_v23 = vpack.c.bf16 %v992_v16, %v990_v15  ;;  %v512_v59 = vld [vmem:[%s4200_s4 + $0x6b8] sm:$0xff] }
  0xea   : > { %v1007_v16 = vld [vmem:[%s4200_s4 + $0x1630] sm:$0xff]  ;;  %v1430_v22 = vcombine.high %v4690_v8, %v4690_v8 }
  0xeb   : > { %2985 = vmatpush1.bf16.msra.mxu1 %v2984_v28  ;;  %v994_v28 = vld [vmem:[%s4200_s4 + $0x15c8] sm:$0xff]  ;;  %v3532_v24 = vpack.c.bf16 %v1007_v16, %v1005_v14  ;;  %v513_v14 = vld [vmem:[%s4200_s4 + $0x6c0] sm:$0xff] }
  0xec   : > { %3497 = vmatpush1.bf16.msra.mxu0 %v3496_v30  ;;  %2987 = vmatprep.subr.bf16.mxu1 %v2986_v32  ;;  %v996_v30 = vld [vmem:[%s4200_s4 + $0x15d8] sm:$0xff]  ;;  %v3004_v32 = vpack.c.bf16 %v479_v21, %v477_v20  ;;  %v1010_v20 = vld [vmem:[%s4200_s4 + $0x1648] sm:$0xff]  ;;  %v1025_v16 = vld [vmem:[%s4200_s4 + $0x16c0] sm:$0xff] }
  0xed   : > { %3499 = vmatprep.subr.bf16.mxu0 %v3498_v37  ;;  %v483_v37 = vld [vmem:[%s4200_s4 + $0x5d0] sm:$0xff]  ;;  %v3518_v39 = vpack.c.bf16 %v996_v30, %v994_v28  ;;  %v1012_v21 = vld [vmem:[%s4200_s4 + $0x1658] sm:$0xff]  ;;  %v1009_v28 = vld [vmem:[%s4200_s4 + $0x1640] sm:$0xff] }
  0xee   : > { %v3534_v30 = vpack.c.bf16 %v1012_v21, %v1010_v20  ;;  %v520_v20 = vld [vmem:[%s4200_s4 + $0x6f8] sm:$0xff]  ;;  %v1030_v21 = vld [vmem:[%s4200_s4 + $0x16e8] sm:$0xff] }
  0xef   : > { %2989 = vmatpush1.bf16.msra.mxu1 %v2988_v43  ;;  %v998_v43 = vld [vmem:[%s4200_s4 + $0x15e8] sm:$0xff] }
  0xf0   : > { %3501 = vmatpush1.bf16.msra.mxu0 %v3500_v44  ;;  %2991 = vmatprep.subr.bf16.mxu1 %v2990_v45  ;;  %v1000_v44 = vld [vmem:[%s4200_s4 + $0x15f8] sm:$0xff]  ;;  %v3008_v45 = vpack.c.bf16 %v483_v37, %v481_v36 }
  0xf1   : > { %3503 = vmatprep.subr.bf16.mxu0 %v3502_v49  ;;  %v487_v49 = vld [vmem:[%s4200_s4 + $0x5f0] sm:$0xff]  ;;  %v3522_v52 = vpack.c.bf16 %v1000_v44, %v998_v43  ;;  %v1016_v36 = vld [vmem:[%s4200_s4 + $0x1678] sm:$0xff] }
  0xf2   : > { %v3012_v61 = vpack.c.bf16 %v487_v49, %v485_v48  ;;  %v1015_v44 = vld [vmem:[%s4200_s4 + $0x1670] sm:$0xff]  ;;  %v1020_v48 = vld [vmem:[%s4200_s4 + $0x1698] sm:$0xff]  ;;  %v3028_v49 = vpack.c.bf16 %v503_v41, %v501_v40  ;;  %v521_v40 = vld [vmem:[%s4200_s4 + $0x700] sm:$0xff] }
  0xf3   : > { %2993 = vmatpush1.bf16.msra.mxu1 %v2992_v57  ;;  %v1346_v57 = vcombine.high %v4536_v51, %v4536_v51  ;;  %v3540_v50 = vpack.c.bf16 %v1015_v44, %v1013_v42  ;;  %v523_v41 = vld [vmem:[%s4200_s4 + $0x710] sm:$0xff]  ;;  %v1033_v42 = vld [vmem:[%s4200_s4 + $0x1700] sm:$0xff] }
  0xf4   : > { %3505 = vmatpush1.bf16.msra.mxu0 %v3504_v29  ;;  %2995 = vmatprep.subr.bf16.mxu1 %v2994_v58  ;;  %v1002_v29 = vld [vmem:[%s4200_s4 + $0x1608] sm:$0xff]  ;;  %v1004_v58 = vld [vmem:[%s4200_s4 + $0x1618] sm:$0xff]  ;;  %v1035_v44 = vld [vmem:[%s4200_s4 + $0x1710] sm:$0xff] }
  0xf5   : > { %3507 = vmatprep.subr.bf16.mxu0 %v3506_v0  ;;  %v3014_v0 = vpack.c.bf16 %v492_v54, %v490_v53  ;;  %v3526_v51 = vpack.c.bf16 %v1004_v58, %v1002_v29  ;;  %v4685_v56 = vrot.slane %v1346_v57, %v4322_v12  ;;  %v507_v53 = vld [vmem:[%s4200_s4 + $0x690] sm:$0xff]  ;;  %v1017_v54 = vld [vmem:[%s4200_s4 + $0x1680] sm:$0xff]  ;;  %v510_v58 = vld [vmem:[%s4200_s4 + $0x6a8] sm:$0xff] }
  0xf6   : > { %v1019_v29 = vld [vmem:[%s4200_s4 + $0x1690] sm:$0xff]  ;;  %v3034_v2 = vpack.c.bf16 %v512_v59, %v510_v58  ;;  %v530_v58 = vld [vmem:[%s4200_s4 + $0x748] sm:$0xff]  ;;  %v532_v59 = vld [vmem:[%s4200_s4 + $0x758] sm:$0xff] }
  0xf7   : > { %2997 = vmatpush1.bf16.msra.mxu1 %v2996_v5  ;;  %v496_v5 = vld [vmem:[%s4200_s4 + $0x638] sm:$0xff]  ;;  %v3544_v1 = vpack.c.bf16 %v1019_v29, %v1017_v54  ;;  %v1037_v54 = vld [vmem:[%s4200_s4 + $0x1720] sm:$0xff]  ;;  %v1039_v29 = vld [vmem:[%s4200_s4 + $0x1730] sm:$0xff] }
  0xf8   : > { %3509 = vmatpush1.bf16.msra.mxu0 %v3508_v6  ;;  %2999 = vmatprep.subr.bf16.mxu1 %v2998_v7  ;;  %v1006_v6 = vld [vmem:[%s4200_s4 + $0x1628] sm:$0xff]  ;;  %v1008_v7 = vld [vmem:[%s4200_s4 + $0x1638] sm:$0xff] }
  0xf9   : > { %3511 = vmatprep.subr.bf16.mxu0 %v3510_v10  ;;  %v3018_v10 = vpack.c.bf16 %v496_v5, %v494_v4  ;;  %v3530_v15 = vpack.c.bf16 %v1008_v7, %v1006_v6  ;;  %v1023_v5 = vld [vmem:[%s4200_s4 + $0x16b0] sm:$0xff]  ;;  %v514_v6 = vld [vmem:[%s4200_s4 + $0x6c8] sm:$0xff]  ;;  %v516_v7 = vld [vmem:[%s4200_s4 + $0x6d8] sm:$0xff] }
  0xfb   : > { %3001 = vmatpush1.bf16.msra.mxu1 %v3000_v17  ;;  %v498_v17 = vld [vmem:[%s4200_s4 + $0x648] sm:$0xff] }
  0xfc   : > { %3513 = vmatpush1.bf16.msra.mxu0 %v3512_v18  ;;  %3003 = vmatprep.subr.bf16.mxu1 %v3002_v19  ;;  %v500_v18 = vld [vmem:[%s4200_s4 + $0x658] sm:$0xff]  ;;  %v1362_v19 = vcombine.high %v4685_v56, %v4685_v56 }
  0xfd   : > { %3515 = vmatprep.subr.bf16.mxu0 %v3514_v23  ;;  %v3020_v23 = vpack.c.bf16 %v495_v13, %v493_v11  ;;  %v3022_v25 = vpack.c.bf16 %v500_v18, %v498_v17  ;;  %v3548_v11 = vpack.c.bf16 %v1023_v5, %v1021_v3  ;;  %v3038_v13 = vpack.c.bf16 %v516_v7, %v514_v6  ;;  %v1027_v18 = vld [vmem:[%s4200_s4 + $0x16d0] sm:$0xff]  ;;  %v1041_v3 = vld [vmem:[%s4200_s4 + $0x1740] sm:$0xff]  ;;  %v534_v6 = vld [vmem:[%s4200_s4 + $0x768] sm:$0xff] }
  0xfe   : > { %v1043_v5 = vld [vmem:[%s4200_s4 + $0x1750] sm:$0xff]  ;;  %v536_v7 = vld [vmem:[%s4200_s4 + $0x778] sm:$0xff] }
  0xff   : > { %3005 = vmatpush1.bf16.msra.mxu1 %v3004_v32  ;;  %v1011_v32 = vld [vmem:[%s4200_s4 + $0x1650] sm:$0xff] }
 0x100   : > { %3517 = vmatpush1.bf16.msra.mxu0 %v3516_v33  ;;  %3007 = vmatprep.subr.bf16.mxu1 %v3006_v35  ;;  %v502_v33 = vld [vmem:[%s4200_s4 + $0x668] sm:$0xff]  ;;  %v504_v35 = vld [vmem:[%s4200_s4 + $0x678] sm:$0xff]  ;;  %v3536_v38 = vpack.c.bf16 %v1011_v32, %v1009_v28  ;;  %v1029_v28 = vld [vmem:[%s4200_s4 + $0x16e0] sm:$0xff] }
 0x101   : > { %3519 = vmatprep.subr.bf16.mxu0 %v3518_v39  ;;  %v3026_v39 = vpack.c.bf16 %v504_v35, %v502_v33  ;;  %v1031_v32 = vld [vmem:[%s4200_s4 + $0x16f0] sm:$0xff]  ;;  %v522_v33 = vld [vmem:[%s4200_s4 + $0x708] sm:$0xff]  ;;  %v524_v35 = vld [vmem:[%s4200_s4 + $0x718] sm:$0xff] }
 0x103   : > { %3009 = vmatpush1.bf16.msra.mxu1 %v3008_v45  ;;  %v506_v45 = vld [vmem:[%s4200_s4 + $0x688] sm:$0xff] }
 0x104   : > { %3521 = vmatpush1.bf16.msra.mxu0 %v3520_v46  ;;  %3011 = vmatprep.subr.bf16.mxu1 %v3010_v47  ;;  %v508_v46 = vld [vmem:[%s4200_s4 + $0x698] sm:$0xff]  ;;  %v1018_v47 = vld [vmem:[%s4200_s4 + $0x1688] sm:$0xff] }
 0x105   : > { %3523 = vmatprep.subr.bf16.mxu0 %v3522_v52  ;;  %v3030_v52 = vpack.c.bf16 %v508_v46, %v506_v45  ;;  %v3542_v57 = vpack.c.bf16 %v1020_v48, %v1018_v47  ;;  %v526_v45 = vld [vmem:[%s4200_s4 + $0x728] sm:$0xff]  ;;  %v528_v46 = vld [vmem:[%s4200_s4 + $0x738] sm:$0xff] }
 0x106   : > { %v1038_v47 = vld [vmem:[%s4200_s4 + $0x1728] sm:$0xff]  ;;  %v1040_v48 = vld [vmem:[%s4200_s4 + $0x1738] sm:$0xff] }
 0x107   : > { %3013 = vmatpush1.bf16.msra.mxu1 %v3012_v61  ;;  %v1022_v61 = vld [vmem:[%s4200_s4 + $0x16a8] sm:$0xff] }
 0x108   : > { %3525 = vmatpush1.bf16.msra.mxu0 %v3524_v62  ;;  %3015 = vmatprep.subr.bf16.mxu1 %v3014_v0  ;;  %v1024_v62 = vld [vmem:[%s4200_s4 + $0x16b8] sm:$0xff]  ;;  %v3032_v0 = vpack.c.bf16 %v507_v53, %v505_v26  ;;  %v525_v26 = vld [vmem:[%s4200_s4 + $0x720] sm:$0xff]  ;;  %v527_v53 = vld [vmem:[%s4200_s4 + $0x730] sm:$0xff] }
 0x109   : > { %3527 = vmatprep.subr.bf16.mxu0 %v3526_v51  ;;  %v511_v51 = vld [vmem:[%s4200_s4 + $0x6b0] sm:$0xff]  ;;  %v3546_v4 = vpack.c.bf16 %v1024_v62, %v1022_v61  ;;  %v1042_v61 = vld [vmem:[%s4200_s4 + $0x1748] sm:$0xff]  ;;  %v1044_v62 = vld [vmem:[%s4200_s4 + $0x1758] sm:$0xff] }
 0x10a   : > { %1704 = vmatmul.mubr.f32.vlgmr.msra.gmra.mrb[0].mxu1 %v4542_v55  ;;  %v499_v55 = vld [vmem:[%s4200_s4 + $0x650] sm:$0xff] }
 0x10b   : > { %3017 = vmatpush1.bf16.msra.mxu1 %v3016_v34  ;;  %2272 = vmatmul.mubr.f32.vlgmr.msra.gmra.mrb[0].mxu0 %v4552_v60  ;;  %v1014_v60 = vld [vmem:[%s4200_s4 + $0x1668] sm:$0xff]  ;;  %v3024_v37 = vpack.c.bf16 %v499_v55, %v497_v27  ;;  %v517_v27 = vld [vmem:[%s4200_s4 + $0x6e0] sm:$0xff]  ;;  %v519_v55 = vld [vmem:[%s4200_s4 + $0x6f0] sm:$0xff] }
 0x10c   : > { %3529 = vmatpush1.bf16.msra.mxu0 %v3528_v9  ;;  %3019 = vmatprep.subr.bf16.mxu1 %v3018_v10  ;;  %v3538_v43 = vpack.c.bf16 %v1016_v36, %v1014_v60  ;;  %v1026_v34 = vld [vmem:[%s4200_s4 + $0x16c8] sm:$0xff]  ;;  %v1028_v9 = vld [vmem:[%s4200_s4 + $0x16d8] sm:$0xff]  ;;  %v3036_v10 = vpack.c.bf16 %v511_v51, %v509_v31  ;;  %v529_v31 = vld [vmem:[%s4200_s4 + $0x740] sm:$0xff] }
 0x10d   : > { %3531 = vmatprep.subr.bf16.mxu0 %v3530_v15  ;;  %1774 = vmatprep.mubr.f32.mxu1 %v1362_v19  ;;  %v515_v15 = vld [vmem:[%s4200_s4 + $0x6d0] sm:$0xff]  ;;  %v3550_v17 = vpack.c.bf16 %v1028_v9, %v1026_v34  ;;  %v518_v19 = vld [vmem:[%s4200_s4 + $0x6e8] sm:$0xff]  ;;  %v1036_v36 = vld [vmem:[%s4200_s4 + $0x1718] sm:$0xff] }
 0x10e   : > { %2342 = vmatprep.mubr.f32.mxu0 %v1430_v22  ;;  %v1032_v22 = vld [vmem:[%s4200_s4 + $0x16f8] sm:$0xff]  ;;  %v1034_v60 = vld [vmem:[%s4200_s4 + $0x1708] sm:$0xff]  ;;  %v531_v51 = vld [vmem:[%s4200_s4 + $0x750] sm:$0xff] }
 0x10f   : > { %3021 = vmatpush1.bf16.msra.mxu1 %v3020_v23  ;;  %v3040_v23 = vpack.c.bf16 %v515_v15, %v513_v14  ;;  %v1046_v34 = vld [vmem:[%s4200_s4 + $0x1768] sm:$0xff]  ;;  %v1048_v9 = vld [vmem:[%s4200_s4 + $0x1778] sm:$0xff]  ;;  %v533_v14 = vld [vmem:[%s4200_s4 + $0x760] sm:$0xff] }
 0x110   : > { %3533 = vmatpush1.bf16.msra.mxu0 %v3532_v24  ;;  %3023 = vmatprep.subr.bf16.mxu1 %v3022_v25  ;;  %v3552_v24 = vpack.c.bf16 %v1027_v18, %v1025_v16  ;;  %v3042_v25 = vpack.c.bf16 %v520_v20, %v518_v19  ;;  %v535_v15 = vld [vmem:[%s4200_s4 + $0x770] sm:$0xff]  ;;  %v1045_v16 = vld [vmem:[%s4200_s4 + $0x1760] sm:$0xff]  ;;  %v538_v19 = vld [vmem:[%s4200_s4 + $0x788] sm:$0xff] }
 0x111   : > { %3535 = vmatprep.subr.bf16.mxu0 %v3534_v30  ;;  %v3554_v30 = vpack.c.bf16 %v1032_v22, %v1030_v21  ;;  %v1047_v18 = vld [vmem:[%s4200_s4 + $0x1770] sm:$0xff]  ;;  %v540_v20 = vld [vmem:[%s4200_s4 + $0x798] sm:$0xff]  ;;  %v1050_v21 = vld [vmem:[%s4200_s4 + $0x1788] sm:$0xff] }
 0x112   : > { %v1052_v22 = vld [vmem:[%s4200_s4 + $0x1798] sm:$0xff] }
 0x113   : > { %3025 = vmatpush1.bf16.msra.mxu1 %v3024_v37  ;;  %v3044_v37 = vpack.c.bf16 %v519_v55, %v517_v27  ;;  %v537_v27 = vld [vmem:[%s4200_s4 + $0x780] sm:$0xff]  ;;  %v539_v55 = vld [vmem:[%s4200_s4 + $0x790] sm:$0xff] }
 0x114   : > { %3537 = vmatpush1.bf16.msra.mxu0 %v3536_v38  ;;  %3027 = vmatprep.subr.bf16.mxu1 %v3026_v39  ;;  %v3556_v38 = vpack.c.bf16 %v1031_v32, %v1029_v28  ;;  %v3046_v39 = vpack.c.bf16 %v524_v35, %v522_v33  ;;  %v1049_v28 = vld [vmem:[%s4200_s4 + $0x1780] sm:$0xff]  ;;  %v1051_v32 = vld [vmem:[%s4200_s4 + $0x1790] sm:$0xff]  ;;  %v542_v33 = vld [vmem:[%s4200_s4 + $0x7a8] sm:$0xff] }
 0x115   : > { %3539 = vmatprep.subr.bf16.mxu0 %v3538_v43  ;;  %v3558_v43 = vpack.c.bf16 %v1036_v36, %v1034_v60  ;;  %v544_v35 = vld [vmem:[%s4200_s4 + $0x7b8] sm:$0xff]  ;;  %v1054_v60 = vld [vmem:[%s4200_s4 + $0x17a8] sm:$0xff] }
 0x116   : > { %v1056_v36 = vld [vmem:[%s4200_s4 + $0x17b8] sm:$0xff] }
 0x117   : > { %3029 = vmatpush1.bf16.msra.mxu1 %v3028_v49  ;;  %v3048_v49 = vpack.c.bf16 %v523_v41, %v521_v40  ;;  %v541_v40 = vld [vmem:[%s4200_s4 + $0x7a0] sm:$0xff]  ;;  %v543_v41 = vld [vmem:[%s4200_s4 + $0x7b0] sm:$0xff] }
 0x118   : > { %3541 = vmatpush1.bf16.msra.mxu0 %v3540_v50  ;;  %3031 = vmatprep.subr.bf16.mxu1 %v3030_v52  ;;  %v3560_v50 = vpack.c.bf16 %v1035_v44, %v1033_v42  ;;  %v3050_v52 = vpack.c.bf16 %v528_v46, %v526_v45  ;;  %v1053_v42 = vld [vmem:[%s4200_s4 + $0x17a0] sm:$0xff]  ;;  %v1055_v44 = vld [vmem:[%s4200_s4 + $0x17b0] sm:$0xff]  ;;  %v546_v45 = vld [vmem:[%s4200_s4 + $0x7c8] sm:$0xff] }
 0x119   : > { %3543 = vmatprep.subr.bf16.mxu0 %v3542_v57  ;;  %v3562_v57 = vpack.c.bf16 %v1040_v48, %v1038_v47  ;;  %v548_v46 = vld [vmem:[%s4200_s4 + $0x7d8] sm:$0xff]  ;;  %v1058_v47 = vld [vmem:[%s4200_s4 + $0x17c8] sm:$0xff] }
 0x11a   : > { %v1060_v48 = vld [vmem:[%s4200_s4 + $0x17d8] sm:$0xff] }
 0x11b   : > { %3033 = vmatpush1.bf16.msra.mxu1 %v3032_v0  ;;  %v3052_v0 = vpack.c.bf16 %v527_v53, %v525_v26  ;;  %v545_v26 = vld [vmem:[%s4200_s4 + $0x7c0] sm:$0xff]  ;;  %v547_v53 = vld [vmem:[%s4200_s4 + $0x7d0] sm:$0xff] }
 0x11c   : > { %3545 = vmatpush1.bf16.msra.mxu0 %v3544_v1  ;;  %3035 = vmatprep.subr.bf16.mxu1 %v3034_v2  ;;  %v3564_v1 = vpack.c.bf16 %v1039_v29, %v1037_v54  ;;  %v3054_v2 = vpack.c.bf16 %v532_v59, %v530_v58  ;;  %v1057_v54 = vld [vmem:[%s4200_s4 + $0x17c0] sm:$0xff]  ;;  %v1059_v29 = vld [vmem:[%s4200_s4 + $0x17d0] sm:$0xff]  ;;  %v550_v58 = vld [vmem:[%s4200_s4 + $0x7e8] sm:$0xff] }
 0x11d   : > { %3547 = vmatprep.subr.bf16.mxu0 %v3546_v4  ;;  %v3566_v4 = vpack.c.bf16 %v1044_v62, %v1042_v61  ;;  %v552_v59 = vld [vmem:[%s4200_s4 + $0x7f8] sm:$0xff]  ;;  %v1062_v61 = vld [vmem:[%s4200_s4 + $0x17e8] sm:$0xff] }
 0x11e   : > { %v1064_v62 = vld [vmem:[%s4200_s4 + $0x17f8] sm:$0xff] }
 0x11f   : > { %3037 = vmatpush1.bf16.msra.mxu1 %v3036_v10  ;;  %v3056_v10 = vpack.c.bf16 %v531_v51, %v529_v31  ;;  %v549_v31 = vld [vmem:[%s4200_s4 + $0x7e0] sm:$0xff]  ;;  %v551_v51 = vld [vmem:[%s4200_s4 + $0x7f0] sm:$0xff] }
 0x120   : > { %3549 = vmatpush1.bf16.msra.mxu0 %v3548_v11  ;;  %3039 = vmatprep.subr.bf16.mxu1 %v3038_v13  ;;  %v3568_v11 = vpack.c.bf16 %v1043_v5, %v1041_v3  ;;  %v3058_v13 = vpack.c.bf16 %v536_v7, %v534_v6  ;;  %v1061_v3 = vld [vmem:[%s4200_s4 + $0x17e0] sm:$0xff]  ;;  %v1063_v5 = vld [vmem:[%s4200_s4 + $0x17f0] sm:$0xff]  ;;  %v554_v6 = vld [vmem:[%s4200_s4 + $0x808] sm:$0xff] }
 0x121   : > { %3551 = vmatprep.subr.bf16.mxu0 %v3550_v17  ;;  %v3570_v17 = vpack.c.bf16 %v1048_v9, %v1046_v34  ;;  %v556_v7 = vld [vmem:[%s4200_s4 + $0x818] sm:$0xff]  ;;  %v1066_v34 = vld [vmem:[%s4200_s4 + $0x1808] sm:$0xff] }
 0x122   : > { %v1068_v9 = vld [vmem:[%s4200_s4 + $0x1818] sm:$0xff] }
 0x123   : > { %3041 = vmatpush1.bf16.msra.mxu1 %v3040_v23  ;;  %v3060_v23 = vpack.c.bf16 %v535_v15, %v533_v14  ;;  %v3588_v14 = vpack.c.bf16 %v1063_v5, %v1061_v3  ;;  %v3078_v15 = vpack.c.bf16 %v556_v7, %v554_v6  ;;  %v569_v5 = vld [vmem:[%s4200_s4 + $0x880] sm:$0xff]  ;;  %v571_v6 = vld [vmem:[%s4200_s4 + $0x890] sm:$0xff] }
 0x124   : > { %3553 = vmatpush1.bf16.msra.mxu0 %v3552_v24  ;;  %3043 = vmatprep.subr.bf16.mxu1 %v3042_v25  ;;  %v3572_v24 = vpack.c.bf16 %v1047_v18, %v1045_v16  ;;  %v3062_v25 = vpack.c.bf16 %v540_v20, %v538_v19  ;;  %v553_v16 = vld [vmem:[%s4200_s4 + $0x800] sm:$0xff]  ;;  %v3590_v19 = vpack.c.bf16 %v1068_v9, %v1066_v34  ;;  %v1067_v20 = vld [vmem:[%s4200_s4 + $0x1810] sm:$0xff] }
 0x125   : > { %3555 = vmatprep.subr.bf16.mxu0 %v3554_v30  ;;  %v3574_v30 = vpack.c.bf16 %v1052_v22, %v1050_v21  ;;  %v1065_v18 = vld [vmem:[%s4200_s4 + $0x1800] sm:$0xff]  ;;  %v558_v21 = vld [vmem:[%s4200_s4 + $0x828] sm:$0xff]  ;;  %v560_v22 = vld [vmem:[%s4200_s4 + $0x838] sm:$0xff] }
 0x126   : > { %v1081_v7 = vld [vmem:[%s4200_s4 + $0x1880] sm:$0xff]  ;;  %v1083_v9 = vld [vmem:[%s4200_s4 + $0x1890] sm:$0xff] }
 0x127   : > { %3045 = vmatpush1.bf16.msra.mxu1 %v3044_v37  ;;  %v3064_v37 = vpack.c.bf16 %v539_v55, %v537_v27 }
 0x128   : > { %3557 = vmatpush1.bf16.msra.mxu0 %v3556_v38  ;;  %3047 = vmatprep.subr.bf16.mxu1 %v3046_v39  ;;  %v3576_v38 = vpack.c.bf16 %v1051_v32, %v1049_v28  ;;  %v3066_v39 = vpack.c.bf16 %v544_v35, %v542_v33  ;;  %v3592_v28 = vpack.c.bf16 %v1067_v20, %v1065_v18  ;;  %v557_v32 = vld [vmem:[%s4200_s4 + $0x820] sm:$0xff]  ;;  %v559_v33 = vld [vmem:[%s4200_s4 + $0x830] sm:$0xff] }
 0x129   : > { %3559 = vmatprep.subr.bf16.mxu0 %v3558_v43  ;;  %v3578_v43 = vpack.c.bf16 %v1056_v36, %v1054_v60  ;;  %v1069_v35 = vld [vmem:[%s4200_s4 + $0x1820] sm:$0xff]  ;;  %v1071_v36 = vld [vmem:[%s4200_s4 + $0x1830] sm:$0xff]  ;;  %v3608_v18 = vpack.c.bf16 %v1083_v9, %v1081_v7 }
 0x12a   : > { %v573_v20 = vld [vmem:[%s4200_s4 + $0x8a0] sm:$0xff] }
 0x12b   : > { %3049 = vmatpush1.bf16.msra.mxu1 %v3048_v49  ;;  %v3068_v49 = vpack.c.bf16 %v543_v41, %v541_v40  ;;  %v1074_v40 = vld [vmem:[%s4200_s4 + $0x1848] sm:$0xff]  ;;  %v1076_v41 = vld [vmem:[%s4200_s4 + $0x1858] sm:$0xff]  ;;  %v589_v7 = vld [vmem:[%s4200_s4 + $0x920] sm:$0xff] }
 0x12c   : > { %3561 = vmatpush1.bf16.msra.mxu0 %v3560_v50  ;;  %3051 = vmatprep.subr.bf16.mxu1 %v3050_v52  ;;  %v3580_v50 = vpack.c.bf16 %v1055_v44, %v1053_v42  ;;  %v3070_v52 = vpack.c.bf16 %v548_v46, %v546_v45  ;;  %v3596_v44 = vpack.c.bf16 %v1071_v36, %v1069_v35  ;;  %v561_v46 = vld [vmem:[%s4200_s4 + $0x840] sm:$0xff] }
 0x12d   : > { %3563 = vmatprep.subr.bf16.mxu0 %v3562_v57  ;;  %v3582_v57 = vpack.c.bf16 %v1060_v48, %v1058_v47  ;;  %v1073_v47 = vld [vmem:[%s4200_s4 + $0x1840] sm:$0xff]  ;;  %v3598_v48 = vpack.c.bf16 %v1076_v41, %v1074_v40  ;;  %v1091_v40 = vld [vmem:[%s4200_s4 + $0x18d0] sm:$0xff]  ;;  %v582_v41 = vld [vmem:[%s4200_s4 + $0x8e8] sm:$0xff] }
 0x12e   : > { %v577_v36 = vld [vmem:[%s4200_s4 + $0x8c0] sm:$0xff] }
 0x12f   : > { %3053 = vmatpush1.bf16.msra.mxu1 %v3052_v0  ;;  %v3072_v0 = vpack.c.bf16 %v547_v53, %v545_v26  ;;  %v1080_v26 = vld [vmem:[%s4200_s4 + $0x1878] sm:$0xff]  ;;  %v1101_v9 = vld [vmem:[%s4200_s4 + $0x1920] sm:$0xff] }
 0x130   : > { %3565 = vmatpush1.bf16.msra.mxu0 %v3564_v1  ;;  %3055 = vmatprep.subr.bf16.mxu1 %v3054_v2  ;;  %v3584_v1 = vpack.c.bf16 %v1059_v29, %v1057_v54  ;;  %v3074_v2 = vpack.c.bf16 %v552_v59, %v550_v58  ;;  %v565_v29 = vld [vmem:[%s4200_s4 + $0x860] sm:$0xff]  ;;  %v567_v58 = vld [vmem:[%s4200_s4 + $0x870] sm:$0xff] }
 0x131   : > { %3567 = vmatprep.subr.bf16.mxu0 %v3566_v4  ;;  %v3586_v4 = vpack.c.bf16 %v1064_v62, %v1062_v61  ;;  %v1077_v59 = vld [vmem:[%s4200_s4 + $0x1860] sm:$0xff]  ;;  %v1079_v62 = vld [vmem:[%s4200_s4 + $0x1870] sm:$0xff] }
 0x132   : > { %v3604_v3 = vpack.c.bf16 %v1079_v62, %v1077_v59  ;;  %v585_v59 = vld [vmem:[%s4200_s4 + $0x900] sm:$0xff] }
 0x133   : > { %3057 = vmatpush1.bf16.msra.mxu1 %v3056_v10  ;;  %v4819_v10 = vld [vmem:[%s4213_s29 + $0x10] sm:$0xff]  ;;  %v1097_v62 = vld [vmem:[%s4200_s4 + $0x1900] sm:$0xff] }
 0x134   : > { %3569 = vmatpush1.bf16.msra.mxu0 %v3568_v11  ;;  %3059 = vmatprep.subr.bf16.mxu1 %v3058_v13  ;;  %v3076_v11 = vpack.c.bf16 %v551_v51, %v549_v31  ;;  %v4822_v13 = vld [vmem:[%s4213_s29 + $0x30] sm:$0xff]  ;;  %v1084_v31 = vld [vmem:[%s4200_s4 + $0x1898] sm:$0xff]  ;;  %v3092_v51 = vpack.c.bf16 %v567_v58, %v565_v29 }
 0x135   : > { %3571 = vmatprep.subr.bf16.mxu0 %v3570_v17  ;;  %v555_v17 = vld [vmem:[%s4200_s4 + $0x810] sm:$0xff]  ;;  %v4838_v27 = vrot.slane %v4822_v13, %v4322_v12 }
 0x136   : > { %v3080_v55 = vpack.c.bf16 %v555_v17, %v553_v16  ;;  %v1088_v16 = vld [vmem:[%s4200_s4 + $0x18b8] sm:$0xff]  ;;  %v3096_v17 = vpack.c.bf16 %v571_v6, %v569_v5 }
 0x137   : > { %3061 = vmatpush1.bf16.msra.mxu1 %v3060_v23  ;;  %v4832_v23 = vrot.slane %v4819_v10, %v4322_v12  ;;  %v1446_v42 = vcombine.high %v4838_v27, %v4838_v27 }
 0x138   : > { %3573 = vmatpush1.bf16.msra.mxu0 %v3572_v24  ;;  %3063 = vmatprep.subr.bf16.mxu1 %v3062_v25  ;;  %v1070_v24 = vld [vmem:[%s4200_s4 + $0x1828] sm:$0xff]  ;;  %v1072_v25 = vld [vmem:[%s4200_s4 + $0x1838] sm:$0xff] }
 0x139   : > { %3575 = vmatprep.subr.bf16.mxu0 %v3574_v30  ;;  %v3082_v30 = vpack.c.bf16 %v560_v22, %v558_v21  ;;  %v3594_v60 = vpack.c.bf16 %v1072_v25, %v1070_v24  ;;  %v575_v21 = vld [vmem:[%s4200_s4 + $0x8b0] sm:$0xff]  ;;  %v1085_v22 = vld [vmem:[%s4200_s4 + $0x18a0] sm:$0xff] }
 0x13a   : > { %v1087_v25 = vld [vmem:[%s4200_s4 + $0x18b0] sm:$0xff] }
 0x13b   : > { %3065 = vmatpush1.bf16.msra.mxu1 %v3064_v37  ;;  %v562_v37 = vld [vmem:[%s4200_s4 + $0x848] sm:$0xff]  ;;  %v3612_v35 = vpack.c.bf16 %v1087_v25, %v1085_v22  ;;  %v593_v22 = vld [vmem:[%s4200_s4 + $0x940] sm:$0xff] }
 0x13c   : > { %3577 = vmatpush1.bf16.msra.mxu0 %v3576_v38  ;;  %3067 = vmatprep.subr.bf16.mxu1 %v3066_v39  ;;  %v564_v38 = vld [vmem:[%s4200_s4 + $0x858] sm:$0xff]  ;;  %v1378_v39 = vcombine.high %v4832_v23, %v4832_v23  ;;  %v1105_v25 = vld [vmem:[%s4200_s4 + $0x1940] sm:$0xff] }
 0x13d   : > { %3579 = vmatprep.subr.bf16.mxu0 %v3578_v43  ;;  %v3084_v43 = vpack.c.bf16 %v559_v33, %v557_v32  ;;  %v3086_v45 = vpack.c.bf16 %v564_v38, %v562_v37  ;;  %v1092_v32 = vld [vmem:[%s4200_s4 + $0x18d8] sm:$0xff]  ;;  %v3100_v33 = vpack.c.bf16 %v575_v21, %v573_v20  ;;  %v579_v37 = vld [vmem:[%s4200_s4 + $0x8d0] sm:$0xff]  ;;  %v1089_v38 = vld [vmem:[%s4200_s4 + $0x18c0] sm:$0xff] }
 0x13f   : > { %3069 = vmatpush1.bf16.msra.mxu1 %v3068_v49  ;;  %v1075_v49 = vld [vmem:[%s4200_s4 + $0x1850] sm:$0xff] }
 0x140   : > { %3581 = vmatpush1.bf16.msra.mxu0 %v3580_v50  ;;  %3071 = vmatprep.subr.bf16.mxu1 %v3070_v52  ;;  %v566_v50 = vld [vmem:[%s4200_s4 + $0x868] sm:$0xff]  ;;  %v568_v52 = vld [vmem:[%s4200_s4 + $0x878] sm:$0xff]  ;;  %v3600_v54 = vpack.c.bf16 %v1075_v49, %v1073_v47  ;;  %v581_v47 = vld [vmem:[%s4200_s4 + $0x8e0] sm:$0xff] }
 0x141   : > { %3583 = vmatprep.subr.bf16.mxu0 %v3582_v57  ;;  %v3090_v57 = vpack.c.bf16 %v568_v52, %v566_v50  ;;  %v1093_v49 = vld [vmem:[%s4200_s4 + $0x18e0] sm:$0xff]  ;;  %v1095_v52 = vld [vmem:[%s4200_s4 + $0x18f0] sm:$0xff] }
 0x142   : > { %v3620_v29 = vpack.c.bf16 %v1095_v52, %v1093_v49  ;;  %v601_v49 = vld [vmem:[%s4200_s4 + $0x980] sm:$0xff] }
 0x143   : > { %3073 = vmatpush1.bf16.msra.mxu1 %v3072_v0  ;;  %v570_v0 = vld [vmem:[%s4200_s4 + $0x888] sm:$0xff]  ;;  %v1113_v52 = vld [vmem:[%s4200_s4 + $0x1980] sm:$0xff] }
 0x144   : > { %3585 = vmatpush1.bf16.msra.mxu0 %v3584_v1  ;;  %3075 = vmatprep.subr.bf16.mxu1 %v3074_v2  ;;  %v572_v1 = vld [vmem:[%s4200_s4 + $0x898] sm:$0xff]  ;;  %v1082_v2 = vld [vmem:[%s4200_s4 + $0x1888] sm:$0xff] }
 0x145   : > { %3587 = vmatprep.subr.bf16.mxu0 %v3586_v4  ;;  %v3094_v4 = vpack.c.bf16 %v572_v1, %v570_v0  ;;  %v3606_v34 = vpack.c.bf16 %v1084_v31, %v1082_v2  ;;  %v1099_v1 = vld [vmem:[%s4200_s4 + $0x1910] sm:$0xff]  ;;  %v590_v2 = vld [vmem:[%s4200_s4 + $0x928] sm:$0xff]  ;;  %v592_v31 = vld [vmem:[%s4200_s4 + $0x938] sm:$0xff] }
 0x146   : > { %v3624_v5 = vpack.c.bf16 %v1099_v1, %v1097_v62  ;;  %v3114_v6 = vpack.c.bf16 %v592_v31, %v590_v2  ;;  %v605_v62 = vld [vmem:[%s4200_s4 + $0x9a0] sm:$0xff]  ;;  %v1119_v31 = vld [vmem:[%s4200_s4 + $0x19b0] sm:$0xff] }
 0x147   : > { %3077 = vmatpush1.bf16.msra.mxu1 %v3076_v11  ;;  %v574_v11 = vld [vmem:[%s4200_s4 + $0x8a8] sm:$0xff]  ;;  %v1117_v1 = vld [vmem:[%s4200_s4 + $0x19a0] sm:$0xff] }
 0x148   : > { %3589 = vmatpush1.bf16.msra.mxu0 %v3588_v14  ;;  %3079 = vmatprep.subr.bf16.mxu1 %v3078_v15  ;;  %v576_v14 = vld [vmem:[%s4200_s4 + $0x8b8] sm:$0xff]  ;;  %v1086_v15 = vld [vmem:[%s4200_s4 + $0x18a8] sm:$0xff] }
 0x149   : > { %3591 = vmatprep.subr.bf16.mxu0 %v3590_v19  ;;  %v3098_v19 = vpack.c.bf16 %v576_v14, %v574_v11  ;;  %v3610_v24 = vpack.c.bf16 %v1088_v16, %v1086_v15  ;;  %v1103_v14 = vld [vmem:[%s4200_s4 + $0x1930] sm:$0xff]  ;;  %v594_v15 = vld [vmem:[%s4200_s4 + $0x948] sm:$0xff]  ;;  %v596_v16 = vld [vmem:[%s4200_s4 + $0x958] sm:$0xff] }
 0x14a   : > { %1775 = vmatmul.mubr.f32.vlgmr.msra.gmra.mrb[0].mxu1 %v4685_v56  ;;  %v563_v56 = vld [vmem:[%s4200_s4 + $0x850] sm:$0xff]  ;;  %v3628_v20 = vpack.c.bf16 %v1103_v14, %v1101_v9  ;;  %v3118_v21 = vpack.c.bf16 %v596_v16, %v594_v15  ;;  %v609_v9 = vld [vmem:[%s4200_s4 + $0x9c0] sm:$0xff] }
 0x14b   : > { %3081 = vmatpush1.bf16.msra.mxu1 %v3080_v55  ;;  %2343 = vmatmul.mubr.f32.vlgmr.msra.gmra.mrb[0].mxu0 %v4690_v8  ;;  %v1078_v8 = vld [vmem:[%s4200_s4 + $0x1868] sm:$0xff]  ;;  %v3088_v53 = vpack.c.bf16 %v563_v56, %v561_v46  ;;  %v3616_v46 = vpack.c.bf16 %v1091_v40, %v1089_v38  ;;  %v597_v38 = vld [vmem:[%s4200_s4 + $0x960] sm:$0xff]  ;;  %v1123_v16 = vld [vmem:[%s4200_s4 + $0x19d0] sm:$0xff] }
 0x14c   : > { %3593 = vmatpush1.bf16.msra.mxu0 %v3592_v28  ;;  %3083 = vmatprep.subr.bf16.mxu1 %v3082_v30  ;;  %v3602_v61 = vpack.c.bf16 %v1080_v26, %v1078_v8  ;;  %v578_v55 = vld [vmem:[%s4200_s4 + $0x8c8] sm:$0xff]  ;;  %v580_v28 = vld [vmem:[%s4200_s4 + $0x8d8] sm:$0xff]  ;;  %v1109_v40 = vld [vmem:[%s4200_s4 + $0x1960] sm:$0xff] }
 0x14d   : > { %3595 = vmatprep.subr.bf16.mxu0 %v3594_v60  ;;  %1845 = vmatprep.mubr.f32.mxu1 %v1378_v39  ;;  %v1090_v30 = vld [vmem:[%s4200_s4 + $0x18c8] sm:$0xff]  ;;  %v3102_v60 = vpack.c.bf16 %v580_v28, %v578_v55  ;;  %v588_v26 = vld [vmem:[%s4200_s4 + $0x918] sm:$0xff]  ;;  %v1107_v28 = vld [vmem:[%s4200_s4 + $0x1950] sm:$0xff] }
 0x14e   : > { %2413 = vmatprep.mubr.f32.mxu0 %v1446_v42  ;;  %v3614_v39 = vpack.c.bf16 %v1092_v32, %v1090_v30  ;;  %v584_v42 = vld [vmem:[%s4200_s4 + $0x8f8] sm:$0xff]  ;;  %v586_v8 = vld [vmem:[%s4200_s4 + $0x908] sm:$0xff]  ;;  %v1121_v14 = vld [vmem:[%s4200_s4 + $0x19c0] sm:$0xff] }
 0x14f   : > { %3085 = vmatpush1.bf16.msra.mxu1 %v3084_v43  ;;  %v1094_v43 = vld [vmem:[%s4200_s4 + $0x18e8] sm:$0xff]  ;;  %v3106_v56 = vpack.c.bf16 %v584_v42, %v582_v41  ;;  %v3110_v58 = vpack.c.bf16 %v588_v26, %v586_v8  ;;  %v600_v32 = vld [vmem:[%s4200_s4 + $0x978] sm:$0xff]  ;;  %v1111_v42 = vld [vmem:[%s4200_s4 + $0x1970] sm:$0xff] }
 0x150   : > { %3597 = vmatpush1.bf16.msra.mxu0 %v3596_v44  ;;  %3087 = vmatprep.subr.bf16.mxu1 %v3086_v45  ;;  %v1096_v44 = vld [vmem:[%s4200_s4 + $0x18f8] sm:$0xff]  ;;  %v3104_v45 = vpack.c.bf16 %v579_v37, %v577_v36  ;;  %v598_v30 = vld [vmem:[%s4200_s4 + $0x968] sm:$0xff]  ;;  %v3632_v36 = vpack.c.bf16 %v1107_v28, %v1105_v25  ;;  %v1115_v26 = vld [vmem:[%s4200_s4 + $0x1990] sm:$0xff] }
 0x151   : > { %3599 = vmatprep.subr.bf16.mxu0 %v3598_v48  ;;  %v583_v48 = vld [vmem:[%s4200_s4 + $0x8f0] sm:$0xff]  ;;  %v3618_v50 = vpack.c.bf16 %v1096_v44, %v1094_v43  ;;  %v3122_v37 = vpack.c.bf16 %v600_v32, %v598_v30  ;;  %v602_v43 = vld [vmem:[%s4200_s4 + $0x988] sm:$0xff]  ;;  %v604_v44 = vld [vmem:[%s4200_s4 + $0x998] sm:$0xff] }
 0x152   : > { %v613_v25 = vld [vmem:[%s4200_s4 + $0x9e0] sm:$0xff]  ;;  %v1127_v32 = vld [vmem:[%s4200_s4 + $0x19f0] sm:$0xff] }
 0x153   : > { %3089 = vmatpush1.bf16.msra.mxu1 %v3088_v53  ;;  %v1098_v53 = vld [vmem:[%s4200_s4 + $0x1908] sm:$0xff]  ;;  %v1125_v28 = vld [vmem:[%s4200_s4 + $0x19e0] sm:$0xff] }
 0x154   : > { %3601 = vmatpush1.bf16.msra.mxu0 %v3600_v54  ;;  %3091 = vmatprep.subr.bf16.mxu1 %v3090_v57  ;;  %v1100_v54 = vld [vmem:[%s4200_s4 + $0x1918] sm:$0xff]  ;;  %v3108_v57 = vpack.c.bf16 %v583_v48, %v581_v47  ;;  %v3636_v47 = vpack.c.bf16 %v1111_v42, %v1109_v40  ;;  %v3126_v48 = vpack.c.bf16 %v604_v44, %v602_v43  ;;  %v617_v42 = vld [vmem:[%s4200_s4 + $0xa00] sm:$0xff]  ;;  %v619_v43 = vld [vmem:[%s4200_s4 + $0xa10] sm:$0xff] }
 0x155   : > { %3603 = vmatprep.subr.bf16.mxu0 %v3602_v61  ;;  %v587_v61 = vld [vmem:[%s4200_s4 + $0x910] sm:$0xff]  ;;  %v3622_v0 = vpack.c.bf16 %v1100_v54, %v1098_v53  ;;  %v606_v53 = vld [vmem:[%s4200_s4 + $0x9a8] sm:$0xff]  ;;  %v608_v54 = vld [vmem:[%s4200_s4 + $0x9b8] sm:$0xff]  ;;  %v3652_v40 = vpack.c.bf16 %v1127_v32, %v1125_v28 }
 0x156   : > { %v1129_v44 = vld [vmem:[%s4200_s4 + $0x1a00] sm:$0xff] }
 0x157   : > { %3093 = vmatpush1.bf16.msra.mxu1 %v3092_v51  ;;  %v1102_v51 = vld [vmem:[%s4200_s4 + $0x1928] sm:$0xff]  ;;  %v633_v32 = vld [vmem:[%s4200_s4 + $0xa80] sm:$0xff] }
 0x158   : > { %3605 = vmatpush1.bf16.msra.mxu0 %v3604_v3  ;;  %3095 = vmatprep.subr.bf16.mxu1 %v3094_v4  ;;  %v1104_v3 = vld [vmem:[%s4200_s4 + $0x1938] sm:$0xff]  ;;  %v3112_v4 = vpack.c.bf16 %v587_v61, %v585_v59  ;;  %v3640_v59 = vpack.c.bf16 %v1115_v26, %v1113_v52  ;;  %v3130_v61 = vpack.c.bf16 %v608_v54, %v606_v53  ;;  %v621_v26 = vld [vmem:[%s4200_s4 + $0xa20] sm:$0xff]  ;;  %v623_v53 = vld [vmem:[%s4200_s4 + $0xa30] sm:$0xff] }
 0x159   : > { %3607 = vmatprep.subr.bf16.mxu0 %v3606_v34  ;;  %v591_v34 = vld [vmem:[%s4200_s4 + $0x930] sm:$0xff]  ;;  %v3626_v11 = vpack.c.bf16 %v1104_v3, %v1102_v51  ;;  %v610_v51 = vld [vmem:[%s4200_s4 + $0x9c8] sm:$0xff]  ;;  %v612_v3 = vld [vmem:[%s4200_s4 + $0x9d8] sm:$0xff] }
 0x15a   : > { %v1133_v54 = vld [vmem:[%s4200_s4 + $0x1a20] sm:$0xff] }
 0x15b   : > { %3097 = vmatpush1.bf16.msra.mxu1 %v3096_v17  ;;  %v1106_v17 = vld [vmem:[%s4200_s4 + $0x1948] sm:$0xff] }
 0x15c   : > { %3609 = vmatpush1.bf16.msra.mxu0 %v3608_v18  ;;  %3099 = vmatprep.subr.bf16.mxu1 %v3098_v19  ;;  %v1108_v18 = vld [vmem:[%s4200_s4 + $0x1958] sm:$0xff]  ;;  %v3116_v19 = vpack.c.bf16 %v591_v34, %v589_v7  ;;  %v3644_v7 = vpack.c.bf16 %v1119_v31, %v1117_v1  ;;  %v3134_v34 = vpack.c.bf16 %v612_v3, %v610_v51  ;;  %v625_v3 = vld [vmem:[%s4200_s4 + $0xa40] sm:$0xff] }
 0x15d   : > { %3611 = vmatprep.subr.bf16.mxu0 %v3610_v24  ;;  %v595_v24 = vld [vmem:[%s4200_s4 + $0x950] sm:$0xff]  ;;  %v3630_v55 = vpack.c.bf16 %v1108_v18, %v1106_v17  ;;  %v614_v17 = vld [vmem:[%s4200_s4 + $0x9e8] sm:$0xff]  ;;  %v616_v18 = vld [vmem:[%s4200_s4 + $0x9f8] sm:$0xff] }
 0x15f   : > { %3101 = vmatpush1.bf16.msra.mxu1 %v3100_v33  ;;  %v1110_v33 = vld [vmem:[%s4200_s4 + $0x1968] sm:$0xff] }
 0x160   : > { %3613 = vmatpush1.bf16.msra.mxu0 %v3612_v35  ;;  %3103 = vmatprep.subr.bf16.mxu1 %v3102_v60  ;;  %v1112_v35 = vld [vmem:[%s4200_s4 + $0x1978] sm:$0xff]  ;;  %v3120_v60 = vpack.c.bf16 %v595_v24, %v593_v22  ;;  %v3648_v22 = vpack.c.bf16 %v1123_v16, %v1121_v14  ;;  %v3138_v24 = vpack.c.bf16 %v616_v18, %v614_v17  ;;  %v629_v16 = vld [vmem:[%s4200_s4 + $0xa60] sm:$0xff]  ;;  %v631_v17 = vld [vmem:[%s4200_s4 + $0xa70] sm:$0xff] }
 0x161   : > { %3615 = vmatprep.subr.bf16.mxu0 %v3614_v39  ;;  %v599_v39 = vld [vmem:[%s4200_s4 + $0x970] sm:$0xff]  ;;  %v3634_v41 = vpack.c.bf16 %v1112_v35, %v1110_v33  ;;  %v618_v33 = vld [vmem:[%s4200_s4 + $0xa08] sm:$0xff]  ;;  %v620_v35 = vld [vmem:[%s4200_s4 + $0xa18] sm:$0xff] }
 0x162   : > { %v1141_v18 = vld [vmem:[%s4200_s4 + $0x1a60] sm:$0xff] }
 0x163   : > { %3105 = vmatpush1.bf16.msra.mxu1 %v3104_v45  ;;  %v1114_v45 = vld [vmem:[%s4200_s4 + $0x1988] sm:$0xff] }
 0x164   : > { %3617 = vmatpush1.bf16.msra.mxu0 %v3616_v46  ;;  %3107 = vmatprep.subr.bf16.mxu1 %v3106_v56  ;;  %v1116_v46 = vld [vmem:[%s4200_s4 + $0x1998] sm:$0xff]  ;;  %v3124_v56 = vpack.c.bf16 %v599_v39, %v597_v38  ;;  %v1431_v38 = vcombine.high %v4822_v13, %v4822_v13 }
 0x165   : > { %3619 = vmatprep.subr.bf16.mxu0 %v3618_v50  ;;  %v603_v50 = vld [vmem:[%s4200_s4 + $0x990] sm:$0xff]  ;;  %v3638_v8 = vpack.c.bf16 %v1116_v46, %v1114_v45  ;;  %v622_v46 = vld [vmem:[%s4200_s4 + $0xa28] sm:$0xff] }
 0x166   : > { %v1131_v45 = vld [vmem:[%s4200_s4 + $0x1a10] sm:$0xff] }
 0x167   : > { %3109 = vmatpush1.bf16.msra.mxu1 %v3108_v57  ;;  %v1118_v57 = vld [vmem:[%s4200_s4 + $0x19a8] sm:$0xff]  ;;  %v3656_v52 = vpack.c.bf16 %v1131_v45, %v1129_v44  ;;  %v637_v44 = vld [vmem:[%s4200_s4 + $0xaa0] sm:$0xff] }
 0x168   : > { %3621 = vmatpush1.bf16.msra.mxu0 %v3620_v29  ;;  %3111 = vmatprep.subr.bf16.mxu1 %v3110_v58  ;;  %v1120_v29 = vld [vmem:[%s4200_s4 + $0x19b8] sm:$0xff]  ;;  %v3128_v58 = vpack.c.bf16 %v603_v50, %v601_v49  ;;  %v4982_v49 = vrot.slane %v1431_v38, %v4322_v12  ;;  %v3144_v50 = vpack.c.bf16 %v619_v43, %v617_v42  ;;  %v1149_v45 = vld [vmem:[%s4200_s4 + $0x1aa0] sm:$0xff] }
 0x169   : > { %3623 = vmatprep.subr.bf16.mxu0 %v3622_v0  ;;  %v607_v0 = vld [vmem:[%s4200_s4 + $0x9b0] sm:$0xff]  ;;  %v3642_v2 = vpack.c.bf16 %v1120_v29, %v1118_v57  ;;  %v640_v38 = vld [vmem:[%s4200_s4 + $0xab8] sm:$0xff] }
 0x16a   : > { %v1135_v29 = vld [vmem:[%s4200_s4 + $0x1a30] sm:$0xff]  ;;  %v1447_v1 = vcombine.high %v4982_v49, %v4982_v49 }
 0x16b   : > { %3113 = vmatpush1.bf16.msra.mxu1 %v3112_v4  ;;  %v1122_v4 = vld [vmem:[%s4200_s4 + $0x19c8] sm:$0xff]  ;;  %v3660_v31 = vpack.c.bf16 %v1135_v29, %v1133_v54  ;;  %v641_v54 = vld [vmem:[%s4200_s4 + $0xac0] sm:$0xff] }
 0x16c   : > { %3625 = vmatpush1.bf16.msra.mxu0 %v3624_v5  ;;  %3115 = vmatprep.subr.bf16.mxu1 %v3114_v6  ;;  %v1124_v5 = vld [vmem:[%s4200_s4 + $0x19d8] sm:$0xff]  ;;  %v3132_v6 = vpack.c.bf16 %v607_v0, %v605_v62  ;;  %v1138_v62 = vld [vmem:[%s4200_s4 + $0x1a48] sm:$0xff]  ;;  %v1153_v29 = vld [vmem:[%s4200_s4 + $0x1ac0] sm:$0xff] }
 0x16d   : > { %3627 = vmatprep.subr.bf16.mxu0 %v3626_v11  ;;  %v611_v11 = vld [vmem:[%s4200_s4 + $0x9d0] sm:$0xff]  ;;  %v3646_v15 = vpack.c.bf16 %v1124_v5, %v1122_v4  ;;  %v1140_v0 = vld [vmem:[%s4200_s4 + $0x1a58] sm:$0xff]  ;;  %v1137_v4 = vld [vmem:[%s4200_s4 + $0x1a40] sm:$0xff] }
 0x16e   : > { %v3662_v5 = vpack.c.bf16 %v1140_v0, %v1138_v62  ;;  %v648_v62 = vld [vmem:[%s4200_s4 + $0xaf8] sm:$0xff]  ;;  %v1158_v0 = vld [vmem:[%s4200_s4 + $0x1ae8] sm:$0xff] }
 0x16f   : > { %3117 = vmatpush1.bf16.msra.mxu1 %v3116_v19  ;;  %v1126_v19 = vld [vmem:[%s4200_s4 + $0x19e8] sm:$0xff] }
 0x170   : > { %3629 = vmatpush1.bf16.msra.mxu0 %v3628_v20  ;;  %3119 = vmatprep.subr.bf16.mxu1 %v3118_v21  ;;  %v1128_v20 = vld [vmem:[%s4200_s4 + $0x19f8] sm:$0xff]  ;;  %v3136_v21 = vpack.c.bf16 %v611_v11, %v609_v9 }
 0x171   : > { %3631 = vmatprep.subr.bf16.mxu0 %v3630_v55  ;;  %v615_v55 = vld [vmem:[%s4200_s4 + $0x9f0] sm:$0xff]  ;;  %v3650_v30 = vpack.c.bf16 %v1128_v20, %v1126_v19  ;;  %v1144_v9 = vld [vmem:[%s4200_s4 + $0x1a78] sm:$0xff] }
 0x172   : > { %v3140_v39 = vpack.c.bf16 %v615_v55, %v613_v25  ;;  %v1143_v20 = vld [vmem:[%s4200_s4 + $0x1a70] sm:$0xff]  ;;  %v1148_v25 = vld [vmem:[%s4200_s4 + $0x1a98] sm:$0xff]  ;;  %v3156_v55 = vpack.c.bf16 %v631_v17, %v629_v16  ;;  %v649_v16 = vld [vmem:[%s4200_s4 + $0xb00] sm:$0xff] }
 0x173   : > { %3121 = vmatpush1.bf16.msra.mxu1 %v3120_v60  ;;  %v1363_v60 = vcombine.high %v4819_v10, %v4819_v10  ;;  %v3668_v28 = vpack.c.bf16 %v1143_v20, %v1141_v18  ;;  %v651_v17 = vld [vmem:[%s4200_s4 + $0xb10] sm:$0xff]  ;;  %v1161_v18 = vld [vmem:[%s4200_s4 + $0x1b00] sm:$0xff] }
 0x174   : > { %3633 = vmatpush1.bf16.msra.mxu0 %v3632_v36  ;;  %3123 = vmatprep.subr.bf16.mxu1 %v3122_v37  ;;  %v1130_v36 = vld [vmem:[%s4200_s4 + $0x1a08] sm:$0xff]  ;;  %v1132_v37 = vld [vmem:[%s4200_s4 + $0x1a18] sm:$0xff]  ;;  %v1163_v20 = vld [vmem:[%s4200_s4 + $0x1b10] sm:$0xff] }
 0x175   : > { %3635 = vmatprep.subr.bf16.mxu0 %v3634_v41  ;;  %v3142_v41 = vpack.c.bf16 %v620_v35, %v618_v33  ;;  %v3654_v10 = vpack.c.bf16 %v1132_v37, %v1130_v36  ;;  %v4977_v13 = vrot.slane %v1363_v60, %v4322_v12  ;;  %v635_v33 = vld [vmem:[%s4200_s4 + $0xa90] sm:$0xff]  ;;  %v1145_v35 = vld [vmem:[%s4200_s4 + $0x1a80] sm:$0xff]  ;;  %v638_v37 = vld [vmem:[%s4200_s4 + $0xaa8] sm:$0xff] }
 0x176   : > { %v1147_v36 = vld [vmem:[%s4200_s4 + $0x1a90] sm:$0xff]  ;;  %v3162_v43 = vpack.c.bf16 %v640_v38, %v638_v37  ;;  %v658_v37 = vld [vmem:[%s4200_s4 + $0xb48] sm:$0xff]  ;;  %v660_v38 = vld [vmem:[%s4200_s4 + $0xb58] sm:$0xff] }
 0x177   : > { %3125 = vmatpush1.bf16.msra.mxu1 %v3124_v56  ;;  %v624_v56 = vld [vmem:[%s4200_s4 + $0xa38] sm:$0xff]  ;;  %v3672_v42 = vpack.c.bf16 %v1147_v36, %v1145_v35  ;;  %v1165_v35 = vld [vmem:[%s4200_s4 + $0x1b20] sm:$0xff]  ;;  %v1167_v36 = vld [vmem:[%s4200_s4 + $0x1b30] sm:$0xff] }
 0x178   : > { %3637 = vmatpush1.bf16.msra.mxu0 %v3636_v47  ;;  %3127 = vmatprep.subr.bf16.mxu1 %v3126_v48  ;;  %v1134_v47 = vld [vmem:[%s4200_s4 + $0x1a28] sm:$0xff]  ;;  %v1136_v48 = vld [vmem:[%s4200_s4 + $0x1a38] sm:$0xff] }
 0x179   : > { %3639 = vmatprep.subr.bf16.mxu0 %v3638_v8  ;;  %v3146_v8 = vpack.c.bf16 %v624_v56, %v622_v46  ;;  %v3658_v57 = vpack.c.bf16 %v1136_v48, %v1134_v47  ;;  %v1151_v56 = vld [vmem:[%s4200_s4 + $0x1ab0] sm:$0xff]  ;;  %v642_v47 = vld [vmem:[%s4200_s4 + $0xac8] sm:$0xff]  ;;  %v644_v48 = vld [vmem:[%s4200_s4 + $0xad8] sm:$0xff] }
 0x17b   : > { %3129 = vmatpush1.bf16.msra.mxu1 %v3128_v58  ;;  %v626_v58 = vld [vmem:[%s4200_s4 + $0xa48] sm:$0xff] }
 0x17c   : > { %3641 = vmatpush1.bf16.msra.mxu0 %v3640_v59  ;;  %3131 = vmatprep.subr.bf16.mxu1 %v3130_v61  ;;  %v628_v59 = vld [vmem:[%s4200_s4 + $0xa58] sm:$0xff]  ;;  %v1379_v61 = vcombine.high %v4977_v13, %v4977_v13 }
 0x17d   : > { %3643 = vmatprep.subr.bf16.mxu0 %v3642_v2  ;;  %v3148_v2 = vpack.c.bf16 %v623_v53, %v621_v26  ;;  %v3150_v51 = vpack.c.bf16 %v628_v59, %v626_v58  ;;  %v3676_v26 = vpack.c.bf16 %v1151_v56, %v1149_v45  ;;  %v3166_v53 = vpack.c.bf16 %v644_v48, %v642_v47  ;;  %v1155_v59 = vld [vmem:[%s4200_s4 + $0x1ad0] sm:$0xff]  ;;  %v1169_v45 = vld [vmem:[%s4200_s4 + $0x1b40] sm:$0xff]  ;;  %v662_v47 = vld [vmem:[%s4200_s4 + $0xb68] sm:$0xff] }
 0x17e   : > { %v1171_v56 = vld [vmem:[%s4200_s4 + $0x1b50] sm:$0xff]  ;;  %v664_v48 = vld [vmem:[%s4200_s4 + $0xb78] sm:$0xff] }
 0x17f   : > { %3133 = vmatpush1.bf16.msra.mxu1 %v3132_v6  ;;  %v1139_v6 = vld [vmem:[%s4200_s4 + $0x1a50] sm:$0xff] }
 0x180   : > { %3645 = vmatpush1.bf16.msra.mxu0 %v3644_v7  ;;  %3135 = vmatprep.subr.bf16.mxu1 %v3134_v34  ;;  %v630_v7 = vld [vmem:[%s4200_s4 + $0xa68] sm:$0xff]  ;;  %v632_v34 = vld [vmem:[%s4200_s4 + $0xa78] sm:$0xff]  ;;  %v3664_v14 = vpack.c.bf16 %v1139_v6, %v1137_v4  ;;  %v1157_v4 = vld [vmem:[%s4200_s4 + $0x1ae0] sm:$0xff] }
 0x181   : > { %3647 = vmatprep.subr.bf16.mxu0 %v3646_v15  ;;  %v3154_v15 = vpack.c.bf16 %v632_v34, %v630_v7  ;;  %v1159_v6 = vld [vmem:[%s4200_s4 + $0x1af0] sm:$0xff]  ;;  %v650_v7 = vld [vmem:[%s4200_s4 + $0xb08] sm:$0xff]  ;;  %v652_v34 = vld [vmem:[%s4200_s4 + $0xb18] sm:$0xff] }
 0x183   : > { %3137 = vmatpush1.bf16.msra.mxu1 %v3136_v21  ;;  %v634_v21 = vld [vmem:[%s4200_s4 + $0xa88] sm:$0xff] }
 0x184   : > { %3649 = vmatpush1.bf16.msra.mxu0 %v3648_v22  ;;  %3139 = vmatprep.subr.bf16.mxu1 %v3138_v24  ;;  %v636_v22 = vld [vmem:[%s4200_s4 + $0xa98] sm:$0xff]  ;;  %v1146_v24 = vld [vmem:[%s4200_s4 + $0x1a88] sm:$0xff] }
 0x185   : > { %3651 = vmatprep.subr.bf16.mxu0 %v3650_v30  ;;  %v3158_v30 = vpack.c.bf16 %v636_v22, %v634_v21  ;;  %v3670_v60 = vpack.c.bf16 %v1148_v25, %v1146_v24  ;;  %v654_v21 = vld [vmem:[%s4200_s4 + $0xb28] sm:$0xff]  ;;  %v656_v22 = vld [vmem:[%s4200_s4 + $0xb38] sm:$0xff] }
 0x186   : > { %v1166_v24 = vld [vmem:[%s4200_s4 + $0x1b28] sm:$0xff]  ;;  %v1168_v25 = vld [vmem:[%s4200_s4 + $0x1b38] sm:$0xff] }
 0x187   : > { %3141 = vmatpush1.bf16.msra.mxu1 %v3140_v39  ;;  %v1150_v39 = vld [vmem:[%s4200_s4 + $0x1aa8] sm:$0xff] }
 0x188   : > { %3653 = vmatpush1.bf16.msra.mxu0 %v3652_v40  ;;  %3143 = vmatprep.subr.bf16.mxu1 %v3142_v41  ;;  %v1152_v40 = vld [vmem:[%s4200_s4 + $0x1ab8] sm:$0xff]  ;;  %v3160_v41 = vpack.c.bf16 %v635_v33, %v633_v32  ;;  %v653_v32 = vld [vmem:[%s4200_s4 + $0xb20] sm:$0xff]  ;;  %v655_v33 = vld [vmem:[%s4200_s4 + $0xb30] sm:$0xff] }
 0x189   : > { %3655 = vmatprep.subr.bf16.mxu0 %v3654_v10  ;;  %v639_v10 = vld [vmem:[%s4200_s4 + $0xab0] sm:$0xff]  ;;  %v3674_v46 = vpack.c.bf16 %v1152_v40, %v1150_v39  ;;  %v1170_v39 = vld [vmem:[%s4200_s4 + $0x1b48] sm:$0xff]  ;;  %v1172_v40 = vld [vmem:[%s4200_s4 + $0x1b58] sm:$0xff] }
 0x18a   : > { %1846 = vmatmul.mubr.f32.vlgmr.msra.gmra.mrb[0].mxu1 %v4832_v23  ;;  %v627_v23 = vld [vmem:[%s4200_s4 + $0xa50] sm:$0xff] }
 0x18b   : > { %3145 = vmatpush1.bf16.msra.mxu1 %v3144_v50  ;;  %2414 = vmatmul.mubr.f32.vlgmr.msra.gmra.mrb[0].mxu0 %v4838_v27  ;;  %v1142_v27 = vld [vmem:[%s4200_s4 + $0x1a68] sm:$0xff]  ;;  %v3152_v11 = vpack.c.bf16 %v627_v23, %v625_v3  ;;  %v645_v3 = vld [vmem:[%s4200_s4 + $0xae0] sm:$0xff]  ;;  %v647_v23 = vld [vmem:[%s4200_s4 + $0xaf0] sm:$0xff] }
 0x18c   : > { %3657 = vmatpush1.bf16.msra.mxu0 %v3656_v52  ;;  %3147 = vmatprep.subr.bf16.mxu1 %v3146_v8  ;;  %v3666_v19 = vpack.c.bf16 %v1144_v9, %v1142_v27  ;;  %v1154_v50 = vld [vmem:[%s4200_s4 + $0x1ac8] sm:$0xff]  ;;  %v1156_v52 = vld [vmem:[%s4200_s4 + $0x1ad8] sm:$0xff]  ;;  %v3164_v8 = vpack.c.bf16 %v639_v10, %v637_v44  ;;  %v657_v44 = vld [vmem:[%s4200_s4 + $0xb40] sm:$0xff] }
 0x18d   : > { %3659 = vmatprep.subr.bf16.mxu0 %v3658_v57  ;;  %1916 = vmatprep.mubr.f32.mxu1 %v1379_v61  ;;  %v643_v57 = vld [vmem:[%s4200_s4 + $0xad0] sm:$0xff]  ;;  %v3678_v58 = vpack.c.bf16 %v1156_v52, %v1154_v50  ;;  %v646_v61 = vld [vmem:[%s4200_s4 + $0xae8] sm:$0xff]  ;;  %v1164_v9 = vld [vmem:[%s4200_s4 + $0x1b18] sm:$0xff] }
 0x18e   : > { %2484 = vmatprep.mubr.f32.mxu0 %v1447_v1  ;;  %v1160_v1 = vld [vmem:[%s4200_s4 + $0x1af8] sm:$0xff]  ;;  %v1162_v27 = vld [vmem:[%s4200_s4 + $0x1b08] sm:$0xff]  ;;  %v659_v10 = vld [vmem:[%s4200_s4 + $0xb50] sm:$0xff] }
 0x18f   : > { %3149 = vmatpush1.bf16.msra.mxu1 %v3148_v2  ;;  %v3168_v2 = vpack.c.bf16 %v643_v57, %v641_v54  ;;  %v1174_v50 = vld [vmem:[%s4200_s4 + $0x1b68] sm:$0xff]  ;;  %v1176_v52 = vld [vmem:[%s4200_s4 + $0x1b78] sm:$0xff]  ;;  %v661_v54 = vld [vmem:[%s4200_s4 + $0xb60] sm:$0xff] }
 0x190   : > { %3661 = vmatpush1.bf16.msra.mxu0 %v3660_v31  ;;  %3151 = vmatprep.subr.bf16.mxu1 %v3150_v51  ;;  %v3680_v31 = vpack.c.bf16 %v1155_v59, %v1153_v29  ;;  %v3170_v51 = vpack.c.bf16 %v648_v62, %v646_v61  ;;  %v663_v57 = vld [vmem:[%s4200_s4 + $0xb70] sm:$0xff]  ;;  %v1173_v29 = vld [vmem:[%s4200_s4 + $0x1b60] sm:$0xff]  ;;  %v666_v61 = vld [vmem:[%s4200_s4 + $0xb88] sm:$0xff] }
 0x191   : > { %3663 = vmatprep.subr.bf16.mxu0 %v3662_v5  ;;  %v3682_v5 = vpack.c.bf16 %v1160_v1, %v1158_v0  ;;  %v1175_v59 = vld [vmem:[%s4200_s4 + $0x1b70] sm:$0xff]  ;;  %v668_v62 = vld [vmem:[%s4200_s4 + $0xb98] sm:$0xff]  ;;  %v1178_v0 = vld [vmem:[%s4200_s4 + $0x1b88] sm:$0xff] }
 0x192   : > { %v1180_v1 = vld [vmem:[%s4200_s4 + $0x1b98] sm:$0xff] }
 0x193   : > { %3153 = vmatpush1.bf16.msra.mxu1 %v3152_v11  ;;  %v3172_v11 = vpack.c.bf16 %v647_v23, %v645_v3  ;;  %v665_v3 = vld [vmem:[%s4200_s4 + $0xb80] sm:$0xff]  ;;  %v667_v23 = vld [vmem:[%s4200_s4 + $0xb90] sm:$0xff] }
 0x194   : > { %3665 = vmatpush1.bf16.msra.mxu0 %v3664_v14  ;;  %3155 = vmatprep.subr.bf16.mxu1 %v3154_v15  ;;  %v3684_v14 = vpack.c.bf16 %v1159_v6, %v1157_v4  ;;  %v3174_v15 = vpack.c.bf16 %v652_v34, %v650_v7  ;;  %v1177_v4 = vld [vmem:[%s4200_s4 + $0x1b80] sm:$0xff]  ;;  %v1179_v6 = vld [vmem:[%s4200_s4 + $0x1b90] sm:$0xff]  ;;  %v670_v7 = vld [vmem:[%s4200_s4 + $0xba8] sm:$0xff] }
 0x195   : > { %3667 = vmatprep.subr.bf16.mxu0 %v3666_v19  ;;  %v3686_v19 = vpack.c.bf16 %v1164_v9, %v1162_v27  ;;  %v672_v34 = vld [vmem:[%s4200_s4 + $0xbb8] sm:$0xff]  ;;  %v1182_v27 = vld [vmem:[%s4200_s4 + $0x1ba8] sm:$0xff] }
 0x196   : > { %v1184_v9 = vld [vmem:[%s4200_s4 + $0x1bb8] sm:$0xff] }
 0x197   : > { %3157 = vmatpush1.bf16.msra.mxu1 %v3156_v55  ;;  %v3176_v55 = vpack.c.bf16 %v651_v17, %v649_v16  ;;  %v669_v16 = vld [vmem:[%s4200_s4 + $0xba0] sm:$0xff]  ;;  %v671_v17 = vld [vmem:[%s4200_s4 + $0xbb0] sm:$0xff] }
 0x198   : > { %3669 = vmatpush1.bf16.msra.mxu0 %v3668_v28  ;;  %3159 = vmatprep.subr.bf16.mxu1 %v3158_v30  ;;  %v3688_v28 = vpack.c.bf16 %v1163_v20, %v1161_v18  ;;  %v3178_v30 = vpack.c.bf16 %v656_v22, %v654_v21  ;;  %v1181_v18 = vld [vmem:[%s4200_s4 + $0x1ba0] sm:$0xff]  ;;  %v1183_v20 = vld [vmem:[%s4200_s4 + $0x1bb0] sm:$0xff]  ;;  %v674_v21 = vld [vmem:[%s4200_s4 + $0xbc8] sm:$0xff] }
 0x199   : > { %3671 = vmatprep.subr.bf16.mxu0 %v3670_v60  ;;  %v3690_v60 = vpack.c.bf16 %v1168_v25, %v1166_v24  ;;  %v676_v22 = vld [vmem:[%s4200_s4 + $0xbd8] sm:$0xff]  ;;  %v1186_v24 = vld [vmem:[%s4200_s4 + $0x1bc8] sm:$0xff] }
 0x19a   : > { %v1188_v25 = vld [vmem:[%s4200_s4 + $0x1bd8] sm:$0xff] }
 0x19b   : > { %3161 = vmatpush1.bf16.msra.mxu1 %v3160_v41  ;;  %v3180_v41 = vpack.c.bf16 %v655_v33, %v653_v32  ;;  %v673_v32 = vld [vmem:[%s4200_s4 + $0xbc0] sm:$0xff]  ;;  %v675_v33 = vld [vmem:[%s4200_s4 + $0xbd0] sm:$0xff] }
 0x19c   : > { %3673 = vmatpush1.bf16.msra.mxu0 %v3672_v42  ;;  %3163 = vmatprep.subr.bf16.mxu1 %v3162_v43  ;;  %v3692_v42 = vpack.c.bf16 %v1167_v36, %v1165_v35  ;;  %v3182_v43 = vpack.c.bf16 %v660_v38, %v658_v37  ;;  %v1185_v35 = vld [vmem:[%s4200_s4 + $0x1bc0] sm:$0xff]  ;;  %v1187_v36 = vld [vmem:[%s4200_s4 + $0x1bd0] sm:$0xff]  ;;  %v678_v37 = vld [vmem:[%s4200_s4 + $0xbe8] sm:$0xff] }
 0x19d   : > { %3675 = vmatprep.subr.bf16.mxu0 %v3674_v46  ;;  %v3694_v46 = vpack.c.bf16 %v1172_v40, %v1170_v39  ;;  %v680_v38 = vld [vmem:[%s4200_s4 + $0xbf8] sm:$0xff]  ;;  %v1190_v39 = vld [vmem:[%s4200_s4 + $0x1be8] sm:$0xff] }
 0x19e   : > { %v1192_v40 = vld [vmem:[%s4200_s4 + $0x1bf8] sm:$0xff] }
 0x19f   : > { %3165 = vmatpush1.bf16.msra.mxu1 %v3164_v8  ;;  %v3184_v8 = vpack.c.bf16 %v659_v10, %v657_v44  ;;  %v677_v44 = vld [vmem:[%s4200_s4 + $0xbe0] sm:$0xff]  ;;  %v679_v10 = vld [vmem:[%s4200_s4 + $0xbf0] sm:$0xff] }
 0x1a0   : > { %3677 = vmatpush1.bf16.msra.mxu0 %v3676_v26  ;;  %3167 = vmatprep.subr.bf16.mxu1 %v3166_v53  ;;  %v3696_v26 = vpack.c.bf16 %v1171_v56, %v1169_v45  ;;  %v3186_v53 = vpack.c.bf16 %v664_v48, %v662_v47  ;;  %v1189_v45 = vld [vmem:[%s4200_s4 + $0x1be0] sm:$0xff]  ;;  %v1191_v56 = vld [vmem:[%s4200_s4 + $0x1bf0] sm:$0xff]  ;;  %v682_v47 = vld [vmem:[%s4200_s4 + $0xc08] sm:$0xff] }
 0x1a1   : > { %3679 = vmatprep.subr.bf16.mxu0 %v3678_v58  ;;  %v3698_v58 = vpack.c.bf16 %v1176_v52, %v1174_v50  ;;  %v684_v48 = vld [vmem:[%s4200_s4 + $0xc18] sm:$0xff]  ;;  %v1194_v50 = vld [vmem:[%s4200_s4 + $0x1c08] sm:$0xff] }
 0x1a2   : > { %v1196_v52 = vld [vmem:[%s4200_s4 + $0x1c18] sm:$0xff] }
 0x1a3   : > { %3169 = vmatpush1.bf16.msra.mxu1 %v3168_v2  ;;  %v3188_v2 = vpack.c.bf16 %v663_v57, %v661_v54  ;;  %v3716_v54 = vpack.c.bf16 %v1191_v56, %v1189_v45  ;;  %v3206_v57 = vpack.c.bf16 %v684_v48, %v682_v47  ;;  %v697_v56 = vld [vmem:[%s4200_s4 + $0xc80] sm:$0xff]  ;;  %v699_v47 = vld [vmem:[%s4200_s4 + $0xc90] sm:$0xff] }
 0x1a4   : > { %3681 = vmatpush1.bf16.msra.mxu0 %v3680_v31  ;;  %3171 = vmatprep.subr.bf16.mxu1 %v3170_v51  ;;  %v3700_v31 = vpack.c.bf16 %v1175_v59, %v1173_v29  ;;  %v3190_v51 = vpack.c.bf16 %v668_v62, %v666_v61  ;;  %v681_v29 = vld [vmem:[%s4200_s4 + $0xc00] sm:$0xff]  ;;  %v3718_v61 = vpack.c.bf16 %v1196_v52, %v1194_v50  ;;  %v1195_v62 = vld [vmem:[%s4200_s4 + $0x1c10] sm:$0xff] }
 0x1a5   : > { %3683 = vmatprep.subr.bf16.mxu0 %v3682_v5  ;;  %v3702_v5 = vpack.c.bf16 %v1180_v1, %v1178_v0  ;;  %v1193_v59 = vld [vmem:[%s4200_s4 + $0x1c00] sm:$0xff]  ;;  %v686_v0 = vld [vmem:[%s4200_s4 + $0xc28] sm:$0xff]  ;;  %v688_v1 = vld [vmem:[%s4200_s4 + $0xc38] sm:$0xff] }
 0x1a6   : > { %v1209_v48 = vld [vmem:[%s4200_s4 + $0x1c80] sm:$0xff]  ;;  %v1211_v52 = vld [vmem:[%s4200_s4 + $0x1c90] sm:$0xff] }
 0x1a7   : > { %3173 = vmatpush1.bf16.msra.mxu1 %v3172_v11  ;;  %v3192_v11 = vpack.c.bf16 %v667_v23, %v665_v3 }
 0x1a8   : > { %3685 = vmatpush1.bf16.msra.mxu0 %v3684_v14  ;;  %3175 = vmatprep.subr.bf16.mxu1 %v3174_v15  ;;  %v3704_v14 = vpack.c.bf16 %v1179_v6, %v1177_v4  ;;  %v3194_v15 = vpack.c.bf16 %v672_v34, %v670_v7  ;;  %v3720_v4 = vpack.c.bf16 %v1195_v62, %v1193_v59  ;;  %v685_v6 = vld [vmem:[%s4200_s4 + $0xc20] sm:$0xff]  ;;  %v687_v7 = vld [vmem:[%s4200_s4 + $0xc30] sm:$0xff] }
 0x1a9   : > { %3687 = vmatprep.subr.bf16.mxu0 %v3686_v19  ;;  %v3706_v19 = vpack.c.bf16 %v1184_v9, %v1182_v27  ;;  %v1197_v34 = vld [vmem:[%s4200_s4 + $0x1c20] sm:$0xff]  ;;  %v1199_v9 = vld [vmem:[%s4200_s4 + $0x1c30] sm:$0xff]  ;;  %v3736_v59 = vpack.c.bf16 %v1211_v52, %v1209_v48 }
 0x1aa   : > { %v701_v62 = vld [vmem:[%s4200_s4 + $0xca0] sm:$0xff] }
 0x1ab   : > { %3177 = vmatpush1.bf16.msra.mxu1 %v3176_v55  ;;  %v3196_v55 = vpack.c.bf16 %v671_v17, %v669_v16  ;;  %v1202_v16 = vld [vmem:[%s4200_s4 + $0x1c48] sm:$0xff]  ;;  %v1204_v17 = vld [vmem:[%s4200_s4 + $0x1c58] sm:$0xff]  ;;  %v717_v48 = vld [vmem:[%s4200_s4 + $0xd20] sm:$0xff] }
 0x1ac   : > { %3689 = vmatpush1.bf16.msra.mxu0 %v3688_v28  ;;  %3179 = vmatprep.subr.bf16.mxu1 %v3178_v30  ;;  %v3708_v28 = vpack.c.bf16 %v1183_v20, %v1181_v18  ;;  %v3198_v30 = vpack.c.bf16 %v676_v22, %v674_v21  ;;  %v3724_v20 = vpack.c.bf16 %v1199_v9, %v1197_v34  ;;  %v689_v22 = vld [vmem:[%s4200_s4 + $0xc40] sm:$0xff] }
 0x1ad   : > { %3691 = vmatprep.subr.bf16.mxu0 %v3690_v60  ;;  %v3710_v60 = vpack.c.bf16 %v1188_v25, %v1186_v24  ;;  %v1201_v24 = vld [vmem:[%s4200_s4 + $0x1c40] sm:$0xff]  ;;  %v3726_v25 = vpack.c.bf16 %v1204_v17, %v1202_v16  ;;  %v1219_v16 = vld [vmem:[%s4200_s4 + $0x1cd0] sm:$0xff]  ;;  %v710_v17 = vld [vmem:[%s4200_s4 + $0xce8] sm:$0xff] }
 0x1ae   : > { %v705_v9 = vld [vmem:[%s4200_s4 + $0xcc0] sm:$0xff] }
 0x1af   : > { %3181 = vmatpush1.bf16.msra.mxu1 %v3180_v41  ;;  %v3200_v41 = vpack.c.bf16 %v675_v33, %v673_v32  ;;  %v1208_v32 = vld [vmem:[%s4200_s4 + $0x1c78] sm:$0xff]  ;;  %v1229_v52 = vld [vmem:[%s4200_s4 + $0x1d20] sm:$0xff] }
 0x1b0   : > { %3693 = vmatpush1.bf16.msra.mxu0 %v3692_v42  ;;  %3183 = vmatprep.subr.bf16.mxu1 %v3182_v43  ;;  %v3712_v42 = vpack.c.bf16 %v1187_v36, %v1185_v35  ;;  %v3202_v43 = vpack.c.bf16 %v680_v38, %v678_v37  ;;  %v693_v36 = vld [vmem:[%s4200_s4 + $0xc60] sm:$0xff]  ;;  %v695_v37 = vld [vmem:[%s4200_s4 + $0xc70] sm:$0xff] }
 0x1b1   : > { %3695 = vmatprep.subr.bf16.mxu0 %v3694_v46  ;;  %v3714_v46 = vpack.c.bf16 %v1192_v40, %v1190_v39  ;;  %v1205_v38 = vld [vmem:[%s4200_s4 + $0x1c60] sm:$0xff]  ;;  %v1207_v40 = vld [vmem:[%s4200_s4 + $0x1c70] sm:$0xff] }
 0x1b2   : > { %v3732_v45 = vpack.c.bf16 %v1207_v40, %v1205_v38  ;;  %v713_v38 = vld [vmem:[%s4200_s4 + $0xd00] sm:$0xff] }
 0x1b3   : > { %3185 = vmatpush1.bf16.msra.mxu1 %v3184_v8  ;;  %v5111_v8 = vld [vmem:[%s4213_s29 + $0x18] sm:$0xff]  ;;  %v1225_v40 = vld [vmem:[%s4200_s4 + $0x1d00] sm:$0xff] }
 0x1b4   : > { %3697 = vmatpush1.bf16.msra.mxu0 %v3696_v26  ;;  %3187 = vmatprep.subr.bf16.mxu1 %v3186_v53  ;;  %v3204_v26 = vpack.c.bf16 %v679_v10, %v677_v44  ;;  %v5114_v53 = vld [vmem:[%s4213_s29 + $0x38] sm:$0xff]  ;;  %v3220_v10 = vpack.c.bf16 %v695_v37, %v693_v36 }
 0x1b5   : > { %3699 = vmatprep.subr.bf16.mxu0 %v3698_v58  ;;  %v683_v58 = vld [vmem:[%s4200_s4 + $0xc10] sm:$0xff]  ;;  %v5130_v3 = vrot.slane %v5114_v53, %v4322_v12  ;;  %v1212_v44 = vld [vmem:[%s4200_s4 + $0x1c98] sm:$0xff] }
 0x1b6   : > { %v3208_v23 = vpack.c.bf16 %v683_v58, %v681_v29  ;;  %v1216_v29 = vld [vmem:[%s4200_s4 + $0x1cb8] sm:$0xff]  ;;  %v3224_v58 = vpack.c.bf16 %v699_v47, %v697_v56 }
 0x1b7   : > { %3189 = vmatpush1.bf16.msra.mxu1 %v3188_v2  ;;  %v5124_v2 = vrot.slane %v5111_v8, %v4322_v12  ;;  %v1463_v18 = vcombine.high %v5130_v3, %v5130_v3 }
 0x1b8   : > { %3701 = vmatpush1.bf16.msra.mxu0 %v3700_v31  ;;  %3191 = vmatprep.subr.bf16.mxu1 %v3190_v51  ;;  %v1198_v31 = vld [vmem:[%s4200_s4 + $0x1c28] sm:$0xff]  ;;  %v1200_v51 = vld [vmem:[%s4200_s4 + $0x1c38] sm:$0xff] }
 0x1b9   : > { %3703 = vmatprep.subr.bf16.mxu0 %v3702_v5  ;;  %v3210_v5 = vpack.c.bf16 %v688_v1, %v686_v0  ;;  %v3722_v27 = vpack.c.bf16 %v1200_v51, %v1198_v31  ;;  %v703_v0 = vld [vmem:[%s4200_s4 + $0xcb0] sm:$0xff]  ;;  %v1213_v1 = vld [vmem:[%s4200_s4 + $0x1ca0] sm:$0xff] }
 0x1ba   : > { %v1215_v51 = vld [vmem:[%s4200_s4 + $0x1cb0] sm:$0xff] }
 0x1bb   : > { %3193 = vmatpush1.bf16.msra.mxu1 %v3192_v11  ;;  %v690_v11 = vld [vmem:[%s4200_s4 + $0xc48] sm:$0xff]  ;;  %v3740_v34 = vpack.c.bf16 %v1215_v51, %v1213_v1  ;;  %v721_v1 = vld [vmem:[%s4200_s4 + $0xd40] sm:$0xff] }
 0x1bc   : > { %3705 = vmatpush1.bf16.msra.mxu0 %v3704_v14  ;;  %3195 = vmatprep.subr.bf16.mxu1 %v3194_v15  ;;  %v692_v14 = vld [vmem:[%s4200_s4 + $0xc58] sm:$0xff]  ;;  %v1395_v15 = vcombine.high %v5124_v2, %v5124_v2  ;;  %v1233_v51 = vld [vmem:[%s4200_s4 + $0x1d40] sm:$0xff] }
 0x1bd   : > { %3707 = vmatprep.subr.bf16.mxu0 %v3706_v19  ;;  %v3212_v19 = vpack.c.bf16 %v687_v7, %v685_v6  ;;  %v3214_v21 = vpack.c.bf16 %v692_v14, %v690_v11  ;;  %v1220_v6 = vld [vmem:[%s4200_s4 + $0x1cd8] sm:$0xff]  ;;  %v3228_v7 = vpack.c.bf16 %v703_v0, %v701_v62  ;;  %v707_v11 = vld [vmem:[%s4200_s4 + $0xcd0] sm:$0xff]  ;;  %v1217_v14 = vld [vmem:[%s4200_s4 + $0x1cc0] sm:$0xff] }
 0x1bf   : > { %3197 = vmatpush1.bf16.msra.mxu1 %v3196_v55  ;;  %v1203_v55 = vld [vmem:[%s4200_s4 + $0x1c50] sm:$0xff] }
 0x1c0   : > { %3709 = vmatpush1.bf16.msra.mxu0 %v3708_v28  ;;  %3199 = vmatprep.subr.bf16.mxu1 %v3198_v30  ;;  %v694_v28 = vld [vmem:[%s4200_s4 + $0xc68] sm:$0xff]  ;;  %v696_v30 = vld [vmem:[%s4200_s4 + $0xc78] sm:$0xff]  ;;  %v3728_v35 = vpack.c.bf16 %v1203_v55, %v1201_v24  ;;  %v709_v24 = vld [vmem:[%s4200_s4 + $0xce0] sm:$0xff] }
 0x1c1   : > { %3711 = vmatprep.subr.bf16.mxu0 %v3710_v60  ;;  %v3218_v60 = vpack.c.bf16 %v696_v30, %v694_v28  ;;  %v1221_v55 = vld [vmem:[%s4200_s4 + $0x1ce0] sm:$0xff]  ;;  %v1223_v30 = vld [vmem:[%s4200_s4 + $0x1cf0] sm:$0xff] }
 0x1c2   : > { %v3748_v36 = vpack.c.bf16 %v1223_v30, %v1221_v55  ;;  %v729_v55 = vld [vmem:[%s4200_s4 + $0xd80] sm:$0xff] }
 0x1c3   : > { %3201 = vmatpush1.bf16.msra.mxu1 %v3200_v41  ;;  %v698_v41 = vld [vmem:[%s4200_s4 + $0xc88] sm:$0xff]  ;;  %v1241_v30 = vld [vmem:[%s4200_s4 + $0x1d80] sm:$0xff] }
 0x1c4   : > { %3713 = vmatpush1.bf16.msra.mxu0 %v3712_v42  ;;  %3203 = vmatprep.subr.bf16.mxu1 %v3202_v43  ;;  %v700_v42 = vld [vmem:[%s4200_s4 + $0xc98] sm:$0xff]  ;;  %v1210_v43 = vld [vmem:[%s4200_s4 + $0x1c88] sm:$0xff] }
 0x1c5   : > { %3715 = vmatprep.subr.bf16.mxu0 %v3714_v46  ;;  %v3222_v46 = vpack.c.bf16 %v700_v42, %v698_v41  ;;  %v3734_v50 = vpack.c.bf16 %v1212_v44, %v1210_v43  ;;  %v1227_v42 = vld [vmem:[%s4200_s4 + $0x1d10] sm:$0xff]  ;;  %v718_v43 = vld [vmem:[%s4200_s4 + $0xd28] sm:$0xff]  ;;  %v720_v44 = vld [vmem:[%s4200_s4 + $0xd38] sm:$0xff] }
 0x1c6   : > { %v3752_v56 = vpack.c.bf16 %v1227_v42, %v1225_v40  ;;  %v3242_v47 = vpack.c.bf16 %v720_v44, %v718_v43  ;;  %v733_v40 = vld [vmem:[%s4200_s4 + $0xda0] sm:$0xff]  ;;  %v1247_v44 = vld [vmem:[%s4200_s4 + $0x1db0] sm:$0xff] }
 0x1c7   : > { %3205 = vmatpush1.bf16.msra.mxu1 %v3204_v26  ;;  %v702_v26 = vld [vmem:[%s4200_s4 + $0xca8] sm:$0xff]  ;;  %v1245_v42 = vld [vmem:[%s4200_s4 + $0x1da0] sm:$0xff] }
 0x1c8   : > { %3717 = vmatpush1.bf16.msra.mxu0 %v3716_v54  ;;  %3207 = vmatprep.subr.bf16.mxu1 %v3206_v57  ;;  %v704_v54 = vld [vmem:[%s4200_s4 + $0xcb8] sm:$0xff]  ;;  %v1214_v57 = vld [vmem:[%s4200_s4 + $0x1ca8] sm:$0xff] }
 0x1c9   : > { %3719 = vmatprep.subr.bf16.mxu0 %v3718_v61  ;;  %v3226_v61 = vpack.c.bf16 %v704_v54, %v702_v26  ;;  %v3738_v31 = vpack.c.bf16 %v1216_v29, %v1214_v57  ;;  %v1231_v54 = vld [vmem:[%s4200_s4 + $0x1d30] sm:$0xff]  ;;  %v722_v57 = vld [vmem:[%s4200_s4 + $0xd48] sm:$0xff]  ;;  %v724_v29 = vld [vmem:[%s4200_s4 + $0xd58] sm:$0xff] }
 0x1ca   : > { %1917 = vmatmul.mubr.f32.vlgmr.msra.gmra.mrb[0].mxu1 %v4977_v13  ;;  %v691_v13 = vld [vmem:[%s4200_s4 + $0xc50] sm:$0xff]  ;;  %v3756_v62 = vpack.c.bf16 %v1231_v54, %v1229_v52  ;;  %v3246_v0 = vpack.c.bf16 %v724_v29, %v722_v57  ;;  %v737_v52 = vld [vmem:[%s4200_s4 + $0xdc0] sm:$0xff] }
 0x1cb   : > { %3209 = vmatpush1.bf16.msra.mxu1 %v3208_v23  ;;  %2485 = vmatmul.mubr.f32.vlgmr.msra.gmra.mrb[0].mxu0 %v4982_v49  ;;  %v1206_v49 = vld [vmem:[%s4200_s4 + $0x1c68] sm:$0xff]  ;;  %v3216_v33 = vpack.c.bf16 %v691_v13, %v689_v22  ;;  %v3744_v22 = vpack.c.bf16 %v1219_v16, %v1217_v14  ;;  %v725_v14 = vld [vmem:[%s4200_s4 + $0xd60] sm:$0xff]  ;;  %v1251_v29 = vld [vmem:[%s4200_s4 + $0x1dd0] sm:$0xff] }
 0x1cc   : > { %3721 = vmatpush1.bf16.msra.mxu0 %v3720_v4  ;;  %3211 = vmatprep.subr.bf16.mxu1 %v3210_v5  ;;  %v3730_v39 = vpack.c.bf16 %v1208_v32, %v1206_v49  ;;  %v706_v23 = vld [vmem:[%s4200_s4 + $0xcc8] sm:$0xff]  ;;  %v708_v4 = vld [vmem:[%s4200_s4 + $0xcd8] sm:$0xff]  ;;  %v1237_v16 = vld [vmem:[%s4200_s4 + $0x1d60] sm:$0xff] }
 0x1cd   : > { %3723 = vmatprep.subr.bf16.mxu0 %v3722_v27  ;;  %1987 = vmatprep.mubr.f32.mxu1 %v1395_v15  ;;  %v1218_v5 = vld [vmem:[%s4200_s4 + $0x1cc8] sm:$0xff]  ;;  %v3230_v27 = vpack.c.bf16 %v708_v4, %v706_v23  ;;  %v716_v32 = vld [vmem:[%s4200_s4 + $0xd18] sm:$0xff]  ;;  %v1235_v4 = vld [vmem:[%s4200_s4 + $0x1d50] sm:$0xff] }
 0x1ce   : > { %2555 = vmatprep.mubr.f32.mxu0 %v1463_v18  ;;  %v3742_v15 = vpack.c.bf16 %v1220_v6, %v1218_v5  ;;  %v712_v18 = vld [vmem:[%s4200_s4 + $0xcf8] sm:$0xff]  ;;  %v714_v49 = vld [vmem:[%s4200_s4 + $0xd08] sm:$0xff]  ;;  %v1249_v54 = vld [vmem:[%s4200_s4 + $0x1dc0] sm:$0xff] }
 0x1cf   : > { %3213 = vmatpush1.bf16.msra.mxu1 %v3212_v19  ;;  %v1222_v19 = vld [vmem:[%s4200_s4 + $0x1ce8] sm:$0xff]  ;;  %v3234_v13 = vpack.c.bf16 %v712_v18, %v710_v17  ;;  %v3238_v37 = vpack.c.bf16 %v716_v32, %v714_v49  ;;  %v728_v6 = vld [vmem:[%s4200_s4 + $0xd78] sm:$0xff]  ;;  %v1239_v18 = vld [vmem:[%s4200_s4 + $0x1d70] sm:$0xff] }
 0x1d0   : > { %3725 = vmatpush1.bf16.msra.mxu0 %v3724_v20  ;;  %3215 = vmatprep.subr.bf16.mxu1 %v3214_v21  ;;  %v1224_v20 = vld [vmem:[%s4200_s4 + $0x1cf8] sm:$0xff]  ;;  %v3232_v21 = vpack.c.bf16 %v707_v11, %v705_v9  ;;  %v726_v5 = vld [vmem:[%s4200_s4 + $0xd68] sm:$0xff]  ;;  %v3760_v9 = vpack.c.bf16 %v1235_v4, %v1233_v51  ;;  %v1243_v32 = vld [vmem:[%s4200_s4 + $0x1d90] sm:$0xff] }
 0x1d1   : > { %3727 = vmatprep.subr.bf16.mxu0 %v3726_v25  ;;  %v711_v25 = vld [vmem:[%s4200_s4 + $0xcf0] sm:$0xff]  ;;  %v3746_v28 = vpack.c.bf16 %v1224_v20, %v1222_v19  ;;  %v3250_v11 = vpack.c.bf16 %v728_v6, %v726_v5  ;;  %v730_v19 = vld [vmem:[%s4200_s4 + $0xd88] sm:$0xff]  ;;  %v732_v20 = vld [vmem:[%s4200_s4 + $0xd98] sm:$0xff] }
 0x1d2   : > { %v741_v51 = vld [vmem:[%s4200_s4 + $0xde0] sm:$0xff]  ;;  %v1255_v6 = vld [vmem:[%s4200_s4 + $0x1df0] sm:$0xff] }
 0x1d3   : > { %3217 = vmatpush1.bf16.msra.mxu1 %v3216_v33  ;;  %v1226_v33 = vld [vmem:[%s4200_s4 + $0x1d08] sm:$0xff]  ;;  %v1253_v4 = vld [vmem:[%s4200_s4 + $0x1de0] sm:$0xff] }
 0x1d4   : > { %3729 = vmatpush1.bf16.msra.mxu0 %v3728_v35  ;;  %3219 = vmatprep.subr.bf16.mxu1 %v3218_v60  ;;  %v1228_v35 = vld [vmem:[%s4200_s4 + $0x1d18] sm:$0xff]  ;;  %v3236_v60 = vpack.c.bf16 %v711_v25, %v709_v24  ;;  %v3764_v24 = vpack.c.bf16 %v1239_v18, %v1237_v16  ;;  %v3254_v25 = vpack.c.bf16 %v732_v20, %v730_v19  ;;  %v745_v18 = vld [vmem:[%s4200_s4 + $0xe00] sm:$0xff]  ;;  %v747_v19 = vld [vmem:[%s4200_s4 + $0xe10] sm:$0xff] }
 0x1d5   : > { %3731 = vmatprep.subr.bf16.mxu0 %v3730_v39  ;;  %v715_v39 = vld [vmem:[%s4200_s4 + $0xd10] sm:$0xff]  ;;  %v3750_v41 = vpack.c.bf16 %v1228_v35, %v1226_v33  ;;  %v734_v33 = vld [vmem:[%s4200_s4 + $0xda8] sm:$0xff]  ;;  %v736_v35 = vld [vmem:[%s4200_s4 + $0xdb8] sm:$0xff]  ;;  %v3780_v16 = vpack.c.bf16 %v1255_v6, %v1253_v4 }
 0x1d6   : > { %v1257_v20 = vld [vmem:[%s4200_s4 + $0x1e00] sm:$0xff] }
 0x1d7   : > { %3221 = vmatpush1.bf16.msra.mxu1 %v3220_v10  ;;  %v1230_v10 = vld [vmem:[%s4200_s4 + $0x1d28] sm:$0xff]  ;;  %v761_v6 = vld [vmem:[%s4200_s4 + $0xe80] sm:$0xff] }
 0x1d8   : > { %3733 = vmatpush1.bf16.msra.mxu0 %v3732_v45  ;;  %3223 = vmatprep.subr.bf16.mxu1 %v3222_v46  ;;  %v1232_v45 = vld [vmem:[%s4200_s4 + $0x1d38] sm:$0xff]  ;;  %v3240_v46 = vpack.c.bf16 %v715_v39, %v713_v38  ;;  %v3768_v38 = vpack.c.bf16 %v1243_v32, %v1241_v30  ;;  %v3258_v39 = vpack.c.bf16 %v736_v35, %v734_v33  ;;  %v749_v32 = vld [vmem:[%s4200_s4 + $0xe20] sm:$0xff]  ;;  %v751_v33 = vld [vmem:[%s4200_s4 + $0xe30] sm:$0xff] }
 0x1d9   : > { %3735 = vmatprep.subr.bf16.mxu0 %v3734_v50  ;;  %v719_v50 = vld [vmem:[%s4200_s4 + $0xd30] sm:$0xff]  ;;  %v3754_v26 = vpack.c.bf16 %v1232_v45, %v1230_v10  ;;  %v738_v10 = vld [vmem:[%s4200_s4 + $0xdc8] sm:$0xff]  ;;  %v740_v45 = vld [vmem:[%s4200_s4 + $0xdd8] sm:$0xff] }
 0x1da   : > { %v1261_v35 = vld [vmem:[%s4200_s4 + $0x1e20] sm:$0xff] }
 0x1db   : > { %3225 = vmatpush1.bf16.msra.mxu1 %v3224_v58  ;;  %v1234_v58 = vld [vmem:[%s4200_s4 + $0x1d48] sm:$0xff] }
 0x1dc   : > { %3737 = vmatpush1.bf16.msra.mxu0 %v3736_v59  ;;  %3227 = vmatprep.subr.bf16.mxu1 %v3226_v61  ;;  %v1236_v59 = vld [vmem:[%s4200_s4 + $0x1d58] sm:$0xff]  ;;  %v3244_v61 = vpack.c.bf16 %v719_v50, %v717_v48  ;;  %v3772_v48 = vpack.c.bf16 %v1247_v44, %v1245_v42  ;;  %v3262_v50 = vpack.c.bf16 %v740_v45, %v738_v10  ;;  %v753_v45 = vld [vmem:[%s4200_s4 + $0xe40] sm:$0xff] }
 0x1dd   : > { %3739 = vmatprep.subr.bf16.mxu0 %v3738_v31  ;;  %v723_v31 = vld [vmem:[%s4200_s4 + $0xd50] sm:$0xff]  ;;  %v3758_v23 = vpack.c.bf16 %v1236_v59, %v1234_v58  ;;  %v742_v58 = vld [vmem:[%s4200_s4 + $0xde8] sm:$0xff]  ;;  %v744_v59 = vld [vmem:[%s4200_s4 + $0xdf8] sm:$0xff] }
 0x1df   : > { %3229 = vmatpush1.bf16.msra.mxu1 %v3228_v7  ;;  %v1238_v7 = vld [vmem:[%s4200_s4 + $0x1d68] sm:$0xff] }
 0x1e0   : > { %3741 = vmatpush1.bf16.msra.mxu0 %v3740_v34  ;;  %3231 = vmatprep.subr.bf16.mxu1 %v3230_v27  ;;  %v1240_v34 = vld [vmem:[%s4200_s4 + $0x1d78] sm:$0xff]  ;;  %v3248_v27 = vpack.c.bf16 %v723_v31, %v721_v1  ;;  %v3776_v1 = vpack.c.bf16 %v1251_v29, %v1249_v54  ;;  %v3266_v31 = vpack.c.bf16 %v744_v59, %v742_v58  ;;  %v757_v29 = vld [vmem:[%s4200_s4 + $0xe60] sm:$0xff]  ;;  %v759_v58 = vld [vmem:[%s4200_s4 + $0xe70] sm:$0xff] }
 0x1e1   : > { %3743 = vmatprep.subr.bf16.mxu0 %v3742_v15  ;;  %v727_v15 = vld [vmem:[%s4200_s4 + $0xd70] sm:$0xff]  ;;  %v3762_v17 = vpack.c.bf16 %v1240_v34, %v1238_v7  ;;  %v746_v7 = vld [vmem:[%s4200_s4 + $0xe08] sm:$0xff]  ;;  %v748_v34 = vld [vmem:[%s4200_s4 + $0xe18] sm:$0xff] }
 0x1e2   : > { %v1269_v59 = vld [vmem:[%s4200_s4 + $0x1e60] sm:$0xff] }
 0x1e3   : > { %3233 = vmatpush1.bf16.msra.mxu1 %v3232_v21  ;;  %v1242_v21 = vld [vmem:[%s4200_s4 + $0x1d88] sm:$0xff] }
 0x1e4   : > { %3745 = vmatpush1.bf16.msra.mxu0 %v3744_v22  ;;  %3235 = vmatprep.subr.bf16.mxu1 %v3234_v13  ;;  %v1244_v22 = vld [vmem:[%s4200_s4 + $0x1d98] sm:$0xff]  ;;  %v3252_v13 = vpack.c.bf16 %v727_v15, %v725_v14  ;;  %v1448_v14 = vcombine.high %v5114_v53, %v5114_v53 }
 0x1e5   : > { %3747 = vmatprep.subr.bf16.mxu0 %v3746_v28  ;;  %v731_v28 = vld [vmem:[%s4200_s4 + $0xd90] sm:$0xff]  ;;  %v3766_v49 = vpack.c.bf16 %v1244_v22, %v1242_v21  ;;  %v750_v22 = vld [vmem:[%s4200_s4 + $0xe28] sm:$0xff] }
 0x1e6   : > { %v1259_v21 = vld [vmem:[%s4200_s4 + $0x1e10] sm:$0xff] }
 0x1e7   : > { %3237 = vmatpush1.bf16.msra.mxu1 %v3236_v60  ;;  %v1246_v60 = vld [vmem:[%s4200_s4 + $0x1da8] sm:$0xff]  ;;  %v3784_v30 = vpack.c.bf16 %v1259_v21, %v1257_v20  ;;  %v765_v20 = vld [vmem:[%s4200_s4 + $0xea0] sm:$0xff] }
 0x1e8   : > { %3749 = vmatpush1.bf16.msra.mxu0 %v3748_v36  ;;  %3239 = vmatprep.subr.bf16.mxu1 %v3238_v37  ;;  %v1248_v36 = vld [vmem:[%s4200_s4 + $0x1db8] sm:$0xff]  ;;  %v3256_v37 = vpack.c.bf16 %v731_v28, %v729_v55  ;;  %v5274_v55 = vrot.slane %v1448_v14, %v4322_v12  ;;  %v3272_v28 = vpack.c.bf16 %v747_v19, %v745_v18  ;;  %v1277_v21 = vld [vmem:[%s4200_s4 + $0x1ea0] sm:$0xff] }
 0x1e9   : > { %3751 = vmatprep.subr.bf16.mxu0 %v3750_v41  ;;  %v735_v41 = vld [vmem:[%s4200_s4 + $0xdb0] sm:$0xff]  ;;  %v3770_v43 = vpack.c.bf16 %v1248_v36, %v1246_v60  ;;  %v768_v14 = vld [vmem:[%s4200_s4 + $0xeb8] sm:$0xff] }
 0x1ea   : > { %v1263_v36 = vld [vmem:[%s4200_s4 + $0x1e30] sm:$0xff]  ;;  %v1464_v42 = vcombine.high %v5274_v55, %v5274_v55 }
 0x1eb   : > { %3241 = vmatpush1.bf16.msra.mxu1 %v3240_v46  ;;  %v1250_v46 = vld [vmem:[%s4200_s4 + $0x1dc8] sm:$0xff]  ;;  %v3788_v44 = vpack.c.bf16 %v1263_v36, %v1261_v35  ;;  %v769_v35 = vld [vmem:[%s4200_s4 + $0xec0] sm:$0xff] }
 0x1ec   : > { %3753 = vmatpush1.bf16.msra.mxu0 %v3752_v56  ;;  %3243 = vmatprep.subr.bf16.mxu1 %v3242_v47  ;;  %v1252_v56 = vld [vmem:[%s4200_s4 + $0x1dd8] sm:$0xff]  ;;  %v3260_v47 = vpack.c.bf16 %v735_v41, %v733_v40  ;;  %v1266_v40 = vld [vmem:[%s4200_s4 + $0x1e48] sm:$0xff]  ;;  %v1281_v36 = vld [vmem:[%s4200_s4 + $0x1ec0] sm:$0xff] }
 0x1ed   : > { %3755 = vmatprep.subr.bf16.mxu0 %v3754_v26  ;;  %v739_v26 = vld [vmem:[%s4200_s4 + $0xdd0] sm:$0xff]  ;;  %v3774_v57 = vpack.c.bf16 %v1252_v56, %v1250_v46  ;;  %v1268_v41 = vld [vmem:[%s4200_s4 + $0x1e58] sm:$0xff]  ;;  %v1265_v46 = vld [vmem:[%s4200_s4 + $0x1e40] sm:$0xff] }
 0x1ee   : > { %v3790_v56 = vpack.c.bf16 %v1268_v41, %v1266_v40  ;;  %v776_v40 = vld [vmem:[%s4200_s4 + $0xef8] sm:$0xff]  ;;  %v1286_v41 = vld [vmem:[%s4200_s4 + $0x1ee8] sm:$0xff] }
 0x1ef   : > { %3245 = vmatpush1.bf16.msra.mxu1 %v3244_v61  ;;  %v1254_v61 = vld [vmem:[%s4200_s4 + $0x1de8] sm:$0xff] }
 0x1f0   : > { %3757 = vmatpush1.bf16.msra.mxu0 %v3756_v62  ;;  %3247 = vmatprep.subr.bf16.mxu1 %v3246_v0  ;;  %v1256_v62 = vld [vmem:[%s4200_s4 + $0x1df8] sm:$0xff]  ;;  %v3264_v0 = vpack.c.bf16 %v739_v26, %v737_v52 }
 0x1f1   : > { %3759 = vmatprep.subr.bf16.mxu0 %v3758_v23  ;;  %v743_v23 = vld [vmem:[%s4200_s4 + $0xdf0] sm:$0xff]  ;;  %v3778_v5 = vpack.c.bf16 %v1256_v62, %v1254_v61  ;;  %v1272_v52 = vld [vmem:[%s4200_s4 + $0x1e78] sm:$0xff] }
 0x1f2   : > { %v3268_v15 = vpack.c.bf16 %v743_v23, %v741_v51  ;;  %v1271_v62 = vld [vmem:[%s4200_s4 + $0x1e70] sm:$0xff]  ;;  %v1276_v51 = vld [vmem:[%s4200_s4 + $0x1e98] sm:$0xff]  ;;  %v3284_v23 = vpack.c.bf16 %v759_v58, %v757_v29  ;;  %v777_v29 = vld [vmem:[%s4200_s4 + $0xf00] sm:$0xff] }
 0x1f3   : > { %3249 = vmatpush1.bf16.msra.mxu1 %v3248_v27  ;;  %v1380_v27 = vcombine.high %v5111_v8, %v5111_v8  ;;  %v3796_v4 = vpack.c.bf16 %v1271_v62, %v1269_v59  ;;  %v779_v58 = vld [vmem:[%s4200_s4 + $0xf10] sm:$0xff]  ;;  %v1289_v59 = vld [vmem:[%s4200_s4 + $0x1f00] sm:$0xff] }
 0x1f4   : > { %3761 = vmatpush1.bf16.msra.mxu0 %v3760_v9  ;;  %3251 = vmatprep.subr.bf16.mxu1 %v3250_v11  ;;  %v1258_v9 = vld [vmem:[%s4200_s4 + $0x1e08] sm:$0xff]  ;;  %v1260_v11 = vld [vmem:[%s4200_s4 + $0x1e18] sm:$0xff]  ;;  %v1291_v62 = vld [vmem:[%s4200_s4 + $0x1f10] sm:$0xff] }
 0x1f5   : > { %3763 = vmatprep.subr.bf16.mxu0 %v3762_v17  ;;  %v3270_v17 = vpack.c.bf16 %v748_v34, %v746_v7  ;;  %v3782_v8 = vpack.c.bf16 %v1260_v11, %v1258_v9  ;;  %v5269_v53 = vrot.slane %v1380_v27, %v4322_v12  ;;  %v763_v7 = vld [vmem:[%s4200_s4 + $0xe90] sm:$0xff]  ;;  %v1273_v34 = vld [vmem:[%s4200_s4 + $0x1e80] sm:$0xff]  ;;  %v766_v11 = vld [vmem:[%s4200_s4 + $0xea8] sm:$0xff] }
 0x1f6   : > { %v1275_v9 = vld [vmem:[%s4200_s4 + $0x1e90] sm:$0xff]  ;;  %v3290_v19 = vpack.c.bf16 %v768_v14, %v766_v11  ;;  %v786_v11 = vld [vmem:[%s4200_s4 + $0xf48] sm:$0xff]  ;;  %v788_v14 = vld [vmem:[%s4200_s4 + $0xf58] sm:$0xff] }
 0x1f7   : > { %3253 = vmatpush1.bf16.msra.mxu1 %v3252_v13  ;;  %v752_v13 = vld [vmem:[%s4200_s4 + $0xe38] sm:$0xff]  ;;  %v3800_v18 = vpack.c.bf16 %v1275_v9, %v1273_v34  ;;  %v1293_v34 = vld [vmem:[%s4200_s4 + $0x1f20] sm:$0xff]  ;;  %v1295_v9 = vld [vmem:[%s4200_s4 + $0x1f30] sm:$0xff] }
 0x1f8   : > { %3765 = vmatpush1.bf16.msra.mxu0 %v3764_v24  ;;  %3255 = vmatprep.subr.bf16.mxu1 %v3254_v25  ;;  %v1262_v24 = vld [vmem:[%s4200_s4 + $0x1e28] sm:$0xff]  ;;  %v1264_v25 = vld [vmem:[%s4200_s4 + $0x1e38] sm:$0xff] }
 0x1f9   : > { %3767 = vmatprep.subr.bf16.mxu0 %v3766_v49  ;;  %v3274_v49 = vpack.c.bf16 %v752_v13, %v750_v22  ;;  %v3786_v60 = vpack.c.bf16 %v1264_v25, %v1262_v24  ;;  %v1279_v13 = vld [vmem:[%s4200_s4 + $0x1eb0] sm:$0xff]  ;;  %v770_v24 = vld [vmem:[%s4200_s4 + $0xec8] sm:$0xff]  ;;  %v772_v25 = vld [vmem:[%s4200_s4 + $0xed8] sm:$0xff] }
 0x1fb   : > { %3257 = vmatpush1.bf16.msra.mxu1 %v3256_v37  ;;  %v754_v37 = vld [vmem:[%s4200_s4 + $0xe48] sm:$0xff] }
 0x1fc   : > { %3769 = vmatpush1.bf16.msra.mxu0 %v3768_v38  ;;  %3259 = vmatprep.subr.bf16.mxu1 %v3258_v39  ;;  %v756_v38 = vld [vmem:[%s4200_s4 + $0xe58] sm:$0xff]  ;;  %v1396_v39 = vcombine.high %v5269_v53, %v5269_v53 }
 0x1fd   : > { %3771 = vmatprep.subr.bf16.mxu0 %v3770_v43  ;;  %v3276_v43 = vpack.c.bf16 %v751_v33, %v749_v32  ;;  %v3278_v10 = vpack.c.bf16 %v756_v38, %v754_v37  ;;  %v3804_v32 = vpack.c.bf16 %v1279_v13, %v1277_v21  ;;  %v3294_v33 = vpack.c.bf16 %v772_v25, %v770_v24  ;;  %v1283_v38 = vld [vmem:[%s4200_s4 + $0x1ed0] sm:$0xff]  ;;  %v1297_v21 = vld [vmem:[%s4200_s4 + $0x1f40] sm:$0xff]  ;;  %v790_v24 = vld [vmem:[%s4200_s4 + $0xf68] sm:$0xff] }
 0x1fe   : > { %v1299_v13 = vld [vmem:[%s4200_s4 + $0x1f50] sm:$0xff]  ;;  %v792_v25 = vld [vmem:[%s4200_s4 + $0xf78] sm:$0xff] }
 0x1ff   : > { %3261 = vmatpush1.bf16.msra.mxu1 %v3260_v47  ;;  %v1267_v47 = vld [vmem:[%s4200_s4 + $0x1e50] sm:$0xff] }
 0x200   : > { %3773 = vmatpush1.bf16.msra.mxu0 %v3772_v48  ;;  %3263 = vmatprep.subr.bf16.mxu1 %v3262_v50  ;;  %v758_v48 = vld [vmem:[%s4200_s4 + $0xe68] sm:$0xff]  ;;  %v760_v50 = vld [vmem:[%s4200_s4 + $0xe78] sm:$0xff]  ;;  %v3792_v54 = vpack.c.bf16 %v1267_v47, %v1265_v46  ;;  %v1285_v46 = vld [vmem:[%s4200_s4 + $0x1ee0] sm:$0xff] }
 0x201   : > { %3775 = vmatprep.subr.bf16.mxu0 %v3774_v57  ;;  %v3282_v57 = vpack.c.bf16 %v760_v50, %v758_v48  ;;  %v1287_v47 = vld [vmem:[%s4200_s4 + $0x1ef0] sm:$0xff]  ;;  %v778_v48 = vld [vmem:[%s4200_s4 + $0xf08] sm:$0xff]  ;;  %v780_v50 = vld [vmem:[%s4200_s4 + $0xf18] sm:$0xff] }
 0x203   : > { %3265 = vmatpush1.bf16.msra.mxu1 %v3264_v0  ;;  %v762_v0 = vld [vmem:[%s4200_s4 + $0xe88] sm:$0xff] }
 0x204   : > { %3777 = vmatpush1.bf16.msra.mxu0 %v3776_v1  ;;  %3267 = vmatprep.subr.bf16.mxu1 %v3266_v31  ;;  %v764_v1 = vld [vmem:[%s4200_s4 + $0xe98] sm:$0xff]  ;;  %v1274_v31 = vld [vmem:[%s4200_s4 + $0x1e88] sm:$0xff] }
 0x205   : > { %3779 = vmatprep.subr.bf16.mxu0 %v3778_v5  ;;  %v3286_v5 = vpack.c.bf16 %v764_v1, %v762_v0  ;;  %v3798_v27 = vpack.c.bf16 %v1276_v51, %v1274_v31  ;;  %v782_v0 = vld [vmem:[%s4200_s4 + $0xf28] sm:$0xff]  ;;  %v784_v1 = vld [vmem:[%s4200_s4 + $0xf38] sm:$0xff] }
 0x206   : > { %v1294_v31 = vld [vmem:[%s4200_s4 + $0x1f28] sm:$0xff]  ;;  %v1296_v51 = vld [vmem:[%s4200_s4 + $0x1f38] sm:$0xff] }
 0x207   : > { %3269 = vmatpush1.bf16.msra.mxu1 %v3268_v15  ;;  %v1278_v15 = vld [vmem:[%s4200_s4 + $0x1ea8] sm:$0xff] }
 0x208   : > { %3781 = vmatpush1.bf16.msra.mxu0 %v3780_v16  ;;  %3271 = vmatprep.subr.bf16.mxu1 %v3270_v17  ;;  %v1280_v16 = vld [vmem:[%s4200_s4 + $0x1eb8] sm:$0xff]  ;;  %v3288_v17 = vpack.c.bf16 %v763_v7, %v761_v6  ;;  %v781_v6 = vld [vmem:[%s4200_s4 + $0xf20] sm:$0xff]  ;;  %v783_v7 = vld [vmem:[%s4200_s4 + $0xf30] sm:$0xff] }
 0x209   : > { %3783 = vmatprep.subr.bf16.mxu0 %v3782_v8  ;;  %v767_v8 = vld [vmem:[%s4200_s4 + $0xeb0] sm:$0xff]  ;;  %v3802_v22 = vpack.c.bf16 %v1280_v16, %v1278_v15  ;;  %v1298_v15 = vld [vmem:[%s4200_s4 + $0x1f48] sm:$0xff]  ;;  %v1300_v16 = vld [vmem:[%s4200_s4 + $0x1f58] sm:$0xff] }
 0x20a   : > { %1988 = vmatmul.mubr.f32.vlgmr.msra.gmra.mrb[0].mxu1 %v5124_v2  ;;  %v755_v2 = vld [vmem:[%s4200_s4 + $0xe50] sm:$0xff] }
 0x20b   : > { %3273 = vmatpush1.bf16.msra.mxu1 %v3272_v28  ;;  %2556 = vmatmul.mubr.f32.vlgmr.msra.gmra.mrb[0].mxu0 %v5130_v3  ;;  %v1270_v3 = vld [vmem:[%s4200_s4 + $0x1e68] sm:$0xff]  ;;  %v3280_v26 = vpack.c.bf16 %v755_v2, %v753_v45  ;;  %v773_v45 = vld [vmem:[%s4200_s4 + $0xee0] sm:$0xff]  ;;  %v775_v2 = vld [vmem:[%s4200_s4 + $0xef0] sm:$0xff] }
 0x20c   : > { %3785 = vmatpush1.bf16.msra.mxu0 %v3784_v30  ;;  %3275 = vmatprep.subr.bf16.mxu1 %v3274_v49  ;;  %v3794_v61 = vpack.c.bf16 %v1272_v52, %v1270_v3  ;;  %v1282_v28 = vld [vmem:[%s4200_s4 + $0x1ec8] sm:$0xff]  ;;  %v1284_v30 = vld [vmem:[%s4200_s4 + $0x1ed8] sm:$0xff]  ;;  %v3292_v49 = vpack.c.bf16 %v767_v8, %v765_v20  ;;  %v785_v20 = vld [vmem:[%s4200_s4 + $0xf40] sm:$0xff] }
 0x20d   : > { %3787 = vmatprep.subr.bf16.mxu0 %v3786_v60  ;;  %2058 = vmatprep.mubr.f32.mxu1 %v1396_v39  ;;  %v771_v60 = vld [vmem:[%s4200_s4 + $0xed0] sm:$0xff]  ;;  %v3806_v37 = vpack.c.bf16 %v1284_v30, %v1282_v28  ;;  %v774_v39 = vld [vmem:[%s4200_s4 + $0xee8] sm:$0xff]  ;;  %v1292_v52 = vld [vmem:[%s4200_s4 + $0x1f18] sm:$0xff] }
 0x20e   : > { %2626 = vmatprep.mubr.f32.mxu0 %v1464_v42  ;;  %v1288_v42 = vld [vmem:[%s4200_s4 + $0x1ef8] sm:$0xff]  ;;  %v1290_v3 = vld [vmem:[%s4200_s4 + $0x1f08] sm:$0xff]  ;;  %v787_v8 = vld [vmem:[%s4200_s4 + $0xf50] sm:$0xff] }
 0x20f   : > { %3277 = vmatpush1.bf16.msra.mxu1 %v3276_v43  ;;  %v3296_v43 = vpack.c.bf16 %v771_v60, %v769_v35  ;;  %v1302_v28 = vld [vmem:[%s4200_s4 + $0x1f68] sm:$0xff]  ;;  %v1304_v30 = vld [vmem:[%s4200_s4 + $0x1f78] sm:$0xff]  ;;  %v789_v35 = vld [vmem:[%s4200_s4 + $0xf60] sm:$0xff] }
 0x210   : > { %3789 = vmatpush1.bf16.msra.mxu0 %v3788_v44  ;;  %3279 = vmatprep.subr.bf16.mxu1 %v3278_v10  ;;  %v3808_v44 = vpack.c.bf16 %v1283_v38, %v1281_v36  ;;  %v3298_v10 = vpack.c.bf16 %v776_v40, %v774_v39  ;;  %v791_v60 = vld [vmem:[%s4200_s4 + $0xf70] sm:$0xff]  ;;  %v1301_v36 = vld [vmem:[%s4200_s4 + $0x1f60] sm:$0xff]  ;;  %v794_v39 = vld [vmem:[%s4200_s4 + $0xf88] sm:$0xff] }
 0x211   : > { %3791 = vmatprep.subr.bf16.mxu0 %v3790_v56  ;;  %v3810_v56 = vpack.c.bf16 %v1288_v42, %v1286_v41  ;;  %v1303_v38 = vld [vmem:[%s4200_s4 + $0x1f70] sm:$0xff]  ;;  %v796_v40 = vld [vmem:[%s4200_s4 + $0xf98] sm:$0xff]  ;;  %v1306_v41 = vld [vmem:[%s4200_s4 + $0x1f88] sm:$0xff] }
 0x212   : > { %v1308_v42 = vld [vmem:[%s4200_s4 + $0x1f98] sm:$0xff] }
 0x213   : > { %3281 = vmatpush1.bf16.msra.mxu1 %v3280_v26  ;;  %v3300_v26 = vpack.c.bf16 %v775_v2, %v773_v45  ;;  %v793_v45 = vld [vmem:[%s4200_s4 + $0xf80] sm:$0xff]  ;;  %v795_v2 = vld [vmem:[%s4200_s4 + $0xf90] sm:$0xff] }
 0x214   : > { %3793 = vmatpush1.bf16.msra.mxu0 %v3792_v54  ;;  %3283 = vmatprep.subr.bf16.mxu1 %v3282_v57  ;;  %v3812_v54 = vpack.c.bf16 %v1287_v47, %v1285_v46  ;;  %v3302_v57 = vpack.c.bf16 %v780_v50, %v778_v48  ;;  %v1305_v46 = vld [vmem:[%s4200_s4 + $0x1f80] sm:$0xff]  ;;  %v1307_v47 = vld [vmem:[%s4200_s4 + $0x1f90] sm:$0xff]  ;;  %v798_v48 = vld [vmem:[%s4200_s4 + $0xfa8] sm:$0xff] }
 0x215   : > { %3795 = vmatprep.subr.bf16.mxu0 %v3794_v61  ;;  %v3814_v61 = vpack.c.bf16 %v1292_v52, %v1290_v3  ;;  %v800_v50 = vld [vmem:[%s4200_s4 + $0xfb8] sm:$0xff]  ;;  %v1310_v3 = vld [vmem:[%s4200_s4 + $0x1fa8] sm:$0xff] }
 0x216   : > { %v1312_v52 = vld [vmem:[%s4200_s4 + $0x1fb8] sm:$0xff] }
 0x217   : > { %3285 = vmatpush1.bf16.msra.mxu1 %v3284_v23  ;;  %v3304_v23 = vpack.c.bf16 %v779_v58, %v777_v29  ;;  %v797_v29 = vld [vmem:[%s4200_s4 + $0xfa0] sm:$0xff]  ;;  %v799_v58 = vld [vmem:[%s4200_s4 + $0xfb0] sm:$0xff] }
 0x218   : > { %3797 = vmatpush1.bf16.msra.mxu0 %v3796_v4  ;;  %3287 = vmatprep.subr.bf16.mxu1 %v3286_v5  ;;  %v3816_v4 = vpack.c.bf16 %v1291_v62, %v1289_v59  ;;  %v3306_v5 = vpack.c.bf16 %v784_v1, %v782_v0  ;;  %v1309_v59 = vld [vmem:[%s4200_s4 + $0x1fa0] sm:$0xff]  ;;  %v1311_v62 = vld [vmem:[%s4200_s4 + $0x1fb0] sm:$0xff]  ;;  %v802_v0 = vld [vmem:[%s4200_s4 + $0xfc8] sm:$0xff] }
 0x219   : > { %3799 = vmatprep.subr.bf16.mxu0 %v3798_v27  ;;  %v3818_v27 = vpack.c.bf16 %v1296_v51, %v1294_v31  ;;  %v804_v1 = vld [vmem:[%s4200_s4 + $0xfd8] sm:$0xff]  ;;  %v1314_v31 = vld [vmem:[%s4200_s4 + $0x1fc8] sm:$0xff] }
 0x21a   : > { %v1316_v51 = vld [vmem:[%s4200_s4 + $0x1fd8] sm:$0xff] }
 0x21b   : > { %3289 = vmatpush1.bf16.msra.mxu1 %v3288_v17  ;;  %v3308_v17 = vpack.c.bf16 %v783_v7, %v781_v6  ;;  %v801_v6 = vld [vmem:[%s4200_s4 + $0xfc0] sm:$0xff]  ;;  %v803_v7 = vld [vmem:[%s4200_s4 + $0xfd0] sm:$0xff] }
 0x21c   : > { %3801 = vmatpush1.bf16.msra.mxu0 %v3800_v18  ;;  %3291 = vmatprep.subr.bf16.mxu1 %v3290_v19  ;;  %v3820_v18 = vpack.c.bf16 %v1295_v9, %v1293_v34  ;;  %v3310_v19 = vpack.c.bf16 %v788_v14, %v786_v11  ;;  %v1313_v34 = vld [vmem:[%s4200_s4 + $0x1fc0] sm:$0xff]  ;;  %v1315_v9 = vld [vmem:[%s4200_s4 + $0x1fd0] sm:$0xff]  ;;  %v806_v11 = vld [vmem:[%s4200_s4 + $0xfe8] sm:$0xff] }
 0x21d   : > { %3803 = vmatprep.subr.bf16.mxu0 %v3802_v22  ;;  %v3822_v22 = vpack.c.bf16 %v1300_v16, %v1298_v15  ;;  %v808_v14 = vld [vmem:[%s4200_s4 + $0xff8] sm:$0xff]  ;;  %v1318_v15 = vld [vmem:[%s4200_s4 + $0x1fe8] sm:$0xff] }
 0x21e   : > { %v1320_v16 = vld [vmem:[%s4200_s4 + $0x1ff8] sm:$0xff] }
 0x21f   : > { %3293 = vmatpush1.bf16.msra.mxu1 %v3292_v49  ;;  %v3312_v49 = vpack.c.bf16 %v787_v8, %v785_v20  ;;  %v805_v20 = vld [vmem:[%s4200_s4 + $0xfe0] sm:$0xff]  ;;  %v807_v8 = vld [vmem:[%s4200_s4 + $0xff0] sm:$0xff] }
 0x220   : > { %3805 = vmatpush1.bf16.msra.mxu0 %v3804_v32  ;;  %3295 = vmatprep.subr.bf16.mxu1 %v3294_v33  ;;  %v3824_v32 = vpack.c.bf16 %v1299_v13, %v1297_v21  ;;  %v3314_v33 = vpack.c.bf16 %v792_v25, %v790_v24  ;;  %v3842_v21 = vpack.c.bf16 %v1320_v16, %v1318_v15  ;;  %v1319_v13 = vld [vmem:[%s4200_s4 + $0x1ff0] sm:$0xff] }
 0x221   : > { %3807 = vmatprep.subr.bf16.mxu0 %v3806_v37  ;;  %v3826_v37 = vpack.c.bf16 %v1304_v30, %v1302_v28  ;;  %v3332_v24 = vpack.c.bf16 %v807_v8, %v805_v20 }
 0x223   : > { %3297 = vmatpush1.bf16.msra.mxu1 %v3296_v43  ;;  %v3316_v43 = vpack.c.bf16 %v791_v60, %v789_v35 }
 0x224   : > { %3809 = vmatpush1.bf16.msra.mxu0 %v3808_v44  ;;  %3299 = vmatprep.subr.bf16.mxu1 %v3298_v10  ;;  %v3828_v44 = vpack.c.bf16 %v1303_v38, %v1301_v36  ;;  %v3318_v10 = vpack.c.bf16 %v796_v40, %v794_v39  ;;  %v288_v36 = vld [vmem:[%s4223_s12] sm:$0xf]  ;;  %v2659_v39 = vsub.s32 (!%p2818_p6), 1, %v4311_v63 }
 0x225   : > { %3811 = vmatprep.subr.bf16.mxu0 %v3810_v56  ;;  %v3830_v56 = vpack.c.bf16 %v1308_v42, %v1306_v41 }
 0x227   : > { %3301 = vmatpush1.bf16.msra.mxu1 %v3300_v26  ;;  %v3320_v26 = vpack.c.bf16 %v795_v2, %v793_v45 }
 0x228   : > { %3813 = vmatpush1.bf16.msra.mxu0 %v3812_v54  ;;  %3303 = vmatprep.subr.bf16.mxu1 %v3302_v57  ;;  %v3832_v54 = vpack.c.bf16 %v1307_v47, %v1305_v46  ;;  %v3322_v57 = vpack.c.bf16 %v800_v50, %v798_v48 }
 0x229   : > { %3815 = vmatprep.subr.bf16.mxu0 %v3814_v61  ;;  %v3834_v61 = vpack.c.bf16 %v1312_v52, %v1310_v3 }
 0x22b   : > { %3305 = vmatpush1.bf16.msra.mxu1 %v3304_v23  ;;  %v3324_v23 = vpack.c.bf16 %v799_v58, %v797_v29 }
 0x22c   : > { %3817 = vmatpush1.bf16.msra.mxu0 %v3816_v4  ;;  %3307 = vmatprep.subr.bf16.mxu1 %v3306_v5  ;;  %v3836_v4 = vpack.c.bf16 %v1311_v62, %v1309_v59  ;;  %v3326_v5 = vpack.c.bf16 %v804_v1, %v802_v0 }
 0x22d   : > { %3819 = vmatprep.subr.bf16.mxu0 %v3818_v27  ;;  %v3838_v27 = vpack.c.bf16 %v1316_v51, %v1314_v31 }
 0x22f   : > { %3309 = vmatpush1.bf16.msra.mxu1 %v3308_v17  ;;  %v3328_v17 = vpack.c.bf16 %v803_v7, %v801_v6 }
 0x230   : > { %3821 = vmatpush1.bf16.msra.mxu0 %v3820_v18  ;;  %3311 = vmatprep.subr.bf16.mxu1 %v3310_v19  ;;  %v3840_v18 = vpack.c.bf16 %v1315_v9, %v1313_v34  ;;  %v3330_v19 = vpack.c.bf16 %v808_v14, %v806_v11 }
 0x231   : > { %3823 = vmatprep.subr.bf16.mxu0 %v3822_v22  ;;  %v1317_v22 = vld [vmem:[%s4200_s4 + $0x1fe0] sm:$0xff] }
 0x232   : > { %v3844_v25 = vpack.c.bf16 %v1319_v13, %v1317_v22 }
 0x233   : > { %3313 = vmatpush1.bf16.msra.mxu1 %v3312_v49 }
 0x234   : > { %3825 = vmatpush1.bf16.msra.mxu0 %v3824_v32  ;;  %3315 = vmatprep.subr.bf16.mxu1 %v3314_v33 }
 0x235   : > { %3827 = vmatprep.subr.bf16.mxu0 %v3826_v37 }
 0x237   : > { %3317 = vmatpush1.bf16.msra.mxu1 %v3316_v43 }
 0x238   : > { %3829 = vmatpush1.bf16.msra.mxu0 %v3828_v44  ;;  %3319 = vmatprep.subr.bf16.mxu1 %v3318_v10 }
 0x239   : > { %3831 = vmatprep.subr.bf16.mxu0 %v3830_v56 }
 0x23b   : > { %3321 = vmatpush1.bf16.msra.mxu1 %v3320_v26 }
 0x23c   : > { %3833 = vmatpush1.bf16.msra.mxu0 %v3832_v54  ;;  %3323 = vmatprep.subr.bf16.mxu1 %v3322_v57 }
 0x23d   : > { %3835 = vmatprep.subr.bf16.mxu0 %v3834_v61 }
 0x23f   : > { %3325 = vmatpush1.bf16.msra.mxu1 %v3324_v23 }
 0x240   : > { %3837 = vmatpush1.bf16.msra.mxu0 %v3836_v4  ;;  %3327 = vmatprep.subr.bf16.mxu1 %v3326_v5 }
 0x241   : > { %3839 = vmatprep.subr.bf16.mxu0 %v3838_v27 }
 0x243   : > { %3329 = vmatpush1.bf16.msra.mxu1 %v3328_v17 }
 0x244   : > { %3841 = vmatpush1.bf16.msra.mxu0 %v3840_v18  ;;  %3331 = vmatprep.subr.bf16.mxu1 %v3330_v19 }
 0x245   : > { %3843 = vmatprep.subr.bf16.mxu0 %v3842_v21 }
 0x247   : > { %3333 = vmatpush1.bf16.msra.mxu1 %v3332_v24 }
 0x248   : > { %3845 = vmatpush1.bf16.msra.mxu0 %v3844_v25 }
 0x24a   : > { %2059 = vmatmul.mubr.f32.vlgmr.msra.gmra.mrb[0].mxu1 %v5269_v53  ;;  %v2651_v53 = vld [vmem:[%s271_s8] sm:$0x3] (!%p2818_p6) }
 0x24b   : > { %2627 = vmatmul.mubr.f32.vlgmr.msra.gmra.mrb[0].mxu0 %v5274_v55  ;;  %v2655_v55 = vsub.s32 (!%p2818_p6), 0, %v4311_v63  ;;  %v2660_v41 = vrot.slane (!%p2818_p6), %v2651_v53, %v2659_v39 }
 0x24d   : > { %v2656_v40 = vrot.slane (!%p2818_p6), %v2651_v53, %v2655_v55 }
 0x24f   : > { %v2661_v42 = vcombine.low (!%p2818_p6), %v2656_v40, %v2660_v41 }
 0x251   : > { %v2668_v44 = vrot.slane (!%p2818_p6), %v2661_v42, %v4322_v12 }
 0x31d   : > { %v2060_v28 = vpop.f32.mrb[0].mxu1 }
 0x31e   : > { %v2628_v30 = vpop.f32.mrb[0].mxu0  ;;  %v2062_v49 = vpop.f32.mrb[1].mxu1 }
 0x31f   : > { %v3846_v32 = vadd.f32 %v2628_v30, %v2060_v28  ;;  %v2630_v33 = vpop.f32.mrb[1].mxu0 }
 0x320   : > { %v3847_v35 = vadd.f32 %v2630_v33, %v2062_v49 }
 0x322   : > { %v2635_v60 = vcombine.low %v3846_v32, %v3847_v35  ;;  %2649 = sbr.rel (%p2818_p6) target bundleno = 821 (0x335), region = 44 }
 0x324   : > { %v2642_v37 = vrot.slane %v2635_v60, %v4322_v12 }
 0x326   : > { %v2644_v38 = vadd.f32 %v2642_v37, %v288_v36 }
 0x328   : > { %2645 = vst [vmem:[%s4223_s12] sm:$0xf] %v2644_v38 }
 0x32f   : > { %v2650_v43 = vld [vmem:[%s4223_s12] sm:$0xf] }
 0x330   : > { %v2670_v10 = vadd.f32 %v2668_v44, %v2650_v43 }
 0x332   : > { %v2671_v45 = vmax.f32 %v2670_v10, 0.0 }
 0x334   : > { %2672 = vst [vmem:[%s4223_s12] sm:$0xf] %v2671_v45 }
 0x335 PF: > { %s16_s19 = sadd.s32 1, %s4056_s19   ;;  %s5445_s12 = smov %s4032_s13 }
 0x336   : > { %p13_p8 = scmp.ge.s32.totalorder %s16_s19, 10   ;;  %s5446_s13 = smov %s4036_s14 }
 0x337   : > { %s5447_s14 = smov %s4151_s5  ;;  %s5448_s15 = smov %s4048_s17 }
 0x338   : > { %s5449_s16 = smov %s4052_s18  ;;  %s5450_s17 = smov %s5453_s21 }
 0x339   : > { %s5451_s18 = smov %s5457_s22  ;;  %15 = sbr.rel (!%p13_p8) target bundleno = 5 (0x5), region = 86 }
 0x340   :  { %2703 = vsyncpa [#allocation3], 1 }
 0x341   :  { %2705 = vsyncpa [#allocation3 + $0x1], 1 }

</bundles_post_ra>
